<compile_context>
chip_gen: v7x
topology: tpu7x:2x2x1
jax: 0.10.0
libtpu: 0.0.40
codegen_flags: <defaults>
</compile_context>

<pallas_src>
import functools

import numpy as np
import jax
import jax.numpy as jnp
from jax.experimental import pallas as pl
from jax.experimental.pallas import tpu as pltpu


# Geometry fixed by the module: 84x84 input -> 20x20 -> 9x9 -> 7x7 -> 3136.
SW = 11          # super-pixel grid width (84 zero-padded to 88, 88 / 8 = 11)
N_IN = SW * SW   # 121 rows of the flattened 11x11 super-pixel input grid
N1 = 109         # conv1 rows computed (valid 10x10 grid, max flat 11*9+9 = 108)
N2 = 97          # conv2 rows computed (valid 9x9 grid,  max flat 11*8+8 = 96)
N3 = 73          # conv3 rows computed (valid 7x7 grid,  max flat 11*6+6 = 72)
FEAT = 3136      # 7*7*64 dense1 input features
HEAD_PAD = 128   # dueling-head lanes (>= n_actions + 1), lane-dense matmul


# ---------------------------------------------------------------------------
# Fused Pallas kernel
# ---------------------------------------------------------------------------
def _ddqn_kernel(x_ref, w1_ref, b1_ref, w2_ref, b2_ref, w3_ref, b3_ref,
                 wd_ref, bd_ref, wav_ref, bav_ref, q_ref,
                 a1_ref, a2_ref, a3_ref, c3_ref, *, bb, n_actions):
    """Whole Duelling-DQN forward for one batch block of `bb` images.

    x_ref  : (bb, 121, 64*n_frames)  8x8 space-to-depth input, flat 11x11 grid
    w1_ref : (4, 64*n_frames, 128)   conv1 taps; output channels already in
                                     conv2's 2x2 space-to-depth order
    w2_ref : (4, 128, 64)            conv2 taps on that layout
    w3_ref : (9, 64, 64)             conv3 3x3 taps
    wd_ref : (3136, 512)             dense1, rows in (spatial, channel) order
    wav_ref: (512, 128)              [A | V | zero-pad]
    q_ref  : (bb, n_actions)
    a1/a2/a3/c3 : bfloat16 VMEM scratch activations.
    """
    f32 = jnp.float32
    # Bias-initialized accumulators (hoisted once per grid step).
    bias1 = jnp.broadcast_to(b1_ref[...], (N1, 128))
    bias2 = jnp.broadcast_to(b2_ref[...], (N2, 64))
    bias3 = jnp.broadcast_to(b3_ref[...], (N3, 64))

    # ---- conv stack: each conv = a few shifted contiguous-slice MXU taps ----
    for b in range(bb):
        acc = bias1
        for di in range(2):
            for dj in range(2):
                patch = x_ref[b, pl.ds(di * SW + dj, N1), :]
                acc = acc + jnp.dot(patch, w1_ref[di * 2 + dj],
                                    preferred_element_type=f32)
        a1_ref[b] = jnp.maximum(acc, 0.0).astype(a1_ref.dtype)

        acc = bias2
        for di in range(2):
            for dj in range(2):
                patch = a1_ref[b, pl.ds(di * SW + dj, N2), :]
                acc = acc + jnp.dot(patch, w2_ref[di * 2 + dj],
                                    preferred_element_type=f32)
        a2_ref[b] = jnp.maximum(acc, 0.0).astype(a2_ref.dtype)

        acc = bias3
        for ki in range(3):
            for kj in range(3):
                patch = a2_ref[b, pl.ds(ki * SW + kj, N3), :]
                acc = acc + jnp.dot(patch, w3_ref[ki * 3 + kj],
                                    preferred_element_type=f32)
        a3_ref[b] = jnp.maximum(acc, 0.0).astype(a3_ref.dtype)

    # ---- gather the 49 valid conv3 rows into one lane-dense (bb, 3136) ----
    for oy in range(7):
        for ox in range(7):
            s = oy * 7 + ox
            c3_ref[:, 64 * s:64 * (s + 1)] = a3_ref[:, SW * oy + ox, :]

    # ---- dense1 (3136 -> 512, ReLU) + dueling head, fused ----
    h = jnp.dot(c3_ref[...], wd_ref[...], preferred_element_type=f32)
    h = jnp.maximum(h + bd_ref[...], 0.0).astype(jnp.bfloat16)
    av = jnp.dot(h, wav_ref[...], preferred_element_type=f32) + bav_ref[...]
    adv = av[:, :n_actions]
    val = av[:, n_actions:n_actions + 1]
    q_ref[...] = adv + (val - jnp.mean(adv, axis=1, keepdims=True))


def _fused_forward_call(x_s2d, p, n_actions, bb):
    B = x_s2d.shape[0]
    c_sup = x_s2d.shape[-1]
    kern = functools.partial(_ddqn_kernel, bb=bb, n_actions=n_actions)
    return pl.pallas_call(
        kern,
        out_shape=jax.ShapeDtypeStruct((B, n_actions), jnp.float32),
        grid=(B // bb,),
        in_specs=[
            pl.BlockSpec((bb, N_IN, c_sup), lambda i: (i, 0, 0)),
            pl.BlockSpec(p["w1"].shape, lambda i: (0, 0, 0)),
            pl.BlockSpec(p["b1"].shape, lambda i: (0, 0)),
            pl.BlockSpec(p["w2"].shape, lambda i: (0, 0, 0)),
            pl.BlockSpec(p["b2"].shape, lambda i: (0, 0)),
            pl.BlockSpec(p["w3"].shape, lambda i: (0, 0, 0)),
            pl.BlockSpec(p["b3"].shape, lambda i: (0, 0)),
            pl.BlockSpec(p["wd"].shape, lambda i: (0, 0)),
            pl.BlockSpec(p["bd"].shape, lambda i: (0, 0)),
            pl.BlockSpec(p["wav"].shape, lambda i: (0, 0)),
            pl.BlockSpec(p["bav"].shape, lambda i: (0, 0)),
        ],
        out_specs=pl.BlockSpec((bb, n_actions), lambda i: (i, 0)),
        scratch_shapes=[
            pltpu.VMEM((bb, N1, 128), jnp.bfloat16),
            pltpu.VMEM((bb, N2, 64), jnp.bfloat16),
            pltpu.VMEM((bb, N3, 64), jnp.bfloat16),
            pltpu.VMEM((bb, FEAT), jnp.bfloat16),
        ],
        compiler_params=pltpu.CompilerParams(
            dimension_semantics=("parallel",),
            vmem_limit_bytes=32 * 1024 * 1024),
    )(x_s2d, p["w1"], p["b1"], p["w2"], p["b2"], p["w3"], p["b3"],
      p["wd"], p["bd"], p["wav"], p["bav"])


# ---------------------------------------------------------------------------
# Parameters (deterministic synthetic init, PyTorch-default-style uniform)
# ---------------------------------------------------------------------------
def init_params(key, n_frames, n_actions):
    def uinit(k, shape, fan_in):
        bound = 1.0 / float(fan_in) ** 0.5
        return jax.random.uniform(k, shape, jnp.float32, -bound, bound)

    ks = jax.random.split(key, 12)
    p = {}
    p["w1"] = uinit(ks[0], (32, n_frames, 8, 8), n_frames * 8 * 8)
    p["b1"] = uinit(ks[1], (32,), n_frames * 8 * 8)
    p["w2"] = uinit(ks[2], (64, 32, 4, 4), 32 * 4 * 4)
    p["b2"] = uinit(ks[3], (64,), 32 * 4 * 4)
    p["w3"] = uinit(ks[4], (64, 64, 3, 3), 64 * 3 * 3)
    p["b3"] = uinit(ks[5], (64,), 64 * 3 * 3)
    p["wd"] = uinit(ks[6], (3136, 512), 3136)     # rows in torch (c,h,w) order
    p["bd"] = uinit(ks[7], (512,), 3136)
    p["wa"] = uinit(ks[8], (512, n_actions), 512)
    p["ba"] = uinit(ks[9], (n_actions,), 512)
    p["wv"] = uinit(ks[10], (512, 1), 512)
    p["bv"] = uinit(ks[11], (1,), 512)
    return p


def prepare_params(params):
    """One-time weight folding for the fused kernel (runs outside jit).

    * conv1 absorbs BOTH space-to-depth relayouts: its input channels are the
      8x8 super-pixel of the raw image, and its output channels are conv2's
      2x2 space-to-depth layout (4*32 = 128 lanes, zero padding waste).
    * conv2 / conv3 become small per-tap (C_in, C_out) matrices.
    * dense1 rows are permuted from torch's (c, h, w) flatten to the kernel's
      (h, w, c) gather order; A and V are packed into one 128-lane matrix.
    * All matmul operands are cast to bfloat16 (f32 accumulation in-kernel).
    """
    w1 = np.asarray(params["w1"], np.float32)          # (32, C, 8, 8)
    oc1, C = w1.shape[0], w1.shape[1]
    n_actions = params["wa"].shape[1]

    # conv1 super-taps: [DI, DJ, pi, pj, c, a, b, oc]
    w1s = np.zeros((2, 2, 8, 8, C, 2, 2, oc1), np.float32)
    for a in range(2):
        for p in range(8):
            di, pi = divmod(4 * a + p, 8)
            for b in range(2):
                for q in range(8):
                    dj, pj = divmod(4 * b + q, 8)
                    w1s[di, dj, pi, pj, :, a, b, :] = w1[:, :, p, q].T
    w1s = w1s.reshape(4, 64 * C, 4 * oc1)              # (4, 64*C, 128)
    b1s = np.tile(np.asarray(params["b1"], np.float32), 4).reshape(1, 4 * oc1)

    # conv2 on the space-to-depth layout: 2x2 taps of (128 -> 64).
    w2 = np.asarray(params["w2"], np.float32)          # (64, 32, 4, 4)
    w2s = (w2.reshape(64, 32, 2, 2, 2, 2)              # (oc, ic, di, a, dj, b)
             .transpose(2, 4, 3, 5, 1, 0)              # (di, dj, a, b, ic, oc)
             .reshape(4, 128, 64))
    b2s = np.asarray(params["b2"], np.float32).reshape(1, 64)

    # conv3: 3x3 taps of (64 -> 64).
    w3 = np.asarray(params["w3"], np.float32)          # (64, 64, 3, 3)
    w3s = w3.transpose(2, 3, 1, 0).reshape(9, 64, 64)
    b3s = np.asarray(params["b3"], np.float32).reshape(1, 64)

    # dense1: torch flatten order is (c, oy, ox); the kernel gathers (oy, ox, c).
    wd = np.asarray(params["wd"], np.float32)          # (3136, 512)
    wd = wd.reshape(64, 49, 512).transpose(1, 0, 2).reshape(FEAT, 512)
    bd = np.asarray(params["bd"], np.float32).reshape(1, 512)

    # Dueling head: one lane-dense [A | V | 0] matmul.
    assert n_actions + 1 <= HEAD_PAD
    wav = np.zeros((512, HEAD_PAD), np.float32)
    wav[:, :n_actions] = np.asarray(params["wa"], np.float32)
    wav[:, n_actions:n_actions + 1] = np.asarray(params["wv"], np.float32)
    bav = np.zeros((1, HEAD_PAD), np.float32)
    bav[0, :n_actions] = np.asarray(params["ba"], np.float32)
    bav[0, n_actions] = float(np.asarray(params["bv"], np.float32)[0])

    bf16 = jnp.bfloat16
    return {
        "w1": jnp.asarray(w1s, bf16), "b1": jnp.asarray(b1s),
        "w2": jnp.asarray(w2s, bf16), "b2": jnp.asarray(b2s),
        "w3": jnp.asarray(w3s, bf16), "b3": jnp.asarray(b3s),
        "wd": jnp.asarray(wd, bf16),  "bd": jnp.asarray(bd),
        "wav": jnp.asarray(wav, bf16), "bav": jnp.asarray(bav),
    }


# ---------------------------------------------------------------------------
# Forward pass (mirrors Duelling_Double_DQN_ImageGames.forward)
# ---------------------------------------------------------------------------
def forward(prepared, x_nchw, n_actions):
    B, C, H, W = x_nchw.shape
    assert H == 84 and W == 84, "architecture requires 84x84 inputs (3136 feats)"
    # The single wrapper relayout: zero-pad 84 -> 88 and 8x8 space-to-depth so
    # every conv becomes stride-1 contiguous-slice taps on a flat 11x11 grid.
    x = x_nchw.astype(jnp.float32)
    x = jnp.pad(x, ((0, 0), (0, 0), (0, 4), (0, 4)))
    x = (x.reshape(B, C, SW, 8, SW, 8)
           .transpose(0, 2, 4, 3, 5, 1)               # (B, 11, 11, 8, 8, C)
           .reshape(B, N_IN, 64 * C)
           .astype(jnp.bfloat16))
    # Batch block: 8 images per grid step when possible so both v7x TensorCores
    # split the work (grid >= 2 for B >= 16); otherwise one block for the whole
    # (small) batch.
    # TODO(synk): very large batches not divisible by 8 fall back to one block.
    bb = 8 if B % 8 == 0 else B
    return _fused_forward_call(x, prepared, n_actions, bb)


# Pure-JAX reference (torch semantics) for a numerical sanity check.
def forward_reference(params, x_nchw):
    hp = jax.lax.Precision.HIGHEST
    x = x_nchw.astype(jnp.float32)

    def conv(x, w, b, s):
        y = jax.lax.conv_general_dilated(
            x, w, window_strides=(s, s), padding="VALID",
            dimension_numbers=("NCHW", "OIHW", "NCHW"), precision=hp)
        return jnp.maximum(y + b.reshape(1, -1, 1, 1), 0.0)

    x = conv(x, params["w1"], params["b1"], 4)
    x = conv(x, params["w2"], params["b2"], 2)
    x = conv(x, params["w3"], params["b3"], 1)
    x = x.reshape(x.shape[0], -1)                      # NCHW flatten
    x = jnp.maximum(jnp.dot(x, params["wd"], precision=hp) + params["bd"], 0.0)
    A = jnp.dot(x, params["wa"], precision=hp) + params["ba"]
    V = jnp.dot(x, params["wv"], precision=hp) + params["bv"]
    return V + (A - jnp.mean(A, axis=1, keepdims=True))


# TODO(synk): optimizer (Adam), checkpoint save/load, device placement and the
# module's (buggy) advantage() method are training/IO plumbing, not part of the
# forward kernel.

if __name__ == "__main__":
    key = jax.random.PRNGKey(0)
    kp, kx = jax.random.split(key)

    batch, n_frames, n_actions = 2, 4, 6
    params = init_params(kp, n_frames, n_actions)
    prepared = prepare_params(params)
    # 84x84 spatial is required by the module (dense1 expects 3136 = 64*7*7).
    x = jax.random.uniform(kx, (batch, n_frames, 84, 84), jnp.float32)

    fwd = jax.jit(forward, static_argnums=(2,))
    q = jax.block_until_ready(fwd(prepared, x, n_actions))
    assert q.shape == (batch, n_actions) and q.dtype == jnp.float32

    q_ref = jax.block_until_ready(jax.jit(forward_reference)(params, x))
    err = float(jnp.max(jnp.abs(q - q_ref)))
    scale = float(jnp.max(jnp.abs(q_ref))) + 1e-6
    assert err <= 5e-2 * scale + 5e-3, f"numerical mismatch: err={err}, scale={scale}"

    print("KERNEL_OK")
</pallas_src>

<mosaic_0001>
module attributes {stable_mosaic.version = 11 : i64} {
  func.func @_ddqn_kernel(%arg0: i32, %arg1: memref<2x121x256xbf16, #tpu.memory_space<vmem>>, %arg2: memref<4x256x128xbf16, #tpu.memory_space<vmem>>, %arg3: memref<1x128xf32, #tpu.memory_space<vmem>>, %arg4: memref<4x128x64xbf16, #tpu.memory_space<vmem>>, %arg5: memref<1x64xf32, #tpu.memory_space<vmem>>, %arg6: memref<9x64x64xbf16, #tpu.memory_space<vmem>>, %arg7: memref<1x64xf32, #tpu.memory_space<vmem>>, %arg8: memref<3136x512xbf16, #tpu.memory_space<vmem>>, %arg9: memref<1x512xf32, #tpu.memory_space<vmem>>, %arg10: memref<512x128xbf16, #tpu.memory_space<vmem>>, %arg11: memref<1x128xf32, #tpu.memory_space<vmem>>, %arg12: memref<2x6xf32, #tpu.memory_space<vmem>>, %arg13: memref<2x109x128xbf16, #tpu.memory_space<vmem>>, %arg14: memref<2x97x64xbf16, #tpu.memory_space<vmem>>, %arg15: memref<2x73x64xbf16, #tpu.memory_space<vmem>>, %arg16: memref<2x3136xbf16, #tpu.memory_space<vmem>>) attributes {dimension_semantics = [#tpu.dimension_semantics<parallel>], iteration_bounds = array<i64: 1>, scalar_prefetch = 0 : i64, scratch_operands = 4 : i64, tpu.core_type = #tpu.core_type<tc>, window_params = [{transform_indices = @transform_0, window_bounds = array<i64: 2, 121, 256>}, {pipeline_mode = #tpu.pipeline_mode<synchronous>, transform_indices = @transform_1, window_bounds = array<i64: 4, 256, 128>}, {pipeline_mode = #tpu.pipeline_mode<synchronous>, transform_indices = @transform_2, window_bounds = array<i64: 1, 128>}, {pipeline_mode = #tpu.pipeline_mode<synchronous>, transform_indices = @transform_3, window_bounds = array<i64: 4, 128, 64>}, {pipeline_mode = #tpu.pipeline_mode<synchronous>, transform_indices = @transform_4, window_bounds = array<i64: 1, 64>}, {pipeline_mode = #tpu.pipeline_mode<synchronous>, transform_indices = @transform_5, window_bounds = array<i64: 9, 64, 64>}, {pipeline_mode = #tpu.pipeline_mode<synchronous>, transform_indices = @transform_6, window_bounds = array<i64: 1, 64>}, {pipeline_mode = #tpu.pipeline_mode<synchronous>, transform_indices = @transform_7, window_bounds = array<i64: 3136, 512>}, {pipeline_mode = #tpu.pipeline_mode<synchronous>, transform_indices = @transform_8, window_bounds = array<i64: 1, 512>}, {pipeline_mode = #tpu.pipeline_mode<synchronous>, transform_indices = @transform_9, window_bounds = array<i64: 512, 128>}, {pipeline_mode = #tpu.pipeline_mode<synchronous>, transform_indices = @transform_10, window_bounds = array<i64: 1, 128>}, {transform_indices = @transform_11, window_bounds = array<i64: 2, 6>}]} {
    %c0 = arith.constant 0 : index
    %c0_0 = arith.constant 0 : index
    %0 = vector.load %arg3[%c0, %c0_0] : memref<1x128xf32, #tpu.memory_space<vmem>>, vector<1x128xf32>
    %1 = vector.shape_cast %0 : vector<1x128xf32> to vector<1x128xf32>
    %2 = vector.broadcast %1 : vector<1x128xf32> to vector<109x128xf32>
    %c0_1 = arith.constant 0 : index
    %c0_2 = arith.constant 0 : index
    %3 = vector.load %arg5[%c0_1, %c0_2] : memref<1x64xf32, #tpu.memory_space<vmem>>, vector<1x64xf32>
    %4 = vector.shape_cast %3 : vector<1x64xf32> to vector<1x64xf32>
    %5 = vector.broadcast %4 : vector<1x64xf32> to vector<97x64xf32>
    %c0_3 = arith.constant 0 : index
    %c0_4 = arith.constant 0 : index
    %6 = vector.load %arg7[%c0_3, %c0_4] : memref<1x64xf32, #tpu.memory_space<vmem>>, vector<1x64xf32>
    %7 = vector.shape_cast %6 : vector<1x64xf32> to vector<1x64xf32>
    %8 = vector.broadcast %7 : vector<1x64xf32> to vector<73x64xf32>
    %c0_5 = arith.constant 0 : index
    %c0_6 = arith.constant 0 : index
    %c0_7 = arith.constant 0 : index
    %9 = vector.load %arg1[%c0_5, %c0_6, %c0_7] : memref<2x121x256xbf16, #tpu.memory_space<vmem>>, vector<1x109x256xbf16>
    %10 = vector.shape_cast %9 : vector<1x109x256xbf16> to vector<109x256xbf16>
    %c0_8 = arith.constant 0 : index
    %c0_9 = arith.constant 0 : index
    %c0_10 = arith.constant 0 : index
    %11 = vector.load %arg2[%c0_8, %c0_9, %c0_10] : memref<4x256x128xbf16, #tpu.memory_space<vmem>>, vector<1x256x128xbf16>
    %12 = vector.shape_cast %11 : vector<1x256x128xbf16> to vector<256x128xbf16>
    %cst = arith.constant dense<0.000000e+00> : vector<109x128xf32>
    %13 = tpu.matmul %10, %12, %cst {dimension_numbers = #tpu.dot_dimension_numbers<[1], [0], [0], [1], [0, 0, 1, 1], [], []>} : vector<109x256xbf16>, vector<256x128xbf16>, vector<109x128xf32> -> vector<109x128xf32>
    %14 = arith.addf %2, %13 : vector<109x128xf32>
    %c0_11 = arith.constant 0 : index
    %c1 = arith.constant 1 : index
    %c0_12 = arith.constant 0 : index
    %15 = vector.load %arg1[%c0_11, %c1, %c0_12] : memref<2x121x256xbf16, #tpu.memory_space<vmem>>, vector<1x109x256xbf16>
    %16 = vector.shape_cast %15 : vector<1x109x256xbf16> to vector<109x256xbf16>
    %c1_13 = arith.constant 1 : index
    %c0_14 = arith.constant 0 : index
    %c0_15 = arith.constant 0 : index
    %17 = vector.load %arg2[%c1_13, %c0_14, %c0_15] : memref<4x256x128xbf16, #tpu.memory_space<vmem>>, vector<1x256x128xbf16>
    %18 = vector.shape_cast %17 : vector<1x256x128xbf16> to vector<256x128xbf16>
    %cst_16 = arith.constant dense<0.000000e+00> : vector<109x128xf32>
    %19 = tpu.matmul %16, %18, %cst_16 {dimension_numbers = #tpu.dot_dimension_numbers<[1], [0], [0], [1], [0, 0, 1, 1], [], []>} : vector<109x256xbf16>, vector<256x128xbf16>, vector<109x128xf32> -> vector<109x128xf32>
    %20 = arith.addf %14, %19 : vector<109x128xf32>
    %c0_17 = arith.constant 0 : index
    %c11 = arith.constant 11 : index
    %c0_18 = arith.constant 0 : index
    %21 = vector.load %arg1[%c0_17, %c11, %c0_18] : memref<2x121x256xbf16, #tpu.memory_space<vmem>>, vector<1x109x256xbf16>
    %22 = vector.shape_cast %21 : vector<1x109x256xbf16> to vector<109x256xbf16>
    %c2 = arith.constant 2 : index
    %c0_19 = arith.constant 0 : index
    %c0_20 = arith.constant 0 : index
    %23 = vector.load %arg2[%c2, %c0_19, %c0_20] : memref<4x256x128xbf16, #tpu.memory_space<vmem>>, vector<1x256x128xbf16>
    %24 = vector.shape_cast %23 : vector<1x256x128xbf16> to vector<256x128xbf16>
    %cst_21 = arith.constant dense<0.000000e+00> : vector<109x128xf32>
    %25 = tpu.matmul %22, %24, %cst_21 {dimension_numbers = #tpu.dot_dimension_numbers<[1], [0], [0], [1], [0, 0, 1, 1], [], []>} : vector<109x256xbf16>, vector<256x128xbf16>, vector<109x128xf32> -> vector<109x128xf32>
    %26 = arith.addf %20, %25 : vector<109x128xf32>
    %c0_22 = arith.constant 0 : index
    %c12 = arith.constant 12 : index
    %c0_23 = arith.constant 0 : index
    %27 = vector.load %arg1[%c0_22, %c12, %c0_23] : memref<2x121x256xbf16, #tpu.memory_space<vmem>>, vector<1x109x256xbf16>
    %28 = vector.shape_cast %27 : vector<1x109x256xbf16> to vector<109x256xbf16>
    %c3 = arith.constant 3 : index
    %c0_24 = arith.constant 0 : index
    %c0_25 = arith.constant 0 : index
    %29 = vector.load %arg2[%c3, %c0_24, %c0_25] : memref<4x256x128xbf16, #tpu.memory_space<vmem>>, vector<1x256x128xbf16>
    %30 = vector.shape_cast %29 : vector<1x256x128xbf16> to vector<256x128xbf16>
    %cst_26 = arith.constant dense<0.000000e+00> : vector<109x128xf32>
    %31 = tpu.matmul %28, %30, %cst_26 {dimension_numbers = #tpu.dot_dimension_numbers<[1], [0], [0], [1], [0, 0, 1, 1], [], []>} : vector<109x256xbf16>, vector<256x128xbf16>, vector<109x128xf32> -> vector<109x128xf32>
    %32 = arith.addf %26, %31 : vector<109x128xf32>
    %cst_27 = arith.constant 0.000000e+00 : f32
    %33 = vector.broadcast %cst_27 : f32 to vector<109x128xf32>
    %34 = arith.maximumf %32, %33 : vector<109x128xf32>
    %35 = arith.truncf %34 : vector<109x128xf32> to vector<109x128xbf16>
    %c0_28 = arith.constant 0 : index
    %c0_29 = arith.constant 0 : index
    %c0_30 = arith.constant 0 : index
    %36 = vector.load %arg13[%c0_28, %c0_29, %c0_30] : memref<2x109x128xbf16, #tpu.memory_space<vmem>>, vector<1x109x128xbf16>
    %37 = vector.shape_cast %36 : vector<1x109x128xbf16> to vector<109x128xbf16>
    %38 = vector.shape_cast %35 : vector<109x128xbf16> to vector<1x109x128xbf16>
    tpu.vector_store %arg13[%c0_28, %c0_29, %c0_30], %38 {strides = array<i32>} : memref<2x109x128xbf16, #tpu.memory_space<vmem>>, vector<1x109x128xbf16>,
    %c0_31 = arith.constant 0 : index
    %c0_32 = arith.constant 0 : index
    %c0_33 = arith.constant 0 : index
    %39 = vector.load %arg13[%c0_31, %c0_32, %c0_33] : memref<2x109x128xbf16, #tpu.memory_space<vmem>>, vector<1x97x128xbf16>
    %40 = vector.shape_cast %39 : vector<1x97x128xbf16> to vector<97x128xbf16>
    %c0_34 = arith.constant 0 : index
    %c0_35 = arith.constant 0 : index
    %c0_36 = arith.constant 0 : index
    %41 = vector.load %arg4[%c0_34, %c0_35, %c0_36] : memref<4x128x64xbf16, #tpu.memory_space<vmem>>, vector<1x128x64xbf16>
    %42 = vector.shape_cast %41 : vector<1x128x64xbf16> to vector<128x64xbf16>
    %cst_37 = arith.constant dense<0.000000e+00> : vector<97x64xf32>
    %43 = tpu.matmul %40, %42, %cst_37 {dimension_numbers = #tpu.dot_dimension_numbers<[1], [0], [0], [1], [0, 0, 1, 1], [], []>} : vector<97x128xbf16>, vector<128x64xbf16>, vector<97x64xf32> -> vector<97x64xf32>
    %44 = arith.addf %5, %43 : vector<97x64xf32>
    %c0_38 = arith.constant 0 : index
    %c1_39 = arith.constant 1 : index
    %c0_40 = arith.constant 0 : index
    %45 = vector.load %arg13[%c0_38, %c1_39, %c0_40] : memref<2x109x128xbf16, #tpu.memory_space<vmem>>, vector<1x97x128xbf16>
    %46 = vector.shape_cast %45 : vector<1x97x128xbf16> to vector<97x128xbf16>
    %c1_41 = arith.constant 1 : index
    %c0_42 = arith.constant 0 : index
    %c0_43 = arith.constant 0 : index
    %47 = vector.load %arg4[%c1_41, %c0_42, %c0_43] : memref<4x128x64xbf16, #tpu.memory_space<vmem>>, vector<1x128x64xbf16>
    %48 = vector.shape_cast %47 : vector<1x128x64xbf16> to vector<128x64xbf16>
    %cst_44 = arith.constant dense<0.000000e+00> : vector<97x64xf32>
    %49 = tpu.matmul %46, %48, %cst_44 {dimension_numbers = #tpu.dot_dimension_numbers<[1], [0], [0], [1], [0, 0, 1, 1], [], []>} : vector<97x128xbf16>, vector<128x64xbf16>, vector<97x64xf32> -> vector<97x64xf32>
    %50 = arith.addf %44, %49 : vector<97x64xf32>
    %c0_45 = arith.constant 0 : index
    %c11_46 = arith.constant 11 : index
    %c0_47 = arith.constant 0 : index
    %51 = vector.load %arg13[%c0_45, %c11_46, %c0_47] : memref<2x109x128xbf16, #tpu.memory_space<vmem>>, vector<1x97x128xbf16>
    %52 = vector.shape_cast %51 : vector<1x97x128xbf16> to vector<97x128xbf16>
    %c2_48 = arith.constant 2 : index
    %c0_49 = arith.constant 0 : index
    %c0_50 = arith.constant 0 : index
    %53 = vector.load %arg4[%c2_48, %c0_49, %c0_50] : memref<4x128x64xbf16, #tpu.memory_space<vmem>>, vector<1x128x64xbf16>
    %54 = vector.shape_cast %53 : vector<1x128x64xbf16> to vector<128x64xbf16>
    %cst_51 = arith.constant dense<0.000000e+00> : vector<97x64xf32>
    %55 = tpu.matmul %52, %54, %cst_51 {dimension_numbers = #tpu.dot_dimension_numbers<[1], [0], [0], [1], [0, 0, 1, 1], [], []>} : vector<97x128xbf16>, vector<128x64xbf16>, vector<97x64xf32> -> vector<97x64xf32>
    %56 = arith.addf %50, %55 : vector<97x64xf32>
    %c0_52 = arith.constant 0 : index
    %c12_53 = arith.constant 12 : index
    %c0_54 = arith.constant 0 : index
    %57 = vector.load %arg13[%c0_52, %c12_53, %c0_54] : memref<2x109x128xbf16, #tpu.memory_space<vmem>>, vector<1x97x128xbf16>
    %58 = vector.shape_cast %57 : vector<1x97x128xbf16> to vector<97x128xbf16>
    %c3_55 = arith.constant 3 : index
    %c0_56 = arith.constant 0 : index
    %c0_57 = arith.constant 0 : index
    %59 = vector.load %arg4[%c3_55, %c0_56, %c0_57] : memref<4x128x64xbf16, #tpu.memory_space<vmem>>, vector<1x128x64xbf16>
    %60 = vector.shape_cast %59 : vector<1x128x64xbf16> to vector<128x64xbf16>
    %cst_58 = arith.constant dense<0.000000e+00> : vector<97x64xf32>
    %61 = tpu.matmul %58, %60, %cst_58 {dimension_numbers = #tpu.dot_dimension_numbers<[1], [0], [0], [1], [0, 0, 1, 1], [], []>} : vector<97x128xbf16>, vector<128x64xbf16>, vector<97x64xf32> -> vector<97x64xf32>
    %62 = arith.addf %56, %61 : vector<97x64xf32>
    %cst_59 = arith.constant 0.000000e+00 : f32
    %63 = vector.broadcast %cst_59 : f32 to vector<97x64xf32>
    %64 = arith.maximumf %62, %63 : vector<97x64xf32>
    %65 = arith.truncf %64 : vector<97x64xf32> to vector<97x64xbf16>
    %c0_60 = arith.constant 0 : index
    %c0_61 = arith.constant 0 : index
    %c0_62 = arith.constant 0 : index
    %66 = vector.load %arg14[%c0_60, %c0_61, %c0_62] : memref<2x97x64xbf16, #tpu.memory_space<vmem>>, vector<1x97x64xbf16>
    %67 = vector.shape_cast %66 : vector<1x97x64xbf16> to vector<97x64xbf16>
    %68 = vector.shape_cast %65 : vector<97x64xbf16> to vector<1x97x64xbf16>
    tpu.vector_store %arg14[%c0_60, %c0_61, %c0_62], %68 {strides = array<i32>} : memref<2x97x64xbf16, #tpu.memory_space<vmem>>, vector<1x97x64xbf16>,
    %c0_63 = arith.constant 0 : index
    %c0_64 = arith.constant 0 : index
    %c0_65 = arith.constant 0 : index
    %69 = vector.load %arg14[%c0_63, %c0_64, %c0_65] : memref<2x97x64xbf16, #tpu.memory_space<vmem>>, vector<1x73x64xbf16>
    %70 = vector.shape_cast %69 : vector<1x73x64xbf16> to vector<73x64xbf16>
    %c0_66 = arith.constant 0 : index
    %c0_67 = arith.constant 0 : index
    %c0_68 = arith.constant 0 : index
    %71 = vector.load %arg6[%c0_66, %c0_67, %c0_68] : memref<9x64x64xbf16, #tpu.memory_space<vmem>>, vector<1x64x64xbf16>
    %72 = vector.shape_cast %71 : vector<1x64x64xbf16> to vector<64x64xbf16>
    %cst_69 = arith.constant dense<0.000000e+00> : vector<73x64xf32>
    %73 = tpu.matmul %70, %72, %cst_69 {dimension_numbers = #tpu.dot_dimension_numbers<[1], [0], [0], [1], [0, 0, 1, 1], [], []>} : vector<73x64xbf16>, vector<64x64xbf16>, vector<73x64xf32> -> vector<73x64xf32>
    %74 = arith.addf %8, %73 : vector<73x64xf32>
    %c0_70 = arith.constant 0 : index
    %c1_71 = arith.constant 1 : index
    %c0_72 = arith.constant 0 : index
    %75 = vector.load %arg14[%c0_70, %c1_71, %c0_72] : memref<2x97x64xbf16, #tpu.memory_space<vmem>>, vector<1x73x64xbf16>
    %76 = vector.shape_cast %75 : vector<1x73x64xbf16> to vector<73x64xbf16>
    %c1_73 = arith.constant 1 : index
    %c0_74 = arith.constant 0 : index
    %c0_75 = arith.constant 0 : index
    %77 = vector.load %arg6[%c1_73, %c0_74, %c0_75] : memref<9x64x64xbf16, #tpu.memory_space<vmem>>, vector<1x64x64xbf16>
    %78 = vector.shape_cast %77 : vector<1x64x64xbf16> to vector<64x64xbf16>
    %cst_76 = arith.constant dense<0.000000e+00> : vector<73x64xf32>
    %79 = tpu.matmul %76, %78, %cst_76 {dimension_numbers = #tpu.dot_dimension_numbers<[1], [0], [0], [1], [0, 0, 1, 1], [], []>} : vector<73x64xbf16>, vector<64x64xbf16>, vector<73x64xf32> -> vector<73x64xf32>
    %80 = arith.addf %74, %79 : vector<73x64xf32>
    %c0_77 = arith.constant 0 : index
    %c2_78 = arith.constant 2 : index
    %c0_79 = arith.constant 0 : index
    %81 = vector.load %arg14[%c0_77, %c2_78, %c0_79] : memref<2x97x64xbf16, #tpu.memory_space<vmem>>, vector<1x73x64xbf16>
    %82 = vector.shape_cast %81 : vector<1x73x64xbf16> to vector<73x64xbf16>
    %c2_80 = arith.constant 2 : index
    %c0_81 = arith.constant 0 : index
    %c0_82 = arith.constant 0 : index
    %83 = vector.load %arg6[%c2_80, %c0_81, %c0_82] : memref<9x64x64xbf16, #tpu.memory_space<vmem>>, vector<1x64x64xbf16>
    %84 = vector.shape_cast %83 : vector<1x64x64xbf16> to vector<64x64xbf16>
    %cst_83 = arith.constant dense<0.000000e+00> : vector<73x64xf32>
    %85 = tpu.matmul %82, %84, %cst_83 {dimension_numbers = #tpu.dot_dimension_numbers<[1], [0], [0], [1], [0, 0, 1, 1], [], []>} : vector<73x64xbf16>, vector<64x64xbf16>, vector<73x64xf32> -> vector<73x64xf32>
    %86 = arith.addf %80, %85 : vector<73x64xf32>
    %c0_84 = arith.constant 0 : index
    %c11_85 = arith.constant 11 : index
    %c0_86 = arith.constant 0 : index
    %87 = vector.load %arg14[%c0_84, %c11_85, %c0_86] : memref<2x97x64xbf16, #tpu.memory_space<vmem>>, vector<1x73x64xbf16>
    %88 = vector.shape_cast %87 : vector<1x73x64xbf16> to vector<73x64xbf16>
    %c3_87 = arith.constant 3 : index
    %c0_88 = arith.constant 0 : index
    %c0_89 = arith.constant 0 : index
    %89 = vector.load %arg6[%c3_87, %c0_88, %c0_89] : memref<9x64x64xbf16, #tpu.memory_space<vmem>>, vector<1x64x64xbf16>
    %90 = vector.shape_cast %89 : vector<1x64x64xbf16> to vector<64x64xbf16>
    %cst_90 = arith.constant dense<0.000000e+00> : vector<73x64xf32>
    %91 = tpu.matmul %88, %90, %cst_90 {dimension_numbers = #tpu.dot_dimension_numbers<[1], [0], [0], [1], [0, 0, 1, 1], [], []>} : vector<73x64xbf16>, vector<64x64xbf16>, vector<73x64xf32> -> vector<73x64xf32>
    %92 = arith.addf %86, %91 : vector<73x64xf32>
    %c0_91 = arith.constant 0 : index
    %c12_92 = arith.constant 12 : index
    %c0_93 = arith.constant 0 : index
    %93 = vector.load %arg14[%c0_91, %c12_92, %c0_93] : memref<2x97x64xbf16, #tpu.memory_space<vmem>>, vector<1x73x64xbf16>
    %94 = vector.shape_cast %93 : vector<1x73x64xbf16> to vector<73x64xbf16>
    %c4 = arith.constant 4 : index
    %c0_94 = arith.constant 0 : index
    %c0_95 = arith.constant 0 : index
    %95 = vector.load %arg6[%c4, %c0_94, %c0_95] : memref<9x64x64xbf16, #tpu.memory_space<vmem>>, vector<1x64x64xbf16>
    %96 = vector.shape_cast %95 : vector<1x64x64xbf16> to vector<64x64xbf16>
    %cst_96 = arith.constant dense<0.000000e+00> : vector<73x64xf32>
    %97 = tpu.matmul %94, %96, %cst_96 {dimension_numbers = #tpu.dot_dimension_numbers<[1], [0], [0], [1], [0, 0, 1, 1], [], []>} : vector<73x64xbf16>, vector<64x64xbf16>, vector<73x64xf32> -> vector<73x64xf32>
    %98 = arith.addf %92, %97 : vector<73x64xf32>
    %c0_97 = arith.constant 0 : index
    %c13 = arith.constant 13 : index
    %c0_98 = arith.constant 0 : index
    %99 = vector.load %arg14[%c0_97, %c13, %c0_98] : memref<2x97x64xbf16, #tpu.memory_space<vmem>>, vector<1x73x64xbf16>
    %100 = vector.shape_cast %99 : vector<1x73x64xbf16> to vector<73x64xbf16>
    %c5 = arith.constant 5 : index
    %c0_99 = arith.constant 0 : index
    %c0_100 = arith.constant 0 : index
    %101 = vector.load %arg6[%c5, %c0_99, %c0_100] : memref<9x64x64xbf16, #tpu.memory_space<vmem>>, vector<1x64x64xbf16>
    %102 = vector.shape_cast %101 : vector<1x64x64xbf16> to vector<64x64xbf16>
    %cst_101 = arith.constant dense<0.000000e+00> : vector<73x64xf32>
    %103 = tpu.matmul %100, %102, %cst_101 {dimension_numbers = #tpu.dot_dimension_numbers<[1], [0], [0], [1], [0, 0, 1, 1], [], []>} : vector<73x64xbf16>, vector<64x64xbf16>, vector<73x64xf32> -> vector<73x64xf32>
    %104 = arith.addf %98, %103 : vector<73x64xf32>
    %c0_102 = arith.constant 0 : index
    %c22 = arith.constant 22 : index
    %c0_103 = arith.constant 0 : index
    %105 = vector.load %arg14[%c0_102, %c22, %c0_103] : memref<2x97x64xbf16, #tpu.memory_space<vmem>>, vector<1x73x64xbf16>
    %106 = vector.shape_cast %105 : vector<1x73x64xbf16> to vector<73x64xbf16>
    %c6 = arith.constant 6 : index
    %c0_104 = arith.constant 0 : index
    %c0_105 = arith.constant 0 : index
    %107 = vector.load %arg6[%c6, %c0_104, %c0_105] : memref<9x64x64xbf16, #tpu.memory_space<vmem>>, vector<1x64x64xbf16>
    %108 = vector.shape_cast %107 : vector<1x64x64xbf16> to vector<64x64xbf16>
    %cst_106 = arith.constant dense<0.000000e+00> : vector<73x64xf32>
    %109 = tpu.matmul %106, %108, %cst_106 {dimension_numbers = #tpu.dot_dimension_numbers<[1], [0], [0], [1], [0, 0, 1, 1], [], []>} : vector<73x64xbf16>, vector<64x64xbf16>, vector<73x64xf32> -> vector<73x64xf32>
    %110 = arith.addf %104, %109 : vector<73x64xf32>
    %c0_107 = arith.constant 0 : index
    %c23 = arith.constant 23 : index
    %c0_108 = arith.constant 0 : index
    %111 = vector.load %arg14[%c0_107, %c23, %c0_108] : memref<2x97x64xbf16, #tpu.memory_space<vmem>>, vector<1x73x64xbf16>
    %112 = vector.shape_cast %111 : vector<1x73x64xbf16> to vector<73x64xbf16>
    %c7 = arith.constant 7 : index
    %c0_109 = arith.constant 0 : index
    %c0_110 = arith.constant 0 : index
    %113 = vector.load %arg6[%c7, %c0_109, %c0_110] : memref<9x64x64xbf16, #tpu.memory_space<vmem>>, vector<1x64x64xbf16>
    %114 = vector.shape_cast %113 : vector<1x64x64xbf16> to vector<64x64xbf16>
    %cst_111 = arith.constant dense<0.000000e+00> : vector<73x64xf32>
    %115 = tpu.matmul %112, %114, %cst_111 {dimension_numbers = #tpu.dot_dimension_numbers<[1], [0], [0], [1], [0, 0, 1, 1], [], []>} : vector<73x64xbf16>, vector<64x64xbf16>, vector<73x64xf32> -> vector<73x64xf32>
    %116 = arith.addf %110, %115 : vector<73x64xf32>
    %c0_112 = arith.constant 0 : index
    %c24 = arith.constant 24 : index
    %c0_113 = arith.constant 0 : index
    %117 = vector.load %arg14[%c0_112, %c24, %c0_113] : memref<2x97x64xbf16, #tpu.memory_space<vmem>>, vector<1x73x64xbf16>
    %118 = vector.shape_cast %117 : vector<1x73x64xbf16> to vector<73x64xbf16>
    %c8 = arith.constant 8 : index
    %c0_114 = arith.constant 0 : index
    %c0_115 = arith.constant 0 : index
    %119 = vector.load %arg6[%c8, %c0_114, %c0_115] : memref<9x64x64xbf16, #tpu.memory_space<vmem>>, vector<1x64x64xbf16>
    %120 = vector.shape_cast %119 : vector<1x64x64xbf16> to vector<64x64xbf16>
    %cst_116 = arith.constant dense<0.000000e+00> : vector<73x64xf32>
    %121 = tpu.matmul %118, %120, %cst_116 {dimension_numbers = #tpu.dot_dimension_numbers<[1], [0], [0], [1], [0, 0, 1, 1], [], []>} : vector<73x64xbf16>, vector<64x64xbf16>, vector<73x64xf32> -> vector<73x64xf32>
    %122 = arith.addf %116, %121 : vector<73x64xf32>
    %cst_117 = arith.constant 0.000000e+00 : f32
    %123 = vector.broadcast %cst_117 : f32 to vector<73x64xf32>
    %124 = arith.maximumf %122, %123 : vector<73x64xf32>
    %125 = arith.truncf %124 : vector<73x64xf32> to vector<73x64xbf16>
    %c0_118 = arith.constant 0 : index
    %c0_119 = arith.constant 0 : index
    %c0_120 = arith.constant 0 : index
    %126 = vector.load %arg15[%c0_118, %c0_119, %c0_120] : memref<2x73x64xbf16, #tpu.memory_space<vmem>>, vector<1x73x64xbf16>
    %127 = vector.shape_cast %126 : vector<1x73x64xbf16> to vector<73x64xbf16>
    %128 = vector.shape_cast %125 : vector<73x64xbf16> to vector<1x73x64xbf16>
    tpu.vector_store %arg15[%c0_118, %c0_119, %c0_120], %128 {strides = array<i32>} : memref<2x73x64xbf16, #tpu.memory_space<vmem>>, vector<1x73x64xbf16>,
    %c1_121 = arith.constant 1 : index
    %c0_122 = arith.constant 0 : index
    %c0_123 = arith.constant 0 : index
    %129 = vector.load %arg1[%c1_121, %c0_122, %c0_123] : memref<2x121x256xbf16, #tpu.memory_space<vmem>>, vector<1x109x256xbf16>
    %130 = vector.shape_cast %129 : vector<1x109x256xbf16> to vector<109x256xbf16>
    %c0_124 = arith.constant 0 : index
    %c0_125 = arith.constant 0 : index
    %c0_126 = arith.constant 0 : index
    %131 = vector.load %arg2[%c0_124, %c0_125, %c0_126] : memref<4x256x128xbf16, #tpu.memory_space<vmem>>, vector<1x256x128xbf16>
    %132 = vector.shape_cast %131 : vector<1x256x128xbf16> to vector<256x128xbf16>
    %cst_127 = arith.constant dense<0.000000e+00> : vector<109x128xf32>
    %133 = tpu.matmul %130, %132, %cst_127 {dimension_numbers = #tpu.dot_dimension_numbers<[1], [0], [0], [1], [0, 0, 1, 1], [], []>} : vector<109x256xbf16>, vector<256x128xbf16>, vector<109x128xf32> -> vector<109x128xf32>
    %134 = arith.addf %2, %133 : vector<109x128xf32>
    %c1_128 = arith.constant 1 : index
    %c1_129 = arith.constant 1 : index
    %c0_130 = arith.constant 0 : index
    %135 = vector.load %arg1[%c1_128, %c1_129, %c0_130] : memref<2x121x256xbf16, #tpu.memory_space<vmem>>, vector<1x109x256xbf16>
    %136 = vector.shape_cast %135 : vector<1x109x256xbf16> to vector<109x256xbf16>
    %c1_131 = arith.constant 1 : index
    %c0_132 = arith.constant 0 : index
    %c0_133 = arith.constant 0 : index
    %137 = vector.load %arg2[%c1_131, %c0_132, %c0_133] : memref<4x256x128xbf16, #tpu.memory_space<vmem>>, vector<1x256x128xbf16>
    %138 = vector.shape_cast %137 : vector<1x256x128xbf16> to vector<256x128xbf16>
    %cst_134 = arith.constant dense<0.000000e+00> : vector<109x128xf32>
    %139 = tpu.matmul %136, %138, %cst_134 {dimension_numbers = #tpu.dot_dimension_numbers<[1], [0], [0], [1], [0, 0, 1, 1], [], []>} : vector<109x256xbf16>, vector<256x128xbf16>, vector<109x128xf32> -> vector<109x128xf32>
    %140 = arith.addf %134, %139 : vector<109x128xf32>
    %c1_135 = arith.constant 1 : index
    %c11_136 = arith.constant 11 : index
    %c0_137 = arith.constant 0 : index
    %141 = vector.load %arg1[%c1_135, %c11_136, %c0_137] : memref<2x121x256xbf16, #tpu.memory_space<vmem>>, vector<1x109x256xbf16>
    %142 = vector.shape_cast %141 : vector<1x109x256xbf16> to vector<109x256xbf16>
    %c2_138 = arith.constant 2 : index
    %c0_139 = arith.constant 0 : index
    %c0_140 = arith.constant 0 : index
    %143 = vector.load %arg2[%c2_138, %c0_139, %c0_140] : memref<4x256x128xbf16, #tpu.memory_space<vmem>>, vector<1x256x128xbf16>
    %144 = vector.shape_cast %143 : vector<1x256x128xbf16> to vector<256x128xbf16>
    %cst_141 = arith.constant dense<0.000000e+00> : vector<109x128xf32>
    %145 = tpu.matmul %142, %144, %cst_141 {dimension_numbers = #tpu.dot_dimension_numbers<[1], [0], [0], [1], [0, 0, 1, 1], [], []>} : vector<109x256xbf16>, vector<256x128xbf16>, vector<109x128xf32> -> vector<109x128xf32>
    %146 = arith.addf %140, %145 : vector<109x128xf32>
    %c1_142 = arith.constant 1 : index
    %c12_143 = arith.constant 12 : index
    %c0_144 = arith.constant 0 : index
    %147 = vector.load %arg1[%c1_142, %c12_143, %c0_144] : memref<2x121x256xbf16, #tpu.memory_space<vmem>>, vector<1x109x256xbf16>
    %148 = vector.shape_cast %147 : vector<1x109x256xbf16> to vector<109x256xbf16>
    %c3_145 = arith.constant 3 : index
    %c0_146 = arith.constant 0 : index
    %c0_147 = arith.constant 0 : index
    %149 = vector.load %arg2[%c3_145, %c0_146, %c0_147] : memref<4x256x128xbf16, #tpu.memory_space<vmem>>, vector<1x256x128xbf16>
    %150 = vector.shape_cast %149 : vector<1x256x128xbf16> to vector<256x128xbf16>
    %cst_148 = arith.constant dense<0.000000e+00> : vector<109x128xf32>
    %151 = tpu.matmul %148, %150, %cst_148 {dimension_numbers = #tpu.dot_dimension_numbers<[1], [0], [0], [1], [0, 0, 1, 1], [], []>} : vector<109x256xbf16>, vector<256x128xbf16>, vector<109x128xf32> -> vector<109x128xf32>
    %152 = arith.addf %146, %151 : vector<109x128xf32>
    %cst_149 = arith.constant 0.000000e+00 : f32
    %153 = vector.broadcast %cst_149 : f32 to vector<109x128xf32>
    %154 = arith.maximumf %152, %153 : vector<109x128xf32>
    %155 = arith.truncf %154 : vector<109x128xf32> to vector<109x128xbf16>
    %c1_150 = arith.constant 1 : index
    %c0_151 = arith.constant 0 : index
    %c0_152 = arith.constant 0 : index
    %156 = vector.load %arg13[%c1_150, %c0_151, %c0_152] : memref<2x109x128xbf16, #tpu.memory_space<vmem>>, vector<1x109x128xbf16>
    %157 = vector.shape_cast %156 : vector<1x109x128xbf16> to vector<109x128xbf16>
    %158 = vector.shape_cast %155 : vector<109x128xbf16> to vector<1x109x128xbf16>
    tpu.vector_store %arg13[%c1_150, %c0_151, %c0_152], %158 {strides = array<i32>} : memref<2x109x128xbf16, #tpu.memory_space<vmem>>, vector<1x109x128xbf16>,
    %c1_153 = arith.constant 1 : index
    %c0_154 = arith.constant 0 : index
    %c0_155 = arith.constant 0 : index
    %159 = vector.load %arg13[%c1_153, %c0_154, %c0_155] : memref<2x109x128xbf16, #tpu.memory_space<vmem>>, vector<1x97x128xbf16>
    %160 = vector.shape_cast %159 : vector<1x97x128xbf16> to vector<97x128xbf16>
    %c0_156 = arith.constant 0 : index
    %c0_157 = arith.constant 0 : index
    %c0_158 = arith.constant 0 : index
    %161 = vector.load %arg4[%c0_156, %c0_157, %c0_158] : memref<4x128x64xbf16, #tpu.memory_space<vmem>>, vector<1x128x64xbf16>
    %162 = vector.shape_cast %161 : vector<1x128x64xbf16> to vector<128x64xbf16>
    %cst_159 = arith.constant dense<0.000000e+00> : vector<97x64xf32>
    %163 = tpu.matmul %160, %162, %cst_159 {dimension_numbers = #tpu.dot_dimension_numbers<[1], [0], [0], [1], [0, 0, 1, 1], [], []>} : vector<97x128xbf16>, vector<128x64xbf16>, vector<97x64xf32> -> vector<97x64xf32>
    %164 = arith.addf %5, %163 : vector<97x64xf32>
    %c1_160 = arith.constant 1 : index
    %c1_161 = arith.constant 1 : index
    %c0_162 = arith.constant 0 : index
    %165 = vector.load %arg13[%c1_160, %c1_161, %c0_162] : memref<2x109x128xbf16, #tpu.memory_space<vmem>>, vector<1x97x128xbf16>
    %166 = vector.shape_cast %165 : vector<1x97x128xbf16> to vector<97x128xbf16>
    %c1_163 = arith.constant 1 : index
    %c0_164 = arith.constant 0 : index
    %c0_165 = arith.constant 0 : index
    %167 = vector.load %arg4[%c1_163, %c0_164, %c0_165] : memref<4x128x64xbf16, #tpu.memory_space<vmem>>, vector<1x128x64xbf16>
    %168 = vector.shape_cast %167 : vector<1x128x64xbf16> to vector<128x64xbf16>
    %cst_166 = arith.constant dense<0.000000e+00> : vector<97x64xf32>
    %169 = tpu.matmul %166, %168, %cst_166 {dimension_numbers = #tpu.dot_dimension_numbers<[1], [0], [0], [1], [0, 0, 1, 1], [], []>} : vector<97x128xbf16>, vector<128x64xbf16>, vector<97x64xf32> -> vector<97x64xf32>
    %170 = arith.addf %164, %169 : vector<97x64xf32>
    %c1_167 = arith.constant 1 : index
    %c11_168 = arith.constant 11 : index
    %c0_169 = arith.constant 0 : index
    %171 = vector.load %arg13[%c1_167, %c11_168, %c0_169] : memref<2x109x128xbf16, #tpu.memory_space<vmem>>, vector<1x97x128xbf16>
    %172 = vector.shape_cast %171 : vector<1x97x128xbf16> to vector<97x128xbf16>
    %c2_170 = arith.constant 2 : index
    %c0_171 = arith.constant 0 : index
    %c0_172 = arith.constant 0 : index
    %173 = vector.load %arg4[%c2_170, %c0_171, %c0_172] : memref<4x128x64xbf16, #tpu.memory_space<vmem>>, vector<1x128x64xbf16>
    %174 = vector.shape_cast %173 : vector<1x128x64xbf16> to vector<128x64xbf16>
    %cst_173 = arith.constant dense<0.000000e+00> : vector<97x64xf32>
    %175 = tpu.matmul %172, %174, %cst_173 {dimension_numbers = #tpu.dot_dimension_numbers<[1], [0], [0], [1], [0, 0, 1, 1], [], []>} : vector<97x128xbf16>, vector<128x64xbf16>, vector<97x64xf32> -> vector<97x64xf32>
    %176 = arith.addf %170, %175 : vector<97x64xf32>
    %c1_174 = arith.constant 1 : index
    %c12_175 = arith.constant 12 : index
    %c0_176 = arith.constant 0 : index
    %177 = vector.load %arg13[%c1_174, %c12_175, %c0_176] : memref<2x109x128xbf16, #tpu.memory_space<vmem>>, vector<1x97x128xbf16>
    %178 = vector.shape_cast %177 : vector<1x97x128xbf16> to vector<97x128xbf16>
    %c3_177 = arith.constant 3 : index
    %c0_178 = arith.constant 0 : index
    %c0_179 = arith.constant 0 : index
    %179 = vector.load %arg4[%c3_177, %c0_178, %c0_179] : memref<4x128x64xbf16, #tpu.memory_space<vmem>>, vector<1x128x64xbf16>
    %180 = vector.shape_cast %179 : vector<1x128x64xbf16> to vector<128x64xbf16>
    %cst_180 = arith.constant dense<0.000000e+00> : vector<97x64xf32>
    %181 = tpu.matmul %178, %180, %cst_180 {dimension_numbers = #tpu.dot_dimension_numbers<[1], [0], [0], [1], [0, 0, 1, 1], [], []>} : vector<97x128xbf16>, vector<128x64xbf16>, vector<97x64xf32> -> vector<97x64xf32>
    %182 = arith.addf %176, %181 : vector<97x64xf32>
    %cst_181 = arith.constant 0.000000e+00 : f32
    %183 = vector.broadcast %cst_181 : f32 to vector<97x64xf32>
    %184 = arith.maximumf %182, %183 : vector<97x64xf32>
    %185 = arith.truncf %184 : vector<97x64xf32> to vector<97x64xbf16>
    %c1_182 = arith.constant 1 : index
    %c0_183 = arith.constant 0 : index
    %c0_184 = arith.constant 0 : index
    %186 = vector.load %arg14[%c1_182, %c0_183, %c0_184] : memref<2x97x64xbf16, #tpu.memory_space<vmem>>, vector<1x97x64xbf16>
    %187 = vector.shape_cast %186 : vector<1x97x64xbf16> to vector<97x64xbf16>
    %188 = vector.shape_cast %185 : vector<97x64xbf16> to vector<1x97x64xbf16>
    tpu.vector_store %arg14[%c1_182, %c0_183, %c0_184], %188 {strides = array<i32>} : memref<2x97x64xbf16, #tpu.memory_space<vmem>>, vector<1x97x64xbf16>,
    %c1_185 = arith.constant 1 : index
    %c0_186 = arith.constant 0 : index
    %c0_187 = arith.constant 0 : index
    %189 = vector.load %arg14[%c1_185, %c0_186, %c0_187] : memref<2x97x64xbf16, #tpu.memory_space<vmem>>, vector<1x73x64xbf16>
    %190 = vector.shape_cast %189 : vector<1x73x64xbf16> to vector<73x64xbf16>
    %c0_188 = arith.constant 0 : index
    %c0_189 = arith.constant 0 : index
    %c0_190 = arith.constant 0 : index
    %191 = vector.load %arg6[%c0_188, %c0_189, %c0_190] : memref<9x64x64xbf16, #tpu.memory_space<vmem>>, vector<1x64x64xbf16>
    %192 = vector.shape_cast %191 : vector<1x64x64xbf16> to vector<64x64xbf16>
    %cst_191 = arith.constant dense<0.000000e+00> : vector<73x64xf32>
    %193 = tpu.matmul %190, %192, %cst_191 {dimension_numbers = #tpu.dot_dimension_numbers<[1], [0], [0], [1], [0, 0, 1, 1], [], []>} : vector<73x64xbf16>, vector<64x64xbf16>, vector<73x64xf32> -> vector<73x64xf32>
    %194 = arith.addf %8, %193 : vector<73x64xf32>
    %c1_192 = arith.constant 1 : index
    %c1_193 = arith.constant 1 : index
    %c0_194 = arith.constant 0 : index
    %195 = vector.load %arg14[%c1_192, %c1_193, %c0_194] : memref<2x97x64xbf16, #tpu.memory_space<vmem>>, vector<1x73x64xbf16>
    %196 = vector.shape_cast %195 : vector<1x73x64xbf16> to vector<73x64xbf16>
    %c1_195 = arith.constant 1 : index
    %c0_196 = arith.constant 0 : index
    %c0_197 = arith.constant 0 : index
    %197 = vector.load %arg6[%c1_195, %c0_196, %c0_197] : memref<9x64x64xbf16, #tpu.memory_space<vmem>>, vector<1x64x64xbf16>
    %198 = vector.shape_cast %197 : vector<1x64x64xbf16> to vector<64x64xbf16>
    %cst_198 = arith.constant dense<0.000000e+00> : vector<73x64xf32>
    %199 = tpu.matmul %196, %198, %cst_198 {dimension_numbers = #tpu.dot_dimension_numbers<[1], [0], [0], [1], [0, 0, 1, 1], [], []>} : vector<73x64xbf16>, vector<64x64xbf16>, vector<73x64xf32> -> vector<73x64xf32>
    %200 = arith.addf %194, %199 : vector<73x64xf32>
    %c1_199 = arith.constant 1 : index
    %c2_200 = arith.constant 2 : index
    %c0_201 = arith.constant 0 : index
    %201 = vector.load %arg14[%c1_199, %c2_200, %c0_201] : memref<2x97x64xbf16, #tpu.memory_space<vmem>>, vector<1x73x64xbf16>
    %202 = vector.shape_cast %201 : vector<1x73x64xbf16> to vector<73x64xbf16>
    %c2_202 = arith.constant 2 : index
    %c0_203 = arith.constant 0 : index
    %c0_204 = arith.constant 0 : index
    %203 = vector.load %arg6[%c2_202, %c0_203, %c0_204] : memref<9x64x64xbf16, #tpu.memory_space<vmem>>, vector<1x64x64xbf16>
    %204 = vector.shape_cast %203 : vector<1x64x64xbf16> to vector<64x64xbf16>
    %cst_205 = arith.constant dense<0.000000e+00> : vector<73x64xf32>
    %205 = tpu.matmul %202, %204, %cst_205 {dimension_numbers = #tpu.dot_dimension_numbers<[1], [0], [0], [1], [0, 0, 1, 1], [], []>} : vector<73x64xbf16>, vector<64x64xbf16>, vector<73x64xf32> -> vector<73x64xf32>
    %206 = arith.addf %200, %205 : vector<73x64xf32>
    %c1_206 = arith.constant 1 : index
    %c11_207 = arith.constant 11 : index
    %c0_208 = arith.constant 0 : index
    %207 = vector.load %arg14[%c1_206, %c11_207, %c0_208] : memref<2x97x64xbf16, #tpu.memory_space<vmem>>, vector<1x73x64xbf16>
    %208 = vector.shape_cast %207 : vector<1x73x64xbf16> to vector<73x64xbf16>
    %c3_209 = arith.constant 3 : index
    %c0_210 = arith.constant 0 : index
    %c0_211 = arith.constant 0 : index
    %209 = vector.load %arg6[%c3_209, %c0_210, %c0_211] : memref<9x64x64xbf16, #tpu.memory_space<vmem>>, vector<1x64x64xbf16>
    %210 = vector.shape_cast %209 : vector<1x64x64xbf16> to vector<64x64xbf16>
    %cst_212 = arith.constant dense<0.000000e+00> : vector<73x64xf32>
    %211 = tpu.matmul %208, %210, %cst_212 {dimension_numbers = #tpu.dot_dimension_numbers<[1], [0], [0], [1], [0, 0, 1, 1], [], []>} : vector<73x64xbf16>, vector<64x64xbf16>, vector<73x64xf32> -> vector<73x64xf32>
    %212 = arith.addf %206, %211 : vector<73x64xf32>
    %c1_213 = arith.constant 1 : index
    %c12_214 = arith.constant 12 : index
    %c0_215 = arith.constant 0 : index
    %213 = vector.load %arg14[%c1_213, %c12_214, %c0_215] : memref<2x97x64xbf16, #tpu.memory_space<vmem>>, vector<1x73x64xbf16>
    %214 = vector.shape_cast %213 : vector<1x73x64xbf16> to vector<73x64xbf16>
    %c4_216 = arith.constant 4 : index
    %c0_217 = arith.constant 0 : index
    %c0_218 = arith.constant 0 : index
    %215 = vector.load %arg6[%c4_216, %c0_217, %c0_218] : memref<9x64x64xbf16, #tpu.memory_space<vmem>>, vector<1x64x64xbf16>
    %216 = vector.shape_cast %215 : vector<1x64x64xbf16> to vector<64x64xbf16>
    %cst_219 = arith.constant dense<0.000000e+00> : vector<73x64xf32>
    %217 = tpu.matmul %214, %216, %cst_219 {dimension_numbers = #tpu.dot_dimension_numbers<[1], [0], [0], [1], [0, 0, 1, 1], [], []>} : vector<73x64xbf16>, vector<64x64xbf16>, vector<73x64xf32> -> vector<73x64xf32>
    %218 = arith.addf %212, %217 : vector<73x64xf32>
    %c1_220 = arith.constant 1 : index
    %c13_221 = arith.constant 13 : index
    %c0_222 = arith.constant 0 : index
    %219 = vector.load %arg14[%c1_220, %c13_221, %c0_222] : memref<2x97x64xbf16, #tpu.memory_space<vmem>>, vector<1x73x64xbf16>
    %220 = vector.shape_cast %219 : vector<1x73x64xbf16> to vector<73x64xbf16>
    %c5_223 = arith.constant 5 : index
    %c0_224 = arith.constant 0 : index
    %c0_225 = arith.constant 0 : index
    %221 = vector.load %arg6[%c5_223, %c0_224, %c0_225] : memref<9x64x64xbf16, #tpu.memory_space<vmem>>, vector<1x64x64xbf16>
    %222 = vector.shape_cast %221 : vector<1x64x64xbf16> to vector<64x64xbf16>
    %cst_226 = arith.constant dense<0.000000e+00> : vector<73x64xf32>
    %223 = tpu.matmul %220, %222, %cst_226 {dimension_numbers = #tpu.dot_dimension_numbers<[1], [0], [0], [1], [0, 0, 1, 1], [], []>} : vector<73x64xbf16>, vector<64x64xbf16>, vector<73x64xf32> -> vector<73x64xf32>
    %224 = arith.addf %218, %223 : vector<73x64xf32>
    %c1_227 = arith.constant 1 : index
    %c22_228 = arith.constant 22 : index
    %c0_229 = arith.constant 0 : index
    %225 = vector.load %arg14[%c1_227, %c22_228, %c0_229] : memref<2x97x64xbf16, #tpu.memory_space<vmem>>, vector<1x73x64xbf16>
    %226 = vector.shape_cast %225 : vector<1x73x64xbf16> to vector<73x64xbf16>
    %c6_230 = arith.constant 6 : index
    %c0_231 = arith.constant 0 : index
    %c0_232 = arith.constant 0 : index
    %227 = vector.load %arg6[%c6_230, %c0_231, %c0_232] : memref<9x64x64xbf16, #tpu.memory_space<vmem>>, vector<1x64x64xbf16>
    %228 = vector.shape_cast %227 : vector<1x64x64xbf16> to vector<64x64xbf16>
    %cst_233 = arith.constant dense<0.000000e+00> : vector<73x64xf32>
    %229 = tpu.matmul %226, %228, %cst_233 {dimension_numbers = #tpu.dot_dimension_numbers<[1], [0], [0], [1], [0, 0, 1, 1], [], []>} : vector<73x64xbf16>, vector<64x64xbf16>, vector<73x64xf32> -> vector<73x64xf32>
    %230 = arith.addf %224, %229 : vector<73x64xf32>
    %c1_234 = arith.constant 1 : index
    %c23_235 = arith.constant 23 : index
    %c0_236 = arith.constant 0 : index
    %231 = vector.load %arg14[%c1_234, %c23_235, %c0_236] : memref<2x97x64xbf16, #tpu.memory_space<vmem>>, vector<1x73x64xbf16>
    %232 = vector.shape_cast %231 : vector<1x73x64xbf16> to vector<73x64xbf16>
    %c7_237 = arith.constant 7 : index
    %c0_238 = arith.constant 0 : index
    %c0_239 = arith.constant 0 : index
    %233 = vector.load %arg6[%c7_237, %c0_238, %c0_239] : memref<9x64x64xbf16, #tpu.memory_space<vmem>>, vector<1x64x64xbf16>
    %234 = vector.shape_cast %233 : vector<1x64x64xbf16> to vector<64x64xbf16>
    %cst_240 = arith.constant dense<0.000000e+00> : vector<73x64xf32>
    %235 = tpu.matmul %232, %234, %cst_240 {dimension_numbers = #tpu.dot_dimension_numbers<[1], [0], [0], [1], [0, 0, 1, 1], [], []>} : vector<73x64xbf16>, vector<64x64xbf16>, vector<73x64xf32> -> vector<73x64xf32>
    %236 = arith.addf %230, %235 : vector<73x64xf32>
    %c1_241 = arith.constant 1 : index
    %c24_242 = arith.constant 24 : index
    %c0_243 = arith.constant 0 : index
    %237 = vector.load %arg14[%c1_241, %c24_242, %c0_243] : memref<2x97x64xbf16, #tpu.memory_space<vmem>>, vector<1x73x64xbf16>
    %238 = vector.shape_cast %237 : vector<1x73x64xbf16> to vector<73x64xbf16>
    %c8_244 = arith.constant 8 : index
    %c0_245 = arith.constant 0 : index
    %c0_246 = arith.constant 0 : index
    %239 = vector.load %arg6[%c8_244, %c0_245, %c0_246] : memref<9x64x64xbf16, #tpu.memory_space<vmem>>, vector<1x64x64xbf16>
    %240 = vector.shape_cast %239 : vector<1x64x64xbf16> to vector<64x64xbf16>
    %cst_247 = arith.constant dense<0.000000e+00> : vector<73x64xf32>
    %241 = tpu.matmul %238, %240, %cst_247 {dimension_numbers = #tpu.dot_dimension_numbers<[1], [0], [0], [1], [0, 0, 1, 1], [], []>} : vector<73x64xbf16>, vector<64x64xbf16>, vector<73x64xf32> -> vector<73x64xf32>
    %242 = arith.addf %236, %241 : vector<73x64xf32>
    %cst_248 = arith.constant 0.000000e+00 : f32
    %243 = vector.broadcast %cst_248 : f32 to vector<73x64xf32>
    %244 = arith.maximumf %242, %243 : vector<73x64xf32>
    %245 = arith.truncf %244 : vector<73x64xf32> to vector<73x64xbf16>
    %c1_249 = arith.constant 1 : index
    %c0_250 = arith.constant 0 : index
    %c0_251 = arith.constant 0 : index
    %246 = vector.load %arg15[%c1_249, %c0_250, %c0_251] : memref<2x73x64xbf16, #tpu.memory_space<vmem>>, vector<1x73x64xbf16>
    %247 = vector.shape_cast %246 : vector<1x73x64xbf16> to vector<73x64xbf16>
    %248 = vector.shape_cast %245 : vector<73x64xbf16> to vector<1x73x64xbf16>
    tpu.vector_store %arg15[%c1_249, %c0_250, %c0_251], %248 {strides = array<i32>} : memref<2x73x64xbf16, #tpu.memory_space<vmem>>, vector<1x73x64xbf16>,
    %c0_252 = arith.constant 0 : index
    %c0_253 = arith.constant 0 : index
    %c0_254 = arith.constant 0 : index
    %249 = vector.load %arg15[%c0_252, %c0_253, %c0_254] : memref<2x73x64xbf16, #tpu.memory_space<vmem>>, vector<2x1x64xbf16>
    %250 = vector.shape_cast %249 : vector<2x1x64xbf16> to vector<2x64xbf16>
    %c0_255 = arith.constant 0 : index
    %c0_256 = arith.constant 0 : index
    %251 = vector.load %arg16[%c0_255, %c0_256] : memref<2x3136xbf16, #tpu.memory_space<vmem>>, vector<2x64xbf16>
    tpu.vector_store %arg16[%c0_255, %c0_256], %250 {strides = array<i32>} : memref<2x3136xbf16, #tpu.memory_space<vmem>>, vector<2x64xbf16>,
    %c0_257 = arith.constant 0 : index
    %c1_258 = arith.constant 1 : index
    %c0_259 = arith.constant 0 : index
    %252 = vector.load %arg15[%c0_257, %c1_258, %c0_259] : memref<2x73x64xbf16, #tpu.memory_space<vmem>>, vector<2x1x64xbf16>
    %253 = vector.shape_cast %252 : vector<2x1x64xbf16> to vector<2x64xbf16>
    %c0_260 = arith.constant 0 : index
    %c64 = arith.constant 64 : index
    %254 = vector.load %arg16[%c0_260, %c64] : memref<2x3136xbf16, #tpu.memory_space<vmem>>, vector<2x64xbf16>
    tpu.vector_store %arg16[%c0_260, %c64], %253 {strides = array<i32>} : memref<2x3136xbf16, #tpu.memory_space<vmem>>, vector<2x64xbf16>,
    %c0_261 = arith.constant 0 : index
    %c2_262 = arith.constant 2 : index
    %c0_263 = arith.constant 0 : index
    %255 = vector.load %arg15[%c0_261, %c2_262, %c0_263] : memref<2x73x64xbf16, #tpu.memory_space<vmem>>, vector<2x1x64xbf16>
    %256 = vector.shape_cast %255 : vector<2x1x64xbf16> to vector<2x64xbf16>
    %c0_264 = arith.constant 0 : index
    %c128 = arith.constant 128 : index
    %257 = vector.load %arg16[%c0_264, %c128] : memref<2x3136xbf16, #tpu.memory_space<vmem>>, vector<2x64xbf16>
    tpu.vector_store %arg16[%c0_264, %c128], %256 {strides = array<i32>} : memref<2x3136xbf16, #tpu.memory_space<vmem>>, vector<2x64xbf16>,
    %c0_265 = arith.constant 0 : index
    %c3_266 = arith.constant 3 : index
    %c0_267 = arith.constant 0 : index
    %258 = vector.load %arg15[%c0_265, %c3_266, %c0_267] : memref<2x73x64xbf16, #tpu.memory_space<vmem>>, vector<2x1x64xbf16>
    %259 = vector.shape_cast %258 : vector<2x1x64xbf16> to vector<2x64xbf16>
    %c0_268 = arith.constant 0 : index
    %c192 = arith.constant 192 : index
    %260 = vector.load %arg16[%c0_268, %c192] : memref<2x3136xbf16, #tpu.memory_space<vmem>>, vector<2x64xbf16>
    tpu.vector_store %arg16[%c0_268, %c192], %259 {strides = array<i32>} : memref<2x3136xbf16, #tpu.memory_space<vmem>>, vector<2x64xbf16>,
    %c0_269 = arith.constant 0 : index
    %c4_270 = arith.constant 4 : index
    %c0_271 = arith.constant 0 : index
    %261 = vector.load %arg15[%c0_269, %c4_270, %c0_271] : memref<2x73x64xbf16, #tpu.memory_space<vmem>>, vector<2x1x64xbf16>
    %262 = vector.shape_cast %261 : vector<2x1x64xbf16> to vector<2x64xbf16>
    %c0_272 = arith.constant 0 : index
    %c256 = arith.constant 256 : index
    %263 = vector.load %arg16[%c0_272, %c256] : memref<2x3136xbf16, #tpu.memory_space<vmem>>, vector<2x64xbf16>
    tpu.vector_store %arg16[%c0_272, %c256], %262 {strides = array<i32>} : memref<2x3136xbf16, #tpu.memory_space<vmem>>, vector<2x64xbf16>,
    %c0_273 = arith.constant 0 : index
    %c5_274 = arith.constant 5 : index
    %c0_275 = arith.constant 0 : index
    %264 = vector.load %arg15[%c0_273, %c5_274, %c0_275] : memref<2x73x64xbf16, #tpu.memory_space<vmem>>, vector<2x1x64xbf16>
    %265 = vector.shape_cast %264 : vector<2x1x64xbf16> to vector<2x64xbf16>
    %c0_276 = arith.constant 0 : index
    %c320 = arith.constant 320 : index
    %266 = vector.load %arg16[%c0_276, %c320] : memref<2x3136xbf16, #tpu.memory_space<vmem>>, vector<2x64xbf16>
    tpu.vector_store %arg16[%c0_276, %c320], %265 {strides = array<i32>} : memref<2x3136xbf16, #tpu.memory_space<vmem>>, vector<2x64xbf16>,
    %c0_277 = arith.constant 0 : index
    %c6_278 = arith.constant 6 : index
    %c0_279 = arith.constant 0 : index
    %267 = vector.load %arg15[%c0_277, %c6_278, %c0_279] : memref<2x73x64xbf16, #tpu.memory_space<vmem>>, vector<2x1x64xbf16>
    %268 = vector.shape_cast %267 : vector<2x1x64xbf16> to vector<2x64xbf16>
    %c0_280 = arith.constant 0 : index
    %c384 = arith.constant 384 : index
    %269 = vector.load %arg16[%c0_280, %c384] : memref<2x3136xbf16, #tpu.memory_space<vmem>>, vector<2x64xbf16>
    tpu.vector_store %arg16[%c0_280, %c384], %268 {strides = array<i32>} : memref<2x3136xbf16, #tpu.memory_space<vmem>>, vector<2x64xbf16>,
    %c0_281 = arith.constant 0 : index
    %c11_282 = arith.constant 11 : index
    %c0_283 = arith.constant 0 : index
    %270 = vector.load %arg15[%c0_281, %c11_282, %c0_283] : memref<2x73x64xbf16, #tpu.memory_space<vmem>>, vector<2x1x64xbf16>
    %271 = vector.shape_cast %270 : vector<2x1x64xbf16> to vector<2x64xbf16>
    %c0_284 = arith.constant 0 : index
    %c448 = arith.constant 448 : index
    %272 = vector.load %arg16[%c0_284, %c448] : memref<2x3136xbf16, #tpu.memory_space<vmem>>, vector<2x64xbf16>
    tpu.vector_store %arg16[%c0_284, %c448], %271 {strides = array<i32>} : memref<2x3136xbf16, #tpu.memory_space<vmem>>, vector<2x64xbf16>,
    %c0_285 = arith.constant 0 : index
    %c12_286 = arith.constant 12 : index
    %c0_287 = arith.constant 0 : index
    %273 = vector.load %arg15[%c0_285, %c12_286, %c0_287] : memref<2x73x64xbf16, #tpu.memory_space<vmem>>, vector<2x1x64xbf16>
    %274 = vector.shape_cast %273 : vector<2x1x64xbf16> to vector<2x64xbf16>
    %c0_288 = arith.constant 0 : index
    %c512 = arith.constant 512 : index
    %275 = vector.load %arg16[%c0_288, %c512] : memref<2x3136xbf16, #tpu.memory_space<vmem>>, vector<2x64xbf16>
    tpu.vector_store %arg16[%c0_288, %c512], %274 {strides = array<i32>} : memref<2x3136xbf16, #tpu.memory_space<vmem>>, vector<2x64xbf16>,
    %c0_289 = arith.constant 0 : index
    %c13_290 = arith.constant 13 : index
    %c0_291 = arith.constant 0 : index
    %276 = vector.load %arg15[%c0_289, %c13_290, %c0_291] : memref<2x73x64xbf16, #tpu.memory_space<vmem>>, vector<2x1x64xbf16>
    %277 = vector.shape_cast %276 : vector<2x1x64xbf16> to vector<2x64xbf16>
    %c0_292 = arith.constant 0 : index
    %c576 = arith.constant 576 : index
    %278 = vector.load %arg16[%c0_292, %c576] : memref<2x3136xbf16, #tpu.memory_space<vmem>>, vector<2x64xbf16>
    tpu.vector_store %arg16[%c0_292, %c576], %277 {strides = array<i32>} : memref<2x3136xbf16, #tpu.memory_space<vmem>>, vector<2x64xbf16>,
    %c0_293 = arith.constant 0 : index
    %c14 = arith.constant 14 : index
    %c0_294 = arith.constant 0 : index
    %279 = vector.load %arg15[%c0_293, %c14, %c0_294] : memref<2x73x64xbf16, #tpu.memory_space<vmem>>, vector<2x1x64xbf16>
    %280 = vector.shape_cast %279 : vector<2x1x64xbf16> to vector<2x64xbf16>
    %c0_295 = arith.constant 0 : index
    %c640 = arith.constant 640 : index
    %281 = vector.load %arg16[%c0_295, %c640] : memref<2x3136xbf16, #tpu.memory_space<vmem>>, vector<2x64xbf16>
    tpu.vector_store %arg16[%c0_295, %c640], %280 {strides = array<i32>} : memref<2x3136xbf16, #tpu.memory_space<vmem>>, vector<2x64xbf16>,
    %c0_296 = arith.constant 0 : index
    %c15 = arith.constant 15 : index
    %c0_297 = arith.constant 0 : index
    %282 = vector.load %arg15[%c0_296, %c15, %c0_297] : memref<2x73x64xbf16, #tpu.memory_space<vmem>>, vector<2x1x64xbf16>
    %283 = vector.shape_cast %282 : vector<2x1x64xbf16> to vector<2x64xbf16>
    %c0_298 = arith.constant 0 : index
    %c704 = arith.constant 704 : index
    %284 = vector.load %arg16[%c0_298, %c704] : memref<2x3136xbf16, #tpu.memory_space<vmem>>, vector<2x64xbf16>
    tpu.vector_store %arg16[%c0_298, %c704], %283 {strides = array<i32>} : memref<2x3136xbf16, #tpu.memory_space<vmem>>, vector<2x64xbf16>,
    %c0_299 = arith.constant 0 : index
    %c16 = arith.constant 16 : index
    %c0_300 = arith.constant 0 : index
    %285 = vector.load %arg15[%c0_299, %c16, %c0_300] : memref<2x73x64xbf16, #tpu.memory_space<vmem>>, vector<2x1x64xbf16>
    %286 = vector.shape_cast %285 : vector<2x1x64xbf16> to vector<2x64xbf16>
    %c0_301 = arith.constant 0 : index
    %c768 = arith.constant 768 : index
    %287 = vector.load %arg16[%c0_301, %c768] : memref<2x3136xbf16, #tpu.memory_space<vmem>>, vector<2x64xbf16>
    tpu.vector_store %arg16[%c0_301, %c768], %286 {strides = array<i32>} : memref<2x3136xbf16, #tpu.memory_space<vmem>>, vector<2x64xbf16>,
    %c0_302 = arith.constant 0 : index
    %c17 = arith.constant 17 : index
    %c0_303 = arith.constant 0 : index
    %288 = vector.load %arg15[%c0_302, %c17, %c0_303] : memref<2x73x64xbf16, #tpu.memory_space<vmem>>, vector<2x1x64xbf16>
    %289 = vector.shape_cast %288 : vector<2x1x64xbf16> to vector<2x64xbf16>
    %c0_304 = arith.constant 0 : index
    %c832 = arith.constant 832 : index
    %290 = vector.load %arg16[%c0_304, %c832] : memref<2x3136xbf16, #tpu.memory_space<vmem>>, vector<2x64xbf16>
    tpu.vector_store %arg16[%c0_304, %c832], %289 {strides = array<i32>} : memref<2x3136xbf16, #tpu.memory_space<vmem>>, vector<2x64xbf16>,
    %c0_305 = arith.constant 0 : index
    %c22_306 = arith.constant 22 : index
    %c0_307 = arith.constant 0 : index
    %291 = vector.load %arg15[%c0_305, %c22_306, %c0_307] : memref<2x73x64xbf16, #tpu.memory_space<vmem>>, vector<2x1x64xbf16>
    %292 = vector.shape_cast %291 : vector<2x1x64xbf16> to vector<2x64xbf16>
    %c0_308 = arith.constant 0 : index
    %c896 = arith.constant 896 : index
    %293 = vector.load %arg16[%c0_308, %c896] : memref<2x3136xbf16, #tpu.memory_space<vmem>>, vector<2x64xbf16>
    tpu.vector_store %arg16[%c0_308, %c896], %292 {strides = array<i32>} : memref<2x3136xbf16, #tpu.memory_space<vmem>>, vector<2x64xbf16>,
    %c0_309 = arith.constant 0 : index
    %c23_310 = arith.constant 23 : index
    %c0_311 = arith.constant 0 : index
    %294 = vector.load %arg15[%c0_309, %c23_310, %c0_311] : memref<2x73x64xbf16, #tpu.memory_space<vmem>>, vector<2x1x64xbf16>
    %295 = vector.shape_cast %294 : vector<2x1x64xbf16> to vector<2x64xbf16>
    %c0_312 = arith.constant 0 : index
    %c960 = arith.constant 960 : index
    %296 = vector.load %arg16[%c0_312, %c960] : memref<2x3136xbf16, #tpu.memory_space<vmem>>, vector<2x64xbf16>
    tpu.vector_store %arg16[%c0_312, %c960], %295 {strides = array<i32>} : memref<2x3136xbf16, #tpu.memory_space<vmem>>, vector<2x64xbf16>,
    %c0_313 = arith.constant 0 : index
    %c24_314 = arith.constant 24 : index
    %c0_315 = arith.constant 0 : index
    %297 = vector.load %arg15[%c0_313, %c24_314, %c0_315] : memref<2x73x64xbf16, #tpu.memory_space<vmem>>, vector<2x1x64xbf16>
    %298 = vector.shape_cast %297 : vector<2x1x64xbf16> to vector<2x64xbf16>
    %c0_316 = arith.constant 0 : index
    %c1024 = arith.constant 1024 : index
    %299 = vector.load %arg16[%c0_316, %c1024] : memref<2x3136xbf16, #tpu.memory_space<vmem>>, vector<2x64xbf16>
    tpu.vector_store %arg16[%c0_316, %c1024], %298 {strides = array<i32>} : memref<2x3136xbf16, #tpu.memory_space<vmem>>, vector<2x64xbf16>,
    %c0_317 = arith.constant 0 : index
    %c25 = arith.constant 25 : index
    %c0_318 = arith.constant 0 : index
    %300 = vector.load %arg15[%c0_317, %c25, %c0_318] : memref<2x73x64xbf16, #tpu.memory_space<vmem>>, vector<2x1x64xbf16>
    %301 = vector.shape_cast %300 : vector<2x1x64xbf16> to vector<2x64xbf16>
    %c0_319 = arith.constant 0 : index
    %c1088 = arith.constant 1088 : index
    %302 = vector.load %arg16[%c0_319, %c1088] : memref<2x3136xbf16, #tpu.memory_space<vmem>>, vector<2x64xbf16>
    tpu.vector_store %arg16[%c0_319, %c1088], %301 {strides = array<i32>} : memref<2x3136xbf16, #tpu.memory_space<vmem>>, vector<2x64xbf16>,
    %c0_320 = arith.constant 0 : index
    %c26 = arith.constant 26 : index
    %c0_321 = arith.constant 0 : index
    %303 = vector.load %arg15[%c0_320, %c26, %c0_321] : memref<2x73x64xbf16, #tpu.memory_space<vmem>>, vector<2x1x64xbf16>
    %304 = vector.shape_cast %303 : vector<2x1x64xbf16> to vector<2x64xbf16>
    %c0_322 = arith.constant 0 : index
    %c1152 = arith.constant 1152 : index
    %305 = vector.load %arg16[%c0_322, %c1152] : memref<2x3136xbf16, #tpu.memory_space<vmem>>, vector<2x64xbf16>
    tpu.vector_store %arg16[%c0_322, %c1152], %304 {strides = array<i32>} : memref<2x3136xbf16, #tpu.memory_space<vmem>>, vector<2x64xbf16>,
    %c0_323 = arith.constant 0 : index
    %c27 = arith.constant 27 : index
    %c0_324 = arith.constant 0 : index
    %306 = vector.load %arg15[%c0_323, %c27, %c0_324] : memref<2x73x64xbf16, #tpu.memory_space<vmem>>, vector<2x1x64xbf16>
    %307 = vector.shape_cast %306 : vector<2x1x64xbf16> to vector<2x64xbf16>
    %c0_325 = arith.constant 0 : index
    %c1216 = arith.constant 1216 : index
    %308 = vector.load %arg16[%c0_325, %c1216] : memref<2x3136xbf16, #tpu.memory_space<vmem>>, vector<2x64xbf16>
    tpu.vector_store %arg16[%c0_325, %c1216], %307 {strides = array<i32>} : memref<2x3136xbf16, #tpu.memory_space<vmem>>, vector<2x64xbf16>,
    %c0_326 = arith.constant 0 : index
    %c28 = arith.constant 28 : index
    %c0_327 = arith.constant 0 : index
    %309 = vector.load %arg15[%c0_326, %c28, %c0_327] : memref<2x73x64xbf16, #tpu.memory_space<vmem>>, vector<2x1x64xbf16>
    %310 = vector.shape_cast %309 : vector<2x1x64xbf16> to vector<2x64xbf16>
    %c0_328 = arith.constant 0 : index
    %c1280 = arith.constant 1280 : index
    %311 = vector.load %arg16[%c0_328, %c1280] : memref<2x3136xbf16, #tpu.memory_space<vmem>>, vector<2x64xbf16>
    tpu.vector_store %arg16[%c0_328, %c1280], %310 {strides = array<i32>} : memref<2x3136xbf16, #tpu.memory_space<vmem>>, vector<2x64xbf16>,
    %c0_329 = arith.constant 0 : index
    %c33 = arith.constant 33 : index
    %c0_330 = arith.constant 0 : index
    %312 = vector.load %arg15[%c0_329, %c33, %c0_330] : memref<2x73x64xbf16, #tpu.memory_space<vmem>>, vector<2x1x64xbf16>
    %313 = vector.shape_cast %312 : vector<2x1x64xbf16> to vector<2x64xbf16>
    %c0_331 = arith.constant 0 : index
    %c1344 = arith.constant 1344 : index
    %314 = vector.load %arg16[%c0_331, %c1344] : memref<2x3136xbf16, #tpu.memory_space<vmem>>, vector<2x64xbf16>
    tpu.vector_store %arg16[%c0_331, %c1344], %313 {strides = array<i32>} : memref<2x3136xbf16, #tpu.memory_space<vmem>>, vector<2x64xbf16>,
    %c0_332 = arith.constant 0 : index
    %c34 = arith.constant 34 : index
    %c0_333 = arith.constant 0 : index
    %315 = vector.load %arg15[%c0_332, %c34, %c0_333] : memref<2x73x64xbf16, #tpu.memory_space<vmem>>, vector<2x1x64xbf16>
    %316 = vector.shape_cast %315 : vector<2x1x64xbf16> to vector<2x64xbf16>
    %c0_334 = arith.constant 0 : index
    %c1408 = arith.constant 1408 : index
    %317 = vector.load %arg16[%c0_334, %c1408] : memref<2x3136xbf16, #tpu.memory_space<vmem>>, vector<2x64xbf16>
    tpu.vector_store %arg16[%c0_334, %c1408], %316 {strides = array<i32>} : memref<2x3136xbf16, #tpu.memory_space<vmem>>, vector<2x64xbf16>,
    %c0_335 = arith.constant 0 : index
    %c35 = arith.constant 35 : index
    %c0_336 = arith.constant 0 : index
    %318 = vector.load %arg15[%c0_335, %c35, %c0_336] : memref<2x73x64xbf16, #tpu.memory_space<vmem>>, vector<2x1x64xbf16>
    %319 = vector.shape_cast %318 : vector<2x1x64xbf16> to vector<2x64xbf16>
    %c0_337 = arith.constant 0 : index
    %c1472 = arith.constant 1472 : index
    %320 = vector.load %arg16[%c0_337, %c1472] : memref<2x3136xbf16, #tpu.memory_space<vmem>>, vector<2x64xbf16>
    tpu.vector_store %arg16[%c0_337, %c1472], %319 {strides = array<i32>} : memref<2x3136xbf16, #tpu.memory_space<vmem>>, vector<2x64xbf16>,
    %c0_338 = arith.constant 0 : index
    %c36 = arith.constant 36 : index
    %c0_339 = arith.constant 0 : index
    %321 = vector.load %arg15[%c0_338, %c36, %c0_339] : memref<2x73x64xbf16, #tpu.memory_space<vmem>>, vector<2x1x64xbf16>
    %322 = vector.shape_cast %321 : vector<2x1x64xbf16> to vector<2x64xbf16>
    %c0_340 = arith.constant 0 : index
    %c1536 = arith.constant 1536 : index
    %323 = vector.load %arg16[%c0_340, %c1536] : memref<2x3136xbf16, #tpu.memory_space<vmem>>, vector<2x64xbf16>
    tpu.vector_store %arg16[%c0_340, %c1536], %322 {strides = array<i32>} : memref<2x3136xbf16, #tpu.memory_space<vmem>>, vector<2x64xbf16>,
    %c0_341 = arith.constant 0 : index
    %c37 = arith.constant 37 : index
    %c0_342 = arith.constant 0 : index
    %324 = vector.load %arg15[%c0_341, %c37, %c0_342] : memref<2x73x64xbf16, #tpu.memory_space<vmem>>, vector<2x1x64xbf16>
    %325 = vector.shape_cast %324 : vector<2x1x64xbf16> to vector<2x64xbf16>
    %c0_343 = arith.constant 0 : index
    %c1600 = arith.constant 1600 : index
    %326 = vector.load %arg16[%c0_343, %c1600] : memref<2x3136xbf16, #tpu.memory_space<vmem>>, vector<2x64xbf16>
    tpu.vector_store %arg16[%c0_343, %c1600], %325 {strides = array<i32>} : memref<2x3136xbf16, #tpu.memory_space<vmem>>, vector<2x64xbf16>,
    %c0_344 = arith.constant 0 : index
    %c38 = arith.constant 38 : index
    %c0_345 = arith.constant 0 : index
    %327 = vector.load %arg15[%c0_344, %c38, %c0_345] : memref<2x73x64xbf16, #tpu.memory_space<vmem>>, vector<2x1x64xbf16>
    %328 = vector.shape_cast %327 : vector<2x1x64xbf16> to vector<2x64xbf16>
    %c0_346 = arith.constant 0 : index
    %c1664 = arith.constant 1664 : index
    %329 = vector.load %arg16[%c0_346, %c1664] : memref<2x3136xbf16, #tpu.memory_space<vmem>>, vector<2x64xbf16>
    tpu.vector_store %arg16[%c0_346, %c1664], %328 {strides = array<i32>} : memref<2x3136xbf16, #tpu.memory_space<vmem>>, vector<2x64xbf16>,
    %c0_347 = arith.constant 0 : index
    %c39 = arith.constant 39 : index
    %c0_348 = arith.constant 0 : index
    %330 = vector.load %arg15[%c0_347, %c39, %c0_348] : memref<2x73x64xbf16, #tpu.memory_space<vmem>>, vector<2x1x64xbf16>
    %331 = vector.shape_cast %330 : vector<2x1x64xbf16> to vector<2x64xbf16>
    %c0_349 = arith.constant 0 : index
    %c1728 = arith.constant 1728 : index
    %332 = vector.load %arg16[%c0_349, %c1728] : memref<2x3136xbf16, #tpu.memory_space<vmem>>, vector<2x64xbf16>
    tpu.vector_store %arg16[%c0_349, %c1728], %331 {strides = array<i32>} : memref<2x3136xbf16, #tpu.memory_space<vmem>>, vector<2x64xbf16>,
    %c0_350 = arith.constant 0 : index
    %c44 = arith.constant 44 : index
    %c0_351 = arith.constant 0 : index
    %333 = vector.load %arg15[%c0_350, %c44, %c0_351] : memref<2x73x64xbf16, #tpu.memory_space<vmem>>, vector<2x1x64xbf16>
    %334 = vector.shape_cast %333 : vector<2x1x64xbf16> to vector<2x64xbf16>
    %c0_352 = arith.constant 0 : index
    %c1792 = arith.constant 1792 : index
    %335 = vector.load %arg16[%c0_352, %c1792] : memref<2x3136xbf16, #tpu.memory_space<vmem>>, vector<2x64xbf16>
    tpu.vector_store %arg16[%c0_352, %c1792], %334 {strides = array<i32>} : memref<2x3136xbf16, #tpu.memory_space<vmem>>, vector<2x64xbf16>,
    %c0_353 = arith.constant 0 : index
    %c45 = arith.constant 45 : index
    %c0_354 = arith.constant 0 : index
    %336 = vector.load %arg15[%c0_353, %c45, %c0_354] : memref<2x73x64xbf16, #tpu.memory_space<vmem>>, vector<2x1x64xbf16>
    %337 = vector.shape_cast %336 : vector<2x1x64xbf16> to vector<2x64xbf16>
    %c0_355 = arith.constant 0 : index
    %c1856 = arith.constant 1856 : index
    %338 = vector.load %arg16[%c0_355, %c1856] : memref<2x3136xbf16, #tpu.memory_space<vmem>>, vector<2x64xbf16>
    tpu.vector_store %arg16[%c0_355, %c1856], %337 {strides = array<i32>} : memref<2x3136xbf16, #tpu.memory_space<vmem>>, vector<2x64xbf16>,
    %c0_356 = arith.constant 0 : index
    %c46 = arith.constant 46 : index
    %c0_357 = arith.constant 0 : index
    %339 = vector.load %arg15[%c0_356, %c46, %c0_357] : memref<2x73x64xbf16, #tpu.memory_space<vmem>>, vector<2x1x64xbf16>
    %340 = vector.shape_cast %339 : vector<2x1x64xbf16> to vector<2x64xbf16>
    %c0_358 = arith.constant 0 : index
    %c1920 = arith.constant 1920 : index
    %341 = vector.load %arg16[%c0_358, %c1920] : memref<2x3136xbf16, #tpu.memory_space<vmem>>, vector<2x64xbf16>
    tpu.vector_store %arg16[%c0_358, %c1920], %340 {strides = array<i32>} : memref<2x3136xbf16, #tpu.memory_space<vmem>>, vector<2x64xbf16>,
    %c0_359 = arith.constant 0 : index
    %c47 = arith.constant 47 : index
    %c0_360 = arith.constant 0 : index
    %342 = vector.load %arg15[%c0_359, %c47, %c0_360] : memref<2x73x64xbf16, #tpu.memory_space<vmem>>, vector<2x1x64xbf16>
    %343 = vector.shape_cast %342 : vector<2x1x64xbf16> to vector<2x64xbf16>
    %c0_361 = arith.constant 0 : index
    %c1984 = arith.constant 1984 : index
    %344 = vector.load %arg16[%c0_361, %c1984] : memref<2x3136xbf16, #tpu.memory_space<vmem>>, vector<2x64xbf16>
    tpu.vector_store %arg16[%c0_361, %c1984], %343 {strides = array<i32>} : memref<2x3136xbf16, #tpu.memory_space<vmem>>, vector<2x64xbf16>,
    %c0_362 = arith.constant 0 : index
    %c48 = arith.constant 48 : index
    %c0_363 = arith.constant 0 : index
    %345 = vector.load %arg15[%c0_362, %c48, %c0_363] : memref<2x73x64xbf16, #tpu.memory_space<vmem>>, vector<2x1x64xbf16>
    %346 = vector.shape_cast %345 : vector<2x1x64xbf16> to vector<2x64xbf16>
    %c0_364 = arith.constant 0 : index
    %c2048 = arith.constant 2048 : index
    %347 = vector.load %arg16[%c0_364, %c2048] : memref<2x3136xbf16, #tpu.memory_space<vmem>>, vector<2x64xbf16>
    tpu.vector_store %arg16[%c0_364, %c2048], %346 {strides = array<i32>} : memref<2x3136xbf16, #tpu.memory_space<vmem>>, vector<2x64xbf16>,
    %c0_365 = arith.constant 0 : index
    %c49 = arith.constant 49 : index
    %c0_366 = arith.constant 0 : index
    %348 = vector.load %arg15[%c0_365, %c49, %c0_366] : memref<2x73x64xbf16, #tpu.memory_space<vmem>>, vector<2x1x64xbf16>
    %349 = vector.shape_cast %348 : vector<2x1x64xbf16> to vector<2x64xbf16>
    %c0_367 = arith.constant 0 : index
    %c2112 = arith.constant 2112 : index
    %350 = vector.load %arg16[%c0_367, %c2112] : memref<2x3136xbf16, #tpu.memory_space<vmem>>, vector<2x64xbf16>
    tpu.vector_store %arg16[%c0_367, %c2112], %349 {strides = array<i32>} : memref<2x3136xbf16, #tpu.memory_space<vmem>>, vector<2x64xbf16>,
    %c0_368 = arith.constant 0 : index
    %c50 = arith.constant 50 : index
    %c0_369 = arith.constant 0 : index
    %351 = vector.load %arg15[%c0_368, %c50, %c0_369] : memref<2x73x64xbf16, #tpu.memory_space<vmem>>, vector<2x1x64xbf16>
    %352 = vector.shape_cast %351 : vector<2x1x64xbf16> to vector<2x64xbf16>
    %c0_370 = arith.constant 0 : index
    %c2176 = arith.constant 2176 : index
    %353 = vector.load %arg16[%c0_370, %c2176] : memref<2x3136xbf16, #tpu.memory_space<vmem>>, vector<2x64xbf16>
    tpu.vector_store %arg16[%c0_370, %c2176], %352 {strides = array<i32>} : memref<2x3136xbf16, #tpu.memory_space<vmem>>, vector<2x64xbf16>,
    %c0_371 = arith.constant 0 : index
    %c55 = arith.constant 55 : index
    %c0_372 = arith.constant 0 : index
    %354 = vector.load %arg15[%c0_371, %c55, %c0_372] : memref<2x73x64xbf16, #tpu.memory_space<vmem>>, vector<2x1x64xbf16>
    %355 = vector.shape_cast %354 : vector<2x1x64xbf16> to vector<2x64xbf16>
    %c0_373 = arith.constant 0 : index
    %c2240 = arith.constant 2240 : index
    %356 = vector.load %arg16[%c0_373, %c2240] : memref<2x3136xbf16, #tpu.memory_space<vmem>>, vector<2x64xbf16>
    tpu.vector_store %arg16[%c0_373, %c2240], %355 {strides = array<i32>} : memref<2x3136xbf16, #tpu.memory_space<vmem>>, vector<2x64xbf16>,
    %c0_374 = arith.constant 0 : index
    %c56 = arith.constant 56 : index
    %c0_375 = arith.constant 0 : index
    %357 = vector.load %arg15[%c0_374, %c56, %c0_375] : memref<2x73x64xbf16, #tpu.memory_space<vmem>>, vector<2x1x64xbf16>
    %358 = vector.shape_cast %357 : vector<2x1x64xbf16> to vector<2x64xbf16>
    %c0_376 = arith.constant 0 : index
    %c2304 = arith.constant 2304 : index
    %359 = vector.load %arg16[%c0_376, %c2304] : memref<2x3136xbf16, #tpu.memory_space<vmem>>, vector<2x64xbf16>
    tpu.vector_store %arg16[%c0_376, %c2304], %358 {strides = array<i32>} : memref<2x3136xbf16, #tpu.memory_space<vmem>>, vector<2x64xbf16>,
    %c0_377 = arith.constant 0 : index
    %c57 = arith.constant 57 : index
    %c0_378 = arith.constant 0 : index
    %360 = vector.load %arg15[%c0_377, %c57, %c0_378] : memref<2x73x64xbf16, #tpu.memory_space<vmem>>, vector<2x1x64xbf16>
    %361 = vector.shape_cast %360 : vector<2x1x64xbf16> to vector<2x64xbf16>
    %c0_379 = arith.constant 0 : index
    %c2368 = arith.constant 2368 : index
    %362 = vector.load %arg16[%c0_379, %c2368] : memref<2x3136xbf16, #tpu.memory_space<vmem>>, vector<2x64xbf16>
    tpu.vector_store %arg16[%c0_379, %c2368], %361 {strides = array<i32>} : memref<2x3136xbf16, #tpu.memory_space<vmem>>, vector<2x64xbf16>,
    %c0_380 = arith.constant 0 : index
    %c58 = arith.constant 58 : index
    %c0_381 = arith.constant 0 : index
    %363 = vector.load %arg15[%c0_380, %c58, %c0_381] : memref<2x73x64xbf16, #tpu.memory_space<vmem>>, vector<2x1x64xbf16>
    %364 = vector.shape_cast %363 : vector<2x1x64xbf16> to vector<2x64xbf16>
    %c0_382 = arith.constant 0 : index
    %c2432 = arith.constant 2432 : index
    %365 = vector.load %arg16[%c0_382, %c2432] : memref<2x3136xbf16, #tpu.memory_space<vmem>>, vector<2x64xbf16>
    tpu.vector_store %arg16[%c0_382, %c2432], %364 {strides = array<i32>} : memref<2x3136xbf16, #tpu.memory_space<vmem>>, vector<2x64xbf16>,
    %c0_383 = arith.constant 0 : index
    %c59 = arith.constant 59 : index
    %c0_384 = arith.constant 0 : index
    %366 = vector.load %arg15[%c0_383, %c59, %c0_384] : memref<2x73x64xbf16, #tpu.memory_space<vmem>>, vector<2x1x64xbf16>
    %367 = vector.shape_cast %366 : vector<2x1x64xbf16> to vector<2x64xbf16>
    %c0_385 = arith.constant 0 : index
    %c2496 = arith.constant 2496 : index
    %368 = vector.load %arg16[%c0_385, %c2496] : memref<2x3136xbf16, #tpu.memory_space<vmem>>, vector<2x64xbf16>
    tpu.vector_store %arg16[%c0_385, %c2496], %367 {strides = array<i32>} : memref<2x3136xbf16, #tpu.memory_space<vmem>>, vector<2x64xbf16>,
    %c0_386 = arith.constant 0 : index
    %c60 = arith.constant 60 : index
    %c0_387 = arith.constant 0 : index
    %369 = vector.load %arg15[%c0_386, %c60, %c0_387] : memref<2x73x64xbf16, #tpu.memory_space<vmem>>, vector<2x1x64xbf16>
    %370 = vector.shape_cast %369 : vector<2x1x64xbf16> to vector<2x64xbf16>
    %c0_388 = arith.constant 0 : index
    %c2560 = arith.constant 2560 : index
    %371 = vector.load %arg16[%c0_388, %c2560] : memref<2x3136xbf16, #tpu.memory_space<vmem>>, vector<2x64xbf16>
    tpu.vector_store %arg16[%c0_388, %c2560], %370 {strides = array<i32>} : memref<2x3136xbf16, #tpu.memory_space<vmem>>, vector<2x64xbf16>,
    %c0_389 = arith.constant 0 : index
    %c61 = arith.constant 61 : index
    %c0_390 = arith.constant 0 : index
    %372 = vector.load %arg15[%c0_389, %c61, %c0_390] : memref<2x73x64xbf16, #tpu.memory_space<vmem>>, vector<2x1x64xbf16>
    %373 = vector.shape_cast %372 : vector<2x1x64xbf16> to vector<2x64xbf16>
    %c0_391 = arith.constant 0 : index
    %c2624 = arith.constant 2624 : index
    %374 = vector.load %arg16[%c0_391, %c2624] : memref<2x3136xbf16, #tpu.memory_space<vmem>>, vector<2x64xbf16>
    tpu.vector_store %arg16[%c0_391, %c2624], %373 {strides = array<i32>} : memref<2x3136xbf16, #tpu.memory_space<vmem>>, vector<2x64xbf16>,
    %c0_392 = arith.constant 0 : index
    %c66 = arith.constant 66 : index
    %c0_393 = arith.constant 0 : index
    %375 = vector.load %arg15[%c0_392, %c66, %c0_393] : memref<2x73x64xbf16, #tpu.memory_space<vmem>>, vector<2x1x64xbf16>
    %376 = vector.shape_cast %375 : vector<2x1x64xbf16> to vector<2x64xbf16>
    %c0_394 = arith.constant 0 : index
    %c2688 = arith.constant 2688 : index
    %377 = vector.load %arg16[%c0_394, %c2688] : memref<2x3136xbf16, #tpu.memory_space<vmem>>, vector<2x64xbf16>
    tpu.vector_store %arg16[%c0_394, %c2688], %376 {strides = array<i32>} : memref<2x3136xbf16, #tpu.memory_space<vmem>>, vector<2x64xbf16>,
    %c0_395 = arith.constant 0 : index
    %c67 = arith.constant 67 : index
    %c0_396 = arith.constant 0 : index
    %378 = vector.load %arg15[%c0_395, %c67, %c0_396] : memref<2x73x64xbf16, #tpu.memory_space<vmem>>, vector<2x1x64xbf16>
    %379 = vector.shape_cast %378 : vector<2x1x64xbf16> to vector<2x64xbf16>
    %c0_397 = arith.constant 0 : index
    %c2752 = arith.constant 2752 : index
    %380 = vector.load %arg16[%c0_397, %c2752] : memref<2x3136xbf16, #tpu.memory_space<vmem>>, vector<2x64xbf16>
    tpu.vector_store %arg16[%c0_397, %c2752], %379 {strides = array<i32>} : memref<2x3136xbf16, #tpu.memory_space<vmem>>, vector<2x64xbf16>,
    %c0_398 = arith.constant 0 : index
    %c68 = arith.constant 68 : index
    %c0_399 = arith.constant 0 : index
    %381 = vector.load %arg15[%c0_398, %c68, %c0_399] : memref<2x73x64xbf16, #tpu.memory_space<vmem>>, vector<2x1x64xbf16>
    %382 = vector.shape_cast %381 : vector<2x1x64xbf16> to vector<2x64xbf16>
    %c0_400 = arith.constant 0 : index
    %c2816 = arith.constant 2816 : index
    %383 = vector.load %arg16[%c0_400, %c2816] : memref<2x3136xbf16, #tpu.memory_space<vmem>>, vector<2x64xbf16>
    tpu.vector_store %arg16[%c0_400, %c2816], %382 {strides = array<i32>} : memref<2x3136xbf16, #tpu.memory_space<vmem>>, vector<2x64xbf16>,
    %c0_401 = arith.constant 0 : index
    %c69 = arith.constant 69 : index
    %c0_402 = arith.constant 0 : index
    %384 = vector.load %arg15[%c0_401, %c69, %c0_402] : memref<2x73x64xbf16, #tpu.memory_space<vmem>>, vector<2x1x64xbf16>
    %385 = vector.shape_cast %384 : vector<2x1x64xbf16> to vector<2x64xbf16>
    %c0_403 = arith.constant 0 : index
    %c2880 = arith.constant 2880 : index
    %386 = vector.load %arg16[%c0_403, %c2880] : memref<2x3136xbf16, #tpu.memory_space<vmem>>, vector<2x64xbf16>
    tpu.vector_store %arg16[%c0_403, %c2880], %385 {strides = array<i32>} : memref<2x3136xbf16, #tpu.memory_space<vmem>>, vector<2x64xbf16>,
    %c0_404 = arith.constant 0 : index
    %c70 = arith.constant 70 : index
    %c0_405 = arith.constant 0 : index
    %387 = vector.load %arg15[%c0_404, %c70, %c0_405] : memref<2x73x64xbf16, #tpu.memory_space<vmem>>, vector<2x1x64xbf16>
    %388 = vector.shape_cast %387 : vector<2x1x64xbf16> to vector<2x64xbf16>
    %c0_406 = arith.constant 0 : index
    %c2944 = arith.constant 2944 : index
    %389 = vector.load %arg16[%c0_406, %c2944] : memref<2x3136xbf16, #tpu.memory_space<vmem>>, vector<2x64xbf16>
    tpu.vector_store %arg16[%c0_406, %c2944], %388 {strides = array<i32>} : memref<2x3136xbf16, #tpu.memory_space<vmem>>, vector<2x64xbf16>,
    %c0_407 = arith.constant 0 : index
    %c71 = arith.constant 71 : index
    %c0_408 = arith.constant 0 : index
    %390 = vector.load %arg15[%c0_407, %c71, %c0_408] : memref<2x73x64xbf16, #tpu.memory_space<vmem>>, vector<2x1x64xbf16>
    %391 = vector.shape_cast %390 : vector<2x1x64xbf16> to vector<2x64xbf16>
    %c0_409 = arith.constant 0 : index
    %c3008 = arith.constant 3008 : index
    %392 = vector.load %arg16[%c0_409, %c3008] : memref<2x3136xbf16, #tpu.memory_space<vmem>>, vector<2x64xbf16>
    tpu.vector_store %arg16[%c0_409, %c3008], %391 {strides = array<i32>} : memref<2x3136xbf16, #tpu.memory_space<vmem>>, vector<2x64xbf16>,
    %c0_410 = arith.constant 0 : index
    %c72 = arith.constant 72 : index
    %c0_411 = arith.constant 0 : index
    %393 = vector.load %arg15[%c0_410, %c72, %c0_411] : memref<2x73x64xbf16, #tpu.memory_space<vmem>>, vector<2x1x64xbf16>
    %394 = vector.shape_cast %393 : vector<2x1x64xbf16> to vector<2x64xbf16>
    %c0_412 = arith.constant 0 : index
    %c3072 = arith.constant 3072 : index
    %395 = vector.load %arg16[%c0_412, %c3072] : memref<2x3136xbf16, #tpu.memory_space<vmem>>, vector<2x64xbf16>
    tpu.vector_store %arg16[%c0_412, %c3072], %394 {strides = array<i32>} : memref<2x3136xbf16, #tpu.memory_space<vmem>>, vector<2x64xbf16>,
    %c0_413 = arith.constant 0 : index
    %c0_414 = arith.constant 0 : index
    %396 = vector.load %arg16[%c0_413, %c0_414] : memref<2x3136xbf16, #tpu.memory_space<vmem>>, vector<2x3136xbf16>
    %c0_415 = arith.constant 0 : index
    %c0_416 = arith.constant 0 : index
    %397 = vector.load %arg8[%c0_415, %c0_416] : memref<3136x512xbf16, #tpu.memory_space<vmem>>, vector<3136x512xbf16>
    %cst_417 = arith.constant dense<0.000000e+00> : vector<2x512xf32>
    %398 = tpu.matmul %396, %397, %cst_417 {dimension_numbers = #tpu.dot_dimension_numbers<[1], [0], [0], [1], [0, 0, 1, 1], [], []>} : vector<2x3136xbf16>, vector<3136x512xbf16>, vector<2x512xf32> -> vector<2x512xf32>
    %c0_418 = arith.constant 0 : index
    %c0_419 = arith.constant 0 : index
    %399 = vector.load %arg9[%c0_418, %c0_419] : memref<1x512xf32, #tpu.memory_space<vmem>>, vector<1x512xf32>
    %400 = vector.broadcast %399 : vector<1x512xf32> to vector<2x512xf32>
    %401 = arith.addf %398, %400 : vector<2x512xf32>
    %cst_420 = arith.constant 0.000000e+00 : f32
    %402 = vector.broadcast %cst_420 : f32 to vector<2x512xf32>
    %403 = arith.maximumf %401, %402 : vector<2x512xf32>
    %404 = arith.truncf %403 : vector<2x512xf32> to vector<2x512xbf16>
    %c0_421 = arith.constant 0 : index
    %c0_422 = arith.constant 0 : index
    %405 = vector.load %arg10[%c0_421, %c0_422] : memref<512x128xbf16, #tpu.memory_space<vmem>>, vector<512x128xbf16>
    %cst_423 = arith.constant dense<0.000000e+00> : vector<2x128xf32>
    %406 = tpu.matmul %404, %405, %cst_423 {dimension_numbers = #tpu.dot_dimension_numbers<[1], [0], [0], [1], [0, 0, 1, 1], [], []>} : vector<2x512xbf16>, vector<512x128xbf16>, vector<2x128xf32> -> vector<2x128xf32>
    %c0_424 = arith.constant 0 : index
    %c0_425 = arith.constant 0 : index
    %407 = vector.load %arg11[%c0_424, %c0_425] : memref<1x128xf32, #tpu.memory_space<vmem>>, vector<1x128xf32>
    %408 = vector.broadcast %407 : vector<1x128xf32> to vector<2x128xf32>
    %409 = arith.addf %406, %408 : vector<2x128xf32>
    %410 = vector.extract_strided_slice %409 {offsets = [0, 0], sizes = [2, 6], strides = [1, 1]} : vector<2x128xf32> to vector<2x6xf32>
    %411 = vector.extract_strided_slice %409 {offsets = [0, 6], sizes = [2, 1], strides = [1, 1]} : vector<2x128xf32> to vector<2x1xf32>
    %cst_426 = arith.constant dense<0.000000e+00> : vector<2xf32>
    %412 = vector.multi_reduction <add>, %410, %cst_426 [1] : vector<2x6xf32> to vector<2xf32>
    %413 = vector.shape_cast %412 : vector<2xf32> to vector<2x1xf32>
    %cst_427 = arith.constant 6.000000e+00 : f32
    %414 = vector.broadcast %cst_427 : f32 to vector<2x1xf32>
    %415 = arith.divf %413, %414 : vector<2x1xf32>
    %416 = arith.subf %411, %415 : vector<2x1xf32>
    %417 = vector.broadcast %416 : vector<2x1xf32> to vector<2x6xf32>
    %418 = arith.addf %410, %417 : vector<2x6xf32>
    %c0_428 = arith.constant 0 : index
    %c0_429 = arith.constant 0 : index
    %419 = vector.load %arg12[%c0_428, %c0_429] : memref<2x6xf32, #tpu.memory_space<vmem>>, vector<2x6xf32>
    tpu.vector_store %arg12[%c0_428, %c0_429], %418 {strides = array<i32>} : memref<2x6xf32, #tpu.memory_space<vmem>>, vector<2x6xf32>,
    return
  }
  func.func @transform_0(%arg0: i32) -> (i32, i32, i32) {
    %c0_i32 = arith.constant 0 : i32
    %c0_i32_0 = arith.constant 0 : i32
    %c0_i32_1 = arith.constant 0 : i32
    return %arg0, %c0_i32, %c0_i32_0 : i32, i32, i32
  }
  func.func @transform_1(%arg0: i32) -> (i32, i32, i32) {
    %c0_i32 = arith.constant 0 : i32
    %c0_i32_0 = arith.constant 0 : i32
    %c0_i32_1 = arith.constant 0 : i32
    %c0_i32_2 = arith.constant 0 : i32
    return %c0_i32, %c0_i32_0, %c0_i32_1 : i32, i32, i32
  }
  func.func @transform_2(%arg0: i32) -> (i32, i32) {
    %c0_i32 = arith.constant 0 : i32
    %c0_i32_0 = arith.constant 0 : i32
    %c0_i32_1 = arith.constant 0 : i32
    return %c0_i32, %c0_i32_0 : i32, i32
  }
  func.func @transform_3(%arg0: i32) -> (i32, i32, i32) {
    %c0_i32 = arith.constant 0 : i32
    %c0_i32_0 = arith.constant 0 : i32
    %c0_i32_1 = arith.constant 0 : i32
    %c0_i32_2 = arith.constant 0 : i32
    return %c0_i32, %c0_i32_0, %c0_i32_1 : i32, i32, i32
  }
  func.func @transform_4(%arg0: i32) -> (i32, i32) {
    %c0_i32 = arith.constant 0 : i32
    %c0_i32_0 = arith.constant 0 : i32
    %c0_i32_1 = arith.constant 0 : i32
    return %c0_i32, %c0_i32_0 : i32, i32
  }
  func.func @transform_5(%arg0: i32) -> (i32, i32, i32) {
    %c0_i32 = arith.constant 0 : i32
    %c0_i32_0 = arith.constant 0 : i32
    %c0_i32_1 = arith.constant 0 : i32
    %c0_i32_2 = arith.constant 0 : i32
    return %c0_i32, %c0_i32_0, %c0_i32_1 : i32, i32, i32
  }
  func.func @transform_6(%arg0: i32) -> (i32, i32) {
    %c0_i32 = arith.constant 0 : i32
    %c0_i32_0 = arith.constant 0 : i32
    %c0_i32_1 = arith.constant 0 : i32
    return %c0_i32, %c0_i32_0 : i32, i32
  }
  func.func @transform_7(%arg0: i32) -> (i32, i32) {
    %c0_i32 = arith.constant 0 : i32
    %c0_i32_0 = arith.constant 0 : i32
    %c0_i32_1 = arith.constant 0 : i32
    return %c0_i32, %c0_i32_0 : i32, i32
  }
  func.func @transform_8(%arg0: i32) -> (i32, i32) {
    %c0_i32 = arith.constant 0 : i32
    %c0_i32_0 = arith.constant 0 : i32
    %c0_i32_1 = arith.constant 0 : i32
    return %c0_i32, %c0_i32_0 : i32, i32
  }
  func.func @transform_9(%arg0: i32) -> (i32, i32) {
    %c0_i32 = arith.constant 0 : i32
    %c0_i32_0 = arith.constant 0 : i32
    %c0_i32_1 = arith.constant 0 : i32
    return %c0_i32, %c0_i32_0 : i32, i32
  }
  func.func @transform_10(%arg0: i32) -> (i32, i32) {
    %c0_i32 = arith.constant 0 : i32
    %c0_i32_0 = arith.constant 0 : i32
    %c0_i32_1 = arith.constant 0 : i32
    return %c0_i32, %c0_i32_0 : i32, i32
  }
  func.func @transform_11(%arg0: i32) -> (i32, i32) {
    %c0_i32 = arith.constant 0 : i32
    %c0_i32_0 = arith.constant 0 : i32
    return %arg0, %c0_i32 : i32, i32
  }
}

</mosaic_0001>

<bundles_post_ra>
// kernel: forward.1
= control target key start
LH: loop header
LB: loop body
LE: loop exit
PB: predicated region body
PF: predicated region fallthrough
CT: control target
= control target key end

     0   :  { %vm1283_vm0 = vcmask 1045504   ;;  %vm409_vm1 = vsmask.f32 7424  ;;  %vm836_vm2 = vsmask.f32 6400  ;;  %vm24873_vm3 = vmmov 0   ;;  %s31197_s0 = inlined_call_operand.vmem [shape: bf16[2,121,256], index: 0, kind: input, shape index: {}]   ;;  %s31198_s1 = inlined_call_operand.vmem [shape: bf16[4,256,128], index: 1, kind: input, shape index: {}]   ;;  %s31199_s2 = inlined_call_operand.vmem [shape: f32[1,128], index: 2, kind: input, shape index: {}]   ;;  %s31200_s3 = inlined_call_operand.vmem [shape: bf16[4,128,64], index: 3, kind: input, shape index: {}]   ;;  %s31201_s4 = inlined_call_operand.vmem [shape: f32[1,64], index: 4, kind: input, shape index: {}]   ;;  %s31202_s5 = inlined_call_operand.vmem [shape: bf16[9,64,64], index: 5, kind: input, shape index: {}]   ;;  %s31203_s6 = inlined_call_operand.vmem [shape: f32[1,64], index: 6, kind: input, shape index: {}]   ;;  %s31204_s7 = inlined_call_operand.vmem [shape: bf16[3136,512], index: 7, kind: input, shape index: {}]   ;;  %s31205_s8 = inlined_call_operand.vmem [shape: f32[1,512], index: 8, kind: input, shape index: {}]   ;;  %s31206_s9 = inlined_call_operand.vmem [shape: bf16[512,128], index: 9, kind: input, shape index: {}]   ;;  %s31207_s10 = inlined_call_operand.vmem [shape: f32[1,128], index: 10, kind: input, shape index: {}]   ;;  %s31208_s11 = inlined_call_operand.hbm [shape: f32[2,6], index: 11, kind: output, shape index: {}]  }
   0x1   :  { %v23209_v0 = vld [vmem:[%s31198_s1 + $0x40] sm:$0xff]   ;;  %v23211_v2 = vld [vmem:[%s31198_s1 + $0x48] sm:$0xff]   ;;  %v23213_v4 = vld [vmem:[%s31198_s1 + $0x50] sm:$0xff]   ;;  %vm1610_vm4 = vcmask 1042432   ;;  %vm1611_vm5 = vsmask.f32 2304 }
   0x2   :  { %v23210_v1 = vld [vmem:[%s31198_s1] sm:$0xff]   ;;  %20919 = vmatprep.subr.bf16.mxu0 %v23209_v0  ;;  %v23212_v3 = vld [vmem:[%s31198_s1 + $0x8] sm:$0xff]   ;;  %v23214_v5 = vld [vmem:[%s31198_s1 + $0x10] sm:$0xff]  }
   0x3   :  { %20920 = vmatpush3.bf16.msra.mxu0 %v23210_v1  ;;  %v23215_v6 = vld [vmem:[%s31198_s1 + $0x58] sm:$0xff]   ;;  %v23217_v8 = vld [vmem:[%s31198_s1 + $0x60] sm:$0xff]   ;;  %v23219_v10 = vld [vmem:[%s31198_s1 + $0x68] sm:$0xff]  }
   0x4   :  { %20921 = vmatprep.subr.bf16.mxu0 %v23211_v2  ;;  %v23216_v7 = vld [vmem:[%s31198_s1 + $0x18] sm:$0xff]   ;;  %v23218_v9 = vld [vmem:[%s31198_s1 + $0x20] sm:$0xff]   ;;  %v23220_v12 = vld [vmem:[%s31198_s1 + $0x28] sm:$0xff]  }
   0x5   :  { %v24976_v11 = vld [vmem:[%s31197_s0 + $0x4] ss:$8 sps:$4 sm:$0xff]   ;;  %v23221_v13 = vld [vmem:[%s31198_s1 + $0x70] sm:$0xff]   ;;  %v23223_v15 = vld [vmem:[%s31198_s1 + $0x78] sm:$0xff]  }
   0x6   :  { %305 = vmatprep.mubr.bf16.mxu0 %v24976_v11  ;;  %v23222_v14 = vld [vmem:[%s31198_s1 + $0x30] sm:$0xff]   ;;  %v23224_v16 = vld [vmem:[%s31198_s1 + $0x38] sm:$0xff]   ;;  %v24997_v17 = vld [vmem:[%s31197_s0] ss:$8 sps:$4 sm:$0xff]   ;;  %v425_v21 = vshll.u32 %v24976_v11, 16  ;;  %v423_v32 = vshrl.u32 %v24976_v11, 16 }
   0x7   :  { %20922 = vmatpush3.bf16.msra.mxu0 %v23212_v3  ;;  %v23228_v18 = vld [vmem:[%s31198_s1 + $0xc0] sm:$0xff]   ;;  %v25005_v19 = vld [vmem:[%s31197_s0 + $0x10] sm:$0xff]  ;;  %v25010_v20 = vld [vmem:[%s31197_s0 + $0x18] sm:$0xff]  ;;  %v413_v22 = vshll.u32 %v24997_v17, 16 }
   0x8   :  { %20923 = vmatprep.subr.bf16.mxu0 %v23213_v4  ;;  %v23229_v23 = vld [vmem:[%s31198_s1 + $0x80] sm:$0xff]   ;;  %v25019_v24 = vcombine.high %v25005_v19, %v25010_v20  ;;  %v23231_v25 = vld [vmem:[%s31198_s1 + $0xc8] sm:$0xff]   ;;  %v25037_v29 = vcombine.low %v25005_v19, %v25010_v20  ;;  %v25046_v33 = vrot.slane %v425_v21, 1  ;;  %v23234_v35 = vld [vmem:[%s31198_s1 + $0xd0] sm:$0xff]  }
   0x9   :  { %v25027_v26 = vld [vmem:[%s31197_s0 + $0x20] sm:$0xff]  ;;  %v25032_v27 = vld [vmem:[%s31197_s0 + $0x28] sm:$0xff]  ;;  %v25040_v30 = vrot.slane %v413_v22, 1  ;;  %v23236_v40 = vld [vmem:[%s31198_s1 + $0x90] sm:$0xff]  }
   0xa   :  { %v23233_v31 = vld [vmem:[%s31198_s1 + $0x88] sm:$0xff]   ;;  %v418_v34 = vshll.u32 %v25037_v29, 16  ;;  %v25055_v36 = vcombine.high %v25027_v26, %v25032_v27  ;;  %v25059_v37 = vcombine.low %v25027_v26, %v25032_v27  ;;  %v430_v38 = vshll.u32 %v25019_v24, 16  ;;  %v25069_v41 = vld [vmem:[%s31197_s0 + $0x30] sm:$0xff]  ;;  %v25075_v43 = vld [vmem:[%s31197_s0 + $0x38] sm:$0xff] }
   0xb   :  { %20924 = vmatpush3.bf16.msra.mxu0 %v23214_v5  ;;  %v23238_v46 = vld [vmem:[%s31198_s1 + $0xd8] sm:$0xff]   ;;  %v25086_v47 = vld [vmem:[%s31197_s0 + $0x40] sm:$0xff]  ;;  %v25095_v50 = vcombine.high %v25069_v41, %v25075_v43  ;;  %v25100_v51 = vld [vmem:[%s31197_s0 + $0x48] sm:$0xff]  ;;  %v25106_v53 = vcombine.low %v25069_v41, %v25075_v43 }
   0xc   :  { %20925 = vmatprep.subr.bf16.mxu0 %v23215_v6  ;;  %v446_v42 = vshll.u32 %v25055_v36, 16  ;;  %v438_v44 = vshll.u32 %v25059_v37, 16  ;;  %v25078_v45 = vrot.slane %v418_v34, 1  ;;  %v25088_v48 = vrot.slane %v430_v38, 1  ;;  %v23239_v49 = vld [vmem:[%s31198_s1 + $0x98] sm:$0xff]   ;;  %v23242_v54 = vld [vmem:[%s31198_s1 + $0xe0] sm:$0xff]   ;;  %vm25868_vm6 = vmand %vm1610_vm4, %vm1611_vm5 }
   0xd   :  { %v462_v58 = vshll.u32 %v25095_v50, 16  ;;  %v25120_v59 = vcombine.high %v25086_v47, %v25100_v51  ;;  %v25125_v60 = vld [vmem:[%s31197_s0 + $0x50] sm:$0xff]  ;;  %v454_v61 = vshll.u32 %v25106_v53, 16  ;;  %v23243_v62 = vld [vmem:[%s31198_s1 + $0xa0] sm:$0xff]   ;;  %v25134_v63 = vld [vmem:[%s31197_s0 + $0x58] sm:$0xff]  ;;  %v25151_v6 = vcombine.low %v25086_v47, %v25100_v51 }
   0xe   :  { %v25111_v55 = vrot.slane %v446_v42, 1  ;;  %v25113_v56 = vrot.slane %v438_v44, 1  ;;  %v23246_v1 = vld [vmem:[%s31198_s1 + $0xe8] sm:$0xff]   ;;  %v23264_v3 = vld [vmem:[%s31198_s1 + $0x1c0] sm:$0xff]   ;;  %v25185_v22 = vcombine.low %v25125_v60, %v25134_v63  ;;  %v23270_v34 = vld [vmem:[%s31198_s1 + $0x1d0] sm:$0xff]  }
   0xf   :  { %20926 = vmatpush3.bf16.msra.mxu0 %v23216_v7  ;;  %v478_v2 = vshll.u32 %v25120_v59, 16  ;;  %v25144_v4 = vrot.slane %v462_v58, 1  ;;  %v23265_v5 = vld [vmem:[%s31198_s1 + $0x180] sm:$0xff]   ;;  %v25153_v7 = vrot.slane %v454_v61, 1  ;;  %21093 = vmatprep.subr.bf16.mxu1 %v23264_v3  ;;  %v470_v21 = vshll.u32 %v25151_v6, 16  ;;  %v23254_v44 = vld [vmem:[%s31198_s1 + $0xf8] sm:$0xff]  }
  0x10   :  { %20927 = vmatprep.subr.bf16.mxu0 %v23217_v8  ;;  %21094 = vmatpush3.bf16.msra.mxu1 %v23265_v5  ;;  %v486_v38 = vshll.u32 %v25185_v22, 16  ;;  %v25216_v61 = vcombine.high %v25010_v20, %v25027_v26  ;;  %v23255_v3 = vld [vmem:[%s31198_s1 + $0xb8] sm:$0xff]   ;;  %v25303_v58 = vcombine.high %v25075_v43, %v25086_v47 }
  0x12   :  { %v25228_v5 = vrot.slane %v486_v38, 1  ;;  %v866_v38 = vshll.u32 %v25216_v61, 16 }
  0x13   :  { %20928 = vmatpush3.bf16.msra.mxu0 %v23218_v9  ;;  %v23247_v9 = vld [vmem:[%s31198_s1 + $0xa8] sm:$0xff]  }
  0x14   :  { %20929 = vmatprep.subr.bf16.mxu0 %v23219_v10  ;;  %v25161_v10 = vcombine.high %v25125_v60, %v25134_v63 }
  0x17   :  { %20930 = vmatpush3.bf16.msra.mxu0 %v23220_v12  ;;  %v25166_v12 = vld [vmem:[%s31197_s0 + $0x60] sm:$0xff] }
  0x18   :  { %20931 = vmatprep.subr.bf16.mxu0 %v23221_v13  ;;  %v74_v13 = vld [vmem:[%s31197_s0 + $0x68] sm:$0x77] }
  0x19   :  { %v25203_v42 = vcombine.high %v25166_v12, %v74_v13 }
  0x1b   :  { %20932 = vmatpush3.bf16.msra.mxu0 %v23222_v14 }
  0x1c   :  { %20933 = vmatprep.subr.bf16.mxu0 %v23223_v15  ;;  %v23267_v15 = vld [vmem:[%s31198_s1 + $0x1c8] sm:$0xff]  }
  0x1d   :  { %21095 = vmatprep.subr.bf16.mxu1 %v23267_v15 }
  0x1f   :  { %20934 = vmatpush3.bf16.msra.mxu0 %v23224_v16  ;;  %v23250_v16 = vld [vmem:[%s31198_s1 + $0xf0] sm:$0xff]  }
  0x20   :  { %20977 = vmatprep.subr.bf16.mxu0 %v23228_v18  ;;  %v25179_v18 = vrot.slane %v478_v2, 1  ;;  %v510_v2 = vshll.u32 %v25203_v42, 16 }
  0x22   :  { %306 = vmatmul.mubr.bf16.vlgmr.msra.gmra.mrb[0].mxu0 %v24997_v17 }
  0x23   :  { %20978 = vmatpush3.bf16.msra.mxu0 %v23229_v23  ;;  %313 = vmatprep.mubr.bf16.mxu0 %v25019_v24  ;;  %v23269_v23 = vld [vmem:[%s31198_s1 + $0x188] sm:$0xff]  }
  0x24   :  { %20979 = vmatprep.subr.bf16.mxu0 %v23231_v25  ;;  %v494_v25 = vshll.u32 %v25161_v10, 16  ;;  %21096 = vmatpush3.bf16.msra.mxu1 %v23269_v23  ;;  %v863_v23 = vshrl.u32 %v25216_v61, 16 }
  0x25   :  { %21097 = vmatprep.subr.bf16.mxu1 %v23270_v34  ;;  %v25248_v34 = vcombine.low %v25010_v20, %v25027_v26  ;;  %v25262_v20 = vcombine.high %v25032_v27, %v25069_v41  ;;  %v23286_v26 = vld [vmem:[%s31198_s1 + $0x1f8] sm:$0xff]  }
  0x27   :  { %20980 = vmatpush3.bf16.msra.mxu0 %v23233_v31  ;;  %v1174_v31 = vld [vmem:[%s31197_s0 + $0x8] sm:$0xcc] }
  0x28   :  { %20981 = vmatprep.subr.bf16.mxu0 %v23234_v35  ;;  %v23251_v35 = vld [vmem:[%s31198_s1 + $0xb0] sm:$0xff]   ;;  %v18975_v8 = vcombine.high %v1174_v31, %v25005_v19  ;;  %v18974_v0 = vcombine.low %v1174_v31, %v25005_v19  ;;  %v25328_v31 = vcombine.low %v25075_v43, %v25086_v47  ;;  %v902_v47 = vshll.u32 %v25303_v58, 16 }
  0x2a   :  { %314 = vmatmul.mubr.bf16.gmra.mrb[4].mxu0 %v25037_v29 }
  0x2b   :  { %321 = vmatprep.mubr.bf16.mxu0 %v25055_v36  ;;  %20982 = vmatpush3.bf16.msra.mxu0 %v23236_v40  ;;  %v23271_v40 = vld [vmem:[%s31198_s1 + $0x190] sm:$0xff]  }
  0x2c   :  { %20983 = vmatprep.subr.bf16.mxu0 %v23238_v46  ;;  %v25208_v46 = vrot.slane %v470_v21, 1  ;;  %21098 = vmatpush3.bf16.msra.mxu1 %v23271_v40  ;;  %v23277_v40 = vld [vmem:[%s31198_s1 + $0x1a0] sm:$0xff]   ;;  %v733_v21 = vld [vmem:[%s31197_s0 + $0x8] sm:$0xee] }
  0x2f   :  { %20984 = vmatpush3.bf16.msra.mxu0 %v23239_v49  ;;  %v18913_v49 = vcombine.high %v733_v21, %v25005_v19 }
  0x30   :  { %20985 = vmatprep.subr.bf16.mxu0 %v23242_v54  ;;  %v25211_v54 = vrot.slane %v494_v25, 1  ;;  %v25244_v25 = vrot.slane %v510_v2, 1  ;;  %v25265_v2 = vrot.slane %v863_v23, 1  ;;  %v881_v23 = vshrl.u32 %v25262_v20, 16 }
  0x31   :  { %v855_v52 = vshrl.u32 %v18913_v49, 16  ;;  %v858_v39 = vshll.u32 %v18913_v49, 16 }
  0x32   :  { %322 = vmatmul.mubr.bf16.gmra.mrb[8].mxu0 %v25059_v37  ;;  %v25310_v14 = vrot.slane %v881_v23, 1  ;;  %v428_v23 = vor.u32 %v25046_v33, %v423_v32  ;;  %v899_v32 = vshrl.u32 %v25303_v58, 16  ;;  %v25341_v33 = vcombine.high %v25100_v51, %v25125_v60 }
  0x33   :  { %329 = vmatprep.mubr.bf16.mxu0 %v25095_v50  ;;  %20986 = vmatpush3.bf16.msra.mxu0 %v23243_v62  ;;  %v25219_v62 = vcombine.low %v25166_v12, %v74_v13  ;;  %v23256_v13 = vld [vmem:[%s31198_s1 + $0x140] sm:$0xff]   ;;  %v25343_v43 = vrot.slane %v858_v39, 2 }
  0x34   :  { %20987 = vmatprep.subr.bf16.mxu0 %v23246_v1  ;;  %v23274_v1 = vld [vmem:[%s31198_s1 + $0x1d8] sm:$0xff]   ;;  %31217 = vst [vmem:[#allocation9_spill] sm:$0xff] %v25310_v14  ;;  %v1287_v14 = vrot.slane %v18975_v8, 2  ;;  %v31218_v8 = vrot.slane %v25248_v34, 2  ;;  %v433_v39 = vsel %vm409_vm1, %v428_v23, %v25088_v48 }
  0x35   :  { %21099 = vmatprep.subr.bf16.mxu1 %v23274_v1  ;;  %v502_v15 = vshll.u32 %v25219_v62, 16 }
  0x37   :  { %20988 = vmatpush3.bf16.msra.mxu0 %v23247_v9  ;;  %v23275_v9 = vld [vmem:[%s31198_s1 + $0x198] sm:$0xff]   ;;  %v25255_v1 = vrot.slane %v502_v15, 1  ;;  %v846_v15 = vshrl.u32 %v25248_v34, 16 }
  0x38   :  { %20989 = vmatprep.subr.bf16.mxu0 %v23250_v16  ;;  %v23276_v16 = vld [vmem:[%s31198_s1 + $0x1e0] sm:$0xff]   ;;  %21100 = vmatpush3.bf16.msra.mxu1 %v23275_v9  ;;  %v25267_v9 = vrot.slane %v866_v38, 2 }
  0x39   :  { %21101 = vmatprep.subr.bf16.mxu1 %v23276_v16  ;;  %v25272_v16 = vcombine.low %v25032_v27, %v25069_v41  ;;  %v1288_v27 = vrot.slane %v25216_v61, 2  ;;  %v884_v41 = vshll.u32 %v25262_v20, 16  ;;  %v25286_v38 = vrot.slane %v846_v15, 1 }
  0x3a   :  { %330 = vmatmul.mubr.bf16.gmra.mrb[12].mxu0 %v25106_v53 }
  0x3b   :  { %337 = vmatprep.mubr.bf16.mxu0 %v25120_v59  ;;  %20990 = vmatpush3.bf16.msra.mxu0 %v23251_v35  ;;  %v23281_v35 = vld [vmem:[%s31198_s1 + $0x1a8] sm:$0xff]   ;;  %v25315_v57 = vrot.slane %v884_v41, 2  ;;  %v25331_v41 = vrot.slane %v855_v52, 1  ;;  %v1289_v11 = vsel %vm1283_vm0, %v1287_v14, %v1288_v27  ;;  %v25348_v52 = vcombine.low %v25100_v51, %v25125_v60 }
  0x3c   :  { %20991 = vmatprep.subr.bf16.mxu0 %v23254_v44  ;;  %v23280_v44 = vld [vmem:[%s31198_s1 + $0x1e8] sm:$0xff]   ;;  %21102 = vmatpush3.bf16.msra.mxu1 %v23277_v40  ;;  %v872_v40 = vshrl.u32 %v25272_v16, 16  ;;  %v25364_v60 = vrot.slane %v899_v32, 1 }
  0x3d   :  { %21103 = vmatprep.subr.bf16.mxu1 %v23280_v44  ;;  %v23284_v44 = vld [vmem:[%s31198_s1 + $0x1b0] sm:$0xff]   ;;  %1456 = vmatprep.mubr.bf16.mxu1 %v1289_v11  ;;  %v25372_v11 = vrot.slane %v902_v47, 2 }
  0x3e   :  { %v25321_v15 = vrot.slane %v872_v40, 1  ;;  %31220 = vst [vmem:[#allocation10_spill] sm:$0xff] %v25364_v60  ;;  %v25388_v47 = vld [vmem:[%s31197_s0 + $0x6c] ss:$8 sps:$4 sm:$0xff]  }
  0x3f   :  { %20992 = vmatpush3.bf16.msra.mxu0 %v23255_v3  ;;  %v849_v3 = vshll.u32 %v25248_v34, 16  ;;  %31221 = vst [vmem:[#allocation11_spill] sm:$0xff] %v25372_v11  ;;  %v23258_v40 = vld [vmem:[%s31198_s1 + $0x148] sm:$0xff]  }
  0x40   :  { %21035 = vmatprep.subr.bf16.mxu0 %v23256_v13  ;;  %v23282_v13 = vld [vmem:[%s31198_s1 + $0x1f0] sm:$0xff]   ;;  %21104 = vmatpush3.bf16.msra.mxu1 %v23281_v35  ;;  %v18912_v35 = vcombine.low %v733_v21, %v25005_v19  ;;  %v23287_v21 = vld [vmem:[%s31198_s1 + $0x1b8] sm:$0xff]   ;;  %v1284_v19 = vrot.slane %v18974_v0, 2 }
  0x41   :  { %v25298_v61 = vrot.slane %v849_v3, 2  ;;  %21105 = vmatprep.subr.bf16.mxu1 %v23282_v13  ;;  %v875_v3 = vshll.u32 %v25272_v16, 16 }
  0x42   :  { %338 = vmatmul.mubr.bf16.gmra.mrb[16].mxu0 %v25151_v6  ;;  %v838_v28 = vshrl.u32 %v18912_v35, 16  ;;  %v841_v49 = vshll.u32 %v18912_v35, 16  ;;  %v1286_v14 = vsel %vm1283_vm0, %v1284_v19, %v31218_v8  ;;  %v25370_v19 = vcombine.high %v25134_v63, %v25166_v12 }
  0x43   :  { %345 = vmatprep.mubr.bf16.mxu0 %v25161_v10  ;;  %v25333_v13 = vrot.slane %v875_v3, 2  ;;  %v31219_v3 = vrot.slane %v25262_v20, 2  ;;  %v920_v8 = vshll.u32 %v25341_v33, 16 }
  0x44   :  { %21106 = vmatpush3.bf16.msra.mxu1 %v23284_v44  ;;  %v25350_v0 = vrot.slane %v838_v28, 1  ;;  %v893_v44 = vshll.u32 %v25328_v31, 16  ;;  %v25359_v35 = vrot.slane %v841_v49, 2  ;;  %v31226_v49 = vshrl.u32 %v25019_v24, 16 }
  0x45   :  { %21107 = vmatprep.subr.bf16.mxu1 %v23286_v26  ;;  %v890_v26 = vshrl.u32 %v25328_v31, 16  ;;  %v1293_v51 = vsel %vm1283_vm0, %v1288_v27, %v31219_v3  ;;  %v25379_v27 = vcombine.low %v25134_v63, %v25166_v12  ;;  %v908_v3 = vshrl.u32 %v25348_v52, 16 }
  0x46   :  { %v25381_v32 = vrot.slane %v893_v44, 2  ;;  %v31224_v63 = vshrl.u32 %v24997_v17, 16  ;;  %v444_v28 = vor.u32 %v31226_v49, %v25088_v48  ;;  %v25408_v17 = vld [vmem:[%s31197_s0 + $0x68] ss:$8 sps:$4 sm:$0xff]   ;;  %v31228_v24 = vrot.slane %v25248_v34, 2 }
  0x47   :  { %v25374_v23 = vrot.slane %v890_v26, 1  ;;  %v911_v26 = vshll.u32 %v25348_v52, 16  ;;  %v25420_v49 = vrot.slane %v908_v3, 1  ;;  %v23259_v34 = vld [vmem:[%s31198_s1 + $0x108] sm:$0xff]  }
  0x48   :  { %21108 = vmatpush3.bf16.msra.mxu1 %v23287_v21  ;;  %v917_v21 = vshrl.u32 %v25341_v33, 16  ;;  %31223 = vst [vmem:[#allocation13_spill] sm:$0xff] %v25381_v32  ;;  %v416_v12 = vor.u32 %v25040_v30, %v31224_v63  ;;  %v938_v32 = vshll.u32 %v25370_v19, 16  ;;  %v23257_v30 = vld [vmem:[%s31198_s1 + $0x100] sm:$0xff]   ;;  %v929_v63 = vshll.u32 %v25379_v27, 16 }
  0x49   :  { %31222 = vst [vmem:[#allocation12_spill] sm:$0xff] %v25374_v23  ;;  %v31230_v23 = vrot.slane %v25262_v20, 2  ;;  %v25431_v60 = vrot.slane %v911_v26, 2  ;;  %v449_v20 = vsel %vm409_vm1, %v444_v28, %v25111_v55  ;;  %v23260_v28 = vld [vmem:[%s31198_s1 + $0x150] sm:$0xff]  }
  0x4a   :  { %346 = vmatmul.mubr.bf16.gmra.mrb[20].mxu0 %v25185_v22  ;;  %v25396_v44 = vrot.slane %v917_v21, 1  ;;  %v25418_v21 = vrot.slane %v920_v8, 2  ;;  %v25437_v8 = vld [vmem:[%s31197_s0 + $0x78] sm:$0x11]  ;;  %v421_v3 = vsel %vm409_vm1, %v416_v12, %v25078_v45  ;;  %v25454_v12 = vrot.slane %v929_v63, 2 }
  0x4b   :  { %353 = vmatprep.mubr.bf16.mxu0 %v25203_v42  ;;  %1457 = vmatmul.mubr.bf16.vlgmr.msra.gmra.mrb[0].mxu1 %v1286_v14  ;;  %v926_v14 = vshrl.u32 %v25379_v27, 16 }
  0x4c   :  { %1464 = vmatprep.mubr.bf16.mxu1 %v1293_v51  ;;  %31225 = vst [vmem:[#allocation14_spill] sm:$0xff] %v25396_v44  ;;  %v935_v51 = vshrl.u32 %v25370_v19, 16  ;;  %v31229_v44 = vrot.slane %v25303_v58, 2 }
  0x4d   :  { %v25448_v26 = vrot.slane %v926_v14, 1  ;;  %v944_v14 = vshrl.u32 %v25408_v17, 16 }
  0x4e   :  { %v1297_v11 = vsel %vm1283_vm0, %v31230_v23, %v31229_v44  ;;  %v25446_v23 = vrot.slane %v938_v32, 2  ;;  %v1302_v44 = vrot.slane %v25379_v27, 2 }
  0x52   :  { %354 = vmatmul.mubr.bf16.gmra.mrb[24].mxu0 %v25219_v62 }
  0x53   :  { %662 = vmatprep.mubr.bf16.mxu0 %v433_v39  ;;  %v31227_v39 = vrot.slane %v25272_v16, 2 }
  0x55   :  { %v1291_v48 = vsel %vm1283_vm0, %v31228_v24, %v31227_v39  ;;  %v25441_v39 = vrot.slane %v935_v51, 1  ;;  %v953_v24 = vshrl.u32 %v25388_v47, 16  ;;  %v18989_v51 = vcombine.high %v25437_v8, %v25437_v8 }
  0x56   :  { %1465 = vmatmul.mubr.bf16.gmra.mrb[4].mxu1 %v1291_v48 }
  0x57   :  { %31231 = vst [vmem:[#allocation15_spill] sm:$0xff] %v25441_v39  ;;  %1472 = vmatprep.mubr.bf16.mxu1 %v1297_v11  ;;  %v25461_v32 = vrot.slane %v953_v24, 1  ;;  %v31232_v11 = vshrl.u32 %v25037_v29, 16  ;;  %v23261_v24 = vld [vmem:[%s31198_s1 + $0x110] sm:$0xff]  }
  0x59   :  { %v436_v48 = vor.u32 %v31232_v11, %v25078_v45  ;;  %v1306_v45 = vrot.slane %v25408_v17, 2  ;;  %v31236_v11 = vrot.slane %v25341_v33, 2  ;;  %v23278_v33 = vld [vmem:[%s31198_s1 + $0x170] sm:$0xff]  }
  0x5a   :  { %663 = vmatmul.mubr.bf16.vlgmr.msra.gmra.mrb[28].mxu0 %v421_v3  ;;  %v31233_v3 = vshrl.u32 %v25055_v36, 16  ;;  %v31237_v36 = vrot.slane %v25303_v58, 2  ;;  %v23266_v58 = vld [vmem:[%s31198_s1 + $0x160] sm:$0xff]  }
  0x5b   :  { %21036 = vmatpush3.bf16.msra.mxu0 %v23257_v30  ;;  %670 = vmatprep.mubr.bf16.mxu0 %v449_v20  ;;  %v31234_v30 = vrot.slane %v25328_v31, 2  ;;  %v31235_v20 = vrot.slane %v25272_v16, 2  ;;  %v441_v63 = vsel %vm409_vm1, %v436_v48, %v25113_v56  ;;  %v23268_v48 = vld [vmem:[%s31198_s1 + $0x120] sm:$0xff]  }
  0x5c   :  { %21037 = vmatprep.subr.bf16.mxu0 %v23258_v40  ;;  %v460_v39 = vor.u32 %v31233_v3, %v25111_v55  ;;  %v23262_v40 = vld [vmem:[%s31198_s1 + $0x158] sm:$0xff]   ;;  %v1301_v55 = vsel %vm1283_vm0, %v31237_v36, %v31236_v11  ;;  %v1312_v3 = vrot.slane %v18989_v51, 2 }
  0x5d   :  { %v1295_v29 = vsel %vm1283_vm0, %v31235_v20, %v31234_v30  ;;  %v23263_v30 = vld [vmem:[%s31198_s1 + $0x118] sm:$0xff]   ;;  %v31241_v20 = vrot.slane %v25328_v31, 2  ;;  %v23273_v31 = vld [vmem:[%s31198_s1 + $0x128] sm:$0xff]  }
  0x5e   :  { %v465_v16 = vsel %vm409_vm1, %v460_v39, %v25144_v4  ;;  %1473 = vmatmul.mubr.bf16.gmra.mrb[8].mxu1 %v1295_v29  ;;  %v31239_v39 = vshrl.u32 %v25095_v50, 16 }
  0x5f   :  { %21038 = vmatpush3.bf16.msra.mxu0 %v23259_v34  ;;  %1480 = vmatprep.mubr.bf16.mxu1 %v1301_v55  ;;  %v31238_v34 = vshrl.u32 %v25059_v37, 16  ;;  %v23272_v37 = vld [vmem:[%s31198_s1 + $0x168] sm:$0xff]   ;;  %v31245_v55 = vshrl.u32 %v25120_v59, 16 }
  0x60   :  { %21039 = vmatprep.subr.bf16.mxu0 %v23260_v28  ;;  %v476_v28 = vor.u32 %v31239_v39, %v25144_v4 }
  0x61   :  { %v452_v51 = vor.u32 %v31238_v34, %v25113_v56  ;;  %v31242_v56 = vrot.slane %v25370_v19, 2  ;;  %v31249_v19 = vshrl.u32 %v25151_v6, 16 }
  0x62   :  { %671 = vmatmul.mubr.bf16.gmra.mrb[32].mxu0 %v441_v63  ;;  %v31240_v63 = vrot.slane %v25348_v52, 2  ;;  %v23285_v52 = vld [vmem:[%s31198_s1 + $0x138] sm:$0xff]  }
  0x63   :  { %678 = vmatprep.mubr.bf16.mxu0 %v465_v16  ;;  %21040 = vmatpush3.bf16.msra.mxu0 %v23261_v24  ;;  %v31243_v24 = vmov %v31236_v11  ;;  %v457_v4 = vsel %vm409_vm1, %v452_v51, %v25153_v7  ;;  %v31244_v11 = vshrl.u32 %v25106_v53, 16  ;;  %v492_v16 = vor.u32 %v31245_v55, %v25179_v18  ;;  %v23283_v53 = vld [vmem:[%s31198_s1 + $0x178] sm:$0xff]  }
  0x64   :  { %21041 = vmatprep.subr.bf16.mxu0 %v23262_v40  ;;  %v1299_v29 = vsel %vm1283_vm0, %v31241_v20, %v31240_v63  ;;  %v1305_v50 = vsel %vm1283_vm0, %v31243_v24, %v31242_v56  ;;  %v481_v40 = vsel %vm409_vm1, %v476_v28, %v25179_v18  ;;  %v31248_v59 = vmov %v31242_v56 }
  0x65   :  { %v468_v36 = vor.u32 %v31244_v11, %v25153_v7  ;;  %v31247_v7 = vrot.slane %v25388_v47, 2  ;;  %v497_v39 = vsel %vm409_vm1, %v492_v16, %v25211_v54  ;;  %v18988_v28 = vcombine.low %v25437_v8, %v25437_v8  ;;  %v31261_v11 = vld [vmem:[#allocation14_spill] sm:$0xff] }
  0x66   :  { %1481 = vmatmul.mubr.bf16.gmra.mrb[12].mxu1 %v1299_v29  ;;  %v31251_v29 = vshll.u32 %v25388_v47, 16  ;;  %v1307_v8 = vsel %vm1283_vm0, %v1302_v44, %v1306_v45 }
  0x67   :  { %21042 = vmatpush3.bf16.msra.mxu0 %v23263_v30  ;;  %1488 = vmatprep.mubr.bf16.mxu1 %v1305_v50  ;;  %v23279_v30 = vld [vmem:[%s31198_s1 + $0x130] sm:$0xff]   ;;  %v1309_v18 = vsel %vm1283_vm0, %v31248_v59, %v31247_v7  ;;  %v473_v51 = vsel %vm409_vm1, %v468_v36, %v25208_v46  ;;  %v1310_v56 = vrot.slane %v18988_v28, 2  ;;  %v31252_v24 = vmov %v31247_v7 }
  0x68   :  { %21043 = vmatprep.subr.bf16.mxu0 %v23266_v58  ;;  %v31246_v58 = vmov %v31240_v63  ;;  %v31250_v63 = vshrl.u32 %v25161_v10, 16  ;;  %v1313_v6 = vsel %vm1283_vm0, %v31252_v24, %v1312_v3  ;;  %v31254_v3 = vshrl.u32 %v25203_v42, 16  ;;  %v23313_v28 = vld [vmem:[%s31200_s3 + $0x30] sm:$0xff]  }
  0x69   :  { %v1303_v34 = vsel %vm1283_vm0, %v31246_v58, %v1302_v44  ;;  %v1311_v47 = vsel %vm1283_vm0, %v1306_v45, %v1310_v56  ;;  %v844_v42 = vor.u32 %v25359_v35, %v25350_v0  ;;  %v923_v36 = vor.u32 %v25418_v21, %v31261_v11 }
  0x6a   :  { %679 = vmatmul.mubr.bf16.gmra.mrb[36].mxu0 %v457_v4  ;;  %v508_v20 = vor.u32 %v31250_v63, %v25211_v54  ;;  %v31253_v54 = vshrl.u32 %v25185_v22, 16  ;;  %v519_v50 = vor.u32 %v31254_v3, %v25244_v25  ;;  %v861_v4 = vor.u32 %v25343_v43, %v25331_v41 }
  0x6b   :  { %686 = vmatprep.mubr.bf16.mxu0 %v481_v40  ;;  %21044 = vmatpush3.bf16.msra.mxu0 %v23268_v48  ;;  %v484_v48 = vor.u32 %v31249_v19, %v25208_v46  ;;  %v869_v22 = vor.u32 %v25267_v9, %v25265_v2  ;;  %v31258_v9 = vld [vmem:[#allocation11_spill] sm:$0xff]  ;;  %v932_v21 = vor.u32 %v25454_v12, %v25448_v26  ;;  %v946_v7 = vrot.slane %v944_v14, 1  ;;  %v23308_v12 = vld [vmem:[%s31200_s3 + $0x8] sm:$0xff]  }
  0x6c   :  { %21045 = vmatprep.subr.bf16.mxu0 %v23272_v37  ;;  %v958_v37 = vrot.slane %v31251_v29, 2  ;;  %v513_v10 = vsel %vm409_vm1, %v508_v20, %v25244_v25  ;;  %v500_v27 = vor.u32 %v31253_v54, %v25228_v5  ;;  %v852_v25 = vor.u32 %v25298_v61, %v25286_v38  ;;  %v31259_v38 = vld [vmem:[#allocation12_spill] sm:$0xff] }
  0x6d   :  { %v489_v46 = vsel %vm409_vm1, %v484_v48, %v25228_v5  ;;  %v31255_v5 = vshrl.u32 %v25219_v62, 16  ;;  %v870_v40 = vsel %vm836_vm2, %v861_v4, %v869_v22  ;;  %v878_v62 = vor.u32 %v25333_v13, %v25321_v15  ;;  %v31262_v13 = vld [vmem:[#allocation15_spill] sm:$0xff] }
  0x6e   :  { %1489 = vmatmul.mubr.bf16.gmra.mrb[16].mxu1 %v1303_v34  ;;  %v505_v44 = vsel %vm409_vm1, %v500_v27, %v25255_v1  ;;  %v853_v43 = vsel %vm836_vm2, %v844_v42, %v852_v25  ;;  %v914_v15 = vor.u32 %v25431_v60, %v25420_v49  ;;  %v31263_v59 = vshll.u32 %v25408_v17, 16  ;;  %v23307_v17 = vld [vmem:[%s31200_s3] sm:$0xff]   ;;  %v23310_v14 = vld [vmem:[%s31200_s3 + $0x18] sm:$0xff]  }
  0x6f   :  { %21046 = vmatpush3.bf16.msra.mxu0 %v23273_v31  ;;  %1496 = vmatprep.mubr.bf16.mxu1 %v1309_v18  ;;  %v516_v45 = vor.u32 %v31255_v5, %v25255_v1  ;;  %v31256_v31 = vld [vmem:[#allocation9_spill] sm:$0xff]  ;;  %v31257_v1 = vld [vmem:[#allocation10_spill] sm:$0xff]  ;;  %v879_v0 = vsel %vm836_vm2, %v852_v25, %v878_v62  ;;  %v24872_v26 = vmov 0.0   ;;  %v23314_v29 = vld [vmem:[%s31200_s3 + $0x38] sm:$0xff]  }
  0x70   :  { %21047 = vmatprep.subr.bf16.mxu0 %v23278_v33  ;;  %v887_v41 = vor.u32 %v25315_v57, %v31256_v31  ;;  %v905_v33 = vor.u32 %v31258_v9, %v31257_v1  ;;  %v31260_v57 = vld [vmem:[#allocation13_spill] sm:$0xff]  ;;  %v949_v60 = vrot.slane %v31263_v59, 2  ;;  %v933_v49 = vsel %vm836_vm2, %v914_v15, %v932_v21  ;;  %21885 = vmatprep.subr.bf16.mxu1 %v24872_v26  ;;  %v25707_v59 = vld [vmem:[%s31199_s2] ss:$0 sm:$0xff] }
  0x71   :  { %v896_v61 = vor.u32 %v31260_v57, %v31259_v38 }
  0x72   :  { %687 = vmatmul.mubr.bf16.gmra.mrb[40].mxu0 %v473_v51  ;;  %v888_v2 = vsel %vm836_vm2, %v869_v22, %v887_v41  ;;  %v906_v35 = vsel %vm836_vm2, %v887_v41, %v905_v33  ;;  %v924_v16 = vsel %vm836_vm2, %v905_v33, %v923_v36  ;;  %v950_v18 = vor.u32 %v949_v60, %v946_v7 }
  0x73   :  { %694 = vmatprep.mubr.bf16.mxu0 %v497_v39  ;;  %21048 = vmatpush3.bf16.msra.mxu0 %v23279_v30  ;;  %v897_v55 = vsel %vm836_vm2, %v878_v62, %v896_v61  ;;  %v941_v30 = vor.u32 %v25446_v23, %v31262_v13  ;;  %v915_v58 = vsel %vm836_vm2, %v896_v61, %v914_v15  ;;  %v23311_v39 = vld [vmem:[%s31200_s3 + $0x20] sm:$0xff]  }
  0x74   :  { %21049 = vmatprep.subr.bf16.mxu0 %v23283_v53  ;;  %v959_v53 = vor.u32 %v958_v37, %v25461_v32  ;;  %v951_v51 = vsel %vm836_vm2, %v932_v21, %v950_v18  ;;  %v23309_v32 = vld [vmem:[%s31200_s3 + $0x10] sm:$0xff]  }
  0x75   :  { %v942_v34 = vsel %vm836_vm2, %v923_v36, %v941_v30 }
  0x76   :  { %1497 = vmatmul.mubr.bf16.gmra.mrb[20].mxu1 %v1307_v8  ;;  %v960_v23 = vsel %vm836_vm2, %v941_v30, %v959_v53 }
  0x77   :  { %21050 = vmatpush3.bf16.msra.mxu0 %v23285_v52  ;;  %1504 = vmatprep.mubr.bf16.mxu1 %v1313_v6  ;;  %v23312_v52 = vld [vmem:[%s31200_s3 + $0x28] sm:$0xff]  }
  0x78   :  { %21709 = vmatprep.subr.bf16.mxu0 %v24872_v26 }
  0x7a   :  { %695 = vmatmul.mubr.bf16.gmra.mrb[44].mxu0 %v489_v46 }
  0x7b   :  { %702 = vmatprep.mubr.bf16.mxu0 %v513_v10 }
  0x7e   :  { %1505 = vmatmul.mubr.bf16.gmra.mrb[24].mxu1 %v1311_v47 }
  0x7f   :  { %21893 = vmatprep.mubr.msk.bf16.mxu1 %vm24873_vm3, %v24872_v26 }
  0x82   :  { %703 = vmatmul.mubr.bf16.gmra.mrb[48].mxu0 %v505_v44 }
  0x83   :  { %710 = vmatprep.mubr.bf16.mxu0 %v519_v50 }
  0x8a   :  { %711 = vmatmul.mubr.bf16.gmra.mrb[52].mxu0 %v516_v45 }
  0x8b   :  { %1103 = vmatprep.mubr.bf16.mxu0 %v870_v40 }
  0x92   :  { %1104 = vmatmul.mubr.bf16.vlgmr.msra.gmra.mrb[56].mxu0 %v853_v43 }
  0x93   :  { %1111 = vmatprep.mubr.bf16.mxu0 %v888_v2  ;;  %21710 = vmatpush3.bf16.msra.mxu0 %v23307_v17 }
  0x94   :  { %21711 = vmatprep.subr.bf16.mxu0 %v24872_v26 }
  0x97   :  { %21712 = vmatpush3.bf16.msra.mxu0 %v23308_v12 }
  0x98   :  { %21713 = vmatprep.subr.bf16.mxu0 %v24872_v26 }
  0x9a   :  { %1112 = vmatmul.mubr.bf16.gmra.mrb[60].mxu0 %v879_v0 }
  0x9b   :  { %1119 = vmatprep.mubr.bf16.mxu0 %v906_v35  ;;  %21714 = vmatpush3.bf16.msra.mxu0 %v23309_v32 }
  0x9c   :  { %21715 = vmatprep.subr.bf16.mxu0 %v24872_v26 }
  0x9f   :  { %21716 = vmatpush3.bf16.msra.mxu0 %v23310_v14 }
  0xa0   :  { %21717 = vmatprep.subr.bf16.mxu0 %v24872_v26 }
  0xa2   :  { %1120 = vmatmul.mubr.bf16.gmra.mrb[64].mxu0 %v897_v55 }
  0xa3   :  { %1127 = vmatprep.mubr.bf16.mxu0 %v924_v16  ;;  %21718 = vmatpush3.bf16.msra.mxu0 %v23311_v39 }
  0xa4   :  { %21719 = vmatprep.subr.bf16.mxu0 %v24872_v26 }
  0xa7   :  { %21720 = vmatpush3.bf16.msra.mxu0 %v23312_v52 }
  0xa8   :  { %21721 = vmatprep.subr.bf16.mxu0 %v24872_v26 }
  0xaa   :  { %1128 = vmatmul.mubr.bf16.gmra.mrb[68].mxu0 %v915_v58 }
  0xab   :  { %1135 = vmatprep.mubr.bf16.mxu0 %v942_v34  ;;  %21722 = vmatpush3.bf16.msra.mxu0 %v23313_v28 }
  0xac   :  { %21723 = vmatprep.subr.bf16.mxu0 %v24872_v26 }
  0xaf   :  { %21724 = vmatpush3.bf16.msra.mxu0 %v23314_v29 }
  0xb0   :  { %21753 = vmatprep.subr.bf16.mxu0 %v24872_v26 }
  0xb2   :  { %1136 = vmatmul.mubr.bf16.gmra.mrb[72].mxu0 %v933_v49 }
  0xb3   :  { %1143 = vmatprep.mubr.bf16.mxu0 %v960_v23 }
  0xba   :  { %1144 = vmatmul.mubr.bf16.gmra.mrb[76].mxu0 %v951_v51 }
  0xbb   :  { %1151 = vmatprep.mubr.bf16.mxu0 %v959_v53 }
  0xc2   :  { %1152 = vmatmul.mubr.bf16.gmra.mrb[80].mxu0 %v950_v18 }
  0xc3   :  { %21725 = vmatprep.mubr.msk.bf16.mxu0 %vm24873_vm3, %v24872_v26 }
  0xf5   :  { %v20935_v19 = vpop.f32.mrb[0].mxu0 }
  0xf6   :  { %v20936_v48 = vpop.f32.mrb[1].mxu0 }
  0xf7   :  { %v20937_v63 = vadd.f32 %v20936_v48, %v20935_v19  ;;  %v20938_v20 = vpop.f32.mrb[2].mxu0 }
  0xf8   :  { %v20939_v37 = vpop.f32.mrb[3].mxu0 }
  0xf9   :  { %v20940_v8 = vadd.f32 %v20939_v37, %v20938_v20  ;;  %v362_v12 = vadd.f32 %v20937_v63, %v25707_v59 }
  0xfb   :  { %v363_v28 = vadd.f32 %v20940_v8, %v25707_v59 }
  0xfd   :  { %v20941_v56 = vpop.f32.mrb[4].mxu0 }
  0xfe   :  { %v20942_v24 = vpop.f32.mrb[5].mxu0 }
  0xff   :  { %v25676_v6 = vadd.f32 %v20942_v24, %v20941_v56  ;;  %v20944_v46 = vpop.f32.mrb[6].mxu0 }
 0x100   :  { %v20945_v10 = vpop.f32.mrb[7].mxu0 }
 0x101   :  { %v25678_v54 = vadd.f32 %v20945_v10, %v20944_v46 }
 0x105   :  { %v20947_v27 = vpop.f32.mrb[8].mxu0 }
 0x106   :  { %v20948_v47 = vpop.f32.mrb[9].mxu0 }
 0x107   :  { %v25680_v44 = vadd.f32 %v20948_v47, %v20947_v27  ;;  %v20950_v3 = vpop.f32.mrb[10].mxu0  ;;  %v364_v27 = vadd.f32 %v25676_v6, %v25707_v59 }
 0x108   :  { %v20951_v50 = vpop.f32.mrb[11].mxu0 }
 0x109   :  { %v25682_v4 = vadd.f32 %v20951_v50, %v20950_v3 }
 0x10d   :  { %v20953_v22 = vpop.f32.mrb[12].mxu0 }
 0x10e   :  { %v20954_v5 = vpop.f32.mrb[13].mxu0 }
 0x10f   :  { %v25684_v45 = vadd.f32 %v20954_v5, %v20953_v22  ;;  %v20956_v40 = vpop.f32.mrb[14].mxu0  ;;  %v365_v22 = vadd.f32 %v25678_v54, %v25707_v59 }
 0x110   :  { %v20957_v42 = vpop.f32.mrb[15].mxu0 }
 0x111   :  { %v25686_v25 = vadd.f32 %v20957_v42, %v20956_v40 }
 0x115   :  { %v20959_v31 = vpop.f32.mrb[16].mxu0 }
 0x116   :  { %v20960_v41 = vpop.f32.mrb[17].mxu0 }
 0x117   :  { %v25688_v43 = vadd.f32 %v20960_v41, %v20959_v31  ;;  %v20962_v2 = vpop.f32.mrb[18].mxu0 }
 0x118   :  { %v20963_v62 = vpop.f32.mrb[19].mxu0 }
 0x119   :  { %v25690_v1 = vadd.f32 %v20963_v62, %v20962_v2 }
 0x11d   :  { %v20965_v9 = vpop.f32.mrb[20].mxu0 }
 0x11e   :  { %v20966_v33 = vpop.f32.mrb[21].mxu0  ;;  %v21109_v61 = vpop.f32.mrb[0].mxu1 }
 0x11f   :  { %v25692_v0 = vadd.f32 %v20966_v33, %v20965_v9  ;;  %v20968_v35 = vpop.f32.mrb[22].mxu0  ;;  %v21110_v11 = vpop.f32.mrb[1].mxu1 }
 0x120   :  { %v20969_v38 = vpop.f32.mrb[23].mxu0  ;;  %v25696_v55 = vadd.f32 %v21110_v11, %v21109_v61  ;;  %v21112_v16 = vpop.f32.mrb[2].mxu1 }
 0x121   :  { %v25694_v57 = vadd.f32 %v20969_v38, %v20968_v35  ;;  %v21113_v13 = vpop.f32.mrb[3].mxu1  ;;  %v366_v35 = vadd.f32 %v25680_v44, %v25707_v59 }
 0x122   :  { %v25700_v34 = vadd.f32 %v21113_v13, %v21112_v16 }
 0x125   :  { %v20971_v36 = vpop.f32.mrb[24].mxu0 }
 0x126   :  { %v20972_v15 = vpop.f32.mrb[25].mxu0 }
 0x127   :  { %v25698_v30 = vadd.f32 %v20972_v15, %v20971_v36  ;;  %v20974_v58 = vpop.f32.mrb[26].mxu0  ;;  %v367_v36 = vadd.f32 %v25682_v4, %v25707_v59 }
 0x128   :  { %v20975_v21 = vpop.f32.mrb[27].mxu0 }
 0x129   :  { %v25702_v53 = vadd.f32 %v20975_v21, %v20974_v58  ;;  %v21115_v7 = vpop.f32.mrb[4].mxu1 }
 0x12a   :  { %v21116_v60 = vpop.f32.mrb[5].mxu1 }
 0x12b   :  { %v25709_v23 = vadd.f32 %v21116_v60, %v21115_v7  ;;  %v21118_v18 = vpop.f32.mrb[6].mxu1 }
 0x12c   :  { %v21119_v17 = vpop.f32.mrb[7].mxu1 }
 0x12d   :  { %v20993_v49 = vpop.f32.mrb[28].mxu0  ;;  %v25712_v39 = vadd.f32 %v21119_v17, %v21118_v18 }
 0x12e   :  { %v20994_v51 = vpop.f32.mrb[29].mxu0 }
 0x12f   :  { %v20995_v32 = vadd.f32 %v20994_v51, %v20993_v49  ;;  %v20996_v14 = vpop.f32.mrb[30].mxu0  ;;  %v368_v51 = vadd.f32 %v25684_v45, %v25707_v59 }
 0x130   :  { %v20997_v52 = vpop.f32.mrb[31].mxu0 }
 0x131   :  { %v25715_v19 = vadd.f32 %v20995_v32, %v362_v12  ;;  %v20998_v48 = vadd.f32 %v20997_v52, %v20996_v14  ;;  %v21121_v29 = vpop.f32.mrb[8].mxu1  ;;  %v369_v14 = vadd.f32 %v25686_v25, %v25707_v59 }
 0x132   :  { %v21122_v37 = vpop.f32.mrb[9].mxu1 }
 0x133   :  { %v25717_v20 = vadd.f32 %v20998_v48, %v363_v28  ;;  %v25719_v24 = vadd.f32 %v21122_v37, %v21121_v29  ;;  %v21124_v46 = vpop.f32.mrb[10].mxu1 }
 0x134   :  { %v21125_v63 = vpop.f32.mrb[11].mxu1 }
 0x135   :  { %v20999_v56 = vpop.f32.mrb[32].mxu0  ;;  %v25723_v50 = vadd.f32 %v21125_v63, %v21124_v46 }
 0x136   :  { %v21000_v10 = vpop.f32.mrb[33].mxu0 }
 0x137   :  { %v21001_v47 = vadd.f32 %v21000_v10, %v20999_v56  ;;  %v21002_v3 = vpop.f32.mrb[34].mxu0 }
 0x138   :  { %v21003_v8 = vpop.f32.mrb[35].mxu0 }
 0x139   :  { %v25727_v5 = vadd.f32 %v21001_v47, %v364_v27  ;;  %v21004_v40 = vadd.f32 %v21003_v8, %v21002_v3  ;;  %v21127_v31 = vpop.f32.mrb[12].mxu1  ;;  %v370_v27 = vadd.f32 %v25688_v43, %v25707_v59 }
 0x13a   :  { %v21128_v41 = vpop.f32.mrb[13].mxu1 }
 0x13b   :  { %v25729_v42 = vadd.f32 %v21004_v40, %v365_v22  ;;  %v25731_v62 = vadd.f32 %v21128_v41, %v21127_v31  ;;  %v21130_v9 = vpop.f32.mrb[14].mxu1  ;;  %v371_v22 = vadd.f32 %v25690_v1, %v25707_v59 }
 0x13c   :  { %v21131_v33 = vpop.f32.mrb[15].mxu1 }
 0x13d   :  { %v21005_v2 = vpop.f32.mrb[36].mxu0  ;;  %v25735_v11 = vadd.f32 %v21131_v33, %v21130_v9 }
 0x13e   :  { %v21006_v6 = vpop.f32.mrb[37].mxu0 }
 0x13f   :  { %v21007_v38 = vadd.f32 %v21006_v6, %v21005_v2  ;;  %v21008_v61 = vpop.f32.mrb[38].mxu0 }
 0x140   :  { %v21009_v54 = vpop.f32.mrb[39].mxu0 }
 0x141   :  { %v25739_v16 = vadd.f32 %v21007_v38, %v366_v35  ;;  %v21010_v15 = vadd.f32 %v21009_v54, %v21008_v61  ;;  %v21133_v58 = vpop.f32.mrb[16].mxu1  ;;  %v372_v61 = vadd.f32 %v25692_v0, %v25707_v59 }
 0x142   :  { %v21134_v21 = vpop.f32.mrb[17].mxu1 }
 0x143   :  { %v25741_v13 = vadd.f32 %v21010_v15, %v367_v36  ;;  %v25743_v60 = vadd.f32 %v21134_v21, %v21133_v58  ;;  %v21136_v49 = vpop.f32.mrb[18].mxu1  ;;  %v373_v58 = vadd.f32 %v25694_v57, %v25707_v59 }
 0x144   :  { %v21137_v18 = vpop.f32.mrb[19].mxu1 }
 0x145   :  { %v21011_v7 = vpop.f32.mrb[40].mxu0  ;;  %v25747_v32 = vadd.f32 %v21137_v18, %v21136_v49 }
 0x146   :  { %v21012_v44 = vpop.f32.mrb[41].mxu0 }
 0x147   :  { %v21013_v17 = vadd.f32 %v21012_v44, %v21011_v7  ;;  %v21014_v12 = vpop.f32.mrb[42].mxu0 }
 0x148   :  { %v21015_v4 = vpop.f32.mrb[43].mxu0 }
 0x149   :  { %v25751_v52 = vadd.f32 %v21013_v17, %v368_v51  ;;  %v21016_v28 = vadd.f32 %v21015_v4, %v21014_v12  ;;  %v21139_v29 = vpop.f32.mrb[20].mxu1  ;;  %v374_v51 = vadd.f32 %v25698_v30, %v25707_v59  ;;  %v375_v4 = vadd.f32 %v25702_v53, %v25707_v59 }
 0x14a   :  { %v21140_v37 = vpop.f32.mrb[21].mxu1 }
 0x14b   :  { %v25753_v48 = vadd.f32 %v21016_v28, %v369_v14  ;;  %v25755_v46 = vadd.f32 %v21140_v37, %v21139_v29  ;;  %v21142_v10 = vpop.f32.mrb[22].mxu1 }
 0x14c   :  { %v21143_v63 = vpop.f32.mrb[23].mxu1 }
 0x14d   :  { %v21017_v56 = vpop.f32.mrb[44].mxu0  ;;  %v25759_v8 = vadd.f32 %v21143_v63, %v21142_v10 }
 0x14e   :  { %v21018_v45 = vpop.f32.mrb[45].mxu0 }
 0x14f   :  { %v21019_v47 = vadd.f32 %v21018_v45, %v21017_v56  ;;  %v21020_v3 = vpop.f32.mrb[46].mxu0 }
 0x150   :  { %v21021_v25 = vpop.f32.mrb[47].mxu0 }
 0x151   :  { %v25763_v40 = vadd.f32 %v21019_v47, %v370_v27  ;;  %v21022_v31 = vadd.f32 %v21021_v25, %v21020_v3  ;;  %v21145_v2 = vpop.f32.mrb[24].mxu1 }
 0x152   :  { %v21146_v9 = vpop.f32.mrb[25].mxu1 }
 0x153   :  { %v25765_v41 = vadd.f32 %v21022_v31, %v371_v22  ;;  %v25767_v33 = vadd.f32 %v21146_v9, %v21145_v2  ;;  %v21148_v35 = vpop.f32.mrb[26].mxu1 }
 0x154   :  { %v21149_v38 = vpop.f32.mrb[27].mxu1 }
 0x155   :  { %v21023_v6 = vpop.f32.mrb[48].mxu0  ;;  %v25771_v15 = vadd.f32 %v21149_v38, %v21148_v35 }
 0x156   :  { %v21024_v43 = vpop.f32.mrb[49].mxu0 }
 0x157   :  { %v21025_v54 = vadd.f32 %v21024_v43, %v21023_v6  ;;  %v21026_v36 = vpop.f32.mrb[50].mxu0 }
 0x158   :  { %v21027_v1 = vpop.f32.mrb[51].mxu0 }
 0x159   :  { %v25775_v21 = vadd.f32 %v21025_v54, %v372_v61  ;;  %v21028_v7 = vadd.f32 %v21027_v1, %v21026_v36 }
 0x15b   :  { %v25777_v49 = vadd.f32 %v21028_v7, %v373_v58  ;;  %v23316_v58 = vld [vmem:[%s31200_s3 + $0x40] sm:$0xff]  }
 0x15d   :  { %v21029_v44 = vpop.f32.mrb[52].mxu0 }
 0x15e   :  { %v21030_v18 = vpop.f32.mrb[53].mxu0 }
 0x15f   :  { %v21031_v17 = vadd.f32 %v21030_v18, %v21029_v44  ;;  %v21032_v0 = vpop.f32.mrb[54].mxu0 }
 0x160   :  { %v21033_v12 = vpop.f32.mrb[55].mxu0 }
 0x161   :  { %v25783_v14 = vadd.f32 %v21031_v17, %v374_v51  ;;  %v21034_v28 = vadd.f32 %v21033_v12, %v21032_v0  ;;  %v23318_v51 = vld [vmem:[%s31200_s3 + $0x48] sm:$0xff]  }
 0x163   :  { %v25785_v57 = vadd.f32 %v21034_v28, %v375_v4  ;;  %v23319_v28 = vld [vmem:[%s31200_s3 + $0x50] sm:$0xff]  }
 0x165   :  { %v21051_v29 = vpop.f32.mrb[56].mxu0 }
 0x166   :  { %v21052_v37 = vpop.f32.mrb[57].mxu0 }
 0x167   :  { %v21053_v56 = vadd.f32 %v21052_v37, %v21051_v29  ;;  %v21054_v10 = vpop.f32.mrb[58].mxu0 }
 0x168   :  { %v21055_v45 = vpop.f32.mrb[59].mxu0 }
 0x169   :  { %v1160_v63 = vadd.f32 %v21053_v56, %v25715_v19  ;;  %v21056_v27 = vadd.f32 %v21055_v45, %v21054_v10 }
 0x16b   :  { %v1513_v30 = vadd.f32 %v25696_v55, %v1160_v63  ;;  %v1161_v47 = vadd.f32 %v21056_v27, %v25717_v20  ;;  %v23321_v27 = vld [vmem:[%s31200_s3 + $0x58] sm:$0xff]  }
 0x16d   :  { %v1514_v3 = vadd.f32 %v25700_v34, %v1161_v47  ;;  %v21057_v53 = vpop.f32.mrb[60].mxu0  ;;  %v1527_v25 = vmax.f32 %v1513_v30, 0.0 }
 0x16e   :  { %v21058_v59 = vpop.f32.mrb[61].mxu0 }
 0x16f   :  { %v1528_v22 = vmax.f32 %v1514_v3, 0.0  ;;  %v21059_v31 = vadd.f32 %v21058_v59, %v21057_v53  ;;  %v21060_v2 = vpop.f32.mrb[62].mxu0  ;;  %v23323_v59 = vld [vmem:[%s31200_s3 + $0x60] sm:$0xff]  }
 0x170   :  { %v21061_v9 = vpop.f32.mrb[63].mxu0 }
 0x171   :  { %v20852_v6 = vpack.c.bf16 %v1528_v22, %v1527_v25  ;;  %v1162_v35 = vadd.f32 %v21059_v31, %v25727_v5  ;;  %v21062_v43 = vadd.f32 %v21061_v9, %v21060_v2 }
 0x173   :  { %20853 = vst [vmem:[#allocation2] sm:$0xff] %v20852_v6   ;;  %v1515_v19 = vadd.f32 %v25709_v23, %v1162_v35  ;;  %v1163_v55 = vadd.f32 %v21062_v43, %v25729_v42 }
 0x175   :  { %v1516_v20 = vadd.f32 %v25712_v39, %v1163_v55  ;;  %v21063_v38 = vpop.f32.mrb[64].mxu0  ;;  %v1529_v61 = vmax.f32 %v1515_v19, 0.0 }
 0x176   :  { %v21064_v34 = vpop.f32.mrb[65].mxu0 }
 0x177   :  { %v1530_v54 = vmax.f32 %v1516_v20, 0.0  ;;  %v21065_v36 = vadd.f32 %v21064_v34, %v21063_v38  ;;  %v21066_v1 = vpop.f32.mrb[66].mxu0 }
 0x178   :  { %v21067_v7 = vpop.f32.mrb[67].mxu0 }
 0x179   :  { %v20857_v5 = vpack.c.bf16 %v1530_v54, %v1529_v61  ;;  %v1164_v44 = vadd.f32 %v21065_v36, %v25739_v16  ;;  %v21068_v18 = vadd.f32 %v21067_v7, %v21066_v1 }
 0x17a   :  { %v25799_v23 = vld [vmem:[#allocation2] sm:$0xff]  }
 0x17b   :  { %20909 = vst [vmem:[#allocation2 + $0x8] sm:$0xff] %v20857_v5   ;;  %v1517_v39 = vadd.f32 %v25719_v24, %v1164_v44  ;;  %v1165_v42 = vadd.f32 %v21068_v18, %v25741_v13  ;;  %21726 = vmatmul.mubr.bf16.vlgmr.msra.gmra.mrb[84].mxu0 %v25799_v23 }
 0x17c   :  { %21754 = vmatpush3.bf16.msra.mxu0 %v23316_v58  ;;  %21729 = vmatprep.mubr.msk.bf16.mxu0 %vm24873_vm3, %v24872_v26 }
 0x17d   :  { %v1518_v17 = vadd.f32 %v25723_v50, %v1165_v42  ;;  %v21069_v0 = vpop.f32.mrb[68].mxu0  ;;  %21755 = vmatprep.subr.bf16.mxu0 %v24872_v26  ;;  %v1531_v12 = vmax.f32 %v1517_v39, 0.0 }
 0x17e   :  { %v21070_v16 = vpop.f32.mrb[69].mxu0 }
 0x17f   :  { %v1532_v24 = vmax.f32 %v1518_v17, 0.0  ;;  %v21071_v4 = vadd.f32 %v21070_v16, %v21069_v0  ;;  %v21072_v13 = vpop.f32.mrb[70].mxu0 }
 0x180   :  { %v21073_v29 = vpop.f32.mrb[71].mxu0  ;;  %21756 = vmatpush3.bf16.msra.mxu0 %v23318_v51 }
 0x181   :  { %v20862_v37 = vpack.c.bf16 %v1532_v24, %v1531_v12  ;;  %v1166_v50 = vadd.f32 %v21071_v4, %v25751_v52  ;;  %v21074_v56 = vadd.f32 %v21073_v29, %v21072_v13  ;;  %21757 = vmatprep.subr.bf16.mxu0 %v24872_v26  ;;  %v1613_v13 = vld [vmem:[#allocation2 + $0x34] sm:$0x7] }
 0x182   :  { %v25815_v10 = vld [vmem:[#allocation2 + $0x8] sm:$0xff]  }
 0x183   :  { %20910 = vst [vmem:[#allocation2 + $0x10] sm:$0xff] %v20862_v37   ;;  %v1519_v45 = vadd.f32 %v25731_v62, %v1166_v50  ;;  %v1167_v63 = vadd.f32 %v21074_v56, %v25753_v48  ;;  %21730 = vmatmul.mubr.bf16.gmra.mrb[88].mxu0 %v25815_v10  ;;  %v1859_v56 = vshll.u32 %v25815_v10, 16 }
 0x184   :  { %21733 = vmatprep.mubr.msk.bf16.mxu0 %vm24873_vm3, %v24872_v26  ;;  %21758 = vmatpush3.bf16.msra.mxu0 %v23319_v28 }
 0x185   :  { %v1520_v30 = vadd.f32 %v25735_v11, %v1167_v63  ;;  %v21075_v52 = vpop.f32.mrb[72].mxu0  ;;  %21759 = vmatprep.subr.bf16.mxu0 %v24872_v26  ;;  %v1533_v3 = vmax.f32 %v1519_v45, 0.0  ;;  %v1861_v63 = vrot.slane %v1859_v56, 1 }
 0x186   :  { %v21076_v47 = vpop.f32.mrb[73].mxu0 }
 0x187   :  { %v1534_v62 = vmax.f32 %v1520_v30, 0.0  ;;  %v21077_v53 = vadd.f32 %v21076_v47, %v21075_v52  ;;  %v21078_v48 = vpop.f32.mrb[74].mxu0  ;;  %v23330_v30 = vld [vmem:[%s31200_s3 + $0x80] sm:$0xff]  }
 0x188   :  { %v21079_v25 = vpop.f32.mrb[75].mxu0  ;;  %21760 = vmatpush3.bf16.msra.mxu0 %v23321_v27  ;;  %v1852_v27 = vshrl.u32 %v25799_v23, 16 }
 0x189   :  { %v20867_v22 = vpack.c.bf16 %v1534_v62, %v1533_v3  ;;  %v1168_v11 = vadd.f32 %v21077_v53, %v25763_v40  ;;  %v21080_v31 = vadd.f32 %v21079_v25, %v21078_v48  ;;  %21761 = vmatprep.subr.bf16.mxu0 %v24872_v26  ;;  %v23325_v40 = vld [vmem:[%s31200_s3 + $0x68] sm:$0xff]   ;;  %v23332_v48 = vld [vmem:[%s31200_s3 + $0x90] sm:$0xff]  }
 0x18a   :  { %v25832_v2 = vld [vmem:[#allocation2 + $0x10] sm:$0xff]   ;;  %v23331_v62 = vld [vmem:[%s31200_s3 + $0x88] sm:$0xff]  }
 0x18b   :  { %20911 = vst [vmem:[#allocation2 + $0x18] sm:$0xff] %v20867_v22   ;;  %v1521_v9 = vadd.f32 %v25743_v60, %v1168_v11  ;;  %v1169_v6 = vadd.f32 %v21080_v31, %v25765_v41  ;;  %21734 = vmatmul.mubr.bf16.gmra.mrb[92].mxu0 %v25832_v2  ;;  %v1867_v3 = vshll.u32 %v25832_v2, 16  ;;  %v23333_v11 = vld [vmem:[%s31200_s3 + $0x98] sm:$0xff]  }
 0x18c   :  { %21737 = vmatprep.mubr.msk.bf16.mxu0 %vm24873_vm3, %v24872_v26  ;;  %21762 = vmatpush3.bf16.msra.mxu0 %v23323_v59 }
 0x18d   :  { %v1522_v35 = vadd.f32 %v25747_v32, %v1169_v6  ;;  %v21081_v43 = vpop.f32.mrb[76].mxu0  ;;  %21763 = vmatprep.subr.bf16.mxu0 %v24872_v26  ;;  %v1535_v55 = vmax.f32 %v1521_v9, 0.0  ;;  %v23327_v32 = vld [vmem:[%s31200_s3 + $0x70] sm:$0xff]   ;;  %v1869_v53 = vrot.slane %v1867_v3, 1  ;;  %v23334_v9 = vld [vmem:[%s31200_s3 + $0xa0] sm:$0xff]  }
 0x18e   :  { %v21082_v19 = vpop.f32.mrb[77].mxu0 }
 0x18f   :  { %v1536_v60 = vmax.f32 %v1522_v35, 0.0  ;;  %v21083_v20 = vadd.f32 %v21082_v19, %v21081_v43  ;;  %v21084_v41 = vpop.f32.mrb[78].mxu0 }
 0x190   :  { %v21085_v38 = vpop.f32.mrb[79].mxu0  ;;  %21764 = vmatpush3.bf16.msra.mxu0 %v23325_v40  ;;  %v23335_v40 = vld [vmem:[%s31200_s3 + $0xa8] sm:$0xff]  }
 0x191   :  { %v20872_v34 = vpack.c.bf16 %v1536_v60, %v1535_v55  ;;  %v1170_v61 = vadd.f32 %v21083_v20, %v25775_v21  ;;  %v21086_v54 = vadd.f32 %v21085_v38, %v21084_v41  ;;  %21765 = vmatprep.subr.bf16.mxu0 %v24872_v26  ;;  %v23329_v21 = vld [vmem:[%s31200_s3 + $0x78] sm:$0xff]   ;;  %v23336_v55 = vld [vmem:[%s31200_s3 + $0xb0] sm:$0xff]  }
 0x192   :  { %v25849_v36 = vld [vmem:[#allocation2 + $0x18] sm:$0xff]  }
 0x193   :  { %20912 = vst [vmem:[#allocation2 + $0x20] sm:$0xff] %v20872_v34   ;;  %v1523_v1 = vadd.f32 %v25755_v46, %v1170_v61  ;;  %v1171_v58 = vadd.f32 %v21086_v54, %v25777_v49  ;;  %21738 = vmatmul.mubr.bf16.gmra.mrb[96].mxu0 %v25849_v36  ;;  %v1875_v22 = vshll.u32 %v25849_v36, 16 }
 0x194   :  { %21741 = vmatprep.mubr.msk.bf16.mxu0 %vm24873_vm3, %v24872_v26  ;;  %21766 = vmatpush3.bf16.msra.mxu0 %v23327_v32  ;;  %v23337_v32 = vld [vmem:[%s31200_s3 + $0xb8] sm:$0xff]  }
 0x195   :  { %v1524_v7 = vadd.f32 %v25759_v8, %v1171_v58  ;;  %v21087_v5 = vpop.f32.mrb[80].mxu0  ;;  %21767 = vmatprep.subr.bf16.mxu0 %v24872_v26  ;;  %v1537_v18 = vmax.f32 %v1523_v1, 0.0  ;;  %v1877_v31 = vrot.slane %v1875_v22, 1  ;;  %v23355_v1 = vld [vmem:[%s31202_s5] sm:$0xff]   ;;  %v23356_v58 = vld [vmem:[%s31202_s5 + $0x8] sm:$0xff]  }
 0x196   :  { %v21088_v44 = vpop.f32.mrb[81].mxu0  ;;  %21886 = vmatpush3.bf16.msra.mxu1 %v23355_v1 }
 0x197   :  { %v1538_v46 = vmax.f32 %v1524_v7, 0.0  ;;  %v21089_v39 = vadd.f32 %v21088_v44, %v21087_v5  ;;  %v21090_v49 = vpop.f32.mrb[82].mxu0  ;;  %21887 = vmatprep.subr.bf16.mxu1 %v24872_v26  ;;  %v23357_v44 = vld [vmem:[%s31202_s5 + $0x10] sm:$0xff]  }
 0x198   :  { %v21091_v42 = vpop.f32.mrb[83].mxu0  ;;  %21768 = vmatpush3.bf16.msra.mxu0 %v23329_v21  ;;  %v25955_v21 = vld [vmem:[#allocation2 + $0x8] sm:$0xf] }
 0x199   :  { %v20877_v51 = vpack.c.bf16 %v1538_v46, %v1537_v18  ;;  %v1172_v8 = vadd.f32 %v21089_v39, %v25783_v14  ;;  %v21092_v17 = vadd.f32 %v21091_v42, %v21090_v49  ;;  %21797 = vmatprep.subr.bf16.mxu0 %v24872_v26  ;;  %v25960_v46 = vld [vmem:[#allocation2 + $0xc] sm:$0xff]   ;;  %v2061_v39 = vld [vmem:[#allocation2 + $0x4] sm:$0xe] }
 0x19a   :  { %v25863_v0 = vld [vmem:[#allocation2 + $0x20] sm:$0xff]   ;;  %21888 = vmatpush3.bf16.msra.mxu1 %v23356_v58  ;;  %v19075_v42 = vcombine.low %v2061_v39, %v25955_v21 }
 0x19b   :  { %20913 = vst [vmem:[#allocation2 + $0x28] sm:$0xff] %v20877_v51   ;;  %v1173_v16 = vadd.f32 %v21092_v17, %v25785_v57  ;;  %v1525_v12 = vadd.f32 %v25767_v33, %v1172_v8  ;;  %21742 = vmatmul.mubr.bf16.gmra.mrb[100].mxu0 %v25863_v0  ;;  %v1883_v43 = vshll.u32 %v25863_v0, 16  ;;  %v1887_v38 = vshrl.u32 %v25863_v0, 16  ;;  %21889 = vmatprep.subr.bf16.mxu1 %v24872_v26  ;;  %v25980_v56 = vld [vmem:[#allocation2 + $0x1c] sm:$0xff]  }
 0x19c   :  { %21745 = vmatprep.mubr.msk.bf16.mxu0 %vm24873_vm3, %v24872_v26  ;;  %v2133_v51 = vshrl.u32 %v25960_v46, 16  ;;  %v2136_v8 = vshll.u32 %v25960_v46, 16  ;;  %v2125_v17 = vshrl.u32 %v19075_v42, 16  ;;  %v2128_v0 = vshll.u32 %v19075_v42, 16 }
 0x19d   :  { %v1539_v4 = vmax.f32 %v1525_v12, 0.0  ;;  %v1526_v14 = vadd.f32 %v25771_v15, %v1173_v16  ;;  %v1854_v15 = vshll.u32 %v25799_v23, 16  ;;  %v1863_v23 = vshrl.u32 %v25815_v10, 16  ;;  %v25970_v16 = vld [vmem:[#allocation2 + $0x14] sm:$0xff]  }
 0x19e   :  { %v1871_v10 = vshrl.u32 %v25832_v2, 16  ;;  %v1879_v2 = vshrl.u32 %v25849_v36, 16  ;;  %v1885_v19 = vrot.slane %v1883_v43, 1  ;;  %21890 = vmatpush3.bf16.msra.mxu1 %v23357_v44  ;;  %v2154_v3 = vshll.u32 %v25980_v56, 16 }
 0x19f   :  { %v20787_v28 = vpack.c.bf16 %v1539_v4, %v1539_v4  ;;  %v1540_v29 = vmax.f32 %v1526_v14, 0.0  ;;  %v1856_v45 = vrot.slane %v1854_v15, 1  ;;  %v1865_v59 = vor.u32 %v1863_v23, %v1861_v63  ;;  %21891 = vmatprep.subr.bf16.mxu1 %v24872_v26 }
 0x1a0   :  { %v1873_v6 = vor.u32 %v1871_v10, %v1869_v53  ;;  %v1881_v60 = vor.u32 %v1879_v2, %v1877_v31  ;;  %v1889_v61 = vor.u32 %v1887_v38, %v1885_v19  ;;  %v2135_v4 = vrot.slane %v2133_v51, 1 }
 0x1a1   :  { %1609 = vst [vmem:[#allocation2 + $0x30] sm:$0xf] %v20787_v28  ;;  %v20788_v37 = vpack.c.bf16 %v1540_v29, %v1540_v29  ;;  %v1857_v52 = vor.u32 %v1856_v45, %v1852_v27  ;;  %v1870_v25 = vsel %vm409_vm1, %v1865_v59, %v1869_v53  ;;  %v2138_v14 = vrot.slane %v2136_v8, 2  ;;  %v23342_v27 = vld [vmem:[%s31200_s3 + $0xc8] sm:$0xff]  }
 0x1a2   :  { %v25876_v57 = vld [vmem:[#allocation2 + $0x28] sm:$0xff]   ;;  %v1878_v35 = vsel %vm409_vm1, %v1873_v6, %v1877_v31  ;;  %v1886_v20 = vsel %vm409_vm1, %v1881_v60, %v1885_v19  ;;  %v2130_v28 = vrot.slane %v2128_v0, 2  ;;  %v2156_v59 = vrot.slane %v2154_v3, 2 }
 0x1a3   :  { %v1614_v33 = vsel %vm25868_vm6, %v20788_v37, %v1613_v13  ;;  %21746 = vmatmul.mubr.bf16.gmra.mrb[104].mxu0 %v25876_v57  ;;  %v1862_v47 = vsel %vm409_vm1, %v1857_v52, %v1861_v63  ;;  %v1891_v41 = vshll.u32 %v25876_v57, 16  ;;  %v1895_v7 = vshrl.u32 %v25876_v57, 16  ;;  %v23340_v37 = vld [vmem:[%s31200_s3 + $0xc0] sm:$0xff]   ;;  %v23343_v52 = vld [vmem:[%s31200_s3 + $0xd0] sm:$0xff]   ;;  %v23349_v60 = vld [vmem:[%s31200_s3 + $0xe8] sm:$0xff]  }
 0x1a4   :  { %1615 = vst [vmem:[#allocation2 + $0x34] sm:$0x7] %v1614_v33  ;;  %21749 = vmatprep.mubr.msk.bf16.mxu0 %vm24873_vm3, %v24872_v26  ;;  %v2127_v13 = vrot.slane %v2125_v17, 1  ;;  %v2139_v29 = vor.u32 %v2138_v14, %v2135_v4  ;;  %v2142_v57 = vshrl.u32 %v25970_v16, 16  ;;  %v2145_v33 = vshll.u32 %v25970_v16, 16 }
 0x1a5   :  { %v1893_v34 = vrot.slane %v1891_v41, 1 }
 0x1a6   :  { %v2131_v15 = vor.u32 %v2130_v28, %v2127_v13  ;;  %v2144_v45 = vrot.slane %v2142_v57, 1  ;;  %v2147_v63 = vrot.slane %v2145_v33, 2 }
 0x1a7   :  { %v1894_v54 = vsel %vm409_vm1, %v1889_v61, %v1893_v34  ;;  %v1897_v18 = vor.u32 %v1895_v7, %v1893_v34  ;;  %v23351_v61 = vld [vmem:[%s31200_s3 + $0xf0] sm:$0xff]  }
 0x1a8   :  { %v25884_v50 = vld [vmem:[#allocation2 + $0x30] ss:$0 sps:$4 sm:$0x11]  }
 0x1a9   :  { %v1899_v36 = vshll.u32 %v25884_v50, 16  ;;  %v1903_v12 = vshrl.u32 %v25884_v50, 16  ;;  %v25997_v23 = vld [vmem:[#allocation2 + $0x2c] sm:$0xff]  }
 0x1aa   :  { %v2169_v6 = vshrl.u32 %v25997_v23, 16 }
 0x1ab   :  { %21750 = vmatmul.mubr.bf16.gmra.mrb[108].mxu0 %v25884_v50  ;;  %v1901_v5 = vrot.slane %v1899_v36, 1  ;;  %v2140_v50 = vsel %vm836_vm2, %v2131_v15, %v2139_v29  ;;  %v23350_v22 = vld [vmem:[#allocation2 + $0x34] ss:$0 sps:$4 sm:$0x33]   ;;  %v23352_v36 = vld [vmem:[%s31200_s3 + $0xf8] sm:$0xff]  }
 0x1ac   :  { %21769 = vmatprep.mubr.msk.bf16.mxu0 %vm24873_vm3, %v24872_v26  ;;  %v2178_v43 = vshrl.u32 %v23350_v22, 16 }
 0x1ad   :  { %v1902_v49 = vsel %vm409_vm1, %v1897_v18, %v1901_v5 }
 0x1b3   :  { %21770 = vmatmul.mubr.bf16.vlgmr.msra.gmra.mrb[84].mxu0 %v1862_v47  ;;  %v2151_v47 = vshrl.u32 %v25980_v56, 16 }
 0x1b4   :  { %21798 = vmatpush3.bf16.msra.mxu0 %v23330_v30  ;;  %21773 = vmatprep.mubr.msk.bf16.mxu0 %vm24873_vm3, %v24872_v26  ;;  %v2148_v30 = vor.u32 %v2147_v63, %v2144_v45 }
 0x1b5   :  { %21799 = vmatprep.subr.bf16.mxu0 %v24872_v26 }
 0x1b6   :  { %v2149_v53 = vsel %vm836_vm2, %v2139_v29, %v2148_v30 }
 0x1b8   :  { %21800 = vmatpush3.bf16.msra.mxu0 %v23331_v62  ;;  %v25994_v62 = vld [vmem:[#allocation2 + $0x24] sm:$0xff]  }
 0x1b9   :  { %21801 = vmatprep.subr.bf16.mxu0 %v24872_v26  ;;  %v2160_v10 = vshrl.u32 %v25994_v62, 16  ;;  %v2163_v31 = vshll.u32 %v25994_v62, 16 }
 0x1bb   :  { %21774 = vmatmul.mubr.bf16.gmra.mrb[88].mxu0 %v1870_v25  ;;  %v23345_v25 = vld [vmem:[%s31200_s3 + $0xd8] sm:$0xff]   ;;  %v2162_v19 = vrot.slane %v2160_v10, 1 }
 0x1bc   :  { %21777 = vmatprep.mubr.msk.bf16.mxu0 %vm24873_vm3, %v24872_v26  ;;  %21802 = vmatpush3.bf16.msra.mxu0 %v23332_v48  ;;  %v2153_v48 = vrot.slane %v2151_v47, 1 }
 0x1bd   :  { %21803 = vmatprep.subr.bf16.mxu0 %v24872_v26 }
 0x1c0   :  { %21804 = vmatpush3.bf16.msra.mxu0 %v23333_v11  ;;  %v2157_v11 = vor.u32 %v2156_v59, %v2153_v48 }
 0x1c1   :  { %21805 = vmatprep.subr.bf16.mxu0 %v24872_v26 }
 0x1c2   :  { %v2158_v2 = vsel %vm836_vm2, %v2148_v30, %v2157_v11 }
 0x1c3   :  { %21778 = vmatmul.mubr.bf16.gmra.mrb[92].mxu0 %v1878_v35  ;;  %v2172_v35 = vshll.u32 %v25997_v23, 16 }
 0x1c4   :  { %21781 = vmatprep.mubr.msk.bf16.mxu0 %vm24873_vm3, %v24872_v26  ;;  %21806 = vmatpush3.bf16.msra.mxu0 %v23334_v9  ;;  %v23347_v9 = vld [vmem:[%s31200_s3 + $0xe0] sm:$0xff]  }
 0x1c5   :  { %21807 = vmatprep.subr.bf16.mxu0 %v24872_v26  ;;  %v2174_v41 = vrot.slane %v2172_v35, 2 }
 0x1c8   :  { %21808 = vmatpush3.bf16.msra.mxu0 %v23335_v40  ;;  %v2181_v40 = vshll.u32 %v23350_v22, 16 }
 0x1c9   :  { %21809 = vmatprep.subr.bf16.mxu0 %v24872_v26 }
 0x1ca   :  { %v2183_v38 = vrot.slane %v2181_v40, 2 }
 0x1cb   :  { %21782 = vmatmul.mubr.bf16.gmra.mrb[96].mxu0 %v1886_v20  ;;  %v2171_v20 = vrot.slane %v2169_v6, 1 }
 0x1cc   :  { %21785 = vmatprep.mubr.msk.bf16.mxu0 %vm24873_vm3, %v24872_v26  ;;  %21810 = vmatpush3.bf16.msra.mxu0 %v23336_v55  ;;  %v2165_v55 = vrot.slane %v2163_v31, 2 }
 0x1cd   :  { %21811 = vmatprep.subr.bf16.mxu0 %v24872_v26  ;;  %v2175_v1 = vor.u32 %v2174_v41, %v2171_v20 }
 0x1ce   :  { %v2166_v34 = vor.u32 %v2165_v55, %v2162_v19 }
 0x1d0   :  { %21812 = vmatpush3.bf16.msra.mxu0 %v23337_v32  ;;  %v2180_v32 = vrot.slane %v2178_v43, 1  ;;  %v2176_v58 = vsel %vm836_vm2, %v2166_v34, %v2175_v1 }
 0x1d1   :  { %21841 = vmatprep.subr.bf16.mxu0 %v24872_v26 }
 0x1d2   :  { %v2184_v7 = vor.u32 %v2183_v38, %v2180_v32 }
 0x1d3   :  { %21786 = vmatmul.mubr.bf16.gmra.mrb[100].mxu0 %v1894_v54  ;;  %v2167_v54 = vsel %vm836_vm2, %v2157_v11, %v2166_v34 }
 0x1d4   :  { %21789 = vmatprep.mubr.msk.bf16.mxu0 %vm24873_vm3, %v24872_v26  ;;  %v2185_v5 = vsel %vm836_vm2, %v2175_v1, %v2184_v7 }
 0x1db   :  { %21790 = vmatmul.mubr.bf16.gmra.mrb[104].mxu0 %v1902_v49 }
 0x1dc   :  { %21793 = vmatprep.mubr.msk.bf16.mxu0 %vm24873_vm3, %v24872_v26 }
 0x1e3   :  { %21794 = vmatmul.mubr.bf16.gmra.mrb[108].mxu0 %v1903_v12 }
 0x1e4   :  { %21813 = vmatprep.mubr.msk.bf16.mxu0 %vm24873_vm3, %v24872_v26 }
 0x1eb   :  { %21814 = vmatmul.mubr.bf16.vlgmr.msra.gmra.mrb[84].mxu0 %v2140_v50 }
 0x1ec   :  { %21842 = vmatpush3.bf16.msra.mxu0 %v23340_v37  ;;  %21817 = vmatprep.mubr.msk.bf16.mxu0 %vm24873_vm3, %v24872_v26 }
 0x1ed   :  { %21843 = vmatprep.subr.bf16.mxu0 %v24872_v26 }
 0x1f0   :  { %21844 = vmatpush3.bf16.msra.mxu0 %v23342_v27 }
 0x1f1   :  { %21845 = vmatprep.subr.bf16.mxu0 %v24872_v26 }
 0x1f3   :  { %21818 = vmatmul.mubr.bf16.gmra.mrb[88].mxu0 %v2149_v53 }
 0x1f4   :  { %21821 = vmatprep.mubr.msk.bf16.mxu0 %vm24873_vm3, %v24872_v26  ;;  %21846 = vmatpush3.bf16.msra.mxu0 %v23343_v52 }
 0x1f5   :  { %21847 = vmatprep.subr.bf16.mxu0 %v24872_v26 }
 0x1f8   :  { %21848 = vmatpush3.bf16.msra.mxu0 %v23345_v25 }
 0x1f9   :  { %21849 = vmatprep.subr.bf16.mxu0 %v24872_v26 }
 0x1fb   :  { %21822 = vmatmul.mubr.bf16.gmra.mrb[92].mxu0 %v2158_v2 }
 0x1fc   :  { %21825 = vmatprep.mubr.msk.bf16.mxu0 %vm24873_vm3, %v24872_v26  ;;  %21850 = vmatpush3.bf16.msra.mxu0 %v23347_v9 }
 0x1fd   :  { %21851 = vmatprep.subr.bf16.mxu0 %v24872_v26 }
 0x200   :  { %21852 = vmatpush3.bf16.msra.mxu0 %v23349_v60 }
 0x201   :  { %21853 = vmatprep.subr.bf16.mxu0 %v24872_v26 }
 0x203   :  { %21826 = vmatmul.mubr.bf16.gmra.mrb[96].mxu0 %v2167_v54 }
 0x204   :  { %21829 = vmatprep.mubr.msk.bf16.mxu0 %vm24873_vm3, %v24872_v26  ;;  %21854 = vmatpush3.bf16.msra.mxu0 %v23351_v61 }
 0x205   :  { %21855 = vmatprep.subr.bf16.mxu0 %v24872_v26 }
 0x208   :  { %21856 = vmatpush3.bf16.msra.mxu0 %v23352_v36 }
 0x20b   :  { %21830 = vmatmul.mubr.bf16.gmra.mrb[100].mxu0 %v2176_v58 }
 0x20c   :  { %21833 = vmatprep.mubr.msk.bf16.mxu0 %vm24873_vm3, %v24872_v26 }
 0x20d   :  { %16 = vsyncpa [#allocation7], 0  ;;  %v2342_v44 = vld [vmem:[#allocation2 + $0x4] sm:$0xc]  ;;  %v2368_v39 = vrot.slane %v25960_v46, 2  ;;  %v2370_v51 = vrot.slane %v25970_v16, 2 }
 0x20e   :  { %v19106_v18 = vcombine.low %v2342_v44, %v25955_v21  ;;  %v2372_v17 = vrot.slane %v25980_v56, 2  ;;  %v2374_v46 = vrot.slane %v25994_v62, 2  ;;  %v2376_v16 = vrot.slane %v25997_v23, 2  ;;  %v23354_v4 = vld [vmem:[#allocation2 + $0x34] ss:$0 sps:$4 sm:$0x77]  }
 0x20f   :  { %v2371_v8 = vsel %vm1283_vm0, %v2368_v39, %v2370_v51  ;;  %v2378_v14 = vrot.slane %v23354_v4, 2  ;;  %v23358_v28 = vld [vmem:[%s31202_s5 + $0x18] sm:$0xff]   ;;  %v23376_v29 = vld [vmem:[%s31198_s1 + $0x40] sm:$0xff]   ;;  %v23378_v57 = vld [vmem:[%s31198_s1 + $0x48] sm:$0xff]   ;;  %vm2602_vm7 = vcmask 519168   ;;  %vm2688_vm8 = vcmask 523264  }
 0x210   :  { %v2367_v49 = vrot.slane %v19106_v18, 2  ;;  %v2373_v21 = vsel %vm1283_vm0, %v2370_v51, %v2372_v17  ;;  %v2375_v0 = vsel %vm1283_vm0, %v2372_v17, %v2374_v46  ;;  %v2377_v12 = vsel %vm1283_vm0, %v2374_v46, %v2376_v16  ;;  %21892 = vmatpush3.bf16.msra.mxu1 %v23358_v28  ;;  %v23377_v37 = vld [vmem:[%s31198_s1] sm:$0xff]   ;;  %21292 = vmatprep.subr.bf16.mxu0 %v23376_v29  ;;  %v23379_v33 = vld [vmem:[%s31198_s1 + $0x8] sm:$0xff]   ;;  %v23381_v27 = vld [vmem:[%s31198_s1 + $0x50] sm:$0xff]   ;;  %s24876_s23 = smov 64  }
 0x211   :  { %v2379_v13 = vsel %vm1283_vm0, %v2376_v16, %v2378_v14  ;;  %21913 = vmatprep.subr.bf16.mxu1 %v24872_v26  ;;  %v26083_v15 = vld [vmem:[%s31201_s4] ss:$0 sm:$0xff]  ;;  %v23382_v3 = vld [vmem:[%s31198_s1 + $0x10] sm:$0xff]   ;;  %v23383_v62 = vld [vmem:[%s31198_s1 + $0x58] sm:$0xff]   ;;  %vm2969_vm9 = vcmask 1046528   ;;  %vm2615_vm10 = vcmask 516096  }
 0x212   :  { %v2369_v42 = vsel %vm1283_vm0, %v2367_v49, %v2368_v39  ;;  %v23384_v48 = vld [vmem:[%s31198_s1 + $0x18] sm:$0xff]   ;;  %v23387_v31 = vld [vmem:[%s31198_s1 + $0x60] sm:$0xff]   ;;  %v23390_v40 = vld [vmem:[%s31198_s1 + $0x68] sm:$0xff]   ;;  %vm2616_vm11 = vsmask.f32 256  ;;  %vm3664_vm14 = vcmask 1044480  }
 0x213   :  { %21834 = vmatmul.mubr.bf16.gmra.mrb[104].mxu0 %v2185_v5  ;;  %v23389_v43 = vld [vmem:[%s31198_s1 + $0x20] sm:$0xff]   ;;  %v23391_v55 = vld [vmem:[%s31198_s1 + $0x28] sm:$0xff]   ;;  %v23393_v1 = vld [vmem:[%s31198_s1 + $0x70] sm:$0xff]   ;;  %vm3468_vm12 = vsmask.f32 5376 }
 0x214   :  { %21837 = vmatprep.mubr.msk.bf16.mxu0 %vm24873_vm3, %v24872_v26  ;;  %v23360_v38 = vld [vmem:[%s31202_s5 + $0x20] sm:$0xff]   ;;  %v23394_v44 = vld [vmem:[%s31198_s1 + $0x30] sm:$0xff]   ;;  %v23362_v18 = vld [vmem:[%s31202_s5 + $0x28] sm:$0xff]   ;;  %vm3805_vm15 = vsmask.f32 4352 }
 0x215   :  { %v23396_v39 = vld [vmem:[%s31198_s1 + $0x78] sm:$0xff]   ;;  %vm26304_vm13 = vmand %vm2615_vm10, %vm2616_vm11 }
 0x21b   :  { %21838 = vmatmul.mubr.bf16.gmra.mrb[108].mxu0 %v2180_v32 }
 0x21c   :  { %21857 = vmatprep.mubr.msk.bf16.mxu0 %vm24873_vm3, %v24872_v26 }
 0x223   :  { %21858 = vmatmul.mubr.bf16.vlgmr.msra.gmra.mrb[84].mxu0 %v2369_v42 }
 0x224   :  { %21861 = vmatprep.mubr.msk.bf16.mxu0 %vm24873_vm3, %v24872_v26  ;;  %21293 = vmatpush3.bf16.msra.mxu0 %v23377_v37 }
 0x225   :  { %21294 = vmatprep.subr.bf16.mxu0 %v23378_v57 }
 0x228   :  { %21295 = vmatpush3.bf16.msra.mxu0 %v23379_v33 }
 0x229   :  { %21296 = vmatprep.subr.bf16.mxu0 %v23381_v27  ;;  %v26184_v27 = vld [vmem:[%s31197_s0 + $0x98] sm:$0xff] }
 0x22b   :  { %21862 = vmatmul.mubr.bf16.gmra.mrb[88].mxu0 %v2371_v8  ;;  %v26144_v8 = vld [vmem:[%s31197_s0 + $0x84] ss:$8 sps:$4 sm:$0xff]  }
 0x22c   :  { %21865 = vmatprep.mubr.msk.bf16.mxu0 %vm24873_vm3, %v24872_v26  ;;  %21297 = vmatpush3.bf16.msra.mxu0 %v23382_v3 }
 0x22d   :  { %21298 = vmatprep.subr.bf16.mxu0 %v23383_v62 }
 0x230   :  { %21299 = vmatpush3.bf16.msra.mxu0 %v23384_v48 }
 0x231   :  { %21300 = vmatprep.subr.bf16.mxu0 %v23387_v31 }
 0x233   :  { %21866 = vmatmul.mubr.bf16.gmra.mrb[92].mxu0 %v2373_v21  ;;  %v23397_v21 = vld [vmem:[%s31198_s1 + $0x38] sm:$0xff]  }
 0x234   :  { %21869 = vmatprep.mubr.msk.bf16.mxu0 %vm24873_vm3, %v24872_v26  ;;  %21301 = vmatpush3.bf16.msra.mxu0 %v23389_v43 }
 0x235   :  { %21302 = vmatprep.subr.bf16.mxu0 %v23390_v40  ;;  %v26219_v40 = vld [vmem:[%s31197_s0 + $0xa0] sm:$0xff] }
 0x238   :  { %21303 = vmatpush3.bf16.msra.mxu0 %v23391_v55 }
 0x239   :  { %21304 = vmatprep.subr.bf16.mxu0 %v23393_v1 }
 0x23b   :  { %21870 = vmatmul.mubr.bf16.gmra.mrb[96].mxu0 %v2375_v0  ;;  %v23364_v0 = vld [vmem:[%s31202_s5 + $0x30] sm:$0xff]  }
 0x23c   :  { %21873 = vmatprep.mubr.msk.bf16.mxu0 %vm24873_vm3, %v24872_v26  ;;  %21305 = vmatpush3.bf16.msra.mxu0 %v23394_v44 }
 0x23d   :  { %21306 = vmatprep.subr.bf16.mxu0 %v23396_v39 }
 0x240   :  { %21307 = vmatpush3.bf16.msra.mxu0 %v23397_v21  ;;  %v26263_v21 = vld [vmem:[%s31197_s0 + $0xb0] sm:$0xff] }
 0x243   :  { %21874 = vmatmul.mubr.bf16.gmra.mrb[100].mxu0 %v2377_v12 }
 0x244   :  { %21877 = vmatprep.mubr.msk.bf16.mxu0 %vm24873_vm3, %v24872_v26 }
 0x24b   :  { %21878 = vmatmul.mubr.bf16.gmra.mrb[104].mxu0 %v2379_v13  ;;  %v26162_v13 = vld [vmem:[%s31197_s0 + $0x80] ss:$8 sps:$4 sm:$0xff]  }
 0x24c   :  { %21881 = vmatprep.mubr.msk.bf16.mxu0 %vm24873_vm3, %v24872_v26 }
 0x253   :  { %21882 = vmatmul.mubr.bf16.gmra.mrb[108].mxu0 %v2378_v14 }
 0x254   :  { %4445 = vmatprep.mubr.bf16.mxu0 %v26144_v8 }
 0x25b   :  { %4446 = vmatmul.mubr.bf16.vlgmr.msra.gmra.mrb[112].mxu0 %v26162_v13 }
 0x2f6   :  { %v2469_v56 = vpop.f32.mrb[84].mxu0 }
 0x2f7   :  { %v22565_v50 = vadd.f32 %v26083_v15, %v2469_v56  ;;  %v21859_v45 = vpop.f32.mrb[85].mxu0 }
 0x2f8   :  { %v2472_v63 = vpop.f32.mrb[86].mxu0 }
 0x2f9   :  { %v2536_v30 = vmax.f32 %v22565_v50, 0.0  ;;  %v22566_v52 = vadd.f32 %v26083_v15, %v2472_v63  ;;  %v21860_v47 = vpop.f32.mrb[87].mxu0  ;;  %v23366_v50 = vld [vmem:[%s31202_s5 + $0x38] sm:$0xff]   ;;  %v26179_v63 = vld [vmem:[%s31197_s0 + $0x90] sm:$0xff] }
 0x2fa   :  { %v26190_v47 = vcombine.high %v26179_v63, %v26184_v27 }
 0x2fb   :  { %v20789_v23 = vpack.c.bf16 %v2536_v30, %v2536_v30  ;;  %v2537_v53 = vmax.f32 %v22566_v52, 0.0 }
 0x2fc   :  { %4453 = vmatprep.mubr.bf16.mxu0 %v26190_v47 }
 0x2fd   :  { %2603 = vst.msk [vmem:[#allocation3] sm:$0xf] %vm2602_vm7, %v20789_v23  ;;  %v20790_v59 = vpack.c.bf16 %v2537_v53, %v2537_v53 }
 0x2fe   :  { %v2477_v25 = vpop.f32.mrb[88].mxu0 }
 0x2ff   :  { %2604 = vst.msk [vmem:[#allocation3 + $0x4] sm:$0xf] %vm2602_vm7, %v20790_v59  ;;  %v22567_v22 = vadd.f32 %v26083_v15, %v2477_v25  ;;  %v21863_v11 = vpop.f32.mrb[89].mxu0 }
 0x300   :  { %v2480_v10 = vpop.f32.mrb[90].mxu0 }
 0x301   :  { %v2538_v9 = vmax.f32 %v22567_v22, 0.0  ;;  %v22568_v6 = vadd.f32 %v26083_v15, %v2480_v10  ;;  %v21864_v35 = vpop.f32.mrb[91].mxu0 }
 0x302   :  { %v26209_v35 = vcombine.low %v26179_v63, %v26184_v27 }
 0x303   :  { %v20791_v2 = vpack.c.bf16 %v2538_v9, %v2538_v9  ;;  %v2539_v19 = vmax.f32 %v22568_v6, 0.0 }
 0x304   :  { %v2621_v41 = vld [vmem:[#allocation3] sm:$0xf]  ;;  %4454 = vmatmul.mubr.bf16.gmra.mrb[116].mxu0 %v26209_v35 }
 0x305   :  { %2605 = vst.msk [vmem:[#allocation3 + $0x8] sm:$0xf] %vm2602_vm7, %v20791_v2  ;;  %v20792_v60 = vpack.c.bf16 %v2539_v19, %v2539_v19  ;;  %v2952_v51 = vld [vmem:[#allocation3] sm:$0xe]  ;;  %v26224_v2 = vld [vmem:[%s31197_s0 + $0xa8] sm:$0xff] }
 0x306   :  { %v2485_v20 = vpop.f32.mrb[92].mxu0  ;;  %v2622_v32 = vld [vmem:[#allocation3 + $0x4] sm:$0xf] }
 0x307   :  { %2606 = vst.msk [vmem:[#allocation3 + $0xc] sm:$0xf] %vm2602_vm7, %v20792_v60  ;;  %v22569_v34 = vadd.f32 %v26083_v15, %v2485_v20  ;;  %v21867_v61 = vpop.f32.mrb[93].mxu0  ;;  %v26121_v54 = vcombine.low %v2621_v41, %v2622_v32  ;;  %v19168_v17 = vcombine.low %v2952_v51, %v2622_v32  ;;  %v26233_v41 = vcombine.high %v26219_v40, %v26224_v2 }
 0x308   :  { %v2488_v36 = vpop.f32.mrb[94].mxu0  ;;  %v26253_v51 = vcombine.low %v26219_v40, %v26224_v2 }
 0x309   :  { %v2540_v58 = vmax.f32 %v22569_v34, 0.0  ;;  %v22570_v7 = vadd.f32 %v26083_v15, %v2488_v36  ;;  %v21868_v5 = vpop.f32.mrb[95].mxu0  ;;  %21894 = vmatmul.mubr.msk.bf16.vlgmr.msra.gmra.mrb[28].mxu1 %vm2688_vm8, %v26121_v54  ;;  %v2970_v29 = vrot.slane %v19168_v17, 1  ;;  %4461 = vmatprep.mubr.bf16.mxu0 %v26233_v41 }
 0x30a   :  { %21914 = vmatpush3.bf16.msra.mxu1 %v23360_v38  ;;  %21897 = vmatprep.mubr.msk.bf16.mxu1 %vm24873_vm3, %v24872_v26 }
 0x30b   :  { %v20793_v49 = vpack.c.bf16 %v2540_v58, %v2540_v58  ;;  %v2541_v42 = vmax.f32 %v22570_v7, 0.0  ;;  %21915 = vmatprep.subr.bf16.mxu1 %v24872_v26 }
 0x30c   :  { %4462 = vmatmul.mubr.bf16.gmra.mrb[120].mxu0 %v26253_v51 }
 0x30d   :  { %2607 = vst.msk [vmem:[#allocation3 + $0x10] sm:$0xf] %vm2602_vm7, %v20793_v49  ;;  %v20794_v46 = vpack.c.bf16 %v2541_v42, %v2541_v42 }
 0x30e   :  { %v2493_v16 = vpop.f32.mrb[96].mxu0  ;;  %v26154_v12 = vld [vmem:[#allocation3 + $0x8] sm:$0xff]   ;;  %21916 = vmatpush3.bf16.msra.mxu1 %v23362_v18 }
 0x30f   :  { %2608 = vst.msk [vmem:[#allocation3 + $0x14] sm:$0xf] %vm2602_vm7, %v20794_v46  ;;  %v22571_v4 = vadd.f32 %v26083_v15, %v2493_v16  ;;  %v21871_v14 = vpop.f32.mrb[97].mxu0  ;;  %21917 = vmatprep.subr.bf16.mxu1 %v24872_v26  ;;  %v2971_v37 = vrot.slane %v26154_v12, 1  ;;  %v26268_v46 = vld [vmem:[%s31197_s0 + $0xb8] sm:$0xff] }
 0x310   :  { %v2496_v28 = vpop.f32.mrb[98].mxu0 }
 0x311   :  { %v2542_v57 = vmax.f32 %v22571_v4, 0.0  ;;  %v22572_v33 = vadd.f32 %v26083_v15, %v2496_v28  ;;  %v21872_v56 = vpop.f32.mrb[99].mxu0  ;;  %21898 = vmatmul.mubr.msk.bf16.gmra.mrb[32].mxu1 %vm2688_vm8, %v26154_v12  ;;  %v26174_v45 = vsel %vm2969_vm9, %v2970_v29, %v2971_v37  ;;  %v26273_v4 = vcombine.high %v26263_v21, %v26268_v46 }
 0x312   :  { %21901 = vmatprep.mubr.msk.bf16.mxu1 %vm24873_vm3, %v24872_v26  ;;  %21918 = vmatpush3.bf16.msra.mxu1 %v23364_v0 }
 0x313   :  { %v20795_v30 = vpack.c.bf16 %v2542_v57, %v2542_v57  ;;  %v2543_v52 = vmax.f32 %v22572_v33, 0.0  ;;  %21919 = vmatprep.subr.bf16.mxu1 %v24872_v26  ;;  %v2798_v57 = vshll.u32 %v26121_v54, 16  ;;  %4469 = vmatprep.mubr.bf16.mxu0 %v26273_v4 }
 0x314   :  { %v26192_v3 = vld [vmem:[#allocation3 + $0xc] sm:$0xff]  }
 0x315   :  { %2609 = vst.msk [vmem:[#allocation3 + $0x18] sm:$0xf] %vm2602_vm7, %v20795_v30  ;;  %v20796_v62 = vpack.c.bf16 %v2543_v52, %v2543_v52  ;;  %v3154_v48 = vshrl.u32 %v26192_v3, 16  ;;  %v3157_v10 = vshll.u32 %v26192_v3, 16 }
 0x316   :  { %v2501_v23 = vpop.f32.mrb[100].mxu0  ;;  %v26196_v53 = vld [vmem:[#allocation3 + $0x10] sm:$0xff]   ;;  %21920 = vmatpush3.bf16.msra.mxu1 %v23366_v50 }
 0x317   :  { %2610 = vst.msk [vmem:[#allocation3 + $0x1c] sm:$0xf] %vm2602_vm7, %v20796_v62  ;;  %v22573_v59 = vadd.f32 %v26083_v15, %v2501_v23  ;;  %v21875_v25 = vpop.f32.mrb[101].mxu0  ;;  %21941 = vmatprep.subr.bf16.mxu1 %v24872_v26  ;;  %v2973_v11 = vrot.slane %v26196_v53, 1  ;;  %v3477_v19 = vrot.slane %v3154_v48, 2  ;;  %v3478_v32 = vrot.slane %v3157_v10, 3 }
 0x318   :  { %v2504_v22 = vpop.f32.mrb[102].mxu0 }
 0x319   :  { %v2544_v31 = vmax.f32 %v22573_v59, 0.0  ;;  %v22574_v9 = vadd.f32 %v26083_v15, %v2504_v22  ;;  %v21876_v6 = vpop.f32.mrb[103].mxu0  ;;  %21902 = vmatmul.mubr.msk.bf16.gmra.mrb[36].mxu1 %vm2688_vm8, %v26196_v53  ;;  %v26214_v43 = vsel %vm2969_vm9, %v2971_v37, %v2973_v11  ;;  %v26241_v36 = vor.u32 %v3478_v32, %v3477_v19 }
 0x31a   :  { %21905 = vmatprep.mubr.msk.bf16.mxu1 %vm24873_vm3, %v24872_v26  ;;  %v23412_v6 = vld [vmem:[%s31198_s1 + $0xc0] sm:$0xff]  }
 0x31b   :  { %v20797_v55 = vpack.c.bf16 %v2544_v31, %v2544_v31  ;;  %v2545_v60 = vmax.f32 %v22574_v9, 0.0  ;;  %v2802_v31 = vshll.u32 %v26154_v12, 16  ;;  %v26293_v9 = vcombine.low %v26263_v21, %v26268_v46  ;;  %21350 = vmatprep.subr.bf16.mxu0 %v23412_v6  ;;  %v23420_v6 = vld [vmem:[%s31198_s1 + $0x90] sm:$0xff]  }
 0x31c   :  { %v26229_v20 = vld [vmem:[#allocation3 + $0x14] sm:$0xff]  }
 0x31d   :  { %2611 = vst.msk [vmem:[#allocation3 + $0x20] sm:$0xf] %vm2602_vm7, %v20797_v55  ;;  %v20798_v38 = vpack.c.bf16 %v2545_v60, %v2545_v60  ;;  %v3163_v44 = vshrl.u32 %v26229_v20, 16  ;;  %v3166_v42 = vshll.u32 %v26229_v20, 16  ;;  %v2618_v55 = vld [vmem:[#allocation3 + $0x30] sm:$0x1]  ;;  %4470 = vmatmul.mubr.bf16.gmra.mrb[124].mxu0 %v26293_v9 }
 0x31e   :  { %v2509_v34 = vpop.f32.mrb[104].mxu0  ;;  %v26238_v61 = vld [vmem:[#allocation3 + $0x18] sm:$0xff]  }
 0x31f   :  { %2612 = vst.msk [vmem:[#allocation3 + $0x24] sm:$0xf] %vm2602_vm7, %v20798_v38  ;;  %v22575_v1 = vadd.f32 %v26083_v15, %v2509_v34  ;;  %v21879_v58 = vpop.f32.mrb[105].mxu0  ;;  %v2975_v5 = vrot.slane %v26238_v61, 1  ;;  %v3481_v29 = vrot.slane %v3163_v44, 2  ;;  %v3482_v33 = vrot.slane %v3166_v42, 3 }
 0x320   :  { %v2512_v7 = vpop.f32.mrb[106].mxu0  ;;  %v2800_v34 = vrot.slane %v2798_v57, 1  ;;  %v23415_v58 = vld [vmem:[%s31198_s1 + $0xc8] sm:$0xff]  }
 0x321   :  { %v2546_v18 = vmax.f32 %v22575_v1, 0.0  ;;  %v22576_v39 = vadd.f32 %v26083_v15, %v2512_v7  ;;  %v21880_v49 = vpop.f32.mrb[107].mxu0  ;;  %21906 = vmatmul.mubr.msk.bf16.gmra.mrb[40].mxu1 %vm2688_vm8, %v26238_v61  ;;  %v26258_v17 = vsel %vm2969_vm9, %v2973_v11, %v2975_v5  ;;  %v3483_v19 = vor.u32 %v3482_v33, %v3481_v29  ;;  %v23414_v1 = vld [vmem:[%s31198_s1 + $0x80] sm:$0xff]  }
 0x322   :  { %21909 = vmatprep.mubr.msk.bf16.mxu1 %vm24873_vm3, %v24872_v26  ;;  %v2796_v29 = vshrl.u32 %v26121_v54, 16  ;;  %21351 = vmatpush3.bf16.msra.mxu0 %v23414_v1  ;;  %v23368_v54 = vld [vmem:[%s31202_s5 + $0x40] sm:$0xff]  }
 0x323   :  { %v20799_v0 = vpack.c.bf16 %v2546_v18, %v2546_v18  ;;  %v2547_v16 = vmax.f32 %v22576_v39, 0.0  ;;  %v26318_v7 = vsel %vm3468_vm12, %v26241_v36, %v3483_v19  ;;  %21352 = vmatprep.subr.bf16.mxu0 %v23415_v58  ;;  %v23423_v58 = vld [vmem:[%s31198_s1 + $0x98] sm:$0xff]  }
 0x324   :  { %v2629_v14 = vld [vmem:[#allocation3 + $0x20] sm:$0xf] }
 0x325   :  { %v26275_v28 = vld [vmem:[#allocation3 + $0x1c] sm:$0xff]   ;;  %2613 = vst.msk [vmem:[#allocation3 + $0x28] sm:$0xf] %vm2602_vm7, %v20799_v0  ;;  %v20800_v37 = vpack.c.bf16 %v2547_v16, %v2547_v16  ;;  %v26330_v0 = vld [vmem:[%s31197_s0 + $0xc0] sm:$0xff] }
 0x326   :  { %v2517_v56 = vpop.f32.mrb[108].mxu0  ;;  %v2630_v50 = vld [vmem:[#allocation3 + $0x24] sm:$0x1]  ;;  %v31210_v52 = vshrl.u32 %v26275_v28, 16  ;;  %v31209_v22 = vshll.u32 %v26275_v28, 16  ;;  %v26335_v16 = vld [vmem:[%s31197_s0 + $0xc8] sm:$0xff] }
 0x327   :  { %v2953_v30 = vld [vmem:[#allocation3 + $0x24] sm:$0x3]  ;;  %2614 = vst.msk [vmem:[#allocation3 + $0x2c] sm:$0xf] %vm2602_vm7, %v20800_v37  ;;  %v22577_v62 = vadd.f32 %v26083_v15, %v2517_v56  ;;  %v21883_v23 = vpop.f32.mrb[109].mxu0  ;;  %v26287_v59 = vcombine.low %v2629_v14, %v2630_v50  ;;  %v2804_v37 = vrot.slane %v2802_v31, 1  ;;  %v26345_v57 = vcombine.high %v26330_v0, %v26335_v16 }
 0x328   :  { %v19169_v25 = vcombine.low %v2629_v14, %v2953_v30  ;;  %v2520_v11 = vpop.f32.mrb[110].mxu0  ;;  %v3485_v18 = vrot.slane %v31210_v52, 2  ;;  %v3486_v14 = vrot.slane %v31209_v22, 3  ;;  %v2801_v56 = vor.u32 %v2800_v34, %v2796_v29  ;;  %v23369_v31 = vld [vmem:[%s31202_s5 + $0x48] sm:$0xff]   ;;  %v23437_v52 = vld [vmem:[%s31198_s1 + $0xb8] sm:$0xff]  }
 0x329   :  { %v2548_v15 = vmax.f32 %v22577_v62, 0.0  ;;  %v21884_v60 = vpop.f32.mrb[111].mxu0  ;;  %21910 = vmatmul.mubr.msk.bf16.gmra.mrb[44].mxu1 %vm2688_vm8, %v26287_v59  ;;  %4477 = vmatprep.mubr.bf16.mxu0 %v26345_v57  ;;  %v2809_v62 = vshll.u32 %v26196_v53, 16  ;;  %v26359_v23 = vcombine.low %v26330_v0, %v26335_v16  ;;  %v2806_v34 = vshrl.u32 %v26154_v12, 16 }
 0x32a   :  { %v26300_v32 = vrot.slane %v19169_v25, 1  ;;  %21921 = vmatprep.mubr.msk.bf16.mxu1 %vm24873_vm3, %v24872_v26  ;;  %v26353_v50 = vor.u32 %v3486_v14, %v3485_v18  ;;  %v2805_v30 = vsel %vm409_vm1, %v2801_v56, %v2804_v37  ;;  %v23419_v25 = vld [vmem:[%s31198_s1 + $0xd0] sm:$0xff]   ;;  %v2816_v14 = vshll.u32 %v26238_v61, 16  ;;  %v23428_v56 = vld [vmem:[%s31198_s1 + $0xe8] sm:$0xff]  }
 0x32b   :  { %v20801_v39 = vpack.c.bf16 %v2548_v15, %v2548_v15  ;;  %v23422_v15 = vld [vmem:[%s31198_s1 + $0xd8] sm:$0xff]   ;;  %4478 = vmatmul.mubr.bf16.gmra.mrb[128].mxu0 %v26359_v23  ;;  %v2811_v1 = vrot.slane %v2809_v62, 1  ;;  %v2808_v18 = vor.u32 %v2806_v34, %v2804_v37  ;;  %v23426_v37 = vld [vmem:[%s31198_s1 + $0xe0] sm:$0xff]   ;;  %v4563_v34 = vshll.u32 %v26144_v8, 16 }
 0x32c   :  { %v26324_v49 = vsel %vm2969_vm9, %v2975_v5, %v26300_v32  ;;  %v23416_v5 = vld [vmem:[%s31198_s1 + $0x88] sm:$0xff]   ;;  %v26366_v11 = vsel %vm3468_vm12, %v3483_v19, %v26353_v50  ;;  %v26383_v19 = vld [vmem:[%s31197_s0 + $0xd0] sm:$0xff] }
 0x32d   :  { %v2619_v33 = vsel %vm26304_vm13, %v20801_v39, %v2618_v55  ;;  %21353 = vmatpush3.bf16.msra.mxu0 %v23416_v5  ;;  %v26388_v55 = vld [vmem:[%s31197_s0 + $0xd8] sm:$0xff]  ;;  %v23370_v39 = vld [vmem:[%s31202_s5 + $0x50] sm:$0xff]   ;;  %v2812_v12 = vsel %vm409_vm1, %v2808_v18, %v2811_v1  ;;  %v2823_v18 = vshll.u32 %v26287_v59, 16 }
 0x32e   :  { %2620 = vst [vmem:[#allocation3 + $0x30] sm:$0x1] %v2619_v33  ;;  %v26394_v60 = vcombine.high %v26383_v19, %v26388_v55  ;;  %21354 = vmatprep.subr.bf16.mxu0 %v23419_v25  ;;  %v26409_v29 = vcombine.low %v26383_v19, %v26388_v55  ;;  %v23371_v5 = vld [vmem:[%s31202_s5 + $0x58] sm:$0xff]   ;;  %v23427_v33 = vld [vmem:[%s31198_s1 + $0xa0] sm:$0xff]   ;;  %v2813_v25 = vshrl.u32 %v26196_v53, 16 }
 0x330   :  { %4485 = vmatprep.mubr.bf16.mxu0 %v26394_v60 }
 0x331   :  { %21922 = vmatmul.mubr.msk.bf16.vlgmr.msra.gmra.mrb[28].mxu1 %vm2688_vm8, %v2805_v30  ;;  %21355 = vmatpush3.bf16.msra.mxu0 %v23420_v6  ;;  %v19321_v30 = vld [vmem:[%s31197_s0 + $0xe8] sm:$0x77] }
 0x332   :  { %21942 = vmatpush3.bf16.msra.mxu1 %v23368_v54  ;;  %21925 = vmatprep.mubr.msk.bf16.mxu1 %vm24873_vm3, %v24872_v26  ;;  %v26429_v54 = vld [vmem:[%s31197_s0 + $0xe0] sm:$0xff]  ;;  %v23430_v6 = vld [vmem:[%s31198_s1 + $0xa8] sm:$0xff]  }
 0x333   :  { %21943 = vmatprep.subr.bf16.mxu1 %v24872_v26  ;;  %21356 = vmatprep.subr.bf16.mxu0 %v23422_v15  ;;  %v26437_v62 = vcombine.high %v26429_v54, %v19321_v30  ;;  %v2815_v15 = vor.u32 %v2813_v25, %v2811_v1  ;;  %v4556_v1 = vshll.u32 %v26209_v35, 16 }
 0x334   :  { %4486 = vmatmul.mubr.bf16.gmra.mrb[132].mxu0 %v26409_v29 }
 0x335   :  { %21357 = vmatpush3.bf16.msra.mxu0 %v23423_v58  ;;  %4493 = vmatprep.mubr.bf16.mxu0 %v26437_v62  ;;  %v4551_v58 = vshll.u32 %v26162_v13, 16 }
 0x336   :  { %21944 = vmatpush3.bf16.msra.mxu1 %v23369_v31  ;;  %v2818_v31 = vrot.slane %v2816_v14, 1  ;;  %21358 = vmatprep.subr.bf16.mxu0 %v23426_v37  ;;  %v23435_v14 = vld [vmem:[%s31198_s1 + $0xb0] sm:$0xff]   ;;  %v23436_v37 = vld [vmem:[%s31198_s1 + $0xf8] sm:$0xff]  }
 0x337   :  { %21945 = vmatprep.subr.bf16.mxu1 %v24872_v26  ;;  %v4553_v25 = vrot.slane %v4551_v58, 1 }
 0x338   :  { %v2819_v53 = vsel %vm409_vm1, %v2815_v15, %v2818_v31  ;;  %v2825_v15 = vrot.slane %v2823_v18, 1  ;;  %v4580_v18 = vshrl.u32 %v26190_v47, 16 }
 0x339   :  { %21926 = vmatmul.mubr.msk.bf16.gmra.mrb[32].mxu1 %vm2688_vm8, %v2812_v12  ;;  %21359 = vmatpush3.bf16.msra.mxu0 %v23427_v33  ;;  %v23434_v12 = vld [vmem:[%s31198_s1 + $0xf0] sm:$0xff]   ;;  %v4565_v33 = vrot.slane %v4563_v34, 1 }
 0x33a   :  { %21929 = vmatprep.mubr.msk.bf16.mxu1 %vm24873_vm3, %v24872_v26  ;;  %21946 = vmatpush3.bf16.msra.mxu1 %v23370_v39  ;;  %v26450_v39 = vcombine.low %v26429_v54, %v19321_v30  ;;  %v4549_v30 = vshrl.u32 %v26162_v13, 16 }
 0x33b   :  { %21947 = vmatprep.subr.bf16.mxu1 %v24872_v26  ;;  %21360 = vmatprep.subr.bf16.mxu0 %v23428_v56  ;;  %v4568_v56 = vshll.u32 %v26190_v47, 16  ;;  %v4596_v47 = vshrl.u32 %v26233_v41, 16 }
 0x33c   :  { %4494 = vmatmul.mubr.bf16.gmra.mrb[136].mxu0 %v26450_v39  ;;  %v4554_v13 = vor.u32 %v4553_v25, %v4549_v30 }
 0x33d   :  { %21361 = vmatpush3.bf16.msra.mxu0 %v23430_v6  ;;  %v2820_v6 = vshrl.u32 %v26238_v61, 16  ;;  %v4570_v22 = vrot.slane %v4568_v56, 1  ;;  %v4576_v56 = vshll.u32 %v26253_v51, 16 }
 0x33e   :  { %21948 = vmatpush3.bf16.msra.mxu1 %v23371_v5  ;;  %21362 = vmatprep.subr.bf16.mxu0 %v23434_v12  ;;  %v4561_v5 = vshrl.u32 %v26144_v8, 16  ;;  %v4558_v12 = vrot.slane %v4556_v1, 1  ;;  %v4584_v1 = vshll.u32 %v26233_v41, 16  ;;  %v4588_v41 = vshrl.u32 %v26253_v51, 16 }
 0x33f   :  { %21969 = vmatprep.subr.bf16.mxu1 %v24872_v26  ;;  %v2822_v8 = vor.u32 %v2820_v6, %v2818_v31  ;;  %v4582_v31 = vor.u32 %v4580_v18, %v4570_v22  ;;  %v4578_v25 = vrot.slane %v4576_v56, 1 }
 0x340   :  { %v4559_v61 = vsel %vm409_vm1, %v4554_v13, %v4558_v12  ;;  %v4616_v13 = vshll.u32 %v26345_v57, 16 }
 0x341   :  { %21930 = vmatmul.mubr.msk.bf16.gmra.mrb[36].mxu1 %vm2688_vm8, %v2819_v53  ;;  %v4566_v53 = vor.u32 %v4565_v33, %v4561_v5  ;;  %21363 = vmatpush3.bf16.msra.mxu0 %v23435_v14  ;;  %v2826_v58 = vsel %vm409_vm1, %v2822_v8, %v2825_v15  ;;  %v4586_v14 = vrot.slane %v4584_v1, 1  ;;  %v23373_v8 = vld [vmem:[%s31202_s5 + $0x68] sm:$0xff]   ;;  %v23374_v1 = vld [vmem:[%s31202_s5 + $0x70] sm:$0xff]  }
 0x342   :  { %21933 = vmatprep.mubr.msk.bf16.mxu1 %vm24873_vm3, %v24872_v26  ;;  %21364 = vmatprep.subr.bf16.mxu0 %v23436_v37  ;;  %v2827_v37 = vshrl.u32 %v26287_v59, 16  ;;  %v4618_v51 = vrot.slane %v4616_v13, 1 }
 0x343   :  { %v4571_v34 = vsel %vm409_vm1, %v4566_v53, %v4570_v22  ;;  %v4587_v5 = vsel %vm409_vm1, %v4582_v31, %v4586_v14  ;;  %v4600_v22 = vshll.u32 %v26273_v4, 16  ;;  %v4598_v59 = vor.u32 %v4596_v47, %v4586_v14  ;;  %v23372_v53 = vld [vmem:[%s31202_s5 + $0x60] sm:$0xff]  }
 0x344   :  { %4800 = vmatprep.mubr.bf16.mxu0 %v4571_v34  ;;  %v2829_v33 = vor.u32 %v2827_v37, %v2825_v15  ;;  %v4612_v34 = vshrl.u32 %v26273_v4, 16  ;;  %v4604_v4 = vshrl.u32 %v26293_v9, 16  ;;  %v4608_v14 = vshll.u32 %v26359_v23, 16  ;;  %v23441_v37 = vld [vmem:[%s31198_s1 + $0x140] sm:$0xff]  }
 0x345   :  { %21365 = vmatpush3.bf16.msra.mxu0 %v23437_v52  ;;  %v4572_v52 = vshrl.u32 %v26209_v35, 16  ;;  %v4602_v6 = vrot.slane %v4600_v22, 1  ;;  %v23445_v22 = vld [vmem:[%s31198_s1 + $0x108] sm:$0xff]  }
 0x346   :  { %v4610_v47 = vrot.slane %v4608_v14, 1  ;;  %21408 = vmatprep.subr.bf16.mxu0 %v23441_v37  ;;  %v23452_v14 = vld [vmem:[%s31198_s1 + $0x120] sm:$0xff]   ;;  %v23453_v37 = vld [vmem:[%s31198_s1 + $0x168] sm:$0xff]  }
 0x347   :  { %v4574_v30 = vor.u32 %v4572_v52, %v4558_v12  ;;  %v4603_v35 = vsel %vm409_vm1, %v4598_v59, %v4602_v6  ;;  %v4592_v12 = vshll.u32 %v26293_v9, 16  ;;  %v4628_v9 = vshrl.u32 %v26345_v57, 16 }
 0x348   :  { %4801 = vmatmul.mubr.bf16.vlgmr.msra.gmra.mrb[140].mxu0 %v4559_v61  ;;  %v4614_v61 = vor.u32 %v4612_v34, %v4602_v6  ;;  %v4632_v52 = vshll.u32 %v26394_v60, 16  ;;  %v4620_v6 = vshrl.u32 %v26359_v23, 16  ;;  %v4648_v23 = vshll.u32 %v26437_v62, 16  ;;  %v23449_v34 = vld [vmem:[%s31198_s1 + $0x118] sm:$0xff]  }
 0x349   :  { %21934 = vmatmul.mubr.msk.bf16.gmra.mrb[40].mxu1 %vm2688_vm8, %v2826_v58  ;;  %4808 = vmatprep.mubr.bf16.mxu0 %v4587_v5  ;;  %v4579_v15 = vsel %vm409_vm1, %v4574_v30, %v4578_v25  ;;  %v4590_v58 = vor.u32 %v4588_v41, %v4578_v25  ;;  %v23442_v5 = vld [vmem:[%s31198_s1 + $0x100] sm:$0xff]   ;;  %v4630_v30 = vor.u32 %v4628_v9, %v4618_v51  ;;  %v23448_v41 = vld [vmem:[%s31198_s1 + $0x158] sm:$0xff]  }
 0x34a   :  { %21937 = vmatprep.mubr.msk.bf16.mxu1 %vm24873_vm3, %v24872_v26  ;;  %v4619_v31 = vsel %vm409_vm1, %v4614_v61, %v4618_v51  ;;  %21409 = vmatpush3.bf16.msra.mxu0 %v23442_v5  ;;  %v4634_v25 = vrot.slane %v4632_v52, 1  ;;  %v26561_v61 = vld [vmem:[#allocation3 + $0x8] sm:$0xf]  ;;  %v3101_v51 = vld [vmem:[#allocation3 + $0x4] sm:$0xe] }
 0x34c   :  { %v4635_v57 = vsel %vm409_vm1, %v4630_v30, %v4634_v25 }
 0x350   :  { %4809 = vmatmul.mubr.bf16.gmra.mrb[144].mxu0 %v4579_v15  ;;  %v4624_v15 = vshll.u32 %v26409_v29, 16 }
 0x351   :  { %21938 = vmatmul.mubr.msk.bf16.gmra.mrb[44].mxu1 %vm2688_vm8, %v2829_v33  ;;  %4816 = vmatprep.mubr.bf16.mxu0 %v4603_v35  ;;  %v23443_v33 = vld [vmem:[%s31198_s1 + $0x148] sm:$0xff]   ;;  %v23447_v35 = vld [vmem:[%s31198_s1 + $0x110] sm:$0xff]  }
 0x352   :  { %21949 = vmatprep.mubr.msk.bf16.mxu1 %vm24873_vm3, %v24872_v26  ;;  %21410 = vmatprep.subr.bf16.mxu0 %v23443_v33  ;;  %v23454_v33 = vld [vmem:[%s31198_s1 + $0x128] sm:$0xff]  }
 0x353   :  { %21411 = vmatpush3.bf16.msra.mxu0 %v23445_v22 }
 0x359   :  { %21950 = vmatmul.mubr.msk.bf16.vlgmr.msra.gmra.mrb[28].mxu1 %vm2688_vm8, %v26174_v45  ;;  %v4594_v45 = vrot.slane %v4592_v12, 1  ;;  %v4622_v12 = vor.u32 %v4620_v6, %v4610_v47  ;;  %v19400_v6 = vld [vmem:[%s31197_s0 + $0x88] sm:$0xee] }
 0x35a   :  { %21970 = vmatpush3.bf16.msra.mxu1 %v23372_v53  ;;  %21953 = vmatprep.mubr.msk.bf16.mxu1 %vm24873_vm3, %v24872_v26  ;;  %v23446_v53 = vld [vmem:[%s31198_s1 + $0x150] sm:$0xff]  }
 0x35b   :  { %21971 = vmatprep.subr.bf16.mxu1 %v24872_v26  ;;  %v4595_v18 = vsel %vm409_vm1, %v4590_v58, %v4594_v45  ;;  %v4606_v56 = vor.u32 %v4604_v4, %v4594_v45  ;;  %21412 = vmatprep.subr.bf16.mxu0 %v23446_v53  ;;  %v4650_v58 = vrot.slane %v4648_v23, 1  ;;  %v23451_v4 = vld [vmem:[%s31198_s1 + $0x160] sm:$0xff]   ;;  %v19447_v53 = vcombine.high %v19400_v6, %v26179_v63 }
 0x35c   :  { %4817 = vmatmul.mubr.bf16.gmra.mrb[148].mxu0 %v4595_v18  ;;  %v19187_v18 = vcombine.low %v3101_v51, %v26561_v61  ;;  %v19446_v23 = vcombine.low %v19400_v6, %v26179_v63  ;;  %v3165_v51 = vrot.slane %v3163_v44, 1  ;;  %v3168_v63 = vrot.slane %v3166_v42, 2  ;;  %v23395_v44 = vld [vmem:[%s31202_s5 + $0x88] sm:$0xff]   ;;  %v26642_v6 = vld [vmem:[#allocation3 + $0x24] sm:$0xf] }
 0x35d   :  { %4824 = vmatprep.mubr.bf16.mxu0 %v4619_v31  ;;  %v4611_v59 = vsel %vm409_vm1, %v4606_v56, %v4610_v47  ;;  %21413 = vmatpush3.bf16.msra.mxu0 %v23447_v35  ;;  %v4640_v31 = vshll.u32 %v26450_v39, 16  ;;  %v3156_v47 = vrot.slane %v3154_v48, 1  ;;  %v23459_v48 = vld [vmem:[%s31198_s1 + $0x130] sm:$0xff]  }
 0x35e   :  { %21972 = vmatpush3.bf16.msra.mxu1 %v23373_v8  ;;  %v4626_v8 = vrot.slane %v4624_v15, 1  ;;  %21414 = vmatprep.subr.bf16.mxu0 %v23448_v41  ;;  %v3146_v9 = vshrl.u32 %v19187_v18, 16  ;;  %v3149_v52 = vshll.u32 %v19187_v18, 16  ;;  %v23461_v15 = vld [vmem:[%s31198_s1 + $0x138] sm:$0xff]  }
 0x35f   :  { %21973 = vmatprep.subr.bf16.mxu1 %v24872_v26  ;;  %v4642_v5 = vrot.slane %v4640_v31, 1  ;;  %v4977_v31 = vshll.u32 %v19446_v23, 16 }
 0x360   :  { %v4627_v45 = vsel %vm409_vm1, %v4622_v12, %v4626_v8  ;;  %v3148_v22 = vrot.slane %v3146_v9, 1  ;;  %v3151_v30 = vrot.slane %v3149_v52, 2  ;;  %v19448_v12 = vcombine.low %v26184_v27, %v26219_v40 }
 0x361   :  { %21954 = vmatmul.mubr.msk.bf16.gmra.mrb[32].mxu1 %vm2688_vm8, %v26214_v43  ;;  %v23380_v43 = vld [vmem:[%s31202_s5 + $0x78] sm:$0xff]   ;;  %21415 = vmatpush3.bf16.msra.mxu0 %v23449_v34  ;;  %v4991_v34 = vshrl.u32 %v19447_v53, 16 }
 0x362   :  { %21957 = vmatprep.mubr.msk.bf16.mxu1 %vm24873_vm3, %v24872_v26  ;;  %21974 = vmatpush3.bf16.msra.mxu1 %v23374_v1  ;;  %v4636_v1 = vshrl.u32 %v26409_v29, 16 }
 0x363   :  { %21975 = vmatprep.subr.bf16.mxu1 %v24872_v26  ;;  %21416 = vmatprep.subr.bf16.mxu0 %v23451_v4  ;;  %v4993_v18 = vrot.slane %v4991_v34, 1  ;;  %v4982_v4 = vshrl.u32 %v19448_v12, 16 }
 0x364   :  { %4825 = vmatmul.mubr.bf16.gmra.mrb[152].mxu0 %v4611_v59  ;;  %v4638_v29 = vor.u32 %v4636_v1, %v4626_v8  ;;  %v23457_v59 = vld [vmem:[%s31198_s1 + $0x170] sm:$0xff]   ;;  %v23388_v8 = vld [vmem:[%s31202_s5 + $0x80] sm:$0xff]   ;;  %v4974_v1 = vshrl.u32 %v19446_v23, 16  ;;  %v23406_v23 = vld [vmem:[%s31202_s5 + $0x98] sm:$0xff]  }
 0x365   :  { %4832 = vmatprep.mubr.bf16.mxu0 %v4635_v57  ;;  %21417 = vmatpush3.bf16.msra.mxu0 %v23452_v14  ;;  %v4985_v14 = vshll.u32 %v19448_v12, 16 }
 0x366   :  { %21976 = vmatpush3.bf16.msra.mxu1 %v23380_v43  ;;  %v4643_v56 = vsel %vm409_vm1, %v4638_v29, %v4642_v5  ;;  %21418 = vmatprep.subr.bf16.mxu0 %v23453_v37  ;;  %v19451_v37 = vcombine.high %v26224_v2, %v26263_v21  ;;  %v4979_v29 = vrot.slane %v4977_v31, 2 }
 0x367   :  { %21997 = vmatprep.subr.bf16.mxu1 %v24872_v26 }
 0x368   :  { %v5017_v52 = vshrl.u32 %v19451_v37, 16 }
 0x369   :  { %21958 = vmatmul.mubr.msk.bf16.gmra.mrb[36].mxu1 %vm2688_vm8, %v26258_v17  ;;  %v4644_v17 = vshrl.u32 %v26394_v60, 16  ;;  %21419 = vmatpush3.bf16.msra.mxu0 %v23454_v33  ;;  %v4987_v33 = vrot.slane %v4985_v14, 2 }
 0x36a   :  { %21961 = vmatprep.mubr.msk.bf16.mxu1 %vm24873_vm3, %v24872_v26  ;;  %21420 = vmatprep.subr.bf16.mxu0 %v23457_v59 }
 0x36b   :  { %v4646_v13 = vor.u32 %v4644_v17, %v4634_v25  ;;  %v4652_v25 = vshrl.u32 %v26450_v39, 16  ;;  %v3152_v17 = vor.u32 %v3151_v30, %v3148_v22  ;;  %v23402_v30 = vld [vmem:[%s31202_s5 + $0x90] sm:$0xff]  }
 0x36c   :  { %4833 = vmatmul.mubr.bf16.gmra.mrb[156].mxu0 %v4627_v45 }
 0x36d   :  { %v4651_v60 = vsel %vm409_vm1, %v4646_v13, %v4650_v58  ;;  %v4654_v39 = vor.u32 %v4652_v25, %v4642_v5  ;;  %21421 = vmatpush3.bf16.msra.mxu0 %v23459_v48  ;;  %v4994_v13 = vshll.u32 %v19447_v53, 16  ;;  %v4984_v5 = vrot.slane %v4982_v4, 1 }
 0x36e   :  { %4840 = vmatprep.mubr.bf16.mxu0 %v4651_v60  ;;  %v5019_v25 = vrot.slane %v5017_v52, 1  ;;  %v31268_v48 = vshrl.u32 %v26275_v28, 16 }
 0x36f   :  { %v4988_v22 = vor.u32 %v4987_v33, %v4984_v5 }
 0x371   :  { %21962 = vmatmul.mubr.msk.bf16.gmra.mrb[40].mxu1 %vm2688_vm8, %v26324_v49  ;;  %v4655_v49 = vshrl.u32 %v26437_v62, 16  ;;  %v3159_v62 = vrot.slane %v3157_v10, 2  ;;  %v23460_v10 = vld [vmem:[%s31198_s1 + $0x178] sm:$0xff]  }
 0x372   :  { %21965 = vmatprep.mubr.msk.bf16.mxu1 %vm24873_vm3, %v24872_v26  ;;  %21422 = vmatprep.subr.bf16.mxu0 %v23460_v10  ;;  %v3174_v10 = vrot.slane %v31268_v48, 1 }
 0x373   :  { %v4657_v43 = vor.u32 %v4655_v49, %v4650_v58  ;;  %v3160_v57 = vor.u32 %v3159_v62, %v3156_v47  ;;  %21423 = vmatpush3.bf16.msra.mxu0 %v23461_v15  ;;  %v4976_v49 = vrot.slane %v4974_v1, 1  ;;  %v3110_v47 = vld [vmem:[#allocation3 + $0x28] sm:$0x3] }
 0x374   :  { %4841 = vmatmul.mubr.bf16.gmra.mrb[160].mxu0 %v4643_v56  ;;  %22137 = vmatprep.subr.bf16.mxu0 %v24872_v26  ;;  %v5020_v56 = vshll.u32 %v19451_v37, 16  ;;  %v19455_v37 = vcombine.high %v26335_v16, %v26383_v19 }
 0x375   :  { %4848 = vmatprep.mubr.bf16.mxu0 %v4657_v43  ;;  %v3161_v60 = vsel %vm836_vm2, %v3152_v17, %v3160_v57  ;;  %v3169_v43 = vor.u32 %v3168_v63, %v3165_v51  ;;  %v4980_v62 = vor.u32 %v4979_v29, %v4976_v49  ;;  %v19450_v17 = vcombine.low %v26224_v2, %v26263_v21 }
 0x376   :  { %v5022_v59 = vrot.slane %v5020_v56, 2  ;;  %v5053_v33 = vshrl.u32 %v19455_v37, 16 }
 0x377   :  { %v4989_v15 = vsel %vm836_vm2, %v4980_v62, %v4988_v22  ;;  %v3170_v53 = vsel %vm836_vm2, %v3160_v57, %v3169_v43  ;;  %v19453_v57 = vcombine.high %v26268_v46, %v26330_v0  ;;  %v5008_v34 = vshrl.u32 %v19450_v17, 16 }
 0x378   :  { %v5055_v56 = vrot.slane %v5053_v33, 1 }
 0x379   :  { %21966 = vmatmul.mubr.msk.bf16.gmra.mrb[44].mxu1 %vm2688_vm8, %v26300_v32  ;;  %v19449_v32 = vcombine.high %v26184_v27, %v26219_v40  ;;  %v4996_v27 = vrot.slane %v4994_v13, 2  ;;  %v5011_v13 = vshll.u32 %v19450_v17, 16 }
 0x37a   :  { %21977 = vmatprep.mubr.msk.bf16.mxu1 %vm24873_vm3, %v24872_v26 }
 0x37b   :  { %v4999_v35 = vshrl.u32 %v19449_v32, 16  ;;  %v5002_v41 = vshll.u32 %v19449_v32, 16  ;;  %v4997_v42 = vor.u32 %v4996_v27, %v4993_v18  ;;  %v31269_v32 = vshll.u32 %v26275_v28, 16 }
 0x37c   :  { %4849 = vmatmul.mubr.bf16.gmra.mrb[164].mxu0 %v4654_v39  ;;  %v5013_v51 = vrot.slane %v5011_v13, 2 }
 0x37d   :  { %v5001_v58 = vrot.slane %v4999_v35, 1  ;;  %v5004_v45 = vrot.slane %v5002_v41, 2  ;;  %v3177_v39 = vrot.slane %v31269_v32, 2  ;;  %v19191_v35 = vcombine.low %v26642_v6, %v3110_v47 }
 0x37e   :  { %v5023_v41 = vor.u32 %v5022_v59, %v5019_v25  ;;  %v19457_v59 = vcombine.high %v26388_v55, %v26429_v54 }
 0x37f   :  { %v5005_v40 = vor.u32 %v5004_v45, %v5001_v58  ;;  %v3181_v2 = vshrl.u32 %v19191_v35, 16  ;;  %v3184_v21 = vshll.u32 %v19191_v35, 16  ;;  %v5035_v58 = vshrl.u32 %v19453_v57, 16 }
 0x380   :  { %v5038_v45 = vshll.u32 %v19453_v57, 16  ;;  %v5071_v32 = vshrl.u32 %v19457_v59, 16 }
 0x381   :  { %21978 = vmatmul.mubr.msk.bf16.vlgmr.msra.gmra.mrb[28].mxu1 %vm2688_vm8, %v3161_v60  ;;  %v5006_v9 = vsel %vm836_vm2, %v4997_v42, %v5005_v40  ;;  %v5024_v12 = vsel %vm836_vm2, %v5005_v40, %v5023_v41  ;;  %v5010_v60 = vrot.slane %v5008_v34, 1  ;;  %v5037_v63 = vrot.slane %v5035_v58, 1  ;;  %v26693_v34 = vld [vmem:[%s31197_s0 + $0xec] ss:$8 sps:$4 sm:$0xff]  }
 0x382   :  { %21998 = vmatpush3.bf16.msra.mxu1 %v23388_v8  ;;  %21981 = vmatprep.mubr.msk.bf16.mxu1 %vm24873_vm3, %v24872_v26  ;;  %v3178_v8 = vor.u32 %v3177_v39, %v3174_v10  ;;  %v5040_v18 = vrot.slane %v5038_v45, 2  ;;  %v3183_v1 = vrot.slane %v3181_v2, 1  ;;  %v3186_v31 = vrot.slane %v3184_v21, 2 }
 0x383   :  { %21999 = vmatprep.subr.bf16.mxu1 %v24872_v26  ;;  %5239 = vmatprep.mubr.bf16.mxu0 %v5006_v9  ;;  %v5014_v27 = vor.u32 %v5013_v51, %v5010_v60  ;;  %v5074_v39 = vshll.u32 %v19457_v59, 16  ;;  %v5073_v35 = vrot.slane %v5071_v32, 1  ;;  %v3329_v21 = vrot.slane %v26192_v3, 2  ;;  %v23413_v60 = vld [vmem:[%s31202_s5 + $0xa0] sm:$0xff]  }
 0x384   :  { %5240 = vmatmul.mubr.bf16.vlgmr.msra.gmra.mrb[168].mxu0 %v4989_v15  ;;  %v3179_v40 = vsel %vm836_vm2, %v3169_v43, %v3178_v8  ;;  %v5041_v4 = vor.u32 %v5040_v18, %v5037_v63  ;;  %v3187_v5 = vor.u32 %v3186_v31, %v3183_v1  ;;  %v5056_v43 = vshll.u32 %v19455_v37, 16  ;;  %v26708_v1 = vld [vmem:[%s31197_s0 + $0xe8] ss:$8 sps:$4 sm:$0xff]  }
 0x385   :  { %5247 = vmatprep.mubr.bf16.mxu0 %v5024_v12  ;;  %v5015_v14 = vsel %vm836_vm2, %v4988_v22, %v5014_v27  ;;  %v19456_v12 = vcombine.low %v26388_v55, %v26429_v54  ;;  %v5089_v55 = vshrl.u32 %v26693_v34, 16  ;;  %v5092_v54 = vshll.u32 %v26693_v34, 16  ;;  %v23421_v31 = vld [vmem:[%s31202_s5 + $0xa8] sm:$0xff]  }
 0x386   :  { %22000 = vmatpush3.bf16.msra.mxu1 %v23395_v44  ;;  %v19452_v44 = vcombine.low %v26268_v46, %v26330_v0  ;;  %v5042_v42 = vsel %vm836_vm2, %v5023_v41, %v5041_v4  ;;  %v5058_v47 = vrot.slane %v5056_v43, 2  ;;  %v3188_v0 = vsel %vm836_vm2, %v3178_v8, %v3187_v5 }
 0x387   :  { %22001 = vmatprep.subr.bf16.mxu1 %v24872_v26  ;;  %v5076_v41 = vrot.slane %v5074_v39, 2  ;;  %v5062_v13 = vshrl.u32 %v19456_v12, 16  ;;  %v5065_v2 = vshll.u32 %v19456_v12, 16  ;;  %v5091_v51 = vrot.slane %v5089_v55, 1  ;;  %v23467_v12 = vld [vmem:[%s31202_s5 + $0xe8] sm:$0xff]  }
 0x388   :  { %v5026_v49 = vshrl.u32 %v19452_v44, 16  ;;  %v5029_v29 = vshll.u32 %v19452_v44, 16  ;;  %v5059_v62 = vor.u32 %v5058_v47, %v5055_v56  ;;  %v5094_v63 = vrot.slane %v5092_v54, 2 }
 0x389   :  { %21982 = vmatmul.mubr.msk.bf16.gmra.mrb[32].mxu1 %vm2688_vm8, %v3170_v53  ;;  %v5064_v58 = vrot.slane %v5062_v13, 1  ;;  %v5083_v44 = vshll.u32 %v26708_v1, 16 }
 0x38a   :  { %21985 = vmatprep.mubr.msk.bf16.mxu1 %vm24873_vm3, %v24872_v26  ;;  %22002 = vmatpush3.bf16.msra.mxu1 %v23402_v30  ;;  %v5028_v9 = vrot.slane %v5026_v49, 1  ;;  %v5031_v52 = vrot.slane %v5029_v29, 2  ;;  %v19454_v30 = vcombine.low %v26335_v16, %v26383_v19  ;;  %v5060_v25 = vsel %vm836_vm2, %v5041_v4, %v5059_v62  ;;  %v3311_v19 = vld [vmem:[#allocation3 + $0x4] sm:$0xc] }
 0x38b   :  { %22003 = vmatprep.subr.bf16.mxu1 %v24872_v26  ;;  %v5077_v16 = vor.u32 %v5076_v41, %v5073_v35  ;;  %v26687_v57 = vcombine.low %v3311_v19, %v26561_v61  ;;  %v5067_v61 = vrot.slane %v5065_v2, 2  ;;  %v5085_v49 = vrot.slane %v5083_v44, 2  ;;  %v23429_v29 = vld [vmem:[%s31202_s5 + $0xb0] sm:$0xff]   ;;  %v23456_v41 = vld [vmem:[#allocation3 + $0x10] sm:$0xff]  }
 0x38c   :  { %5248 = vmatmul.mubr.bf16.gmra.mrb[172].mxu0 %v5015_v14  ;;  %v5032_v46 = vor.u32 %v5031_v52, %v5028_v9  ;;  %v5044_v48 = vshrl.u32 %v19454_v30, 16  ;;  %v5047_v10 = vshll.u32 %v19454_v30, 16  ;;  %v5080_v14 = vshrl.u32 %v26708_v1, 16  ;;  %v3312_v52 = vld [vmem:[#allocation3 + $0x28] sm:$0x7]  ;;  %v23458_v19 = vld [vmem:[%s31202_s5 + $0xe0] sm:$0xff]  }
 0x38d   :  { %5255 = vmatprep.mubr.bf16.mxu0 %v5042_v42  ;;  %v5078_v8 = vsel %vm836_vm2, %v5059_v62, %v5077_v16  ;;  %v3328_v45 = vrot.slane %v26687_v57, 2  ;;  %v5068_v18 = vor.u32 %v5067_v61, %v5064_v58  ;;  %v3331_v42 = vrot.slane %v26229_v20, 2  ;;  %v23438_v20 = vld [vmem:[%s31202_s5 + $0xb8] sm:$0xff]   ;;  %v26804_v2 = vld [vmem:[#allocation3 + $0x20] sm:$0xff]  }
 0x38e   :  { %22004 = vmatpush3.bf16.msra.mxu1 %v23406_v23  ;;  %v5033_v22 = vsel %vm836_vm2, %v5014_v27, %v5032_v46  ;;  %v5046_v15 = vrot.slane %v5044_v48, 1  ;;  %v5049_v53 = vrot.slane %v5047_v10, 2  ;;  %v5082_v37 = vrot.slane %v5080_v14, 1  ;;  %v23440_v48 = vld [vmem:[%s31202_s5 + $0xc8] sm:$0xff]   ;;  %v23444_v10 = vld [vmem:[%s31202_s5 + $0xd0] sm:$0xff]   ;;  %v26816_v58 = vld [vmem:[#allocation3 + $0x28] sm:$0xff]  }
 0x38f   :  { %22025 = vmatprep.subr.bf16.mxu1 %v24872_v26  ;;  %v3330_v27 = vsel %vm1283_vm0, %v3328_v45, %v3329_v21  ;;  %v3332_v33 = vsel %vm1283_vm0, %v3329_v21, %v3331_v42  ;;  %v3333_v9 = vrot.slane %v26275_v28, 2  ;;  %v19210_v47 = vcombine.low %v26642_v6, %v3312_v52  ;;  %v23475_v21 = vld [vmem:[%s31202_s5 + $0xf8] sm:$0xff]  }
 0x390   :  { %v5050_v17 = vor.u32 %v5049_v53, %v5046_v15  ;;  %v3473_v6 = vshll.u32 %v26687_v57, 16  ;;  %v3670_v55 = vrot.slane %v26804_v2, 3  ;;  %v3672_v61 = vrot.slane %v26816_v58, 3 }
 0x391   :  { %21986 = vmatmul.mubr.msk.bf16.gmra.mrb[36].mxu1 %vm2688_vm8, %v3179_v40  ;;  %v5095_v40 = vor.u32 %v5094_v63, %v5091_v51  ;;  %v3334_v56 = vsel %vm1283_vm0, %v3331_v42, %v3333_v9  ;;  %v3490_v32 = vshrl.u32 %v19210_v47, 16  ;;  %v3493_v39 = vshll.u32 %v19210_v47, 16 }
 0x392   :  { %21989 = vmatprep.mubr.msk.bf16.mxu1 %vm24873_vm3, %v24872_v26  ;;  %v5051_v23 = vsel %vm836_vm2, %v5032_v46, %v5050_v17  ;;  %v5069_v3 = vsel %vm836_vm2, %v5050_v17, %v5068_v18  ;;  %v3335_v46 = vrot.slane %v19210_v47, 2  ;;  %v23455_v17 = vld [vmem:[#allocation3 + $0x8] sm:$0xf8]   ;;  %v3673_v45 = vsel %vm3664_vm14, %v3670_v55, %v3672_v61 }
 0x393   :  { %v5096_v4 = vsel %vm836_vm2, %v5077_v16, %v5095_v40  ;;  %v3492_v15 = vrot.slane %v3490_v32, 2  ;;  %v3495_v53 = vrot.slane %v3493_v39, 3  ;;  %v3665_v16 = vrot.slane %v23455_v17, 3  ;;  %v23485_v39 = vld [vmem:[%s31202_s5 + $0x110] sm:$0xff]  }
 0x394   :  { %5256 = vmatmul.mubr.bf16.gmra.mrb[176].mxu0 %v5033_v22  ;;  %v3336_v28 = vsel %vm1283_vm0, %v3333_v9, %v3335_v46  ;;  %v3475_v22 = vrot.slane %v3473_v6, 3  ;;  %v3818_v51 = vshll.u32 %v23456_v41, 16  ;;  %v3807_v63 = vshrl.u32 %v23455_v17, 16  ;;  %v23480_v9 = vld [vmem:[%s31202_s5 + $0x100] sm:$0xff]   ;;  %v23484_v6 = vld [vmem:[%s31202_s5 + $0x108] sm:$0xff]  }
 0x395   :  { %5263 = vmatprep.mubr.bf16.mxu0 %v5060_v25  ;;  %v23439_v25 = vld [vmem:[%s31202_s5 + $0xc0] sm:$0xff]  }
 0x399   :  { %21990 = vmatmul.mubr.msk.bf16.gmra.mrb[40].mxu1 %vm2688_vm8, %v3188_v0  ;;  %v3470_v0 = vshrl.u32 %v26687_v57, 16 }
 0x39a   :  { %21993 = vmatprep.mubr.msk.bf16.mxu1 %vm24873_vm3, %v24872_v26 }
 0x39b   :  { %v3472_v62 = vrot.slane %v3470_v0, 2 }
 0x39c   :  { %5264 = vmatmul.mubr.bf16.gmra.mrb[180].mxu0 %v5051_v23  ;;  %v23466_v23 = vld [vmem:[#allocation3 + $0x18] sm:$0xff]  }
 0x39d   :  { %5271 = vmatprep.mubr.bf16.mxu0 %v5078_v8  ;;  %v3476_v30 = vor.u32 %v3475_v22, %v3472_v62  ;;  %v3668_v57 = vrot.slane %v23466_v23, 3  ;;  %v23471_v8 = vld [vmem:[%s31202_s5 + $0xf0] sm:$0xff]  }
 0x39f   :  { %v3480_v59 = vsel %vm3468_vm12, %v3476_v30, %v26241_v36  ;;  %v23450_v36 = vld [vmem:[%s31202_s5 + $0xd8] sm:$0xff]   ;;  %v3671_v54 = vsel %vm3664_vm14, %v3668_v57, %v3670_v55 }
 0x3a1   :  { %21994 = vmatmul.mubr.msk.bf16.gmra.mrb[44].mxu1 %vm2688_vm8, %v3187_v5  ;;  %v5086_v5 = vor.u32 %v5085_v49, %v5082_v37  ;;  %v3824_v49 = vshrl.u32 %v23466_v23, 16 }
 0x3a2   :  { %22005 = vmatprep.mubr.msk.bf16.mxu1 %vm24873_vm3, %v24872_v26 }
 0x3a3   :  { %v5087_v43 = vsel %vm836_vm2, %v5068_v18, %v5086_v5  ;;  %v3810_v18 = vshll.u32 %v23455_v17, 16 }
 0x3a4   :  { %5272 = vmatmul.mubr.bf16.gmra.mrb[184].mxu0 %v5069_v3  ;;  %v21308_v3 = vpop.f32.mrb[112].mxu0 }
 0x3a5   :  { %5279 = vmatprep.mubr.bf16.mxu0 %v5096_v4  ;;  %v3812_v4 = vrot.slane %v3810_v18, 4  ;;  %v21309_v14 = vpop.f32.mrb[113].mxu0 }
 0x3a6   :  { %v26829_v44 = vadd.f32 %v21309_v14, %v21308_v3  ;;  %v21311_v42 = vpop.f32.mrb[114].mxu0 }
 0x3a9   :  { %22006 = vmatmul.mubr.msk.bf16.vlgmr.msra.gmra.mrb[28].mxu1 %vm2688_vm8, %v3330_v27 }
 0x3aa   :  { %22026 = vmatpush3.bf16.msra.mxu1 %v23413_v60  ;;  %22009 = vmatprep.mubr.msk.bf16.mxu1 %vm24873_vm3, %v24872_v26  ;;  %v3815_v60 = vshrl.u32 %v23456_v41, 16 }
 0x3ab   :  { %22027 = vmatprep.subr.bf16.mxu1 %v24872_v26 }
 0x3ac   :  { %5280 = vmatmul.mubr.bf16.gmra.mrb[188].mxu0 %v5087_v43  ;;  %v3817_v27 = vrot.slane %v3815_v60, 3 }
 0x3ad   :  { %5287 = vmatprep.mubr.bf16.mxu0 %v5095_v40  ;;  %v3820_v40 = vrot.slane %v3818_v51, 4 }
 0x3ae   :  { %22028 = vmatpush3.bf16.msra.mxu1 %v23421_v31  ;;  %v3809_v31 = vrot.slane %v3807_v63, 3 }
 0x3af   :  { %22029 = vmatprep.subr.bf16.mxu1 %v24872_v26  ;;  %v3821_v37 = vor.u32 %v3820_v40, %v3817_v27 }
 0x3b1   :  { %22010 = vmatmul.mubr.msk.bf16.gmra.mrb[32].mxu1 %vm2688_vm8, %v3332_v33 }
 0x3b2   :  { %22013 = vmatprep.mubr.msk.bf16.mxu1 %vm24873_vm3, %v24872_v26  ;;  %22030 = vmatpush3.bf16.msra.mxu1 %v23429_v29  ;;  %v3827_v29 = vshll.u32 %v23466_v23, 16 }
 0x3b3   :  { %22031 = vmatprep.subr.bf16.mxu1 %v24872_v26 }
 0x3b4   :  { %5288 = vmatmul.mubr.bf16.gmra.mrb[192].mxu0 %v5086_v5  ;;  %v21312_v5 = vpop.f32.mrb[115].mxu0 }
 0x3b5   :  { %22153 = vmatprep.mubr.msk.bf16.mxu0 %vm24873_vm3, %v24872_v26  ;;  %v26831_v33 = vadd.f32 %v21312_v5, %v21311_v42 }
 0x3b6   :  { %22032 = vmatpush3.bf16.msra.mxu1 %v23438_v20  ;;  %v3813_v20 = vor.u32 %v3812_v4, %v3809_v31 }
 0x3b7   :  { %22053 = vmatprep.subr.bf16.mxu1 %v24872_v26 }
 0x3b8   :  { %v3822_v47 = vsel %vm3805_vm15, %v3813_v20, %v3821_v37 }
 0x3b9   :  { %22014 = vmatmul.mubr.msk.bf16.gmra.mrb[36].mxu1 %vm2688_vm8, %v3334_v56 }
 0x3ba   :  { %22017 = vmatprep.mubr.msk.bf16.mxu1 %vm24873_vm3, %v24872_v26 }
 0x3c1   :  { %22018 = vmatmul.mubr.msk.bf16.gmra.mrb[40].mxu1 %vm2688_vm8, %v3336_v28  ;;  %v3829_v28 = vrot.slane %v3827_v29, 4 }
 0x3c2   :  { %22021 = vmatprep.mubr.msk.bf16.mxu1 %vm24873_vm3, %v24872_v26 }
 0x3c9   :  { %22022 = vmatmul.mubr.msk.bf16.gmra.mrb[44].mxu1 %vm2688_vm8, %v3335_v46  ;;  %v3826_v46 = vrot.slane %v3824_v49, 3 }
 0x3ca   :  { %22033 = vmatprep.mubr.msk.bf16.mxu1 %vm24873_vm3, %v24872_v26 }
 0x3d1   :  { %22034 = vmatmul.mubr.msk.bf16.vlgmr.msra.gmra.mrb[28].mxu1 %vm2688_vm8, %v3480_v59  ;;  %v3833_v59 = vshrl.u32 %v26804_v2, 16 }
 0x3d2   :  { %22054 = vmatpush3.bf16.msra.mxu1 %v23439_v25  ;;  %22037 = vmatprep.mubr.msk.bf16.mxu1 %vm24873_vm3, %v24872_v26  ;;  %v3830_v25 = vor.u32 %v3829_v28, %v3826_v46 }
 0x3d3   :  { %22055 = vmatprep.subr.bf16.mxu1 %v24872_v26 }
 0x3d6   :  { %22056 = vmatpush3.bf16.msra.mxu1 %v23440_v48  ;;  %v3836_v48 = vshll.u32 %v26804_v2, 16  ;;  %v3842_v2 = vshrl.u32 %v26816_v58, 16 }
 0x3d7   :  { %22057 = vmatprep.subr.bf16.mxu1 %v24872_v26  ;;  %v21314_v43 = vpop.f32.mrb[116].mxu0 }
 0x3d8   :  { %v21315_v52 = vpop.f32.mrb[117].mxu0  ;;  %v3838_v17 = vrot.slane %v3836_v48, 4  ;;  %v3844_v18 = vrot.slane %v3842_v2, 3 }
 0x3d9   :  { %22038 = vmatmul.mubr.msk.bf16.gmra.mrb[32].mxu1 %vm2688_vm8, %v26318_v7  ;;  %v3496_v7 = vor.u32 %v3495_v53, %v3492_v15  ;;  %v26836_v56 = vadd.f32 %v21315_v52, %v21314_v43  ;;  %v21317_v0 = vpop.f32.mrb[118].mxu0  ;;  %v26892_v43 = vld [vmem:[%s31199_s2] ss:$0 sm:$0xff] }
 0x3da   :  { %22041 = vmatprep.mubr.msk.bf16.mxu1 %vm24873_vm3, %v24872_v26  ;;  %22058 = vmatpush3.bf16.msra.mxu1 %v23444_v10  ;;  %v21318_v62 = vpop.f32.mrb[119].mxu0  ;;  %v4502_v20 = vadd.f32 %v26892_v43, %v26829_v44  ;;  %v4503_v28 = vadd.f32 %v26892_v43, %v26831_v33 }
 0x3db   :  { %22059 = vmatprep.subr.bf16.mxu1 %v24872_v26  ;;  %v3497_v35 = vsel %vm3468_vm12, %v26353_v50, %v3496_v7  ;;  %v26846_v22 = vadd.f32 %v21318_v62, %v21317_v0  ;;  %v4504_v44 = vadd.f32 %v26892_v43, %v26836_v56 }
 0x3de   :  { %22060 = vmatpush3.bf16.msra.mxu1 %v23450_v36 }
 0x3df   :  { %22081 = vmatprep.subr.bf16.mxu1 %v24872_v26  ;;  %v21320_v30 = vpop.f32.mrb[120].mxu0 }
 0x3e0   :  { %v21321_v10 = vpop.f32.mrb[121].mxu0 }
 0x3e1   :  { %22042 = vmatmul.mubr.msk.bf16.gmra.mrb[36].mxu1 %vm2688_vm8, %v26366_v11  ;;  %v3666_v11 = vrot.slane %v23456_v41, 3  ;;  %v26850_v36 = vadd.f32 %v21321_v10, %v21320_v30  ;;  %v21323_v32 = vpop.f32.mrb[122].mxu0  ;;  %v3835_v41 = vrot.slane %v3833_v59, 3  ;;  %v4505_v10 = vadd.f32 %v26892_v43, %v26846_v22 }
 0x3e2   :  { %22045 = vmatprep.mubr.msk.bf16.mxu1 %vm24873_vm3, %v24872_v26  ;;  %v21324_v15 = vpop.f32.mrb[123].mxu0 }
 0x3e3   :  { %v3667_v50 = vsel %vm3664_vm14, %v3665_v16, %v3666_v11  ;;  %v3669_v13 = vsel %vm3664_vm14, %v3666_v11, %v3668_v57  ;;  %v26856_v53 = vadd.f32 %v21324_v15, %v21323_v32 }
 0x3e9   :  { %22046 = vmatmul.mubr.msk.bf16.gmra.mrb[40].mxu1 %vm2688_vm8, %v3497_v35  ;;  %v3831_v35 = vsel %vm3805_vm15, %v3821_v37, %v3830_v25 }
 0x3ea   :  { %22049 = vmatprep.mubr.msk.bf16.mxu1 %vm24873_vm3, %v24872_v26 }
 0x3f1   :  { %22050 = vmatmul.mubr.msk.bf16.gmra.mrb[44].mxu1 %vm2688_vm8, %v3496_v7  ;;  %v21326_v7 = vpop.f32.mrb[124].mxu0 }
 0x3f2   :  { %22061 = vmatprep.mubr.msk.bf16.mxu1 %vm24873_vm3, %v24872_v26  ;;  %v21327_v11 = vpop.f32.mrb[125].mxu0 }
 0x3f3   :  { %v26860_v16 = vadd.f32 %v21327_v11, %v21326_v7  ;;  %v4506_v7 = vadd.f32 %v26892_v43, %v26850_v36  ;;  %v4507_v11 = vadd.f32 %v26892_v43, %v26856_v53 }
 0x3f5   :  { %v4508_v36 = vadd.f32 %v26892_v43, %v26860_v16  ;;  %v23490_v16 = vld [vmem:[%s31198_s1 + $0x1c8] sm:$0xff]  }
 0x3f9   :  { %22062 = vmatmul.mubr.msk.bf16.vlgmr.msra.gmra.mrb[28].mxu1 %vm2688_vm8, %v3667_v50  ;;  %v23486_v50 = vld [vmem:[%s31202_s5 + $0x118] sm:$0xff]  }
 0x3fa   :  { %22082 = vmatpush3.bf16.msra.mxu1 %v23458_v19  ;;  %22065 = vmatprep.mubr.msk.bf16.mxu1 %vm24873_vm3, %v24872_v26  ;;  %v21329_v19 = vpop.f32.mrb[126].mxu0 }
 0x3fb   :  { %22083 = vmatprep.subr.bf16.mxu1 %v24872_v26  ;;  %v21330_v23 = vpop.f32.mrb[127].mxu0 }
 0x3fc   :  { %v26871_v57 = vadd.f32 %v21330_v23, %v21329_v19 }
 0x3fe   :  { %22084 = vmatpush3.bf16.msra.mxu1 %v23467_v12  ;;  %v23488_v12 = vld [vmem:[%s31198_s1 + $0x1c0] sm:$0xff]  }
 0x3ff   :  { %22085 = vmatprep.subr.bf16.mxu1 %v24872_v26 }
 0x401   :  { %22066 = vmatmul.mubr.msk.bf16.gmra.mrb[32].mxu1 %vm2688_vm8, %v3669_v13  ;;  %v3839_v13 = vor.u32 %v3838_v17, %v3835_v41 }
 0x402   :  { %22069 = vmatprep.mubr.msk.bf16.mxu1 %vm24873_vm3, %v24872_v26  ;;  %22086 = vmatpush3.bf16.msra.mxu1 %v23471_v8  ;;  %v21332_v8 = vpop.f32.mrb[128].mxu0 }
 0x403   :  { %22087 = vmatprep.subr.bf16.mxu1 %v24872_v26  ;;  %v21333_v55 = vpop.f32.mrb[129].mxu0  ;;  %v3840_v63 = vsel %vm3805_vm15, %v3830_v25, %v3839_v13 }
 0x406   :  { %22088 = vmatpush3.bf16.msra.mxu1 %v23475_v21  ;;  %v3845_v21 = vshll.u32 %v26816_v58, 16 }
 0x407   :  { %22109 = vmatprep.subr.bf16.mxu1 %v24872_v26 }
 0x408   :  { %v3847_v27 = vrot.slane %v3845_v21, 4  ;;  %v4509_v21 = vadd.f32 %v26892_v43, %v26871_v57 }
 0x409   :  { %22070 = vmatmul.mubr.msk.bf16.gmra.mrb[36].mxu1 %vm2688_vm8, %v3671_v54  ;;  %v26875_v54 = vadd.f32 %v21333_v55, %v21332_v8 }
 0x40a   :  { %22073 = vmatprep.mubr.msk.bf16.mxu1 %vm24873_vm3, %v24872_v26  ;;  %v3848_v42 = vor.u32 %v3847_v27, %v3844_v18 }
 0x40b   :  { %v4510_v18 = vadd.f32 %v26892_v43, %v26875_v54 }
 0x411   :  { %22074 = vmatmul.mubr.msk.bf16.gmra.mrb[40].mxu1 %vm2688_vm8, %v3673_v45 }
 0x412   :  { %22077 = vmatprep.mubr.msk.bf16.mxu1 %vm24873_vm3, %v24872_v26 }
 0x419   :  { %22078 = vmatmul.mubr.msk.bf16.gmra.mrb[44].mxu1 %vm2688_vm8, %v3672_v61  ;;  %v21335_v61 = vpop.f32.mrb[130].mxu0 }
 0x41a   :  { %22089 = vmatprep.mubr.msk.bf16.mxu1 %vm24873_vm3, %v24872_v26  ;;  %v21336_v45 = vpop.f32.mrb[131].mxu0 }
 0x41b   :  { %v26877_v60 = vadd.f32 %v21336_v45, %v21335_v61  ;;  %v21338_v51 = vpop.f32.mrb[132].mxu0  ;;  %v23489_v45 = vld [vmem:[%s31198_s1 + $0x180] sm:$0xff]  }
 0x41c   :  { %v21339_v40 = vpop.f32.mrb[133].mxu0 }
 0x41d   :  { %v26881_v3 = vadd.f32 %v21339_v40, %v21338_v51  ;;  %v21341_v58 = vpop.f32.mrb[134].mxu0 }
 0x41e   :  { %v21342_v31 = vpop.f32.mrb[135].mxu0 }
 0x41f   :  { %v26885_v4 = vadd.f32 %v21342_v31, %v21341_v58  ;;  %v21344_v14 = vpop.f32.mrb[136].mxu0  ;;  %v4511_v31 = vadd.f32 %v26892_v43, %v26877_v60  ;;  %v4512_v60 = vadd.f32 %v26892_v43, %v26881_v3  ;;  %v23495_v3 = vld [vmem:[%s31198_s1 + $0x1d8] sm:$0xff]  }
 0x420   :  { %v21345_v37 = vpop.f32.mrb[137].mxu0 }
 0x421   :  { %22090 = vmatmul.mubr.msk.bf16.vlgmr.msra.gmra.mrb[28].mxu1 %vm2688_vm8, %v3822_v47  ;;  %v26887_v49 = vadd.f32 %v21345_v37, %v21344_v14  ;;  %v21347_v29 = vpop.f32.mrb[138].mxu0  ;;  %v3849_v47 = vsel %vm3805_vm15, %v3839_v13, %v3848_v42 }
 0x422   :  { %22110 = vmatpush3.bf16.msra.mxu1 %v23480_v9  ;;  %22093 = vmatprep.mubr.msk.bf16.mxu1 %vm24873_vm3, %v24872_v26  ;;  %v21348_v5 = vpop.f32.mrb[139].mxu0 }
 0x423   :  { %22111 = vmatprep.subr.bf16.mxu1 %v24872_v26  ;;  %v26896_v9 = vadd.f32 %v21348_v5, %v21347_v29  ;;  %v21366_v52 = vpop.f32.mrb[140].mxu0  ;;  %v23491_v29 = vld [vmem:[%s31198_s1 + $0x188] sm:$0xff]   ;;  %v23493_v5 = vld [vmem:[%s31198_s1 + $0x1d0] sm:$0xff]  }
 0x424   :  { %v21367_v46 = vpop.f32.mrb[141].mxu0 }
 0x425   :  { %v21368_v0 = vadd.f32 %v21367_v46, %v21366_v52 }
 0x426   :  { %22112 = vmatpush3.bf16.msra.mxu1 %v23484_v6  ;;  %v21369_v6 = vpop.f32.mrb[142].mxu0 }
 0x427   :  { %22113 = vmatprep.subr.bf16.mxu1 %v24872_v26  ;;  %v21370_v62 = vpop.f32.mrb[143].mxu0  ;;  %v26906_v30 = vadd.f32 %v21368_v0, %v4502_v20 }
 0x428   :  { %v21371_v25 = vadd.f32 %v21370_v62, %v21369_v6  ;;  %v21372_v59 = vpop.f32.mrb[144].mxu0 }
 0x429   :  { %22094 = vmatmul.mubr.msk.bf16.gmra.mrb[32].mxu1 %vm2688_vm8, %v3831_v35  ;;  %v21373_v48 = vpop.f32.mrb[145].mxu0 }
 0x42a   :  { %22097 = vmatprep.mubr.msk.bf16.mxu1 %vm24873_vm3, %v24872_v26  ;;  %22114 = vmatpush3.bf16.msra.mxu1 %v23485_v39  ;;  %v26910_v32 = vadd.f32 %v21371_v25, %v4503_v28  ;;  %v21374_v33 = vadd.f32 %v21373_v48, %v21372_v59  ;;  %v21375_v39 = vpop.f32.mrb[146].mxu0  ;;  %v4513_v28 = vadd.f32 %v26892_v43, %v26885_v4  ;;  %v23492_v59 = vld [vmem:[#allocation3 + $0x14] sm:$0xff]  }
 0x42b   :  { %22115 = vmatprep.subr.bf16.mxu1 %v24872_v26  ;;  %v21376_v15 = vpop.f32.mrb[147].mxu0  ;;  %v4514_v4 = vadd.f32 %v26892_v43, %v26887_v49  ;;  %v4515_v49 = vadd.f32 %v26892_v43, %v26896_v9  ;;  %v23502_v43 = vld [vmem:[%s31198_s1 + $0x1a8] sm:$0xff]   ;;  %v23503_v9 = vld [vmem:[%s31198_s1 + $0x1f0] sm:$0xff]  }
 0x42c   :  { %v26914_v35 = vadd.f32 %v21374_v33, %v4504_v44  ;;  %v21377_v41 = vadd.f32 %v21376_v15, %v21375_v39  ;;  %v23494_v44 = vld [vmem:[%s31198_s1 + $0x190] sm:$0xff]   ;;  %v23497_v15 = vld [vmem:[%s31198_s1 + $0x198] sm:$0xff]  }
 0x42e   :  { %22116 = vmatpush3.bf16.msra.mxu1 %v23486_v50  ;;  %v26919_v19 = vadd.f32 %v21377_v41, %v4505_v10  ;;  %v23498_v41 = vld [vmem:[%s31198_s1 + $0x1e0] sm:$0xff]  }
 0x42f   :  { %21466 = vmatprep.subr.bf16.mxu1 %v23488_v12  ;;  %v21378_v56 = vpop.f32.mrb[148].mxu0 }
 0x430   :  { %v21379_v17 = vpop.f32.mrb[149].mxu0 }
 0x431   :  { %22098 = vmatmul.mubr.msk.bf16.gmra.mrb[36].mxu1 %vm2688_vm8, %v3840_v63  ;;  %v21380_v22 = vadd.f32 %v21379_v17, %v21378_v56  ;;  %v21381_v50 = vpop.f32.mrb[150].mxu0  ;;  %v23487_v63 = vld [vmem:[#allocation3 + $0xc] sm:$0xff]  }
 0x432   :  { %22101 = vmatprep.mubr.msk.bf16.mxu1 %vm24873_vm3, %v24872_v26  ;;  %v21382_v23 = vpop.f32.mrb[151].mxu0 }
 0x433   :  { %v26925_v12 = vadd.f32 %v21380_v22, %v4506_v7  ;;  %v21383_v8 = vadd.f32 %v21382_v23, %v21381_v50  ;;  %v23499_v23 = vld [vmem:[%s31198_s1 + $0x1a0] sm:$0xff]  }
 0x435   :  { %v26929_v53 = vadd.f32 %v21383_v8, %v4507_v11  ;;  %v23501_v8 = vld [vmem:[%s31198_s1 + $0x1e8] sm:$0xff]  }
 0x437   :  { %v21384_v13 = vpop.f32.mrb[152].mxu0 }
 0x438   :  { %v21385_v2 = vpop.f32.mrb[153].mxu0 }
 0x439   :  { %22102 = vmatmul.mubr.msk.bf16.gmra.mrb[40].mxu1 %vm2688_vm8, %v3849_v47  ;;  %v21386_v55 = vadd.f32 %v21385_v2, %v21384_v13  ;;  %v21387_v61 = vpop.f32.mrb[154].mxu0 }
 0x43a   :  { %22105 = vmatprep.mubr.msk.bf16.mxu1 %vm24873_vm3, %v24872_v26  ;;  %v21388_v51 = vpop.f32.mrb[155].mxu0 }
 0x43b   :  { %v26939_v27 = vadd.f32 %v21386_v55, %v4508_v36  ;;  %v21389_v57 = vadd.f32 %v21388_v51, %v21387_v61  ;;  %v23496_v36 = vld [vmem:[#allocation3 + $0x1c] sm:$0xff]  }
 0x43c   :  { %v23504_v51 = vld [vmem:[%s31198_s1 + $0x1b0] sm:$0xff]  }
 0x43d   :  { %v26944_v14 = vadd.f32 %v21389_v57, %v4509_v21  ;;  %v23513_v57 = vld [vmem:[%s31197_s0 + $0x9c] ss:$8 sps:$4 sm:$0xff]  }
 0x43f   :  { %v21390_v40 = vpop.f32.mrb[156].mxu0 }
 0x440   :  { %v21391_v58 = vpop.f32.mrb[157].mxu0 }
 0x441   :  { %22106 = vmatmul.mubr.msk.bf16.gmra.mrb[44].mxu1 %vm2688_vm8, %v3848_v42  ;;  %v21392_v42 = vadd.f32 %v21391_v58, %v21390_v40  ;;  %v21393_v37 = vpop.f32.mrb[158].mxu0 }
 0x442   :  { %22117 = vmatprep.mubr.msk.bf16.mxu1 %vm24873_vm3, %v24872_v26  ;;  %v21394_v54 = vpop.f32.mrb[159].mxu0 }
 0x443   :  { %v26956_v20 = vadd.f32 %v21392_v42, %v4510_v18  ;;  %v21395_v52 = vadd.f32 %v21394_v54, %v21393_v37  ;;  %v23510_v18 = vld [vmem:[%s31197_s0 + $0x8c] ss:$8 sps:$4 sm:$0xfc]   ;;  %v23507_v42 = vld [vmem:[%s31198_s1 + $0x1b8] sm:$0xff]  }
 0x444   :  { %v5421_v37 = vrot.slane %v23510_v18, 2 }
 0x445   :  { %v26960_v0 = vadd.f32 %v21395_v52, %v4511_v31 }
 0x447   :  { %v21396_v47 = vpop.f32.mrb[160].mxu0 }
 0x448   :  { %v21397_v46 = vpop.f32.mrb[161].mxu0 }
 0x449   :  { %22118 = vmatmul.mubr.msk.bf16.vlgmr.msra.gmra.mrb[28].mxu1 %vm2688_vm8, %v23487_v63  ;;  %v21398_v6 = vadd.f32 %v21397_v46, %v21396_v47  ;;  %v21399_v62 = vpop.f32.mrb[162].mxu0  ;;  %v23514_v47 = vld [vmem:[%s31197_s0 + $0xac] ss:$8 sps:$4 sm:$0xff]  }
 0x44a   :  { %21467 = vmatpush3.bf16.msra.mxu1 %v23489_v45  ;;  %22121 = vmatprep.mubr.msk.bf16.mxu1 %vm24873_vm3, %v24872_v26  ;;  %v21400_v25 = vpop.f32.mrb[163].mxu0  ;;  %v23500_v45 = vld [vmem:[#allocation3 + $0x24] sm:$0xff]  }
 0x44b   :  { %21468 = vmatprep.subr.bf16.mxu1 %v23490_v16  ;;  %v26968_v48 = vadd.f32 %v21398_v6, %v4512_v60  ;;  %v21401_v10 = vadd.f32 %v21400_v25, %v21399_v62  ;;  %v23506_v16 = vld [vmem:[%s31198_s1 + $0x1f8] sm:$0xff]  }
 0x44c   :  { %v23505_v60 = vld [vmem:[#allocation3 + $0x2c] sm:$0x1f]  }
 0x44d   :  { %v26973_v33 = vadd.f32 %v21401_v10, %v4513_v28 }
 0x44e   :  { %21469 = vmatpush3.bf16.msra.mxu1 %v23491_v29  ;;  %v5422_v29 = vrot.slane %v23513_v57, 2 }
 0x44f   :  { %21470 = vmatprep.subr.bf16.mxu1 %v23493_v5  ;;  %v21402_v39 = vpop.f32.mrb[164].mxu0 }
 0x450   :  { %v21403_v7 = vpop.f32.mrb[165].mxu0  ;;  %v5423_v52 = vsel %vm1283_vm0, %v5421_v37, %v5422_v29 }
 0x451   :  { %22122 = vmatmul.mubr.msk.bf16.gmra.mrb[32].mxu1 %vm2688_vm8, %v23492_v59  ;;  %v21404_v56 = vadd.f32 %v21403_v7, %v21402_v39  ;;  %v21405_v17 = vpop.f32.mrb[166].mxu0 }
 0x452   :  { %21471 = vmatpush3.bf16.msra.mxu1 %v23494_v44  ;;  %22125 = vmatprep.mubr.msk.bf16.mxu1 %vm24873_vm3, %v24872_v26  ;;  %v21406_v11 = vpop.f32.mrb[167].mxu0 }
 0x453   :  { %21472 = vmatprep.subr.bf16.mxu1 %v23495_v3  ;;  %v26985_v22 = vadd.f32 %v21404_v56, %v4514_v4  ;;  %v21407_v50 = vadd.f32 %v21406_v11, %v21405_v17  ;;  %v5426_v3 = vrot.slane %v23514_v47, 2 }
 0x455   :  { %v26993_v13 = vadd.f32 %v21407_v50, %v4515_v49 }
 0x456   :  { %21473 = vmatpush3.bf16.msra.mxu1 %v23497_v15  ;;  %v23516_v15 = vld [vmem:[%s31197_s0 + $0xa8] ss:$8 sps:$4 sm:$0xff]  }
 0x457   :  { %21474 = vmatprep.subr.bf16.mxu1 %v23498_v41  ;;  %v21424_v2 = vpop.f32.mrb[168].mxu0  ;;  %v5427_v41 = vsel %vm1283_vm0, %v5422_v29, %v5426_v3  ;;  %v5424_v50 = vrot.slane %v23516_v15, 2  ;;  %v5442_v15 = vrot.slane %v26693_v34, 2  ;;  %v5440_v34 = vrot.slane %v26708_v1, 2  ;;  %v23528_v1 = vld [vmem:[%s31200_s3] sm:$0xff]  }
 0x458   :  { %v21425_v21 = vpop.f32.mrb[169].mxu0  ;;  %22138 = vmatpush3.bf16.msra.mxu0 %v23528_v1 }
 0x459   :  { %22126 = vmatmul.mubr.msk.bf16.gmra.mrb[36].mxu1 %vm2688_vm8, %v23496_v36  ;;  %v21426_v55 = vadd.f32 %v21425_v21, %v21424_v2  ;;  %v21427_v61 = vpop.f32.mrb[170].mxu0  ;;  %22139 = vmatprep.subr.bf16.mxu0 %v24872_v26 }
 0x45a   :  { %21475 = vmatpush3.bf16.msra.mxu1 %v23499_v23  ;;  %22129 = vmatprep.mubr.msk.bf16.mxu1 %vm24873_vm3, %v24872_v26  ;;  %v21428_v63 = vpop.f32.mrb[171].mxu0 }
 0x45b   :  { %21476 = vmatprep.subr.bf16.mxu1 %v23501_v8  ;;  %v27017_v40 = vadd.f32 %v21426_v55, %v26906_v30  ;;  %v21429_v58 = vadd.f32 %v21428_v63, %v21427_v61  ;;  %v23508_v30 = vld [vmem:[%s31197_s0 + $0x88] ss:$8 sps:$4 sm:$0xfc]  }
 0x45c   :  { %v5418_v25 = vrot.slane %v23508_v30, 2 }
 0x45d   :  { %v27021_v31 = vadd.f32 %v21429_v58, %v26910_v32  ;;  %v23511_v32 = vld [vmem:[%s31197_s0 + $0x98] ss:$8 sps:$4 sm:$0xff]   ;;  %v23522_v58 = vld [vmem:[%s31197_s0 + $0xc8] ss:$8 sps:$4 sm:$0xff]  }
 0x45e   :  { %21477 = vmatpush3.bf16.msra.mxu1 %v23502_v43  ;;  %v5419_v59 = vrot.slane %v23511_v32, 2 }
 0x45f   :  { %21478 = vmatprep.subr.bf16.mxu1 %v23503_v9  ;;  %v21430_v54 = vpop.f32.mrb[172].mxu0  ;;  %v23519_v9 = vld [vmem:[%s31197_s0 + $0xb8] ss:$8 sps:$4 sm:$0xff]  }
 0x460   :  { %v21431_v5 = vpop.f32.mrb[173].mxu0  ;;  %v5420_v39 = vsel %vm1283_vm0, %v5418_v25, %v5419_v59  ;;  %v5425_v43 = vsel %vm1283_vm0, %v5419_v59, %v5424_v50  ;;  %v5428_v63 = vrot.slane %v23519_v9, 2 }
 0x461   :  { %22130 = vmatmul.mubr.msk.bf16.gmra.mrb[40].mxu1 %vm2688_vm8, %v23500_v45  ;;  %v21432_v46 = vadd.f32 %v21431_v5, %v21430_v54  ;;  %v21433_v28 = vpop.f32.mrb[174].mxu0 }
 0x462   :  { %22133 = vmatprep.mubr.msk.bf16.mxu1 %vm24873_vm3, %v24872_v26  ;;  %21479 = vmatpush3.bf16.msra.mxu1 %v23504_v51  ;;  %v21434_v6 = vpop.f32.mrb[175].mxu0  ;;  %v5429_v57 = vsel %vm1283_vm0, %v5424_v50, %v5428_v63 }
 0x463   :  { %21480 = vmatprep.subr.bf16.mxu1 %v23506_v16  ;;  %v27041_v62 = vadd.f32 %v21432_v46, %v26914_v35  ;;  %v21435_v44 = vadd.f32 %v21434_v6, %v21433_v28  ;;  %v23517_v35 = vld [vmem:[%s31197_s0 + $0xbc] ss:$8 sps:$4 sm:$0xff]   ;;  %v23525_v28 = vld [vmem:[%s31197_s0 + $0xd8] ss:$8 sps:$4 sm:$0xff]  }
 0x464   :  { %v5430_v23 = vrot.slane %v23517_v35, 2 }
 0x465   :  { %v27044_v10 = vadd.f32 %v21435_v44, %v26919_v19 }
 0x466   :  { %21481 = vmatpush3.bf16.msra.mxu1 %v23507_v42  ;;  %v5431_v21 = vsel %vm1283_vm0, %v5426_v3, %v5430_v23 }
 0x467   :  { %22313 = vmatprep.subr.bf16.mxu1 %v24872_v26  ;;  %v21436_v4 = vpop.f32.mrb[176].mxu0 }
 0x468   :  { %v21437_v7 = vpop.f32.mrb[177].mxu0 }
 0x469   :  { %22134 = vmatmul.mubr.msk.bf16.gmra.mrb[44].mxu1 %vm2688_vm8, %v23505_v60  ;;  %v21438_v49 = vadd.f32 %v21437_v7, %v21436_v4  ;;  %v21439_v56 = vpop.f32.mrb[178].mxu0  ;;  %v5436_v4 = vrot.slane %v23525_v28, 2  ;;  %v19490_v7 = vld [vmem:[%s31197_s0 + $0xf8] sm:$0x11] }
 0x46a   :  { %5590 = vmatprep.mubr.bf16.mxu1 %v5423_v52  ;;  %v21440_v17 = vpop.f32.mrb[179].mxu0 }
 0x46b   :  { %v27055_v19 = vadd.f32 %v21438_v49, %v26925_v12  ;;  %v21441_v11 = vadd.f32 %v21440_v17, %v21439_v56  ;;  %v23520_v12 = vld [vmem:[%s31197_s0 + $0xcc] ss:$8 sps:$4 sm:$0xff]   ;;  %v19538_v17 = vcombine.high %v19490_v7, %v19490_v7 }
 0x46c   :  { %v5434_v16 = vrot.slane %v23520_v12, 2 }
 0x46d   :  { %v27058_v36 = vadd.f32 %v21441_v11, %v26929_v53 }
 0x46e   :  { %v5435_v37 = vsel %vm1283_vm0, %v5430_v23, %v5434_v16 }
 0x46f   :  { %v21442_v8 = vpop.f32.mrb[180].mxu0 }
 0x470   :  { %v21443_v2 = vpop.f32.mrb[181].mxu0 }
 0x471   :  { %5591 = vmatmul.mubr.bf16.vlgmr.msra.gmra.mrb[48].mxu1 %v5420_v39  ;;  %v21444_v55 = vadd.f32 %v21443_v2, %v21442_v8  ;;  %v21445_v61 = vpop.f32.mrb[182].mxu0  ;;  %v5441_v2 = vsel %vm1283_vm0, %v5436_v4, %v5440_v34 }
 0x472   :  { %5598 = vmatprep.mubr.bf16.mxu1 %v5427_v41  ;;  %v21446_v45 = vpop.f32.mrb[183].mxu0 }
 0x473   :  { %v27069_v53 = vadd.f32 %v21444_v55, %v26939_v27  ;;  %v21447_v51 = vadd.f32 %v21446_v45, %v21445_v61  ;;  %v23523_v27 = vld [vmem:[%s31197_s0 + $0xdc] ss:$8 sps:$4 sm:$0xff]  }
 0x474   :  { %v5438_v52 = vrot.slane %v23523_v27, 2  ;;  %v23531_v45 = vld [vmem:[%s31200_s3 + $0x18] sm:$0xff]  }
 0x475   :  { %v27072_v18 = vadd.f32 %v21447_v51, %v26944_v14  ;;  %v5432_v14 = vrot.slane %v23522_v58, 2  ;;  %v23532_v51 = vld [vmem:[%s31200_s3 + $0x20] sm:$0xff]  }
 0x476   :  { %v5439_v44 = vsel %vm1283_vm0, %v5434_v16, %v5438_v52  ;;  %v5443_v56 = vsel %vm1283_vm0, %v5438_v52, %v5442_v15  ;;  %v23534_v16 = vld [vmem:[%s31200_s3 + $0x30] sm:$0xff]   ;;  %v18801_v58 = vld [vmem:[%s31203_s6] ss:$0 sm:$0xff] }
 0x477   :  { %v21448_v42 = vpop.f32.mrb[184].mxu0  ;;  %v5433_v46 = vsel %vm1283_vm0, %v5428_v63, %v5432_v14  ;;  %v5437_v35 = vsel %vm1283_vm0, %v5432_v14, %v5436_v4  ;;  %v23533_v63 = vld [vmem:[%s31200_s3 + $0x28] sm:$0xff]  }
 0x478   :  { %v21449_v29 = vpop.f32.mrb[185].mxu0 }
 0x479   :  { %5599 = vmatmul.mubr.bf16.gmra.mrb[52].mxu1 %v5425_v43  ;;  %v21450_v54 = vadd.f32 %v21449_v29, %v21448_v42  ;;  %v21451_v30 = vpop.f32.mrb[186].mxu0 }
 0x47a   :  { %5606 = vmatprep.mubr.bf16.mxu1 %v5431_v21  ;;  %v21452_v32 = vpop.f32.mrb[187].mxu0  ;;  %v19537_v21 = vcombine.low %v19490_v7, %v19490_v7 }
 0x47b   :  { %v27083_v5 = vadd.f32 %v21450_v54, %v26956_v20  ;;  %v21453_v60 = vadd.f32 %v21452_v32, %v21451_v30 }
 0x47c   :  { %v5444_v55 = vrot.slane %v19537_v21, 2 }
 0x47d   :  { %v27086_v47 = vadd.f32 %v21453_v60, %v26960_v0 }
 0x47e   :  { %v5445_v61 = vsel %vm1283_vm0, %v5440_v34, %v5444_v55 }
 0x47f   :  { %v21454_v6 = vpop.f32.mrb[188].mxu0 }
 0x480   :  { %v21455_v25 = vpop.f32.mrb[189].mxu0 }
 0x481   :  { %5607 = vmatmul.mubr.bf16.gmra.mrb[56].mxu1 %v5429_v57  ;;  %v21456_v59 = vadd.f32 %v21455_v25, %v21454_v6  ;;  %v21457_v3 = vpop.f32.mrb[190].mxu0  ;;  %v23535_v57 = vld [vmem:[%s31200_s3 + $0x38] sm:$0xff]  }
 0x482   :  { %5614 = vmatprep.mubr.bf16.mxu1 %v5435_v37  ;;  %v21458_v20 = vpop.f32.mrb[191].mxu0 }
 0x483   :  { %v27094_v39 = vadd.f32 %v21456_v59, %v26968_v48  ;;  %v21459_v0 = vadd.f32 %v21458_v20, %v21457_v3 }
 0x485   :  { %v27101_v41 = vadd.f32 %v21459_v0, %v26973_v33  ;;  %v5446_v33 = vrot.slane %v19538_v17, 2 }
 0x487   :  { %v21460_v49 = vpop.f32.mrb[192].mxu0  ;;  %v5447_v12 = vsel %vm1283_vm0, %v5442_v15, %v5446_v33 }
 0x488   :  { %v21461_v11 = vpop.f32.mrb[193].mxu0 }
 0x489   :  { %5615 = vmatmul.mubr.bf16.gmra.mrb[60].mxu1 %v5433_v46  ;;  %v21462_v50 = vadd.f32 %v21461_v11, %v21460_v49  ;;  %v21463_v48 = vpop.f32.mrb[194].mxu0 }
 0x48a   :  { %5622 = vmatprep.mubr.bf16.mxu1 %v5439_v44  ;;  %v21464_v23 = vpop.f32.mrb[195].mxu0 }
 0x48b   :  { %v27107_v8 = vadd.f32 %v21462_v50, %v26985_v22  ;;  %v21465_v43 = vadd.f32 %v21464_v23, %v21463_v48  ;;  %v23529_v22 = vld [vmem:[%s31200_s3 + $0x8] sm:$0xff]  }
 0x48c   :  { %22140 = vmatpush3.bf16.msra.mxu0 %v23529_v22 }
 0x48d   :  { %v27110_v9 = vadd.f32 %v21465_v43, %v26993_v13  ;;  %22141 = vmatprep.subr.bf16.mxu0 %v24872_v26  ;;  %v23530_v13 = vld [vmem:[%s31200_s3 + $0x10] sm:$0xff]  }
 0x490   :  { %22142 = vmatpush3.bf16.msra.mxu0 %v23530_v13 }
 0x491   :  { %5623 = vmatmul.mubr.bf16.gmra.mrb[64].mxu1 %v5437_v35  ;;  %22143 = vmatprep.subr.bf16.mxu0 %v24872_v26 }
 0x492   :  { %5630 = vmatprep.mubr.bf16.mxu1 %v5443_v56 }
 0x494   :  { %22144 = vmatpush3.bf16.msra.mxu0 %v23531_v45 }
 0x495   :  { %22145 = vmatprep.subr.bf16.mxu0 %v24872_v26 }
 0x498   :  { %22146 = vmatpush3.bf16.msra.mxu0 %v23532_v51 }
 0x499   :  { %5631 = vmatmul.mubr.bf16.gmra.mrb[68].mxu1 %v5441_v2  ;;  %22147 = vmatprep.subr.bf16.mxu0 %v24872_v26 }
 0x49a   :  { %5638 = vmatprep.mubr.bf16.mxu1 %v5447_v12 }
 0x49c   :  { %22148 = vmatpush3.bf16.msra.mxu0 %v23533_v63 }
 0x49d   :  { %22149 = vmatprep.subr.bf16.mxu0 %v24872_v26 }
 0x4a0   :  { %22150 = vmatpush3.bf16.msra.mxu0 %v23534_v16 }
 0x4a1   :  { %5639 = vmatmul.mubr.bf16.gmra.mrb[72].mxu1 %v5445_v61  ;;  %22151 = vmatprep.subr.bf16.mxu0 %v24872_v26 }
 0x4a2   :  { %22321 = vmatprep.mubr.msk.bf16.mxu1 %vm24873_vm3, %v24872_v26 }
 0x4a4   :  { %22152 = vmatpush3.bf16.msra.mxu0 %v23535_v57 }
 0x4a5   :  { %22181 = vmatprep.subr.bf16.mxu0 %v24872_v26 }
 0x51c   :  { %v4089_v42 = vpop.f32.mrb[28].mxu1 }
 0x51d   :  { %v22578_v37 = vadd.f32 %v18801_v58, %v4089_v42  ;;  %v22119_v27 = vpop.f32.mrb[29].mxu1 }
 0x51e   :  { %v4092_v29 = vpop.f32.mrb[30].mxu1 }
 0x51f   :  { %v4138_v54 = vmax.f32 %v22578_v37, 0.0  ;;  %v22579_v30 = vadd.f32 %v18801_v58, %v4092_v29  ;;  %v22120_v32 = vpop.f32.mrb[31].mxu1  ;;  %v4197_v29 = vld [vmem:[#allocation4 + $0x24] sm:$0x1] }
 0x521   :  { %v20802_v14 = vpack.c.bf16 %v4138_v54, %v4138_v54  ;;  %v4139_v60 = vmax.f32 %v22579_v30, 0.0 }
 0x523   :  { %4188 = vst.msk [vmem:[#allocation4] sm:$0xf] %vm2602_vm7, %v20802_v14  ;;  %v20803_v52 = vpack.c.bf16 %v4139_v60, %v4139_v60 }
 0x524   :  { %v4097_v46 = vpop.f32.mrb[32].mxu1 }
 0x525   :  { %4189 = vst.msk [vmem:[#allocation4 + $0x4] sm:$0xf] %vm2602_vm7, %v20803_v52  ;;  %v22580_v28 = vadd.f32 %v18801_v58, %v4097_v46  ;;  %v22123_v6 = vpop.f32.mrb[33].mxu1 }
 0x526   :  { %v4100_v44 = vpop.f32.mrb[34].mxu1 }
 0x527   :  { %v4140_v25 = vmax.f32 %v22580_v28, 0.0  ;;  %v22581_v59 = vadd.f32 %v18801_v58, %v4100_v44  ;;  %v22124_v3 = vpop.f32.mrb[35].mxu1 }
 0x529   :  { %v20804_v20 = vpack.c.bf16 %v4140_v25, %v4140_v25  ;;  %v4141_v4 = vmax.f32 %v22581_v59, 0.0 }
 0x52b   :  { %4190 = vst.msk [vmem:[#allocation4 + $0x8] sm:$0xf] %vm2602_vm7, %v20804_v20  ;;  %v20805_v0 = vpack.c.bf16 %v4141_v4, %v4141_v4 }
 0x52c   :  { %v4105_v15 = vpop.f32.mrb[36].mxu1 }
 0x52d   :  { %4191 = vst.msk [vmem:[#allocation4 + $0xc] sm:$0xf] %vm2602_vm7, %v20805_v0  ;;  %v22582_v7 = vadd.f32 %v18801_v58, %v4105_v15  ;;  %v22127_v35 = vpop.f32.mrb[37].mxu1 }
 0x52e   :  { %v4108_v49 = vpop.f32.mrb[38].mxu1 }
 0x52f   :  { %v4142_v56 = vmax.f32 %v22582_v7, 0.0  ;;  %v22583_v17 = vadd.f32 %v18801_v58, %v4108_v49  ;;  %v22128_v11 = vpop.f32.mrb[39].mxu1 }
 0x531   :  { %v20806_v50 = vpack.c.bf16 %v4142_v56, %v4142_v56  ;;  %v4143_v48 = vmax.f32 %v22583_v17, 0.0 }
 0x533   :  { %4192 = vst.msk [vmem:[#allocation4 + $0x10] sm:$0xf] %vm2602_vm7, %v20806_v50  ;;  %v20807_v23 = vpack.c.bf16 %v4143_v48, %v4143_v48 }
 0x534   :  { %v4113_v34 = vpop.f32.mrb[40].mxu1 }
 0x535   :  { %4193 = vst.msk [vmem:[#allocation4 + $0x14] sm:$0xf] %vm2602_vm7, %v20807_v23  ;;  %v22584_v43 = vadd.f32 %v18801_v58, %v4113_v34  ;;  %v22131_v33 = vpop.f32.mrb[41].mxu1  ;;  %v23537_v23 = vld [vmem:[%s31200_s3 + $0x40] sm:$0xff]  }
 0x536   :  { %v4116_v2 = vpop.f32.mrb[42].mxu1 }
 0x537   :  { %v4144_v21 = vmax.f32 %v22584_v43, 0.0  ;;  %v22585_v12 = vadd.f32 %v18801_v58, %v4116_v2  ;;  %v22132_v55 = vpop.f32.mrb[43].mxu1  ;;  %v23539_v2 = vld [vmem:[%s31200_s3 + $0x48] sm:$0xff]  }
 0x539   :  { %v20808_v61 = vpack.c.bf16 %v4144_v21, %v4144_v21  ;;  %v4145_v1 = vmax.f32 %v22585_v12, 0.0 }
 0x53b   :  { %4194 = vst.msk [vmem:[#allocation4 + $0x18] sm:$0xf] %vm2602_vm7, %v20808_v61  ;;  %v20809_v22 = vpack.c.bf16 %v4145_v1, %v4145_v1 }
 0x53c   :  { %v4121_v13 = vpop.f32.mrb[44].mxu1 }
 0x53d   :  { %4195 = vst.msk [vmem:[#allocation4 + $0x1c] sm:$0xf] %vm2602_vm7, %v20809_v22  ;;  %v22586_v45 = vadd.f32 %v18801_v58, %v4121_v13  ;;  %v22135_v51 = vpop.f32.mrb[45].mxu1 }
 0x53e   :  { %v4124_v63 = vpop.f32.mrb[46].mxu1 }
 0x53f   :  { %v4146_v16 = vmax.f32 %v22586_v45, 0.0  ;;  %v22587_v57 = vadd.f32 %v18801_v58, %v4124_v63  ;;  %v22136_v42 = vpop.f32.mrb[47].mxu1 }
 0x541   :  { %v20810_v37 = vpack.c.bf16 %v4146_v16, %v4146_v16  ;;  %v4147_v27 = vmax.f32 %v22587_v57, 0.0  ;;  %v23542_v57 = vld [vmem:[%s31200_s3 + $0x58] sm:$0xff]  }
 0x543   :  { %4196 = vst.msk [vmem:[#allocation4 + $0x20] sm:$0xf] %vm2602_vm7, %v20810_v37  ;;  %v20811_v54 = vpack.c.bf16 %v4147_v27, %v4147_v27 }
 0x544   :  { %v21482_v30 = vpop.f32.mrb[48].mxu1 }
 0x545   :  { %v4198_v32 = vsel %vm26304_vm13, %v20811_v54, %v4197_v29  ;;  %v21483_v14 = vpop.f32.mrb[49].mxu1 }
 0x546   :  { %4199 = vst [vmem:[#allocation4 + $0x24] sm:$0x1] %v4198_v32  ;;  %v21484_v60 = vadd.f32 %v21483_v14, %v21482_v30  ;;  %v21485_v52 = vpop.f32.mrb[50].mxu1 }
 0x547   :  { %v21486_v46 = vpop.f32.mrb[51].mxu1 }
 0x548   :  { %v5647_v28 = vadd.f32 %v21484_v60, %v27017_v40  ;;  %v21487_v6 = vadd.f32 %v21486_v46, %v21485_v52 }
 0x54a   :  { %v5648_v58 = vadd.f32 %v21487_v6, %v27021_v31  ;;  %v5661_v44 = vmax.f32 %v5647_v28, 0.0  ;;  %v23546_v28 = vld [vmem:[%s31200_s3 + $0x68] sm:$0xff]  }
 0x54c   :  { %v5662_v25 = vmax.f32 %v5648_v58, 0.0  ;;  %v21488_v59 = vpop.f32.mrb[52].mxu1 }
 0x54d   :  { %v21489_v3 = vpop.f32.mrb[53].mxu1 }
 0x54e   :  { %v20882_v20 = vpack.c.bf16 %v5662_v25, %v5661_v44  ;;  %v21490_v4 = vadd.f32 %v21489_v3, %v21488_v59  ;;  %v21491_v0 = vpop.f32.mrb[54].mxu1 }
 0x54f   :  { %v21492_v15 = vpop.f32.mrb[55].mxu1 }
 0x550   :  { %20883 = vst [vmem:[#allocation2 + $0x38] sm:$0xff] %v20882_v20   ;;  %v5649_v7 = vadd.f32 %v21490_v4, %v27041_v62  ;;  %v21493_v35 = vadd.f32 %v21492_v15, %v21491_v0 }
 0x552   :  { %v5650_v49 = vadd.f32 %v21493_v35, %v27044_v10  ;;  %v5663_v56 = vmax.f32 %v5649_v7, 0.0  ;;  %v23550_v35 = vld [vmem:[%s31200_s3 + $0x78] sm:$0xff]  }
 0x554   :  { %v5664_v17 = vmax.f32 %v5650_v49, 0.0  ;;  %v21494_v40 = vpop.f32.mrb[56].mxu1 }
 0x555   :  { %v21495_v11 = vpop.f32.mrb[57].mxu1 }
 0x556   :  { %v20887_v50 = vpack.c.bf16 %v5664_v17, %v5663_v56  ;;  %v21496_v31 = vadd.f32 %v21495_v11, %v21494_v40  ;;  %v21497_v48 = vpop.f32.mrb[58].mxu1 }
 0x557   :  { %v21498_v34 = vpop.f32.mrb[59].mxu1  ;;  %v27170_v43 = vld [vmem:[#allocation2 + $0x38] sm:$0xff]  }
 0x558   :  { %20914 = vst [vmem:[#allocation2 + $0x40] sm:$0xff] %v20887_v50   ;;  %v5651_v62 = vadd.f32 %v21496_v31, %v27055_v19  ;;  %v21499_v33 = vadd.f32 %v21498_v34, %v21497_v48  ;;  %22154 = vmatmul.mubr.bf16.vlgmr.msra.gmra.mrb[196].mxu0 %v27170_v43 }
 0x559   :  { %22182 = vmatpush3.bf16.msra.mxu0 %v23537_v23  ;;  %22157 = vmatprep.mubr.msk.bf16.mxu0 %vm24873_vm3, %v24872_v26 }
 0x55a   :  { %v5652_v10 = vadd.f32 %v21499_v33, %v27058_v36  ;;  %22183 = vmatprep.subr.bf16.mxu0 %v24872_v26  ;;  %v5665_v21 = vmax.f32 %v5651_v62, 0.0  ;;  %v23540_v36 = vld [vmem:[%s31200_s3 + $0x50] sm:$0xff]  }
 0x55c   :  { %v5666_v12 = vmax.f32 %v5652_v10, 0.0  ;;  %v21500_v55 = vpop.f32.mrb[60].mxu1 }
 0x55d   :  { %v21501_v61 = vpop.f32.mrb[61].mxu1  ;;  %22184 = vmatpush3.bf16.msra.mxu0 %v23539_v2  ;;  %v5745_v2 = vld [vmem:[#allocation2 + $0x6c] sm:$0x7] }
 0x55e   :  { %v20892_v19 = vpack.c.bf16 %v5666_v12, %v5665_v21  ;;  %v21502_v1 = vadd.f32 %v21501_v61, %v21500_v55  ;;  %v21503_v22 = vpop.f32.mrb[62].mxu1  ;;  %22185 = vmatprep.subr.bf16.mxu0 %v24872_v26 }
 0x55f   :  { %v21504_v13 = vpop.f32.mrb[63].mxu1  ;;  %v27184_v45 = vld [vmem:[#allocation2 + $0x40] sm:$0xff]  }
 0x560   :  { %20915 = vst [vmem:[#allocation2 + $0x48] sm:$0xff] %v20892_v19   ;;  %v5653_v51 = vadd.f32 %v21502_v1, %v27069_v53  ;;  %v21505_v63 = vadd.f32 %v21504_v13, %v21503_v22  ;;  %22158 = vmatmul.mubr.bf16.gmra.mrb[200].mxu0 %v27184_v45  ;;  %v5990_v61 = vshll.u32 %v27184_v45, 16  ;;  %v5983_v1 = vshrl.u32 %v27170_v43, 16 }
 0x561   :  { %22161 = vmatprep.mubr.msk.bf16.mxu0 %vm24873_vm3, %v24872_v26  ;;  %22186 = vmatpush3.bf16.msra.mxu0 %v23540_v36  ;;  %v23551_v36 = vld [vmem:[%s31200_s3 + $0x80] sm:$0xff]  }
 0x562   :  { %v5654_v16 = vadd.f32 %v21505_v63, %v27072_v18  ;;  %22187 = vmatprep.subr.bf16.mxu0 %v24872_v26  ;;  %v5667_v42 = vmax.f32 %v5653_v51, 0.0  ;;  %v23544_v18 = vld [vmem:[%s31200_s3 + $0x60] sm:$0xff]   ;;  %v5992_v24 = vrot.slane %v5990_v61, 1  ;;  %v23552_v63 = vld [vmem:[%s31200_s3 + $0x88] sm:$0xff]  }
 0x564   :  { %v5668_v37 = vmax.f32 %v5654_v16, 0.0  ;;  %v21506_v27 = vpop.f32.mrb[64].mxu1 }
 0x565   :  { %v21507_v29 = vpop.f32.mrb[65].mxu1  ;;  %22188 = vmatpush3.bf16.msra.mxu0 %v23542_v57 }
 0x566   :  { %v20897_v53 = vpack.c.bf16 %v5668_v37, %v5667_v42  ;;  %v21508_v54 = vadd.f32 %v21507_v29, %v21506_v27  ;;  %v21509_v30 = vpop.f32.mrb[66].mxu1  ;;  %22189 = vmatprep.subr.bf16.mxu0 %v24872_v26  ;;  %v23553_v42 = vld [vmem:[%s31200_s3 + $0x90] sm:$0xff]  }
 0x567   :  { %v21510_v32 = vpop.f32.mrb[67].mxu1  ;;  %v27199_v14 = vld [vmem:[#allocation2 + $0x48] sm:$0xff]  }
 0x568   :  { %20916 = vst [vmem:[#allocation2 + $0x50] sm:$0xff] %v20897_v53   ;;  %v5655_v60 = vadd.f32 %v21508_v54, %v27083_v5  ;;  %v21511_v52 = vadd.f32 %v21510_v32, %v21509_v30  ;;  %22162 = vmatmul.mubr.bf16.gmra.mrb[204].mxu0 %v27199_v14  ;;  %v5998_v51 = vshll.u32 %v27199_v14, 16  ;;  %v6002_v29 = vshrl.u32 %v27199_v14, 16  ;;  %v23555_v30 = vld [vmem:[%s31200_s3 + $0xa0] sm:$0xff]   ;;  %v23556_v14 = vld [vmem:[%s31200_s3 + $0xa8] sm:$0xff]  }
 0x569   :  { %22165 = vmatprep.mubr.msk.bf16.mxu0 %vm24873_vm3, %v24872_v26  ;;  %22190 = vmatpush3.bf16.msra.mxu0 %v23544_v18 }
 0x56a   :  { %v5656_v46 = vadd.f32 %v21511_v52, %v27086_v47  ;;  %22191 = vmatprep.subr.bf16.mxu0 %v24872_v26  ;;  %v5669_v6 = vmax.f32 %v5655_v60, 0.0  ;;  %v23548_v47 = vld [vmem:[%s31200_s3 + $0x70] sm:$0xff]   ;;  %v6000_v16 = vrot.slane %v5998_v51, 1 }
 0x56b   :  { %v23564_v51 = vld [vmem:[%s31200_s3 + $0xd0] sm:$0xff]  }
 0x56c   :  { %v5670_v58 = vmax.f32 %v5656_v46, 0.0  ;;  %v21512_v44 = vpop.f32.mrb[68].mxu1  ;;  %v6004_v54 = vor.u32 %v6002_v29, %v6000_v16  ;;  %v23568_v29 = vld [vmem:[%s31200_s3 + $0xe0] sm:$0xff]  }
 0x56d   :  { %v21513_v25 = vpop.f32.mrb[69].mxu1  ;;  %22192 = vmatpush3.bf16.msra.mxu0 %v23546_v28  ;;  %v23557_v28 = vld [vmem:[%s31200_s3 + $0xb0] sm:$0xff]  }
 0x56e   :  { %v20902_v5 = vpack.c.bf16 %v5670_v58, %v5669_v6  ;;  %v21514_v59 = vadd.f32 %v21513_v25, %v21512_v44  ;;  %v21515_v3 = vpop.f32.mrb[70].mxu1  ;;  %22193 = vmatprep.subr.bf16.mxu0 %v24872_v26  ;;  %v23558_v44 = vld [vmem:[%s31200_s3 + $0xb8] sm:$0xff]  }
 0x56f   :  { %v21516_v20 = vpop.f32.mrb[71].mxu1  ;;  %v27214_v4 = vld [vmem:[#allocation2 + $0x50] sm:$0xff]  }
 0x570   :  { %20917 = vst [vmem:[#allocation2 + $0x58] sm:$0xff] %v20902_v5   ;;  %v5657_v0 = vadd.f32 %v21514_v59, %v27094_v39  ;;  %v21517_v15 = vadd.f32 %v21516_v20, %v21515_v3  ;;  %22166 = vmatmul.mubr.bf16.gmra.mrb[208].mxu0 %v27214_v4  ;;  %v6006_v27 = vshll.u32 %v27214_v4, 16  ;;  %v6010_v60 = vshrl.u32 %v27214_v4, 16  ;;  %v23576_v20 = vld [vmem:[%s31202_s5] sm:$0xff]   ;;  %v23577_v4 = vld [vmem:[%s31202_s5 + $0x8] sm:$0xff]  }
 0x571   :  { %22169 = vmatprep.mubr.msk.bf16.mxu0 %vm24873_vm3, %v24872_v26  ;;  %22194 = vmatpush3.bf16.msra.mxu0 %v23548_v47 }
 0x572   :  { %v5658_v7 = vadd.f32 %v21517_v15, %v27101_v41  ;;  %22195 = vmatprep.subr.bf16.mxu0 %v24872_v26  ;;  %v5671_v49 = vmax.f32 %v5657_v0, 0.0  ;;  %v6008_v53 = vrot.slane %v6006_v27, 1  ;;  %22314 = vmatpush3.bf16.msra.mxu1 %v23576_v20 }
 0x573   :  { %22315 = vmatprep.subr.bf16.mxu1 %v24872_v26 }
 0x574   :  { %v5672_v56 = vmax.f32 %v5658_v7, 0.0  ;;  %v21518_v17 = vpop.f32.mrb[72].mxu1  ;;  %v6009_v18 = vsel %vm409_vm1, %v6004_v54, %v6008_v53  ;;  %v6012_v46 = vor.u32 %v6010_v60, %v6008_v53 }
 0x575   :  { %v21519_v40 = vpop.f32.mrb[73].mxu1  ;;  %22196 = vmatpush3.bf16.msra.mxu0 %v23550_v35  ;;  %v27313_v35 = vld [vmem:[#allocation2 + $0x40] sm:$0xf] }
 0x576   :  { %v20907_v39 = vpack.c.bf16 %v5672_v56, %v5671_v49  ;;  %v21520_v11 = vadd.f32 %v21519_v40, %v21518_v17  ;;  %v21521_v50 = vpop.f32.mrb[74].mxu1  ;;  %22225 = vmatprep.subr.bf16.mxu0 %v24872_v26  ;;  %22316 = vmatpush3.bf16.msra.mxu1 %v23577_v4  ;;  %v23578_v49 = vld [vmem:[%s31202_s5 + $0x10] sm:$0xff]   ;;  %v27319_v17 = vld [vmem:[#allocation2 + $0x44] sm:$0xff]   ;;  %v6192_v40 = vld [vmem:[#allocation2 + $0x3c] sm:$0xe] }
 0x577   :  { %v21522_v31 = vpop.f32.mrb[75].mxu1  ;;  %v27226_v41 = vld [vmem:[#allocation2 + $0x58] sm:$0xff]   ;;  %22317 = vmatprep.subr.bf16.mxu1 %v24872_v26 }
 0x578   :  { %20918 = vst [vmem:[#allocation2 + $0x60] sm:$0xff] %v20907_v39   ;;  %v5659_v48 = vadd.f32 %v21520_v11, %v27107_v8  ;;  %v21523_v23 = vadd.f32 %v21522_v31, %v21521_v50  ;;  %22170 = vmatmul.mubr.bf16.gmra.mrb[212].mxu0 %v27226_v41  ;;  %v5985_v8 = vshll.u32 %v27170_v43, 16  ;;  %v5994_v43 = vshrl.u32 %v27184_v45, 16  ;;  %v23554_v45 = vld [vmem:[%s31200_s3 + $0x98] sm:$0xff]  }
 0x579   :  { %22173 = vmatprep.mubr.msk.bf16.mxu0 %vm24873_vm3, %v24872_v26  ;;  %v6014_v32 = vshll.u32 %v27226_v41, 16  ;;  %v6018_v25 = vshrl.u32 %v27226_v41, 16  ;;  %v19624_v39 = vcombine.low %v6192_v40, %v27313_v35  ;;  %v6263_v11 = vshrl.u32 %v27319_v17, 16 }
 0x57a   :  { %v5673_v34 = vmax.f32 %v5659_v48, 0.0  ;;  %v5660_v62 = vadd.f32 %v21523_v23, %v27110_v9  ;;  %v5987_v19 = vrot.slane %v5985_v8, 1  ;;  %v5996_v57 = vor.u32 %v5994_v43, %v5992_v24  ;;  %22318 = vmatpush3.bf16.msra.mxu1 %v23578_v49  ;;  %v23561_v8 = vld [vmem:[%s31200_s3 + $0xc0] sm:$0xff]  }
 0x57b   :  { %v6016_v52 = vrot.slane %v6014_v32, 1  ;;  %v6266_v50 = vshll.u32 %v27319_v17, 16  ;;  %22319 = vmatprep.subr.bf16.mxu1 %v24872_v26  ;;  %v6255_v31 = vshrl.u32 %v19624_v39, 16  ;;  %v6258_v41 = vshll.u32 %v19624_v39, 16  ;;  %v23570_v32 = vld [vmem:[%s31200_s3 + $0xe8] sm:$0xff]  }
 0x57c   :  { %v20824_v33 = vpack.c.bf16 %v5673_v34, %v5673_v34  ;;  %v5674_v10 = vmax.f32 %v5660_v62, 0.0  ;;  %v5988_v22 = vor.u32 %v5987_v19, %v5983_v1  ;;  %v6001_v37 = vsel %vm409_vm1, %v5996_v57, %v6000_v16  ;;  %v27329_v62 = vld [vmem:[#allocation2 + $0x4c] sm:$0xff]  }
 0x57d   :  { %v6017_v6 = vsel %vm409_vm1, %v6012_v46, %v6016_v52  ;;  %v6020_v59 = vor.u32 %v6018_v25, %v6016_v52  ;;  %v6265_v23 = vrot.slane %v6263_v11, 1  ;;  %v6268_v34 = vrot.slane %v6266_v50, 2  ;;  %v23563_v1 = vld [vmem:[%s31200_s3 + $0xc8] sm:$0xff]   ;;  %v23572_v46 = vld [vmem:[%s31200_s3 + $0xf0] sm:$0xff]   ;;  %v23573_v25 = vld [vmem:[%s31200_s3 + $0xf8] sm:$0xff]  }
 0x57e   :  { %5744 = vst [vmem:[#allocation2 + $0x68] sm:$0xf] %v20824_v33  ;;  %v20825_v21 = vpack.c.bf16 %v5674_v10, %v5674_v10  ;;  %v5993_v13 = vsel %vm409_vm1, %v5988_v22, %v5992_v24  ;;  %v6257_v33 = vrot.slane %v6255_v31, 1  ;;  %v6260_v10 = vrot.slane %v6258_v41, 2  ;;  %v27339_v24 = vld [vmem:[#allocation2 + $0x54] sm:$0xff]  }
 0x57f   :  { %v27234_v12 = vld [vmem:[#allocation2 + $0x60] sm:$0xff]   ;;  %v6499_v11 = vrot.slane %v27329_v62, 2  ;;  %v6501_v31 = vrot.slane %v27339_v24, 2 }
 0x580   :  { %v5746_v55 = vsel %vm25868_vm6, %v20825_v21, %v5745_v2  ;;  %22174 = vmatmul.mubr.bf16.gmra.mrb[216].mxu0 %v27234_v12  ;;  %v6022_v58 = vshll.u32 %v27234_v12, 16  ;;  %v6026_v0 = vshrl.u32 %v27234_v12, 16  ;;  %v6269_v2 = vor.u32 %v6268_v34, %v6265_v23  ;;  %v27354_v57 = vld [vmem:[#allocation2 + $0x5c] sm:$0xff]  }
 0x581   :  { %5747 = vst [vmem:[#allocation2 + $0x6c] sm:$0x7] %v5746_v55  ;;  %22177 = vmatprep.mubr.msk.bf16.mxu0 %vm24873_vm3, %v24872_v26  ;;  %v6272_v21 = vshrl.u32 %v27329_v62, 16  ;;  %v6275_v12 = vshll.u32 %v27329_v62, 16  ;;  %v6261_v55 = vor.u32 %v6260_v10, %v6257_v33  ;;  %v6290_v27 = vshrl.u32 %v27354_v57, 16  ;;  %v23579_v10 = vld [vmem:[%s31202_s5 + $0x18] sm:$0xff]  }
 0x582   :  { %v6024_v5 = vrot.slane %v6022_v58, 1  ;;  %22320 = vmatpush3.bf16.msra.mxu1 %v23579_v10 }
 0x583   :  { %v6274_v61 = vrot.slane %v6272_v21, 1  ;;  %v6277_v19 = vrot.slane %v6275_v12, 2  ;;  %v6292_v54 = vrot.slane %v6290_v27, 1  ;;  %22341 = vmatprep.subr.bf16.mxu1 %v24872_v26  ;;  %v27429_v21 = vld [vmem:[%s31201_s4] ss:$0 sm:$0xff] }
 0x584   :  { %v6025_v3 = vsel %vm409_vm1, %v6020_v59, %v6024_v5  ;;  %v6028_v7 = vor.u32 %v6026_v0, %v6024_v5 }
 0x585   :  { %v27242_v9 = vld [vmem:[#allocation2 + $0x68] ss:$0 sps:$4 sm:$0x11]   ;;  %v6278_v22 = vor.u32 %v6277_v19, %v6274_v61 }
 0x586   :  { %v6030_v47 = vshll.u32 %v27242_v9, 16  ;;  %v6034_v48 = vshrl.u32 %v27242_v9, 16 }
 0x588   :  { %22178 = vmatmul.mubr.bf16.gmra.mrb[220].mxu0 %v27242_v9  ;;  %v6032_v15 = vrot.slane %v6030_v47, 1  ;;  %v6270_v9 = vsel %vm836_vm2, %v6261_v55, %v6269_v2  ;;  %v23575_v34 = vld [vmem:[#allocation2 + $0x6c] ss:$0 sps:$4 sm:$0x77]  }
 0x589   :  { %22197 = vmatprep.mubr.msk.bf16.mxu0 %vm24873_vm3, %v24872_v26  ;;  %v6507_v62 = vrot.slane %v23575_v34, 2 }
 0x58a   :  { %v6033_v56 = vsel %vm409_vm1, %v6028_v7, %v6032_v15  ;;  %v6472_v7 = vld [vmem:[#allocation2 + $0x3c] sm:$0xc] }
 0x58b   :  { %v19655_v49 = vcombine.low %v6472_v7, %v27313_v35  ;;  %v6502_v35 = vsel %vm1283_vm0, %v6499_v11, %v6501_v31 }
 0x58d   :  { %v6496_v40 = vrot.slane %v19655_v49, 2 }
 0x590   :  { %22198 = vmatmul.mubr.bf16.vlgmr.msra.gmra.mrb[196].mxu0 %v5993_v13  ;;  %v6284_v13 = vshll.u32 %v27339_v24, 16 }
 0x591   :  { %22226 = vmatpush3.bf16.msra.mxu0 %v23551_v36  ;;  %22201 = vmatprep.mubr.msk.bf16.mxu0 %vm24873_vm3, %v24872_v26  ;;  %v6281_v36 = vshrl.u32 %v27339_v24, 16 }
 0x592   :  { %22227 = vmatprep.subr.bf16.mxu0 %v24872_v26  ;;  %v6286_v16 = vrot.slane %v6284_v13, 2 }
 0x593   :  { %v6283_v43 = vrot.slane %v6281_v36, 1 }
 0x595   :  { %22228 = vmatpush3.bf16.msra.mxu0 %v23552_v63  ;;  %v6279_v63 = vsel %vm836_vm2, %v6269_v2, %v6278_v22 }
 0x596   :  { %22229 = vmatprep.subr.bf16.mxu0 %v24872_v26 }
 0x598   :  { %22202 = vmatmul.mubr.bf16.gmra.mrb[200].mxu0 %v6001_v37  ;;  %v6287_v37 = vor.u32 %v6286_v16, %v6283_v43 }
 0x599   :  { %22205 = vmatprep.mubr.msk.bf16.mxu0 %vm24873_vm3, %v24872_v26  ;;  %22230 = vmatpush3.bf16.msra.mxu0 %v23553_v42  ;;  %v23566_v42 = vld [vmem:[%s31200_s3 + $0xd8] sm:$0xff]  }
 0x59a   :  { %22231 = vmatprep.subr.bf16.mxu0 %v24872_v26  ;;  %v6288_v53 = vsel %vm836_vm2, %v6278_v22, %v6287_v37 }
 0x59d   :  { %22232 = vmatpush3.bf16.msra.mxu0 %v23554_v45  ;;  %v6293_v45 = vshll.u32 %v27354_v57, 16 }
 0x59e   :  { %22233 = vmatprep.subr.bf16.mxu0 %v24872_v26 }
 0x5a0   :  { %22206 = vmatmul.mubr.bf16.gmra.mrb[204].mxu0 %v6009_v18  ;;  %v27369_v18 = vld [vmem:[#allocation2 + $0x64] sm:$0xff]  }
 0x5a1   :  { %22209 = vmatprep.mubr.msk.bf16.mxu0 %vm24873_vm3, %v24872_v26  ;;  %22234 = vmatpush3.bf16.msra.mxu0 %v23555_v30  ;;  %v6295_v30 = vrot.slane %v6293_v45, 2  ;;  %v6299_v60 = vshrl.u32 %v27369_v18, 16  ;;  %v6302_v52 = vshll.u32 %v27369_v18, 16 }
 0x5a2   :  { %22235 = vmatprep.subr.bf16.mxu0 %v24872_v26 }
 0x5a3   :  { %v6304_v58 = vrot.slane %v6302_v52, 2 }
 0x5a5   :  { %22236 = vmatpush3.bf16.msra.mxu0 %v23556_v14  ;;  %v6296_v14 = vor.u32 %v6295_v30, %v6292_v54  ;;  %v23581_v54 = vld [vmem:[%s31202_s5 + $0x20] sm:$0xff]  }
 0x5a6   :  { %22237 = vmatprep.subr.bf16.mxu0 %v24872_v26 }
 0x5a8   :  { %22210 = vmatmul.mubr.bf16.gmra.mrb[208].mxu0 %v6017_v6  ;;  %v6301_v6 = vrot.slane %v6299_v60, 1 }
 0x5a9   :  { %22213 = vmatprep.mubr.msk.bf16.mxu0 %vm24873_vm3, %v24872_v26  ;;  %22238 = vmatpush3.bf16.msra.mxu0 %v23557_v28  ;;  %v6297_v28 = vsel %vm836_vm2, %v6287_v37, %v6296_v14 }
 0x5aa   :  { %22239 = vmatprep.subr.bf16.mxu0 %v24872_v26  ;;  %v6305_v5 = vor.u32 %v6304_v58, %v6301_v6 }
 0x5ac   :  { %v6306_v47 = vsel %vm836_vm2, %v6296_v14, %v6305_v5 }
 0x5ad   :  { %22240 = vmatpush3.bf16.msra.mxu0 %v23558_v44  ;;  %v23571_v44 = vld [vmem:[#allocation2 + $0x6c] ss:$0 sps:$4 sm:$0x33]  }
 0x5ae   :  { %22269 = vmatprep.subr.bf16.mxu0 %v24872_v26  ;;  %v6308_v59 = vshrl.u32 %v23571_v44, 16 }
 0x5b0   :  { %22214 = vmatmul.mubr.bf16.gmra.mrb[212].mxu0 %v6025_v3  ;;  %v6311_v3 = vshll.u32 %v23571_v44, 16  ;;  %v6310_v20 = vrot.slane %v6308_v59, 1  ;;  %v23585_v59 = vld [vmem:[%s31202_s5 + $0x30] sm:$0xff]  }
 0x5b1   :  { %22217 = vmatprep.mubr.msk.bf16.mxu0 %vm24873_vm3, %v24872_v26 }
 0x5b2   :  { %v6313_v4 = vrot.slane %v6311_v3, 2 }
 0x5b4   :  { %v6314_v0 = vor.u32 %v6313_v4, %v6310_v20 }
 0x5b6   :  { %v6315_v15 = vsel %vm836_vm2, %v6305_v5, %v6314_v0 }
 0x5b8   :  { %22218 = vmatmul.mubr.bf16.gmra.mrb[216].mxu0 %v6033_v56  ;;  %v6497_v56 = vrot.slane %v27319_v17, 2  ;;  %v6503_v17 = vrot.slane %v27354_v57, 2 }
 0x5b9   :  { %22221 = vmatprep.mubr.msk.bf16.mxu0 %vm24873_vm3, %v24872_v26 }
 0x5ba   :  { %v6498_v39 = vsel %vm1283_vm0, %v6496_v40, %v6497_v56  ;;  %v6500_v50 = vsel %vm1283_vm0, %v6497_v56, %v6499_v11  ;;  %v6504_v41 = vsel %vm1283_vm0, %v6501_v31, %v6503_v17 }
 0x5c0   :  { %22222 = vmatmul.mubr.bf16.gmra.mrb[220].mxu0 %v6034_v48  ;;  %v6505_v48 = vrot.slane %v27369_v18, 2 }
 0x5c1   :  { %22241 = vmatprep.mubr.msk.bf16.mxu0 %vm24873_vm3, %v24872_v26 }
 0x5c2   :  { %v6506_v23 = vsel %vm1283_vm0, %v6503_v17, %v6505_v48  ;;  %v6508_v33 = vsel %vm1283_vm0, %v6505_v48, %v6507_v62 }
 0x5c8   :  { %22242 = vmatmul.mubr.bf16.vlgmr.msra.gmra.mrb[196].mxu0 %v6270_v9 }
 0x5c9   :  { %22270 = vmatpush3.bf16.msra.mxu0 %v23561_v8  ;;  %22245 = vmatprep.mubr.msk.bf16.mxu0 %vm24873_vm3, %v24872_v26 }
 0x5ca   :  { %22271 = vmatprep.subr.bf16.mxu0 %v24872_v26 }
 0x5cd   :  { %22272 = vmatpush3.bf16.msra.mxu0 %v23563_v1 }
 0x5ce   :  { %22273 = vmatprep.subr.bf16.mxu0 %v24872_v26 }
 0x5d0   :  { %22246 = vmatmul.mubr.bf16.gmra.mrb[200].mxu0 %v6279_v63 }
 0x5d1   :  { %22249 = vmatprep.mubr.msk.bf16.mxu0 %vm24873_vm3, %v24872_v26  ;;  %22274 = vmatpush3.bf16.msra.mxu0 %v23564_v51 }
 0x5d2   :  { %22275 = vmatprep.subr.bf16.mxu0 %v24872_v26 }
 0x5d5   :  { %22276 = vmatpush3.bf16.msra.mxu0 %v23566_v42 }
 0x5d6   :  { %22277 = vmatprep.subr.bf16.mxu0 %v24872_v26 }
 0x5d8   :  { %22250 = vmatmul.mubr.bf16.gmra.mrb[204].mxu0 %v6288_v53 }
 0x5d9   :  { %22253 = vmatprep.mubr.msk.bf16.mxu0 %vm24873_vm3, %v24872_v26  ;;  %22278 = vmatpush3.bf16.msra.mxu0 %v23568_v29 }
 0x5da   :  { %22279 = vmatprep.subr.bf16.mxu0 %v24872_v26 }
 0x5dd   :  { %22280 = vmatpush3.bf16.msra.mxu0 %v23570_v32 }
 0x5de   :  { %22281 = vmatprep.subr.bf16.mxu0 %v24872_v26 }
 0x5e0   :  { %22254 = vmatmul.mubr.bf16.gmra.mrb[208].mxu0 %v6297_v28  ;;  %v23583_v28 = vld [vmem:[%s31202_s5 + $0x28] sm:$0xff]  }
 0x5e1   :  { %22257 = vmatprep.mubr.msk.bf16.mxu0 %vm24873_vm3, %v24872_v26  ;;  %22282 = vmatpush3.bf16.msra.mxu0 %v23572_v46 }
 0x5e2   :  { %22283 = vmatprep.subr.bf16.mxu0 %v24872_v26 }
 0x5e5   :  { %22284 = vmatpush3.bf16.msra.mxu0 %v23573_v25 }
 0x5e8   :  { %22258 = vmatmul.mubr.bf16.gmra.mrb[212].mxu0 %v6306_v47 }
 0x5e9   :  { %22261 = vmatprep.mubr.msk.bf16.mxu0 %vm24873_vm3, %v24872_v26 }
 0x5f0   :  { %22262 = vmatmul.mubr.bf16.gmra.mrb[216].mxu0 %v6315_v15 }
 0x5f1   :  { %22265 = vmatprep.mubr.msk.bf16.mxu0 %vm24873_vm3, %v24872_v26 }
 0x5f8   :  { %22266 = vmatmul.mubr.bf16.gmra.mrb[220].mxu0 %v6310_v20 }
 0x5f9   :  { %22285 = vmatprep.mubr.msk.bf16.mxu0 %vm24873_vm3, %v24872_v26 }
 0x600   :  { %22286 = vmatmul.mubr.bf16.vlgmr.msra.gmra.mrb[196].mxu0 %v6498_v39  ;;  %v23587_v39 = vld [vmem:[%s31202_s5 + $0x38] sm:$0xff]  }
 0x601   :  { %22289 = vmatprep.mubr.msk.bf16.mxu0 %vm24873_vm3, %v24872_v26 }
 0x608   :  { %22290 = vmatmul.mubr.bf16.gmra.mrb[200].mxu0 %v6500_v50 }
 0x609   :  { %22293 = vmatprep.mubr.msk.bf16.mxu0 %vm24873_vm3, %v24872_v26 }
 0x610   :  { %22294 = vmatmul.mubr.bf16.gmra.mrb[204].mxu0 %v6502_v35 }
 0x611   :  { %22297 = vmatprep.mubr.msk.bf16.mxu0 %vm24873_vm3, %v24872_v26 }
 0x618   :  { %22298 = vmatmul.mubr.bf16.gmra.mrb[208].mxu0 %v6504_v41 }
 0x619   :  { %22301 = vmatprep.mubr.msk.bf16.mxu0 %vm24873_vm3, %v24872_v26 }
 0x620   :  { %22302 = vmatmul.mubr.bf16.gmra.mrb[212].mxu0 %v6506_v23 }
 0x621   :  { %22305 = vmatprep.mubr.msk.bf16.mxu0 %vm24873_vm3, %v24872_v26 }
 0x628   :  { %22306 = vmatmul.mubr.bf16.gmra.mrb[216].mxu0 %v6508_v33 }
 0x629   :  { %22309 = vmatprep.mubr.msk.bf16.mxu0 %vm24873_vm3, %v24872_v26 }
 0x630   :  { %22310 = vmatmul.mubr.bf16.gmra.mrb[220].mxu0 %v6507_v62 }
 0x6d3   :  { %v6598_v2 = vpop.f32.mrb[196].mxu0 }
 0x6d4   :  { %v22588_v12 = vadd.f32 %v27429_v21, %v6598_v2  ;;  %v22287_v55 = vpop.f32.mrb[197].mxu0 }
 0x6d5   :  { %v6601_v8 = vpop.f32.mrb[198].mxu0 }
 0x6d6   :  { %v6665_v9 = vmax.f32 %v22588_v12, 0.0  ;;  %v22589_v61 = vadd.f32 %v27429_v21, %v6601_v8  ;;  %v22288_v19 = vpop.f32.mrb[199].mxu0 }
 0x6d8   :  { %v20826_v24 = vpack.c.bf16 %v6665_v9, %v6665_v9  ;;  %v6666_v1 = vmax.f32 %v22589_v61, 0.0 }
 0x6da   :  { %6732 = vst.msk [vmem:[#allocation3 + $0x34] sm:$0xf] %vm2602_vm7, %v20826_v24  ;;  %v20827_v22 = vpack.c.bf16 %v6666_v1, %v6666_v1 }
 0x6db   :  { %v6606_v36 = vpop.f32.mrb[200].mxu0 }
 0x6dc   :  { %6733 = vst.msk [vmem:[#allocation3 + $0x38] sm:$0xf] %vm2602_vm7, %v20827_v22  ;;  %v22590_v13 = vadd.f32 %v27429_v21, %v6606_v36  ;;  %v22291_v51 = vpop.f32.mrb[201].mxu0 }
 0x6dd   :  { %v6609_v63 = vpop.f32.mrb[202].mxu0 }
 0x6de   :  { %v6667_v43 = vmax.f32 %v22590_v13, 0.0  ;;  %v22591_v16 = vadd.f32 %v27429_v21, %v6609_v63  ;;  %v22292_v57 = vpop.f32.mrb[203].mxu0 }
 0x6e0   :  { %v20828_v42 = vpack.c.bf16 %v6667_v43, %v6667_v43  ;;  %v6668_v37 = vmax.f32 %v22591_v16, 0.0 }
 0x6e1   :  { %v6747_v29 = vld [vmem:[#allocation3 + $0x34] sm:$0xf] }
 0x6e2   :  { %6734 = vst.msk [vmem:[#allocation3 + $0x3c] sm:$0xf] %vm2602_vm7, %v20828_v42  ;;  %v20829_v27 = vpack.c.bf16 %v6668_v37, %v6668_v37  ;;  %v7076_v44 = vld [vmem:[#allocation3 + $0x34] sm:$0xe] }
 0x6e3   :  { %v6614_v45 = vpop.f32.mrb[204].mxu0  ;;  %v6748_v53 = vld [vmem:[#allocation3 + $0x38] sm:$0xf] }
 0x6e4   :  { %6735 = vst.msk [vmem:[#allocation3 + $0x40] sm:$0xf] %vm2602_vm7, %v20829_v27  ;;  %v22592_v30 = vadd.f32 %v27429_v21, %v6614_v45  ;;  %v22295_v18 = vpop.f32.mrb[205].mxu0  ;;  %v27443_v32 = vcombine.low %v6747_v29, %v6748_v53  ;;  %v19717_v25 = vcombine.low %v7076_v44, %v6748_v53 }
 0x6e5   :  { %v6617_v14 = vpop.f32.mrb[206].mxu0 }
 0x6e6   :  { %v6669_v60 = vmax.f32 %v22592_v30, 0.0  ;;  %v22593_v52 = vadd.f32 %v27429_v21, %v6617_v14  ;;  %v22296_v46 = vpop.f32.mrb[207].mxu0  ;;  %22322 = vmatmul.mubr.msk.bf16.vlgmr.msra.gmra.mrb[76].mxu1 %vm2688_vm8, %v27443_v32  ;;  %v7092_v15 = vrot.slane %v19717_v25, 1 }
 0x6e7   :  { %22342 = vmatpush3.bf16.msra.mxu1 %v23581_v54  ;;  %22325 = vmatprep.mubr.msk.bf16.mxu1 %vm24873_vm3, %v24872_v26 }
 0x6e8   :  { %v20830_v6 = vpack.c.bf16 %v6669_v60, %v6669_v60  ;;  %v6670_v58 = vmax.f32 %v22593_v52, 0.0  ;;  %22343 = vmatprep.subr.bf16.mxu1 %v24872_v26  ;;  %v6922_v52 = vshll.u32 %v27443_v32, 16 }
 0x6ea   :  { %6736 = vst.msk [vmem:[#allocation3 + $0x44] sm:$0xf] %vm2602_vm7, %v20830_v6  ;;  %v20831_v5 = vpack.c.bf16 %v6670_v58, %v6670_v58 }
 0x6eb   :  { %v6622_v3 = vpop.f32.mrb[208].mxu0  ;;  %v27458_v47 = vld [vmem:[#allocation3 + $0x3c] sm:$0xff]   ;;  %22344 = vmatpush3.bf16.msra.mxu1 %v23583_v28 }
 0x6ec   :  { %6737 = vst.msk [vmem:[#allocation3 + $0x48] sm:$0xf] %vm2602_vm7, %v20831_v5  ;;  %v22594_v20 = vadd.f32 %v27429_v21, %v6622_v3  ;;  %v22299_v4 = vpop.f32.mrb[209].mxu0  ;;  %22345 = vmatprep.subr.bf16.mxu1 %v24872_v26  ;;  %v7093_v7 = vrot.slane %v27458_v47, 1 }
 0x6ed   :  { %v6625_v0 = vpop.f32.mrb[210].mxu0 }
 0x6ee   :  { %v6671_v49 = vmax.f32 %v22594_v20, 0.0  ;;  %v22595_v56 = vadd.f32 %v27429_v21, %v6625_v0  ;;  %v22300_v40 = vpop.f32.mrb[211].mxu0  ;;  %22326 = vmatmul.mubr.msk.bf16.gmra.mrb[80].mxu1 %vm2688_vm8, %v27458_v47  ;;  %v27473_v11 = vsel %vm2969_vm9, %v7092_v15, %v7093_v7 }
 0x6ef   :  { %22329 = vmatprep.mubr.msk.bf16.mxu1 %vm24873_vm3, %v24872_v26  ;;  %22346 = vmatpush3.bf16.msra.mxu1 %v23585_v59 }
 0x6f0   :  { %v20832_v50 = vpack.c.bf16 %v6671_v49, %v6671_v49  ;;  %v6672_v31 = vmax.f32 %v22595_v56, 0.0  ;;  %22347 = vmatprep.subr.bf16.mxu1 %v24872_v26  ;;  %v6926_v56 = vshll.u32 %v27458_v47, 16 }
 0x6f1   :  { %v27476_v35 = vld [vmem:[#allocation3 + $0x40] sm:$0xff]  }
 0x6f2   :  { %6738 = vst.msk [vmem:[#allocation3 + $0x4c] sm:$0xf] %vm2602_vm7, %v20832_v50  ;;  %v20833_v17 = vpack.c.bf16 %v6672_v31, %v6672_v31  ;;  %v7275_v23 = vshrl.u32 %v27476_v35, 16  ;;  %v7278_v34 = vshll.u32 %v27476_v35, 16 }
 0x6f3   :  { %v6630_v41 = vpop.f32.mrb[212].mxu0  ;;  %v27479_v48 = vld [vmem:[#allocation3 + $0x44] sm:$0xff]   ;;  %22348 = vmatpush3.bf16.msra.mxu1 %v23587_v39 }
 0x6f4   :  { %6739 = vst.msk [vmem:[#allocation3 + $0x50] sm:$0xf] %vm2602_vm7, %v20833_v17  ;;  %v22596_v62 = vadd.f32 %v27429_v21, %v6630_v41  ;;  %v22303_v33 = vpop.f32.mrb[213].mxu0  ;;  %22369 = vmatprep.subr.bf16.mxu1 %v24872_v26  ;;  %v7095_v2 = vrot.slane %v27479_v48, 1  ;;  %v7595_v61 = vrot.slane %v7275_v23, 2  ;;  %v7596_v19 = vrot.slane %v7278_v34, 3 }
 0x6f5   :  { %v6633_v10 = vpop.f32.mrb[214].mxu0  ;;  %v6744_v17 = vld [vmem:[#allocation3 + $0x64] sm:$0x1] }
 0x6f6   :  { %v6673_v12 = vmax.f32 %v22596_v62, 0.0  ;;  %v22597_v55 = vadd.f32 %v27429_v21, %v6633_v10  ;;  %v22304_v8 = vpop.f32.mrb[215].mxu0  ;;  %22330 = vmatmul.mubr.msk.bf16.gmra.mrb[84].mxu1 %vm2688_vm8, %v27479_v48  ;;  %v27493_v9 = vsel %vm2969_vm9, %v7093_v7, %v7095_v2  ;;  %v27501_v36 = vor.u32 %v7596_v19, %v7595_v61  ;;  %v23589_v61 = vld [vmem:[%s31202_s5 + $0x40] sm:$0xff]  }
 0x6f7   :  { %22333 = vmatprep.mubr.msk.bf16.mxu1 %vm24873_vm3, %v24872_v26  ;;  %v6920_v10 = vshrl.u32 %v27443_v32, 16  ;;  %v6933_v32 = vshll.u32 %v27479_v48, 16 }
 0x6f8   :  { %v20834_v24 = vpack.c.bf16 %v6673_v12, %v6673_v12  ;;  %v6674_v1 = vmax.f32 %v22597_v55, 0.0 }
 0x6f9   :  { %v27499_v22 = vld [vmem:[#allocation3 + $0x48] sm:$0xff]  }
 0x6fa   :  { %6740 = vst.msk [vmem:[#allocation3 + $0x54] sm:$0xf] %vm2602_vm7, %v20834_v24  ;;  %v20835_v13 = vpack.c.bf16 %v6674_v1, %v6674_v1  ;;  %v7284_v43 = vshrl.u32 %v27499_v22, 16  ;;  %v7287_v16 = vshll.u32 %v27499_v22, 16  ;;  %v23590_v1 = vld [vmem:[%s31202_s5 + $0x48] sm:$0xff]  }
 0x6fb   :  { %v6638_v51 = vpop.f32.mrb[216].mxu0  ;;  %v27504_v63 = vld [vmem:[#allocation3 + $0x4c] sm:$0xff]  }
 0x6fc   :  { %6741 = vst.msk [vmem:[#allocation3 + $0x58] sm:$0xf] %vm2602_vm7, %v20835_v13  ;;  %v22598_v57 = vadd.f32 %v27429_v21, %v6638_v51  ;;  %v22307_v42 = vpop.f32.mrb[217].mxu0  ;;  %v7097_v27 = vrot.slane %v27504_v63, 1  ;;  %v7599_v30 = vrot.slane %v7284_v43, 2  ;;  %v7600_v18 = vrot.slane %v7287_v16, 3 }
 0x6fd   :  { %v6641_v37 = vpop.f32.mrb[218].mxu0  ;;  %v6930_v13 = vshrl.u32 %v27458_v47, 16  ;;  %v6935_v51 = vrot.slane %v6933_v32, 1  ;;  %v23591_v42 = vld [vmem:[%s31202_s5 + $0x50] sm:$0xff]   ;;  %v23592_v47 = vld [vmem:[%s31202_s5 + $0x58] sm:$0xff]  }
 0x6fe   :  { %v6675_v45 = vmax.f32 %v22598_v57, 0.0  ;;  %v22599_v29 = vadd.f32 %v27429_v21, %v6641_v37  ;;  %v22308_v53 = vpop.f32.mrb[219].mxu0  ;;  %22334 = vmatmul.mubr.msk.bf16.gmra.mrb[88].mxu1 %vm2688_vm8, %v27504_v63  ;;  %v27517_v54 = vsel %vm2969_vm9, %v7095_v2, %v7097_v27  ;;  %v7601_v28 = vor.u32 %v7600_v18, %v7599_v30 }
 0x6ff   :  { %22337 = vmatprep.mubr.msk.bf16.mxu1 %vm24873_vm3, %v24872_v26  ;;  %v6928_v2 = vrot.slane %v6926_v56, 1 }
 0x700   :  { %v20836_v14 = vpack.c.bf16 %v6675_v45, %v6675_v45  ;;  %v6676_v60 = vmax.f32 %v22599_v29, 0.0  ;;  %v27530_v3 = vsel %vm3468_vm12, %v27501_v36, %v7601_v28  ;;  %v6937_v45 = vshrl.u32 %v27479_v48, 16 }
 0x701   :  { %v27524_v46 = vld [vmem:[#allocation3 + $0x50] sm:$0xff]   ;;  %v6932_v57 = vor.u32 %v6930_v13, %v6928_v2  ;;  %v7432_v13 = vld [vmem:[#allocation3 + $0x38] sm:$0xc] }
 0x702   :  { %6742 = vst.msk [vmem:[#allocation3 + $0x5c] sm:$0xf] %vm2602_vm7, %v20836_v14  ;;  %v20837_v6 = vpack.c.bf16 %v6676_v60, %v6676_v60  ;;  %v6755_v58 = vld [vmem:[#allocation3 + $0x54] sm:$0xf]  ;;  %v7293_v59 = vshrl.u32 %v27524_v46, 16  ;;  %v7296_v7 = vshll.u32 %v27524_v46, 16  ;;  %v6939_v53 = vor.u32 %v6937_v45, %v6935_v51 }
 0x703   :  { %v6646_v44 = vpop.f32.mrb[220].mxu0  ;;  %v6756_v25 = vld [vmem:[#allocation3 + $0x58] sm:$0x1]  ;;  %v6936_v37 = vsel %vm409_vm1, %v6932_v57, %v6935_v51  ;;  %v6944_v14 = vshrl.u32 %v27504_v63, 16  ;;  %v7449_v57 = vrot.slane %v27476_v35, 2  ;;  %v7451_v35 = vrot.slane %v27499_v22, 2 }
 0x704   :  { %v7077_v5 = vld [vmem:[#allocation3 + $0x58] sm:$0x3]  ;;  %6743 = vst.msk [vmem:[#allocation3 + $0x60] sm:$0xf] %vm2602_vm7, %v20837_v6  ;;  %v22600_v20 = vadd.f32 %v27429_v21, %v6646_v44  ;;  %v22311_v4 = vpop.f32.mrb[221].mxu0  ;;  %v19682_v0 = vcombine.low %v6755_v58, %v6756_v25  ;;  %v7603_v40 = vrot.slane %v7293_v59, 2 }
 0x705   :  { %v19718_v15 = vcombine.low %v6755_v58, %v7077_v5  ;;  %v6649_v49 = vpop.f32.mrb[222].mxu0  ;;  %v6924_v21 = vrot.slane %v6922_v52, 1  ;;  %v7604_v41 = vrot.slane %v7296_v7, 3  ;;  %v23594_v58 = vld [vmem:[%s31202_s5 + $0x68] sm:$0xff]   ;;  %v23595_v44 = vld [vmem:[%s31202_s5 + $0x70] sm:$0xff]   ;;  %v7453_v22 = vrot.slane %v27524_v46, 2 }
 0x706   :  { %v6677_v39 = vmax.f32 %v22600_v20, 0.0  ;;  %v22312_v50 = vpop.f32.mrb[223].mxu0  ;;  %22338 = vmatmul.mubr.msk.bf16.gmra.mrb[92].mxu1 %vm2688_vm8, %v19682_v0  ;;  %v6947_v18 = vshll.u32 %v19682_v0, 16  ;;  %v6951_v48 = vshrl.u32 %v19682_v0, 16  ;;  %v7223_v25 = vld [vmem:[#allocation3 + $0x38] sm:$0xe] }
 0x707   :  { %v27539_v31 = vrot.slane %v19718_v15, 1  ;;  %22349 = vmatprep.mubr.msk.bf16.mxu1 %vm24873_vm3, %v24872_v26  ;;  %v27550_v12 = vor.u32 %v7604_v41, %v7603_v40  ;;  %v6925_v8 = vor.u32 %v6924_v21, %v6920_v10  ;;  %v7277_v0 = vrot.slane %v7275_v23, 1  ;;  %v23610_v45 = vld [vmem:[%s31202_s5 + $0xb0] sm:$0xff]  }
 0x708   :  { %v20838_v62 = vpack.c.bf16 %v6677_v39, %v6677_v39  ;;  %v6949_v60 = vrot.slane %v6947_v18, 1  ;;  %v23600_v39 = vld [vmem:[%s31202_s5 + $0x80] sm:$0xff]   ;;  %v7286_v23 = vrot.slane %v7284_v43, 1  ;;  %v23604_v43 = vld [vmem:[%s31202_s5 + $0x90] sm:$0xff]   ;;  %v7454_v18 = vsel %vm1283_vm0, %v7451_v35, %v7453_v22 }
 0x709   :  { %v27547_v33 = vsel %vm2969_vm9, %v7097_v27, %v27539_v31  ;;  %v27559_v19 = vsel %vm3468_vm12, %v7601_v28, %v27550_v12  ;;  %v6929_v24 = vsel %vm409_vm1, %v6925_v8, %v6928_v2  ;;  %v6940_v27 = vshll.u32 %v27504_v63, 16  ;;  %v23593_v63 = vld [vmem:[%s31202_s5 + $0x60] sm:$0xff]   ;;  %v7232_v21 = vld [vmem:[#allocation3 + $0x5c] sm:$0x3]  ;;  %v23606_v2 = vld [vmem:[%s31202_s5 + $0x98] sm:$0xff]  }
 0x70a   :  { %v6745_v55 = vsel %vm26304_vm13, %v20838_v62, %v6744_v17  ;;  %v6953_v6 = vor.u32 %v6951_v48, %v6949_v60  ;;  %v7295_v62 = vrot.slane %v7293_v59, 1 }
 0x70b   :  { %6746 = vst [vmem:[#allocation3 + $0x64] sm:$0x1] %v6745_v55  ;;  %v6942_v29 = vrot.slane %v6940_v27, 1 }
 0x70d   :  { %v6943_v30 = vsel %vm409_vm1, %v6939_v53, %v6942_v29  ;;  %v6946_v52 = vor.u32 %v6944_v14, %v6942_v29  ;;  %v7452_v29 = vsel %vm1283_vm0, %v7449_v57, %v7451_v35  ;;  %v23612_v53 = vld [vmem:[%s31202_s5 + $0xb8] sm:$0xff]  }
 0x70e   :  { %22350 = vmatmul.mubr.msk.bf16.vlgmr.msra.gmra.mrb[76].mxu1 %vm2688_vm8, %v6929_v24 }
 0x70f   :  { %22370 = vmatpush3.bf16.msra.mxu1 %v23589_v61  ;;  %22353 = vmatprep.mubr.msk.bf16.mxu1 %vm24873_vm3, %v24872_v26  ;;  %v6950_v28 = vsel %vm409_vm1, %v6946_v52, %v6949_v60  ;;  %vm8479_vm1 = vcmask 1040896  }
 0x710   :  { %22371 = vmatprep.subr.bf16.mxu1 %v24872_v26 }
 0x713   :  { %22372 = vmatpush3.bf16.msra.mxu1 %v23590_v1 }
 0x714   :  { %22373 = vmatprep.subr.bf16.mxu1 %v24872_v26 }
 0x716   :  { %22354 = vmatmul.mubr.msk.bf16.gmra.mrb[80].mxu1 %vm2688_vm8, %v6936_v37  ;;  %v23608_v37 = vld [vmem:[%s31202_s5 + $0xa0] sm:$0xff]  }
 0x717   :  { %22357 = vmatprep.mubr.msk.bf16.mxu1 %vm24873_vm3, %v24872_v26  ;;  %22374 = vmatpush3.bf16.msra.mxu1 %v23591_v42 }
 0x718   :  { %22375 = vmatprep.subr.bf16.mxu1 %v24872_v26 }
 0x71b   :  { %22376 = vmatpush3.bf16.msra.mxu1 %v23592_v47  ;;  %v23609_v47 = vld [vmem:[%s31202_s5 + $0xa8] sm:$0xff]  }
 0x71c   :  { %22397 = vmatprep.subr.bf16.mxu1 %v24872_v26 }
 0x71e   :  { %22358 = vmatmul.mubr.msk.bf16.gmra.mrb[84].mxu1 %vm2688_vm8, %v6943_v30  ;;  %v7433_v30 = vld [vmem:[#allocation3 + $0x5c] sm:$0x7] }
 0x71f   :  { %22361 = vmatprep.mubr.msk.bf16.mxu1 %vm24873_vm3, %v24872_v26 }
 0x726   :  { %22362 = vmatmul.mubr.msk.bf16.gmra.mrb[88].mxu1 %vm2688_vm8, %v6950_v28 }
 0x727   :  { %22365 = vmatprep.mubr.msk.bf16.mxu1 %vm24873_vm3, %v24872_v26 }
 0x72e   :  { %22366 = vmatmul.mubr.msk.bf16.gmra.mrb[92].mxu1 %vm2688_vm8, %v6953_v6 }
 0x72f   :  { %22377 = vmatprep.mubr.msk.bf16.mxu1 %vm24873_vm3, %v24872_v26 }
 0x736   :  { %22378 = vmatmul.mubr.msk.bf16.vlgmr.msra.gmra.mrb[76].mxu1 %vm2688_vm8, %v27473_v11  ;;  %v23597_v11 = vld [vmem:[%s31202_s5 + $0x78] sm:$0xff]  }
 0x737   :  { %22398 = vmatpush3.bf16.msra.mxu1 %v23593_v63  ;;  %22381 = vmatprep.mubr.msk.bf16.mxu1 %vm24873_vm3, %v24872_v26 }
 0x738   :  { %22399 = vmatprep.subr.bf16.mxu1 %v24872_v26 }
 0x73b   :  { %22400 = vmatpush3.bf16.msra.mxu1 %v23594_v58  ;;  %v23613_v58 = vld [vmem:[%s31202_s5 + $0xc0] sm:$0xff]  }
 0x73c   :  { %22401 = vmatprep.subr.bf16.mxu1 %v24872_v26 }
 0x73e   :  { %22382 = vmatmul.mubr.msk.bf16.gmra.mrb[80].mxu1 %vm2688_vm8, %v27493_v9  ;;  %v7224_v9 = vld [vmem:[#allocation3 + $0x3c] sm:$0xf] }
 0x73f   :  { %22385 = vmatprep.mubr.msk.bf16.mxu1 %vm24873_vm3, %v24872_v26  ;;  %22402 = vmatpush3.bf16.msra.mxu1 %v23595_v44  ;;  %v19736_v5 = vcombine.low %v7223_v25, %v7224_v9  ;;  %v19758_v51 = vcombine.low %v7432_v13, %v7224_v9  ;;  %v23615_v9 = vld [vmem:[%s31202_s5 + $0xd0] sm:$0xff]  }
 0x740   :  { %22403 = vmatprep.subr.bf16.mxu1 %v24872_v26 }
 0x741   :  { %v7267_v20 = vshrl.u32 %v19736_v5, 16  ;;  %v7270_v4 = vshll.u32 %v19736_v5, 16  ;;  %v7448_v42 = vrot.slane %v19758_v51, 2  ;;  %v7588_v46 = vshrl.u32 %v19758_v51, 16 }
 0x742   :  { %v7591_v28 = vshll.u32 %v19758_v51, 16  ;;  %v23626_v51 = vld [vmem:[%s31202_s5 + $0x100] sm:$0xff]  }
 0x743   :  { %22404 = vmatpush3.bf16.msra.mxu1 %v23597_v11  ;;  %v7269_v15 = vrot.slane %v7267_v20, 1  ;;  %v7272_v49 = vrot.slane %v7270_v4, 2  ;;  %v7450_v27 = vsel %vm1283_vm0, %v7448_v42, %v7449_v57  ;;  %v7590_v48 = vrot.slane %v7588_v46, 2  ;;  %v23614_v11 = vld [vmem:[%s31202_s5 + $0xc8] sm:$0xff]  }
 0x744   :  { %22425 = vmatprep.subr.bf16.mxu1 %v24872_v26  ;;  %v7593_v6 = vrot.slane %v7591_v28, 3 }
 0x745   :  { %v7273_v40 = vor.u32 %v7272_v49, %v7269_v15  ;;  %v23617_v15 = vld [vmem:[#allocation3 + $0x3c] sm:$0xf8]  }
 0x746   :  { %22386 = vmatmul.mubr.msk.bf16.gmra.mrb[84].mxu1 %vm2688_vm8, %v27517_v54  ;;  %v7280_v54 = vrot.slane %v7278_v34, 2  ;;  %v7289_v34 = vrot.slane %v7287_v16, 2  ;;  %v7231_v16 = vld [vmem:[#allocation3 + $0x58] sm:$0xf]  ;;  %v7594_v63 = vor.u32 %v7593_v6, %v7590_v48  ;;  %v7781_v49 = vrot.slane %v23617_v15, 3 }
 0x747   :  { %22389 = vmatprep.mubr.msk.bf16.mxu1 %vm24873_vm3, %v24872_v26  ;;  %v19740_v10 = vcombine.low %v7231_v16, %v7232_v21  ;;  %v19759_v14 = vcombine.low %v7231_v16, %v7433_v30  ;;  %v23624_v16 = vld [vmem:[#allocation3 + $0x5c] sm:$0xff]  }
 0x748   :  { %v7281_v56 = vor.u32 %v7280_v54, %v7277_v0  ;;  %v7290_v17 = vor.u32 %v7289_v34, %v7286_v23  ;;  %v7598_v44 = vsel %vm3468_vm12, %v7594_v63, %v27501_v36  ;;  %v23616_v36 = vld [vmem:[%s31202_s5 + $0xd8] sm:$0xff]   ;;  %v23623_v23 = vld [vmem:[%s31202_s5 + $0xf0] sm:$0xff]  }
 0x749   :  { %v7302_v8 = vshrl.u32 %v19740_v10, 16  ;;  %v7305_v61 = vshll.u32 %v19740_v10, 16  ;;  %v7455_v60 = vrot.slane %v19759_v14, 2  ;;  %v7608_v25 = vshrl.u32 %v19759_v14, 16  ;;  %v23618_v54 = vld [vmem:[#allocation3 + $0x44] sm:$0xff]  }
 0x74a   :  { %v7282_v50 = vsel %vm836_vm2, %v7273_v40, %v7281_v56  ;;  %v7291_v41 = vsel %vm836_vm2, %v7281_v56, %v7290_v17  ;;  %v7611_v5 = vshll.u32 %v19759_v14, 16  ;;  %v23619_v56 = vld [vmem:[%s31202_s5 + $0xe0] sm:$0xff]   ;;  %v7932_v10 = vshll.u32 %v23618_v54, 16 }
 0x74b   :  { %v7307_v24 = vrot.slane %v7305_v61, 2  ;;  %v7456_v52 = vsel %vm1283_vm0, %v7453_v22, %v7455_v60  ;;  %v7610_v20 = vrot.slane %v7608_v25, 2  ;;  %v23620_v40 = vld [vmem:[#allocation3 + $0x4c] sm:$0xff]   ;;  %v24874_v25 = vmov 1966171168  }
 0x74c   :  { %v7613_v4 = vrot.slane %v7611_v5, 3  ;;  %v7934_v61 = vrot.slane %v7932_v10, 4  ;;  %v8326_v5 = vunpack.c.l.s4 %v24874_v25  ;;  %vm8377_vm0 = vcmask 1041409  }
 0x74e   :  { %22390 = vmatmul.mubr.msk.bf16.gmra.mrb[88].mxu1 %vm2688_vm8, %v27547_v33  ;;  %v7298_v33 = vrot.slane %v7296_v7, 2  ;;  %v7304_v7 = vrot.slane %v7302_v8, 1 }
 0x74f   :  { %22393 = vmatprep.mubr.msk.bf16.mxu1 %vm24873_vm3, %v24872_v26 }
 0x750   :  { %v7299_v55 = vor.u32 %v7298_v33, %v7295_v62  ;;  %v7308_v32 = vor.u32 %v7307_v24, %v7304_v7  ;;  %v7929_v33 = vshrl.u32 %v23618_v54, 16 }
 0x752   :  { %v7300_v59 = vsel %vm836_vm2, %v7290_v17, %v7299_v55  ;;  %v7309_v1 = vsel %vm836_vm2, %v7299_v55, %v7308_v32  ;;  %v23625_v17 = vld [vmem:[%s31202_s5 + $0xf8] sm:$0xff]   ;;  %v7924_v55 = vshll.u32 %v23617_v15, 16  ;;  %v7931_v8 = vrot.slane %v7929_v33, 3 }
 0x753   :  { %vm18771_vm2 = vcmask 41984  }
 0x754   :  { %v7926_v7 = vrot.slane %v7924_v55, 4  ;;  %v7935_v24 = vor.u32 %v7934_v61, %v7931_v8 }
 0x756   :  { %22394 = vmatmul.mubr.msk.bf16.gmra.mrb[92].mxu1 %vm2688_vm8, %v27539_v31  ;;  %v23602_v31 = vld [vmem:[%s31202_s5 + $0x88] sm:$0xff]  }
 0x757   :  { %22405 = vmatprep.mubr.msk.bf16.mxu1 %vm24873_vm3, %v24872_v26 }
 0x75e   :  { %22406 = vmatmul.mubr.msk.bf16.vlgmr.msra.gmra.mrb[76].mxu1 %vm2688_vm8, %v7282_v50  ;;  %v7784_v50 = vrot.slane %v23620_v40, 3 }
 0x75f   :  { %22426 = vmatpush3.bf16.msra.mxu1 %v23600_v39  ;;  %22409 = vmatprep.mubr.msk.bf16.mxu1 %vm24873_vm3, %v24872_v26  ;;  %v23621_v39 = vld [vmem:[%s31202_s5 + $0xe8] sm:$0xff]  }
 0x760   :  { %22427 = vmatprep.subr.bf16.mxu1 %v24872_v26 }
 0x763   :  { %22428 = vmatpush3.bf16.msra.mxu1 %v23602_v31  ;;  %v23622_v31 = vld [vmem:[#allocation3 + $0x54] sm:$0xff]  }
 0x764   :  { %22429 = vmatprep.subr.bf16.mxu1 %v24872_v26  ;;  %v7786_v21 = vrot.slane %v23622_v31, 3  ;;  %v7947_v35 = vshrl.u32 %v23622_v31, 16 }
 0x766   :  { %22410 = vmatmul.mubr.msk.bf16.gmra.mrb[80].mxu1 %vm2688_vm8, %v7291_v41  ;;  %v7788_v41 = vrot.slane %v23624_v16, 3  ;;  %v7949_v22 = vrot.slane %v7947_v35, 3 }
 0x767   :  { %22413 = vmatprep.mubr.msk.bf16.mxu1 %vm24873_vm3, %v24872_v26  ;;  %22430 = vmatpush3.bf16.msra.mxu1 %v23604_v43  ;;  %v7787_v43 = vsel %vm3664_vm14, %v7784_v50, %v7786_v21 }
 0x768   :  { %22431 = vmatprep.subr.bf16.mxu1 %v24872_v26  ;;  %v7789_v62 = vsel %vm3664_vm14, %v7786_v21, %v7788_v41 }
 0x76b   :  { %22432 = vmatpush3.bf16.msra.mxu1 %v23606_v2  ;;  %v7921_v2 = vshrl.u32 %v23617_v15, 16 }
 0x76c   :  { %22453 = vmatprep.subr.bf16.mxu1 %v24872_v26 }
 0x76e   :  { %22414 = vmatmul.mubr.msk.bf16.gmra.mrb[84].mxu1 %vm2688_vm8, %v7300_v59  ;;  %v7923_v59 = vrot.slane %v7921_v2, 3 }
 0x76f   :  { %22417 = vmatprep.mubr.msk.bf16.mxu1 %vm24873_vm3, %v24872_v26 }
 0x770   :  { %v7927_v13 = vor.u32 %v7926_v7, %v7923_v59  ;;  %v19883_v59 = vld.sshfl [vmem:[#allocation4 + $0x8] sm:$0x1 pattern:$0x75316420] }
 0x772   :  { %v7936_v57 = vsel %vm3805_vm15, %v7927_v13, %v7935_v24  ;;  %v19891_v13 = vld.sshfl [vmem:[#allocation4 + $0xc] sm:$0x1 pattern:$0x75316420] }
 0x776   :  { %22418 = vmatmul.mubr.msk.bf16.gmra.mrb[88].mxu1 %vm2688_vm8, %v7309_v1  ;;  %v7941_v1 = vshll.u32 %v23620_v40, 16 }
 0x777   :  { %22421 = vmatprep.mubr.msk.bf16.mxu1 %vm24873_vm3, %v24872_v26 }
 0x77e   :  { %22422 = vmatmul.mubr.msk.bf16.gmra.mrb[92].mxu1 %vm2688_vm8, %v7308_v32  ;;  %v7938_v32 = vshrl.u32 %v23620_v40, 16  ;;  %v19871_v40 = vld.sshfl [vmem:[#allocation4 + $0x4] sm:$0x10 pattern:$0x75316420] }
 0x77f   :  { %22433 = vmatprep.mubr.msk.bf16.mxu1 %vm24873_vm3, %v24872_v26 }
 0x780   :  { %v7940_v42 = vrot.slane %v7938_v32, 3 }
 0x786   :  { %22434 = vmatmul.mubr.msk.bf16.vlgmr.msra.gmra.mrb[76].mxu1 %vm2688_vm8, %v7450_v27  ;;  %v23627_v27 = vld [vmem:[%s31202_s5 + $0x108] sm:$0xff]  }
 0x787   :  { %22454 = vmatpush3.bf16.msra.mxu1 %v23608_v37  ;;  %22437 = vmatprep.mubr.msk.bf16.mxu1 %vm24873_vm3, %v24872_v26  ;;  %v7943_v37 = vrot.slane %v7941_v1, 4 }
 0x788   :  { %22455 = vmatprep.subr.bf16.mxu1 %v24872_v26 }
 0x78b   :  { %22456 = vmatpush3.bf16.msra.mxu1 %v23609_v47  ;;  %v7944_v47 = vor.u32 %v7943_v37, %v7940_v42 }
 0x78c   :  { %22457 = vmatprep.subr.bf16.mxu1 %v24872_v26 }
 0x78e   :  { %22438 = vmatmul.mubr.msk.bf16.gmra.mrb[80].mxu1 %vm2688_vm8, %v7452_v29  ;;  %v23628_v29 = vld [vmem:[%s31202_s5 + $0x110] sm:$0xff]  }
 0x78f   :  { %22441 = vmatprep.mubr.msk.bf16.mxu1 %vm24873_vm3, %v24872_v26  ;;  %22458 = vmatpush3.bf16.msra.mxu1 %v23610_v45  ;;  %v7950_v45 = vshll.u32 %v23622_v31, 16 }
 0x790   :  { %22459 = vmatprep.subr.bf16.mxu1 %v24872_v26 }
 0x791   :  { %v7952_v30 = vrot.slane %v7950_v45, 4  ;;  %v19911_v45 = vld.sshfl [vmem:[#allocation4 + $0x10] sm:$0x20 pattern:$0x75316420] }
 0x793   :  { %22460 = vmatpush3.bf16.msra.mxu1 %v23612_v53  ;;  %v7945_v53 = vsel %vm3805_vm15, %v7935_v24, %v7944_v47  ;;  %v7953_v14 = vor.u32 %v7952_v30, %v7949_v22  ;;  %v19899_v30 = vld.sshfl [vmem:[#allocation4 + $0x10] sm:$0x1 pattern:$0x75316420] }
 0x794   :  { %22481 = vmatprep.subr.bf16.mxu1 %v24872_v26 }
 0x795   :  { %v7954_v46 = vsel %vm3805_vm15, %v7944_v47, %v7953_v14 }
 0x796   :  { %22442 = vmatmul.mubr.msk.bf16.gmra.mrb[84].mxu1 %vm2688_vm8, %v7454_v18  ;;  %v23629_v18 = vld [vmem:[%s31202_s5 + $0x118] sm:$0xff]  }
 0x797   :  { %22445 = vmatprep.mubr.msk.bf16.mxu1 %vm24873_vm3, %v24872_v26 }
 0x79e   :  { %22446 = vmatmul.mubr.msk.bf16.gmra.mrb[88].mxu1 %vm2688_vm8, %v7456_v52  ;;  %v7959_v52 = vshll.u32 %v23624_v16, 16 }
 0x79f   :  { %22449 = vmatprep.mubr.msk.bf16.mxu1 %vm24873_vm3, %v24872_v26 }
 0x7a0   :  { %v7961_v48 = vrot.slane %v7959_v52, 4 }
 0x7a6   :  { %22450 = vmatmul.mubr.msk.bf16.gmra.mrb[92].mxu1 %vm2688_vm8, %v7455_v60  ;;  %v7956_v60 = vshrl.u32 %v23624_v16, 16 }
 0x7a7   :  { %22461 = vmatprep.mubr.msk.bf16.mxu1 %vm24873_vm3, %v24872_v26 }
 0x7a8   :  { %v7958_v28 = vrot.slane %v7956_v60, 3 }
 0x7aa   :  { %v7962_v6 = vor.u32 %v7961_v48, %v7958_v28  ;;  %v19907_v48 = vld.sshfl [vmem:[#allocation4 + $0x10] sm:$0x2 pattern:$0x75316420] }
 0x7ac   :  { %v7963_v63 = vsel %vm3805_vm15, %v7953_v14, %v7962_v6 }
 0x7ae   :  { %22462 = vmatmul.mubr.msk.bf16.vlgmr.msra.gmra.mrb[76].mxu1 %vm2688_vm8, %v7598_v44  ;;  %v23631_v44 = vld [vmem:[#allocation3 + $0x48] sm:$0xff]  }
 0x7af   :  { %22482 = vmatpush3.bf16.msra.mxu1 %v23613_v58  ;;  %22465 = vmatprep.mubr.msk.bf16.mxu1 %vm24873_vm3, %v24872_v26  ;;  %v23630_v58 = vld [vmem:[#allocation3 + $0x40] sm:$0xff]  }
 0x7b0   :  { %22483 = vmatprep.subr.bf16.mxu1 %v24872_v26 }
 0x7b3   :  { %22484 = vmatpush3.bf16.msra.mxu1 %v23614_v11  ;;  %v23632_v11 = vld [vmem:[#allocation3 + $0x50] sm:$0xff]  }
 0x7b4   :  { %22485 = vmatprep.subr.bf16.mxu1 %v24872_v26 }
 0x7b6   :  { %22466 = vmatmul.mubr.msk.bf16.gmra.mrb[80].mxu1 %vm2688_vm8, %v27530_v3  ;;  %v7614_v3 = vor.u32 %v7613_v4, %v7610_v20  ;;  %v8328_v20 = vlaneseq  ;;  %v8327_v4 = vunpack.c.0.s8 %v8326_v5 }
 0x7b7   :  { %22469 = vmatprep.mubr.msk.bf16.mxu1 %vm24873_vm3, %v24872_v26  ;;  %22486 = vmatpush3.bf16.msra.mxu1 %v23615_v9  ;;  %v23633_v9 = vld [vmem:[#allocation3 + $0x58] sm:$0xff]  }
 0x7b8   :  { %22487 = vmatprep.subr.bf16.mxu1 %v24872_v26  ;;  %v7615_v0 = vsel %vm3468_vm12, %v27550_v12, %v7614_v3 }
 0x7bb   :  { %22488 = vmatpush3.bf16.msra.mxu1 %v23616_v36  ;;  %v23634_v36 = vld [vmem:[#allocation3 + $0x60] sm:$0x1f]  }
 0x7bc   :  { %22509 = vmatprep.subr.bf16.mxu1 %v24872_v26 }
 0x7be   :  { %22470 = vmatmul.mubr.msk.bf16.gmra.mrb[84].mxu1 %vm2688_vm8, %v27559_v19  ;;  %v7782_v19 = vrot.slane %v23618_v54, 3 }
 0x7bf   :  { %22473 = vmatprep.mubr.msk.bf16.mxu1 %vm24873_vm3, %v24872_v26 }
 0x7c0   :  { %v7783_v12 = vsel %vm3664_vm14, %v7781_v49, %v7782_v19  ;;  %v7785_v34 = vsel %vm3664_vm14, %v7782_v19, %v7784_v50  ;;  %v19867_v19 = vld.sshfl [vmem:[#allocation4] sm:$0x2 pattern:$0x75316420] }
 0x7c1   :  { %v19859_v49 = vld.sshfl [vmem:[#allocation4] sm:$0x1 pattern:$0x75316420] }
 0x7c2   :  { %v19879_v50 = vld.sshfl [vmem:[#allocation4 + $0x4] sm:$0x20 pattern:$0x75316420] }
 0x7c3   :  { %v9251_v16 = vcombine.high %v19879_v50, %v19879_v50 }
 0x7c6   :  { %22474 = vmatmul.mubr.msk.bf16.gmra.mrb[88].mxu1 %vm2688_vm8, %v7615_v0  ;;  %v24875_v0 = vmov 1935823168  }
 0x7c7   :  { %22477 = vmatprep.mubr.msk.bf16.mxu1 %vm24873_vm3, %v24872_v26  ;;  %v8347_v54 = vunpack.c.l.s4 %v24875_v0 }
 0x7ce   :  { %22478 = vmatmul.mubr.msk.bf16.gmra.mrb[92].mxu1 %vm2688_vm8, %v7614_v3  ;;  %v27838_v3 = vshrl.u32 %v8328_v20, 7  ;;  %v19919_v20 = vld.sshfl [vmem:[#allocation4 + $0x14] sm:$0x20 pattern:$0x75316420] }
 0x7cf   :  { %22489 = vmatprep.mubr.msk.bf16.mxu1 %vm24873_vm3, %v24872_v26 }
 0x7d0   :  { %31270 = vst [vmem:[#allocation9_spill] sm:$0xff] %v27838_v3  ;;  %v27841_v15 = vsub.s32 %v8327_v4, %v27838_v3 }
 0x7d2   :  { %v8414_v31 = vrot.slane %v19859_v49, %v27841_v15  ;;  %v9258_v8 = vrot.slane %v9251_v16, %v27841_v15  ;;  %v9425_v42 = vrot.slane %v19883_v59, %v27841_v15  ;;  %v9761_v35 = vrot.slane %v19891_v13, %v27841_v15  ;;  %v19923_v16 = vld.sshfl [vmem:[#allocation4 + $0x18] sm:$0x1 pattern:$0x75316420] }
 0x7d6   :  { %22490 = vmatmul.mubr.msk.bf16.vlgmr.msra.gmra.mrb[76].mxu1 %vm2688_vm8, %v7783_v12  ;;  %v8348_v12 = vunpack.c.0.s8 %v8347_v54 }
 0x7d7   :  { %22510 = vmatpush3.bf16.msra.mxu1 %v23619_v56  ;;  %22493 = vmatprep.mubr.msk.bf16.mxu1 %vm24873_vm3, %v24872_v26  ;;  %v19863_v56 = vld.sshfl [vmem:[#allocation4] sm:$0x10 pattern:$0x75316420] }
 0x7d8   :  { %22511 = vmatprep.subr.bf16.mxu1 %v24872_v26 }
 0x7db   :  { %22512 = vmatpush3.bf16.msra.mxu1 %v23621_v39  ;;  %v19875_v39 = vld.sshfl [vmem:[#allocation4 + $0x4] sm:$0x2 pattern:$0x75316420] }
 0x7dc   :  { %22513 = vmatprep.subr.bf16.mxu1 %v24872_v26  ;;  %v9087_v21 = vrot.slane %v19875_v39, %v27841_v15 }
 0x7de   :  { %22494 = vmatmul.mubr.msk.bf16.gmra.mrb[80].mxu1 %vm2688_vm8, %v7785_v34  ;;  %v27845_v34 = vsub.s32 %v8348_v12, %v27838_v3  ;;  %v9088_v2 = vcombine.high %v9087_v21, %v9087_v21 }
 0x7df   :  { %22497 = vmatprep.mubr.msk.bf16.mxu1 %vm24873_vm3, %v24872_v26  ;;  %22514 = vmatpush3.bf16.msra.mxu1 %v23623_v23  ;;  %v8575_v23 = vcombine.high %v19863_v56, %v19863_v56  ;;  %v10429_v56 = vrot.slane %v19907_v48, %v27841_v15 }
 0x7e0   :  { %22515 = vmatprep.subr.bf16.mxu1 %v24872_v26  ;;  %v8435_v33 = vrot.slane %v8414_v31, %v27845_v34  ;;  %v9110_v1 = vrot.slane %v9088_v2, %v27845_v34  ;;  %v9446_v60 = vrot.slane %v9425_v42, %v27845_v34  ;;  %v10933_v31 = vcombine.high %v19919_v20, %v19919_v20  ;;  %v23635_v2 = vld [vmem:[%s31204_s7] ss:$16 sps:$4 sm:$0xff]   ;;  %v19943_v20 = vld.sshfl [vmem:[#allocation4 + $0x20] sm:$0x10 pattern:$0x75316420] }
 0x7e1   :  { %v10430_v59 = vcombine.high %v10429_v56, %v10429_v56  ;;  %v11107_v42 = vrot.slane %v19923_v16, %v27841_v15 }
 0x7e2   :  { %v8442_v24 = vrot.slane %v8435_v33, %v27845_v34  ;;  %v9117_v22 = vrot.slane %v9110_v1, %v27845_v34  ;;  %v9453_v54 = vrot.slane %v9446_v60, %v27845_v34  ;;  %v23643_v1 = vld [vmem:[%s31204_s7 + $0x24] ss:$16 sps:$4 sm:$0xff]   ;;  %v23644_v60 = vld [vmem:[%s31204_s7 + $0x28] ss:$16 sps:$4 sm:$0xff]  }
 0x7e3   :  { %22516 = vmatpush3.bf16.msra.mxu1 %v23625_v17  ;;  %v8913_v17 = vcombine.high %v19871_v40, %v19871_v40 }
 0x7e4   :  { %22537 = vmatprep.subr.bf16.mxu1 %v24872_v26  ;;  %v27874_v25 = vunpack.c.l.b16 %v9117_v22 }
 0x7e5   :  { %v8920_v10 = vrot.slane %v8913_v17, %v27841_v15 }
 0x7e6   :  { %22498 = vmatmul.mubr.msk.bf16.gmra.mrb[84].mxu1 %vm2688_vm8, %v7787_v43 }
 0x7e7   :  { %22501 = vmatprep.mubr.msk.bf16.mxu1 %vm24873_vm3, %v24872_v26  ;;  %v8942_v32 = vrot.slane %v8920_v10, %v27845_v34 }
 0x7ee   :  { %22502 = vmatmul.mubr.msk.bf16.gmra.mrb[88].mxu1 %vm2688_vm8, %v7789_v62  ;;  %v8582_v62 = vrot.slane %v8575_v23, %v27841_v15 }
 0x7ef   :  { %22505 = vmatprep.mubr.msk.bf16.mxu1 %vm24873_vm3, %v24872_v26 }
 0x7f0   :  { %v8604_v7 = vrot.slane %v8582_v62, %v27845_v34  ;;  %v27894_v62 = vunpack.c.l.b16 %v9453_v54  ;;  %v19951_v54 = vld.sshfl [vmem:[#allocation4 + $0x20] sm:$0x20 pattern:$0x75316420] }
 0x7f2   :  { %v8611_v47 = vrot.slane %v8604_v7, %v27845_v34 }
 0x7f6   :  { %22506 = vmatmul.mubr.msk.bf16.gmra.mrb[92].mxu1 %vm2688_vm8, %v7788_v41  ;;  %v19887_v41 = vld.sshfl [vmem:[#allocation4 + $0x8] sm:$0x20 pattern:$0x75316420] }
 0x7f7   :  { %22517 = vmatprep.mubr.msk.bf16.mxu1 %vm24873_vm3, %v24872_v26  ;;  %v9587_v61 = vcombine.high %v19887_v41, %v19887_v41 }
 0x7f9   :  { %v9594_v37 = vrot.slane %v9587_v61, %v27841_v15 }
 0x7fb   :  { %v9595_v52 = vcombine.high %v9594_v37, %v9594_v37  ;;  %v23646_v37 = vld [vmem:[%s31204_s7 + $0x2c] ss:$16 sps:$4 sm:$0xff]  }
 0x7fe   :  { %22518 = vmatmul.mubr.msk.bf16.vlgmr.msra.gmra.mrb[76].mxu1 %vm2688_vm8, %v7936_v57  ;;  %v9259_v57 = vcombine.high %v9258_v8, %v9258_v8  ;;  %v23638_v8 = vld [vmem:[%s31204_s7 + $0x8] ss:$16 sps:$4 sm:$0xff]  }
 0x7ff   :  { %22538 = vmatpush3.bf16.msra.mxu1 %v23626_v51  ;;  %22521 = vmatprep.mubr.msk.bf16.mxu1 %vm24873_vm3, %v24872_v26 }
 0x800   :  { %22539 = vmatprep.subr.bf16.mxu1 %v24872_v26  ;;  %v9282_v14 = vrot.slane %v9259_v57, %v27845_v34  ;;  %v10940_v57 = vrot.slane %v10933_v31, %v27841_v15 }
 0x802   :  { %v9289_v0 = vrot.slane %v9282_v14, %v27845_v34 }
 0x803   :  { %22540 = vmatpush3.bf16.msra.mxu1 %v23627_v27  ;;  %v19895_v27 = vld.sshfl [vmem:[#allocation4 + $0xc] sm:$0x10 pattern:$0x75316420] }
 0x804   :  { %22541 = vmatprep.subr.bf16.mxu1 %v24872_v26  ;;  %v9921_v28 = vcombine.high %v19895_v27, %v19895_v27  ;;  %v27892_v41 = vunpack.c.l.b16 %v9289_v0 }
 0x806   :  { %22522 = vmatmul.mubr.msk.bf16.gmra.mrb[80].mxu1 %vm2688_vm8, %v7945_v53  ;;  %v8949_v53 = vrot.slane %v8942_v32, %v27845_v34  ;;  %v9928_v49 = vrot.slane %v9921_v28, %v27841_v15  ;;  %v23640_v32 = vld [vmem:[%s31204_s7 + $0xc] ss:$16 sps:$4 sm:$0xff]   ;;  %v10452_v28 = vrot.slane %v10430_v59, %v27845_v34 }
 0x807   :  { %22525 = vmatprep.mubr.msk.bf16.mxu1 %vm24873_vm3, %v24872_v26  ;;  %22542 = vmatpush3.bf16.msra.mxu1 %v23628_v29  ;;  %v27863_v29 = vunpack.c.l.b16 %v8442_v24  ;;  %v19953_v59 = vld.sshfl [vmem:[#allocation4 + $0x24] sm:$0x1 pattern:$0x75316420] }
 0x808   :  { %22543 = vmatprep.subr.bf16.mxu1 %v24872_v26  ;;  %v9950_v61 = vrot.slane %v9928_v49, %v27845_v34  ;;  %v10459_v31 = vrot.slane %v10452_v28, %v27845_v34 }
 0x80b   :  { %22544 = vmatpush3.bf16.msra.mxu1 %v23629_v18 }
 0x80c   :  { %17887 = vmatprep.subr.bf16.mxu1 %v23640_v32  ;;  %v23653_v32 = vld [vmem:[%s31204_s7 + $0x60] ss:$16 sps:$4 sm:$0xff]  }
 0x80e   :  { %22526 = vmatmul.mubr.msk.bf16.gmra.mrb[84].mxu1 %vm2688_vm8, %v7954_v46  ;;  %v19903_v46 = vld.sshfl [vmem:[#allocation4 + $0x10] sm:$0x10 pattern:$0x75316420] }
 0x80f   :  { %22529 = vmatprep.mubr.msk.bf16.mxu1 %vm24873_vm3, %v24872_v26  ;;  %v10255_v5 = vcombine.high %v19903_v46, %v19903_v46  ;;  %v9957_v46 = vrot.slane %v9950_v61, %v27845_v34  ;;  %v19947_v61 = vld.sshfl [vmem:[#allocation4 + $0x20] sm:$0x2 pattern:$0x75316420] }
 0x816   :  { %22530 = vmatmul.mubr.msk.bf16.gmra.mrb[88].mxu1 %vm2688_vm8, %v7963_v63  ;;  %v8626_v63 = vunpack.c.l.b16 %v8611_v47  ;;  %v19931_v47 = vld.sshfl [vmem:[#allocation4 + $0x1c] sm:$0x1 pattern:$0x75316420] }
 0x817   :  { %22533 = vmatprep.mubr.msk.bf16.mxu1 %vm24873_vm3, %v24872_v26 }
 0x818   :  { %v27884_v39 = vrot.slane %v8626_v63, 1  ;;  %v19939_v63 = vld.sshfl [vmem:[#allocation4 + $0x1c] sm:$0x2 pattern:$0x75316420] }
 0x81e   :  { %22534 = vmatmul.mubr.msk.bf16.gmra.mrb[92].mxu1 %vm2688_vm8, %v7962_v6  ;;  %v10593_v6 = vcombine.high %v19911_v45, %v19911_v45  ;;  %v23641_v45 = vld [vmem:[%s31204_s7 + $0x20] ss:$16 sps:$4 sm:$0xff]  }
 0x81f   :  { %22545 = vmatprep.mubr.msk.bf16.mxu1 %vm24873_vm3, %v24872_v26 }
 0x820   :  { %v10600_v12 = vrot.slane %v10593_v6, %v27841_v15 }
 0x822   :  { %v10601_v7 = vcombine.high %v10600_v12, %v10600_v12  ;;  %v11441_v12 = vrot.slane %v19931_v47, %v27841_v15  ;;  %v19869_v47 = vld.sshfl [vmem:[#allocation4] sm:$0x20 pattern:$0x75316420] }
 0x824   :  { %v10624_v48 = vrot.slane %v10601_v7, %v27845_v34  ;;  %v11937_v7 = vcombine.high %v19943_v20, %v19943_v20  ;;  %v23659_v20 = vld [vmem:[%s31204_s7 + $0x80] ss:$16 sps:$4 sm:$0xff]  }
 0x826   :  { %22546 = vmatmul.mubr.msk.bf16.vlgmr.msra.gmra.mrb[76].mxu1 %vm2688_vm8, %v23630_v58  ;;  %v9782_v58 = vrot.slane %v9761_v35, %v27845_v34  ;;  %v19935_v35 = vld.sshfl [vmem:[#allocation4 + $0x1c] sm:$0x10 pattern:$0x75316420] }
 0x827   :  { %22549 = vmatprep.mubr.msk.bf16.mxu1 %vm24873_vm3, %v24872_v26  ;;  %17888 = vmatpush1.bf16.msra.mxu1 %v23638_v8  ;;  %v11775_v8 = vrot.slane %v19939_v63, %v27841_v15  ;;  %v19877_v63 = vld.sshfl [vmem:[#allocation4 + $0x4] sm:$0x20 pattern:$0x75316420] }
 0x828   :  { %v9789_v50 = vrot.slane %v9782_v58, %v27845_v34  ;;  %17889 = vmatprep.subr.bf16.mxu1 %v23646_v37  ;;  %v23652_v58 = vld [vmem:[%s31204_s7 + $0x4c] ss:$16 sps:$4 sm:$0xff]   ;;  %v23656_v37 = vld [vmem:[%s31204_s7 + $0x68] ss:$16 sps:$4 sm:$0xff]  }
 0x82a   :  { %v27913_v13 = vunpack.c.l.b16 %v9789_v50  ;;  %v23655_v50 = vld [vmem:[%s31204_s7 + $0x64] ss:$16 sps:$4 sm:$0xff]  }
 0x82b   :  { %17890 = vmatpush1.bf16.msra.mxu1 %v23644_v60 }
 0x82c   :  { %17891 = vmatprep.subr.bf16.mxu1 %v23652_v58  ;;  %v11944_v58 = vrot.slane %v11937_v7, %v27841_v15  ;;  %v19861_v7 = vld.sshfl [vmem:[#allocation4] sm:$0x10 pattern:$0x75316420] }
 0x82e   :  { %22550 = vmatmul.mubr.msk.bf16.gmra.mrb[80].mxu1 %vm2688_vm8, %v23631_v44  ;;  %v10095_v44 = vrot.slane %v19899_v30, %v27841_v15 }
 0x82f   :  { %22553 = vmatprep.mubr.msk.bf16.mxu1 %vm24873_vm3, %v24872_v26 }
 0x830   :  { %v10116_v23 = vrot.slane %v10095_v44, %v27845_v34 }
 0x836   :  { %22554 = vmatmul.mubr.msk.bf16.gmra.mrb[84].mxu1 %vm2688_vm8, %v23632_v11  ;;  %v19915_v11 = vld.sshfl [vmem:[#allocation4 + $0x14] sm:$0x2 pattern:$0x75316420] }
 0x837   :  { %22557 = vmatprep.mubr.msk.bf16.mxu1 %vm24873_vm3, %v24872_v26  ;;  %v10769_v40 = vrot.slane %v19915_v11, %v27841_v15 }
 0x839   :  { %v10770_v24 = vcombine.high %v10769_v40, %v10769_v40  ;;  %v11601_v40 = vcombine.high %v19935_v35, %v19935_v35 }
 0x83b   :  { %v10792_v6 = vrot.slane %v10770_v24, %v27845_v34  ;;  %v12275_v24 = vcombine.high %v19951_v54, %v19951_v54 }
 0x83d   :  { %v10799_v16 = vrot.slane %v10792_v6, %v27845_v34  ;;  %v11776_v6 = vcombine.high %v11775_v8, %v11775_v8 }
 0x83e   :  { %22558 = vmatmul.mubr.msk.bf16.gmra.mrb[88].mxu1 %vm2688_vm8, %v23633_v9  ;;  %v19945_v9 = vld.sshfl [vmem:[#allocation4 + $0x20] sm:$0x2 pattern:$0x75316420] }
 0x83f   :  { %22561 = vmatprep.mubr.msk.bf16.mxu1 %vm24873_vm3, %v24872_v26  ;;  %v8749_v26 = vrot.slane %v19867_v19, %v27841_v15  ;;  %v9618_v19 = vrot.slane %v9595_v52, %v27845_v34  ;;  %v23649_v52 = vld [vmem:[%s31204_s7 + $0x44] ss:$16 sps:$4 sm:$0xff]   ;;  %v27987_v60 = vunpack.c.l.b16 %v10799_v16 }
 0x841   :  { %v8750_v43 = vcombine.high %v8749_v26, %v8749_v26  ;;  %v19927_v26 = vld.sshfl [vmem:[#allocation4 + $0x18] sm:$0x20 pattern:$0x75316420]  ;;  %v9625_v33 = vrot.slane %v9618_v19, %v27845_v34 }
 0x842   :  { %v11267_v10 = vcombine.high %v19927_v26, %v19927_v26  ;;  %v23647_v19 = vld [vmem:[%s31204_s7 + $0x40] ss:$16 sps:$4 sm:$0xff]   ;;  %v23650_v26 = vld [vmem:[%s31204_s7 + $0x48] ss:$16 sps:$4 sm:$0xff]  }
 0x843   :  { %v8772_v55 = vrot.slane %v8750_v43, %v27845_v34  ;;  %v10262_v43 = vrot.slane %v10255_v5, %v27841_v15  ;;  %v27927_v30 = vunpack.c.l.b16 %v9625_v33  ;;  %v11128_v5 = vrot.slane %v11107_v42, %v27845_v34  ;;  %v23658_v33 = vld [vmem:[%s31204_s7 + $0x6c] ss:$16 sps:$4 sm:$0xff]   ;;  %17892 = vmatpush1.bf16.msra.mxu1 %v23650_v26  ;;  %v23667_v26 = vld [vmem:[%s31204_s7 + $0xa4] ss:$16 sps:$4 sm:$0xff]  }
 0x844   :  { %v11274_v14 = vrot.slane %v11267_v10, %v27841_v15  ;;  %v11608_v42 = vrot.slane %v11601_v40, %v27841_v15  ;;  %17893 = vmatprep.subr.bf16.mxu1 %v23658_v33  ;;  %v23662_v40 = vld [vmem:[%s31204_s7 + $0x88] ss:$16 sps:$4 sm:$0xff]   ;;  %v23670_v33 = vld [vmem:[%s31204_s7 + $0xac] ss:$16 sps:$4 sm:$0xff]  }
 0x845   :  { %v8779_v51 = vrot.slane %v8772_v55, %v27845_v34  ;;  %v23637_v55 = vld [vmem:[%s31204_s7 + $0x4] ss:$16 sps:$4 sm:$0xff]   ;;  %v10284_v27 = vrot.slane %v10262_v43, %v27845_v34  ;;  %v10631_v43 = vrot.slane %v10624_v48, %v27845_v34  ;;  %v19913_v10 = vld.sshfl [vmem:[#allocation4 + $0x14] sm:$0x2 pattern:$0x75316420] }
 0x846   :  { %22562 = vmatmul.mubr.msk.bf16.gmra.mrb[92].mxu1 %vm2688_vm8, %v23634_v36  ;;  %v8964_v36 = vunpack.c.l.b16 %v8949_v53  ;;  %17354 = vmatprep.subr.bf16.mxu0 %v23637_v55  ;;  %v11275_v56 = vcombine.high %v11274_v14, %v11274_v14  ;;  %v11135_v55 = vrot.slane %v11128_v5, %v27845_v34  ;;  %v12282_v5 = vrot.slane %v12275_v24, %v27841_v15 }
 0x847   :  { %v27867_v18 = vunpack.c.l.b16 %v8779_v51  ;;  %v10123_v51 = vrot.slane %v10116_v23, %v27845_v34  ;;  %17355 = vmatpush1.bf16.msra.mxu0 %v23635_v2  ;;  %v10291_v0 = vrot.slane %v10284_v27, %v27845_v34  ;;  %v9972_v23 = vunpack.c.l.b16 %v9957_v46  ;;  %v23661_v27 = vld [vmem:[%s31204_s7 + $0x84] ss:$16 sps:$4 sm:$0xff]   ;;  %17894 = vmatpush1.bf16.msra.mxu1 %v23656_v37 }
 0x848   :  { %v27888_v17 = vrot.slane %v8964_v36, 1  ;;  %17356 = vmatprep.subr.bf16.mxu0 %v23643_v1  ;;  %v10941_v36 = vcombine.high %v10940_v57, %v10940_v57  ;;  %v11462_v57 = vrot.slane %v11441_v12, %v27845_v34  ;;  %v27985_v14 = vunpack.c.l.b16 %v10631_v43  ;;  %v19897_v43 = vld.sshfl [vmem:[#allocation4 + $0xc] sm:$0x2 pattern:$0x75316420] }
 0x849   :  { %v27944_v11 = vunpack.c.l.b16 %v10123_v51  ;;  %v10306_v1 = vunpack.c.l.b16 %v10291_v0  ;;  %v11298_v51 = vrot.slane %v11275_v56, %v27845_v34  ;;  %v27981_v35 = vrot.slane %v9972_v23, 1  ;;  %v28002_v0 = vld.sshfl [vmem:[#allocation4 + $0x8] sm:$0x20 pattern:$0x75316420] }
 0x84a   :  { %v10964_v2 = vrot.slane %v10941_v36, %v27845_v34  ;;  %v12368_v46 = vrot.slane %v19953_v59, %v27841_v15  ;;  %v27994_v48 = vunpack.c.l.b16 %v11135_v55  ;;  %v12111_v36 = vrot.slane %v19947_v61, %v27841_v15  ;;  %v19865_v23 = vld.sshfl [vmem:[#allocation4] sm:$0x2 pattern:$0x75316420] }
 0x84b   :  { %17357 = vmatpush1.bf16.msra.mxu0 %v23641_v45  ;;  %v27983_v45 = vunpack.c.l.b16 %v10459_v31  ;;  %v28004_v54 = vrot.slane %v10306_v1, 1  ;;  %v11469_v56 = vrot.slane %v11462_v57, %v27845_v34  ;;  %v11630_v12 = vrot.slane %v11608_v42, %v27845_v34  ;;  %v19873_v57 = vld.sshfl [vmem:[#allocation4 + $0x4] sm:$0x2 pattern:$0x75316420] }
 0x84c   :  { %17358 = vmatprep.subr.bf16.mxu0 %v23649_v52  ;;  %v23664_v52 = vld [vmem:[%s31204_s7 + $0x8c] ss:$16 sps:$4 sm:$0xff]   ;;  %v10971_v28 = vrot.slane %v10964_v2, %v27845_v34  ;;  %v8828_v2 = vcombine.high %v19869_v47, %v19869_v47  ;;  %v12389_v55 = vrot.slane %v12368_v46, %v27845_v34  ;;  %v11798_v59 = vrot.slane %v11776_v6, %v27845_v34  ;;  %v23673_v46 = vld [vmem:[%s31204_s7 + $0xc4] ss:$16 sps:$4 sm:$0xff]  }
 0x84d   :  { %17895 = vmatprep.subr.bf16.mxu1 %v23664_v52  ;;  %v11966_v24 = vrot.slane %v11944_v58, %v27845_v34  ;;  %v12283_v1 = vcombine.high %v12282_v5, %v12282_v5  ;;  %v9166_v42 = vcombine.high %v19877_v63, %v19877_v63  ;;  %v11637_v47 = vrot.slane %v11630_v12, %v27845_v34  ;;  %v23668_v52 = vld [vmem:[%s31204_s7 + $0xa8] ss:$16 sps:$4 sm:$0xff]   ;;  %v23676_v6 = vld [vmem:[%s31204_s7 + $0xcc] ss:$16 sps:$4 sm:$0xff]  }
 0x84e   :  { %v28022_v8 = vunpack.c.l.b16 %v10971_v28  ;;  %17896 = vmatpush1.bf16.msra.mxu1 %v23662_v40  ;;  %v9502_v28 = vcombine.high %v28002_v0, %v28002_v0  ;;  %v8666_v58 = vrot.slane %v19865_v23, %v27841_v15  ;;  %v8835_v5 = vrot.slane %v8828_v2, %v27841_v15  ;;  %v19893_v2 = vld.sshfl [vmem:[#allocation4 + $0xc] sm:$0x10 pattern:$0x75316420] }
 0x84f   :  { %17359 = vmatpush1.bf16.msra.mxu0 %v23647_v19  ;;  %v11305_v19 = vrot.slane %v11298_v51, %v27845_v34  ;;  %v23665_v51 = vld [vmem:[%s31204_s7 + $0xa0] ss:$16 sps:$4 sm:$0xff]   ;;  %17897 = vmatprep.subr.bf16.mxu1 %v23670_v33  ;;  %v9004_v0 = vrot.slane %v19873_v57, %v27841_v15  ;;  %v11973_v12 = vrot.slane %v11966_v24, %v27845_v34  ;;  %v23674_v24 = vld [vmem:[%s31204_s7 + $0xc8] ss:$16 sps:$4 sm:$0xff]  }
 0x850   :  { %17360 = vmatprep.subr.bf16.mxu0 %v23655_v50  ;;  %v19857_v50 = vld.sshfl [vmem:[#allocation4] sm:$0x1 pattern:$0x75316420]  ;;  %v9173_v23 = vrot.slane %v9166_v42, %v27841_v15  ;;  %v8667_v42 = vcombine.high %v8666_v58, %v8666_v58  ;;  %v9838_v61 = vcombine.high %v19893_v2, %v19893_v2 }
 0x851   :  { %v28030_v37 = vunpack.c.l.b16 %v11305_v19  ;;  %v8331_v63 = vrot.slane %v19857_v50, %v27841_v15  ;;  %v23671_v50 = vld [vmem:[%s31204_s7 + $0xc0] ss:$16 sps:$4 sm:$0xff]   ;;  %v9005_v19 = vcombine.high %v9004_v0, %v9004_v0 }
 0x852   :  { %v19881_v33 = vld.sshfl [vmem:[#allocation4 + $0x8] sm:$0x1 pattern:$0x75316420]  ;;  %17898 = vmatpush1.bf16.msra.mxu1 %v23668_v52  ;;  %v8836_v52 = vcombine.high %v8835_v5, %v8835_v5  ;;  %v9174_v58 = vcombine.high %v9173_v23, %v9173_v23  ;;  %v8689_v23 = vrot.slane %v8667_v42, %v27845_v34 }
 0x853   :  { %17361 = vmatpush1.bf16.msra.mxu0 %v23653_v32  ;;  %v12112_v32 = vcombine.high %v12111_v36, %v12111_v36  ;;  %v8492_v36 = vcombine.high %v19861_v7, %v19861_v7  ;;  %v11652_v7 = vunpack.c.l.b16 %v11637_v47  ;;  %17899 = vmatprep.subr.bf16.mxu1 %v23676_v6  ;;  %v8352_v57 = vrot.slane %v8331_v63, %v27845_v34  ;;  %v23677_v63 = vld [vmem:[%s31204_s7 + $0xe0] ss:$16 sps:$4 sm:$0xff]  }
 0x854   :  { %17362 = vmatprep.subr.bf16.mxu0 %v23661_v27  ;;  %v28032_v27 = vunpack.c.l.b16 %v11469_v56  ;;  %v11805_v56 = vrot.slane %v11798_v59, %v27845_v34  ;;  %v9344_v0 = vrot.slane %v19881_v33, %v27841_v15  ;;  %v9027_v33 = vrot.slane %v9005_v19, %v27845_v34 }
 0x855   :  { %v12134_v40 = vrot.slane %v12112_v32, %v27845_v34  ;;  %v23679_v32 = vld [vmem:[%s31204_s7 + $0xe4] ss:$16 sps:$4 sm:$0xff]   ;;  %v8499_v47 = vrot.slane %v8492_v36, %v27841_v15  ;;  %v19901_v36 = vld.sshfl [vmem:[#allocation4 + $0x10] sm:$0x10 pattern:$0x75316420]  ;;  %v9197_v42 = vrot.slane %v9174_v58, %v27845_v34  ;;  %v8696_v58 = vrot.slane %v8689_v23, %v27845_v34 }
 0x856   :  { %v28076_v59 = vunpack.c.l.b16 %v11805_v56  ;;  %v28083_v5 = vrot.slane %v11652_v7, 1  ;;  %17900 = vmatpush1.bf16.msra.mxu1 %v23674_v24  ;;  %v23685_v56 = vld [vmem:[%s31204_s7 + $0x104] ss:$16 sps:$4 sm:$0xff]   ;;  %v8859_v7 = vrot.slane %v8836_v52, %v27845_v34 }
 0x857   :  { %17363 = vmatpush1.bf16.msra.mxu0 %v23659_v20  ;;  %v12396_v20 = vrot.slane %v12389_v55, %v27845_v34  ;;  %v12141_v6 = vrot.slane %v12134_v40, %v27845_v34  ;;  %v8521_v2 = vrot.slane %v8499_v47, %v27845_v34  ;;  %v10172_v47 = vcombine.high %v19901_v36, %v19901_v36 }
 0x858   :  { %17364 = vmatprep.subr.bf16.mxu0 %v23667_v26  ;;  %v12306_v26 = vrot.slane %v12283_v1, %v27845_v34  ;;  %v9509_v1 = vrot.slane %v9502_v28, %v27841_v15  ;;  %v11988_v28 = vunpack.c.l.b16 %v11973_v12  ;;  %v8866_v36 = vrot.slane %v8859_v7, %v27845_v34 }
 0x859   :  { %v28074_v55 = vunpack.c.l.b16 %v12396_v20  ;;  %v23680_v20 = vld [vmem:[%s31204_s7 + $0xe8] ss:$16 sps:$4 sm:$0xff]   ;;  %v28106_v31 = vunpack.c.l.b16 %v12141_v6  ;;  %v19917_v6 = vld.sshfl [vmem:[#allocation4 + $0x14] sm:$0x20 pattern:$0x75316420] }
 0x85a   :  { %v12313_v16 = vrot.slane %v12306_v26, %v27845_v34  ;;  %v9510_v12 = vcombine.high %v9509_v1, %v9509_v1  ;;  %v23688_v26 = vld [vmem:[%s31204_s7 + $0x10c] ss:$16 sps:$4 sm:$0xff]   ;;  %v10012_v1 = vrot.slane %v19897_v43, %v27841_v15  ;;  %v23686_v43 = vld [vmem:[%s31204_s7 + $0x108] ss:$16 sps:$4 sm:$0xff]   ;;  %v10848_v23 = vcombine.high %v19917_v6, %v19917_v6 }
 0x85b   :  { %17365 = vmatpush1.bf16.msra.mxu0 %v23665_v51  ;;  %v23682_v51 = vld [vmem:[%s31204_s7 + $0xec] ss:$16 sps:$4 sm:$0xff]  }
 0x85c   :  { %17366 = vmatprep.subr.bf16.mxu0 %v23673_v46  ;;  %v19889_v46 = vld.sshfl [vmem:[#allocation4 + $0xc] sm:$0x1 pattern:$0x75316420]  ;;  %17901 = vmatprep.subr.bf16.mxu1 %v23682_v51  ;;  %v28112_v52 = vunpack.c.l.b16 %v12313_v16  ;;  %v9533_v19 = vrot.slane %v9510_v12, %v27845_v34  ;;  %v28124_v16 = vrot.slane %v8521_v2, %v27845_v34  ;;  %v10013_v24 = vcombine.high %v10012_v1, %v10012_v1 }
 0x85d   :  { %v9680_v40 = vrot.slane %v19889_v46, %v27841_v15  ;;  %v19909_v51 = vld.sshfl [vmem:[#allocation4 + $0x10] sm:$0x20 pattern:$0x75316420]  ;;  %v28104_v46 = vrot.slane %v11988_v28, 1  ;;  %17902 = vmatpush1.bf16.msra.mxu1 %v23680_v20 }
 0x85e   :  { %17903 = vmatprep.subr.bf16.mxu1 %v23688_v26  ;;  %v19905_v20 = vld.sshfl [vmem:[#allocation4 + $0x10] sm:$0x2 pattern:$0x75316420]  ;;  %v10508_v12 = vcombine.high %v19909_v51, %v19909_v51  ;;  %v9204_v26 = vrot.slane %v9197_v42, %v27845_v34  ;;  %v28136_v51 = vunpack.c.l.b16 %v8696_v58 }
 0x85f   :  { %17367 = vmatpush1.bf16.msra.mxu0 %v23671_v50  ;;  %v8359_v50 = vrot.slane %v8352_v57, %v27845_v34  ;;  %v23683_v57 = vld [vmem:[%s31204_s7 + $0x100] ss:$16 sps:$4 sm:$0xff]   ;;  %v9701_v28 = vrot.slane %v9680_v40, %v27845_v34  ;;  %v19933_v1 = vld.sshfl [vmem:[#allocation4 + $0x1c] sm:$0x10 pattern:$0x75316420]  ;;  %v28139_v40 = vunpack.c.l.b16 %v8866_v36  ;;  %v10346_v42 = vrot.slane %v19905_v20, %v27841_v15 }
 0x860   :  { %17368 = vmatprep.subr.bf16.mxu0 %v23679_v32  ;;  %v9845_v32 = vrot.slane %v9838_v61, %v27841_v15  ;;  %v9365_v61 = vrot.slane %v9344_v0, %v27845_v34  ;;  %v19925_v2 = vld.sshfl [vmem:[#allocation4 + $0x18] sm:$0x10 pattern:$0x75316420]  ;;  %v28149_v49 = vunpack.c.l.b16 %v9204_v26  ;;  %v10686_v36 = vrot.slane %v19913_v10, %v27841_v15  ;;  %v28164_v10 = vld [vmem:[%s31203_s6] ss:$0 sm:$0xff] }
 0x861   :  { %17904 = vmatpush1.bf16.msra.mxu1 %v23686_v43  ;;  %v11184_v53 = vcombine.high %v19925_v2, %v19925_v2  ;;  %v10347_v22 = vcombine.high %v10346_v42, %v10346_v42  ;;  %v11518_v21 = vcombine.high %v19933_v1, %v19933_v1 }
 0x862   :  { %v9867_v0 = vrot.slane %v9845_v32, %v27845_v34  ;;  %v9372_v7 = vrot.slane %v9365_v61, %v27845_v34  ;;  %v9708_v32 = vrot.slane %v9701_v28, %v27845_v34  ;;  %v10035_v61 = vrot.slane %v10013_v24, %v27845_v34  ;;  %v19941_v28 = vld.sshfl [vmem:[#allocation4 + $0x20] sm:$0x10 pattern:$0x75316420] }
 0x863   :  { %17369 = vmatpush1.bf16.msra.mxu0 %v23677_v63  ;;  %v28120_v63 = vunpack.c.l.b16 %v8359_v50  ;;  %v10179_v50 = vrot.slane %v10172_v47, %v27841_v15  ;;  %v19937_v47 = vld.sshfl [vmem:[#allocation4 + $0x1c] sm:$0x2 pattern:$0x75316420]  ;;  %v11854_v4 = vcombine.high %v19941_v28, %v19941_v28  ;;  %v10687_v1 = vcombine.high %v10686_v36, %v10686_v36 }
 0x864   :  { %17370 = vmatprep.subr.bf16.mxu0 %v23685_v56  ;;  %v9034_v56 = vrot.slane %v9027_v33, %v27845_v34  ;;  %v9540_v33 = vrot.slane %v9533_v19, %v27845_v34  ;;  %v28145_v43 = vrot.slane %v9867_v0, %v27845_v34  ;;  %v10515_v19 = vrot.slane %v10508_v12, %v27841_v15  ;;  %v19921_v0 = vld.sshfl [vmem:[#allocation4 + $0x18] sm:$0x1 pattern:$0x75316420] }
 0x865   :  { %v10201_v58 = vrot.slane %v10179_v50, %v27845_v34  ;;  %v28154_v20 = vunpack.c.l.b16 %v9372_v7  ;;  %v28158_v44 = vunpack.c.l.b16 %v9708_v32  ;;  %v19929_v12 = vld.sshfl [vmem:[#allocation4 + $0x1c] sm:$0x1 pattern:$0x75316420]  ;;  %v11692_v26 = vrot.slane %v19937_v47, %v27841_v15 }
 0x866   :  { %v28142_v6 = vunpack.c.l.b16 %v9034_v56  ;;  %31271 = vst [vmem:[#allocation10_spill] sm:$0xff] %v28145_v43  ;;  %v28156_v56 = vunpack.c.l.b16 %v9540_v33  ;;  %v10042_v33 = vrot.slane %v10035_v61, %v27845_v34  ;;  %v10516_v2 = vcombine.high %v10515_v19, %v10515_v19  ;;  %v19949_v7 = vld.sshfl [vmem:[#allocation4 + $0x20] sm:$0x20 pattern:$0x75316420] }
 0x867   :  { %17371 = vmatpush1.bf16.msra.mxu0 %v23683_v57  ;;  %v10855_v57 = vrot.slane %v10848_v23, %v27841_v15  ;;  %31273 = vst [vmem:[#allocation12_spill] sm:$0xff] %v28158_v44  ;;  %v28170_v42 = vrot.slane %v10201_v58, %v27845_v34  ;;  %v11026_v28 = vrot.slane %v19921_v0, %v27841_v15 }
 0x868   :  { %31272 = vst [vmem:[#allocation11_spill] sm:$0xff] %v28156_v56  ;;  %v10369_v61 = vrot.slane %v10347_v22, %v27845_v34  ;;  %v11525_v19 = vrot.slane %v11518_v21, %v27841_v15  ;;  %v11693_v58 = vcombine.high %v11692_v26, %v11692_v26  ;;  %v11861_v36 = vrot.slane %v11854_v4, %v27841_v15 }
 0x869   :  { %v10856_v47 = vcombine.high %v10855_v57, %v10855_v57  ;;  %v10539_v0 = vrot.slane %v10516_v2, %v27845_v34  ;;  %v28185_v21 = vunpack.c.l.b16 %v10042_v33 }
 0x86a   :  { %v10376_v26 = vrot.slane %v10369_v61, %v27845_v34  ;;  %v11715_v2 = vrot.slane %v11693_v58, %v27845_v34 }
 0x8f9   :  { %v8202_v24 = vpop.f32.mrb[76].mxu1 }
 0x8fa   :  { %v22601_v50 = vadd.f32 %v28164_v10, %v8202_v24  ;;  %v22547_v23 = vpop.f32.mrb[77].mxu1  ;;  %v11191_v24 = vrot.slane %v11184_v53, %v27841_v15  ;;  %v10879_v53 = vrot.slane %v10856_v47, %v27845_v34  ;;  %v10546_v47 = vrot.slane %v10539_v0, %v27845_v34 }
 0x8fb   :  { %v8205_v32 = vpop.f32.mrb[78].mxu1  ;;  %v11360_v23 = vrot.slane %v19929_v12, %v27841_v15  ;;  %v11047_v12 = vrot.slane %v11026_v28, %v27845_v34  ;;  %v28206_v0 = vunpack.c.l.b16 %v10376_v26 }
 0x8fc   :  { %v8251_v3 = vmax.f32 %v22601_v50, 0.0  ;;  %v22602_v56 = vadd.f32 %v28164_v10, %v8205_v32  ;;  %v22548_v44 = vpop.f32.mrb[79].mxu1  ;;  %v12028_v50 = vrot.slane %v19945_v9, %v27841_v15  ;;  %v12190_v32 = vcombine.high %v19949_v7, %v19949_v7 }
 0x8fd   :  { %v10709_v44 = vrot.slane %v10687_v1, %v27845_v34  ;;  %v11213_v4 = vrot.slane %v11191_v24, %v27845_v34  ;;  %v11547_v9 = vrot.slane %v11525_v19, %v27845_v34  ;;  %v11883_v1 = vrot.slane %v11861_v36, %v27845_v34 }
 0x8fe   :  { %v20839_v57 = vpack.c.bf16 %v8251_v3, %v8251_v3  ;;  %v8252_v43 = vmax.f32 %v22602_v56, 0.0  ;;  %v11381_v3 = vrot.slane %v11360_v23, %v27845_v34  ;;  %v12029_v28 = vcombine.high %v12028_v50, %v12028_v50 }
 0x8ff   :  { %v10716_v23 = vrot.slane %v10709_v44, %v27845_v34  ;;  %v10886_v61 = vrot.slane %v10879_v53, %v27845_v34  ;;  %v11054_v19 = vrot.slane %v11047_v12, %v27845_v34  ;;  %v12197_v58 = vrot.slane %v12190_v32, %v27841_v15 }
 0x900   :  { %8302 = vst.msk [vmem:[#allocation4 + $0x28] sm:$0xf] %vm2602_vm7, %v20839_v57  ;;  %v20840_v22 = vpack.c.bf16 %v8252_v43, %v8252_v43  ;;  %v28209_v50 = vrot.slane %v11547_v9, %v27845_v34  ;;  %v11722_v44 = vrot.slane %v11715_v2, %v27845_v34  ;;  %v28213_v53 = vrot.slane %v11883_v1, %v27845_v34 }
 0x901   :  { %v8210_v56 = vpop.f32.mrb[80].mxu1  ;;  %v28224_v26 = vunpack.c.l.b16 %v11054_v19  ;;  %v12198_v9 = vcombine.high %v12197_v58, %v12197_v58 }
 0x902   :  { %8303 = vst.msk [vmem:[#allocation4 + $0x2c] sm:$0xf] %vm2602_vm7, %v20840_v22  ;;  %v22603_v7 = vadd.f32 %v28164_v10, %v8210_v56  ;;  %v22551_v43 = vpop.f32.mrb[81].mxu1  ;;  %v28203_v56 = vrot.slane %v11213_v4, %v27845_v34  ;;  %31275 = vst [vmem:[#allocation14_spill] sm:$0xff] %v28209_v50 }
 0x903   :  { %v8213_v24 = vpop.f32.mrb[82].mxu1  ;;  %v11388_v43 = vrot.slane %v11381_v3, %v27845_v34  ;;  %31276 = vst [vmem:[#allocation15_spill] sm:$0xff] %v28213_v53  ;;  %v28222_v3 = vunpack.c.l.b16 %v10886_v61  ;;  %31279 = vst [vmem:[#allocation18_spill] sm:$0xff] %v28224_v26 }
 0x904   :  { %v8253_v36 = vmax.f32 %v22603_v7, 0.0  ;;  %v22604_v57 = vadd.f32 %v28164_v10, %v8213_v24  ;;  %v22552_v22 = vpop.f32.mrb[83].mxu1  ;;  %31274 = vst [vmem:[#allocation13_spill] sm:$0xff] %v28203_v56  ;;  %v28215_v7 = vunpack.c.l.b16 %v10546_v47  ;;  %v28218_v24 = vrot.slane %v12029_v28, %v27845_v34 }
 0x905   :  { %v28220_v22 = vunpack.c.l.b16 %v10716_v23  ;;  %31278 = vst [vmem:[#allocation17_spill] sm:$0xff] %v28222_v3  ;;  %v28233_v3 = vunpack.c.l.b16 %v11722_v44 }
 0x906   :  { %v20841_v12 = vpack.c.bf16 %v8253_v36, %v8253_v36  ;;  %v8254_v32 = vmax.f32 %v22604_v57, 0.0  ;;  %v28229_v57 = vunpack.c.l.b16 %v11388_v43 }
 0x907   :  { %v19860_v4 = vld.sshfl [vmem:[#allocation4 + $0x28] sm:$0x1 pattern:$0x75316420]  ;;  %31277 = vst [vmem:[#allocation16_spill] sm:$0xff] %v28220_v22  ;;  %31281 = vst [vmem:[#allocation20_spill] sm:$0xff] %v28233_v3  ;;  %v28242_v3 = vrot.slane %v12198_v9, %v27845_v34 }
 0x908   :  { %8304 = vst.msk [vmem:[#allocation4 + $0x30] sm:$0xf] %vm2602_vm7, %v20841_v12  ;;  %v20842_v2 = vpack.c.bf16 %v8254_v32, %v8254_v32  ;;  %v8428_v1 = vrot.slane %v19860_v4, %v27841_v15  ;;  %v19868_v36 = vld.sshfl [vmem:[#allocation4 + $0x28] sm:$0x2 pattern:$0x75316420] }
 0x909   :  { %31280 = vst [vmem:[#allocation19_spill] sm:$0xff] %v28229_v57  ;;  %v8218_v28 = vpop.f32.mrb[84].mxu1  ;;  %v8764_v33 = vrot.slane %v19868_v36, %v27841_v15  ;;  %v19864_v23 = vld.sshfl [vmem:[#allocation4 + $0x28] sm:$0x10 pattern:$0x75316420] }
 0x90a   :  { %8305 = vst.msk [vmem:[#allocation4 + $0x34] sm:$0xf] %vm2602_vm7, %v20842_v2  ;;  %v22605_v58 = vadd.f32 %v28164_v10, %v8218_v28  ;;  %v22555_v12 = vpop.f32.mrb[85].mxu1  ;;  %v8449_v32 = vrot.slane %v8428_v1, %v27845_v34  ;;  %v8590_v4 = vcombine.high %v19864_v23, %v19864_v23  ;;  %31282 = vst [vmem:[#allocation21_spill] sm:$0xff] %v28242_v3  ;;  %v23689_v9 = vld [vmem:[%s31204_s7 + $0x120] ss:$16 sps:$4 sm:$0xff]  }
 0x90b   :  { %v19872_v43 = vld.sshfl [vmem:[#allocation4 + $0x2c] sm:$0x10 pattern:$0x75316420]  ;;  %v8221_v36 = vpop.f32.mrb[86].mxu1  ;;  %v8765_v56 = vcombine.high %v8764_v33, %v8764_v33 }
 0x90c   :  { %v8928_v61 = vcombine.high %v19872_v43, %v19872_v43  ;;  %v19876_v44 = vld.sshfl [vmem:[#allocation4 + $0x2c] sm:$0x2 pattern:$0x75316420]  ;;  %v8255_v19 = vmax.f32 %v22605_v58, 0.0  ;;  %v22606_v2 = vadd.f32 %v28164_v10, %v8221_v36  ;;  %v22556_v28 = vpop.f32.mrb[87].mxu1  ;;  %v8456_v12 = vrot.slane %v8449_v32, %v27845_v34 }
 0x90d   :  { %v8597_v1 = vrot.slane %v8590_v4, %v27841_v15  ;;  %v19880_v23 = vld.sshfl [vmem:[#allocation4 + $0x2c] sm:$0x20 pattern:$0x75316420]  ;;  %v8786_v53 = vrot.slane %v8765_v56, %v27845_v34  ;;  %v9102_v33 = vrot.slane %v19876_v44, %v27841_v15  ;;  %v23692_v56 = vld [vmem:[%s31204_s7 + $0x128] ss:$16 sps:$4 sm:$0xff]  }
 0x90e   :  { %v8935_v47 = vrot.slane %v8928_v61, %v27841_v15  ;;  %v9267_v43 = vcombine.high %v19880_v23, %v19880_v23  ;;  %v20843_v58 = vpack.c.bf16 %v8255_v19, %v8255_v19  ;;  %v8256_v3 = vmax.f32 %v22606_v2, 0.0  ;;  %v23691_v32 = vld [vmem:[%s31204_s7 + $0x124] ss:$16 sps:$4 sm:$0xff]   ;;  %v23694_v2 = vld [vmem:[%s31204_s7 + $0x12c] ss:$16 sps:$4 sm:$0xff]  }
 0x90f   :  { %v8458_v36 = vunpack.c.l.b16 %v8456_v12  ;;  %v8618_v28 = vrot.slane %v8597_v1, %v27845_v34  ;;  %v8793_v61 = vrot.slane %v8786_v53, %v27845_v34  ;;  %v9103_v44 = vcombine.high %v9102_v33, %v9102_v33  ;;  %v19884_v19 = vld.sshfl [vmem:[#allocation4 + $0x30] sm:$0x1 pattern:$0x75316420]  ;;  %17372 = vmatprep.subr.bf16.mxu0 %v23691_v32  ;;  %17905 = vmatprep.subr.bf16.mxu1 %v23694_v2 }
 0x910   :  { %v8956_v4 = vrot.slane %v8935_v47, %v27845_v34  ;;  %v9274_v23 = vrot.slane %v9267_v43, %v27841_v15  ;;  %8306 = vst.msk [vmem:[#allocation4 + $0x38] sm:$0xf] %vm2602_vm7, %v20843_v58  ;;  %v20844_v12 = vpack.c.bf16 %v8256_v3, %v8256_v3  ;;  %v31283_v1 = vrot.slane %v27863_v29, 1  ;;  %17373 = vmatpush1.bf16.msra.mxu0 %v23689_v9 }
 0x911   :  { %v8625_v57 = vrot.slane %v8618_v28, %v27845_v34  ;;  %v9439_v53 = vrot.slane %v19884_v19, %v27841_v15  ;;  %v8226_v47 = vpop.f32.mrb[88].mxu1  ;;  %v8795_v43 = vunpack.c.l.b16 %v8793_v61  ;;  %v9124_v22 = vrot.slane %v9103_v44, %v27845_v34  ;;  %17906 = vmatpush1.bf16.msra.mxu1 %v23692_v56 }
 0x912   :  { %v8460_v50 = vsel %vm8377_vm0, %v8458_v36, %v31283_v1  ;;  %v8963_v26 = vrot.slane %v8956_v4, %v27845_v34  ;;  %8307 = vst.msk [vmem:[#allocation4 + $0x3c] sm:$0xf] %vm2602_vm7, %v20844_v12  ;;  %v22607_v29 = vadd.f32 %v28164_v10, %v8226_v47  ;;  %v22559_v3 = vpop.f32.mrb[89].mxu1  ;;  %v9275_v36 = vcombine.high %v9274_v23, %v9274_v23  ;;  %v23700_v47 = vld [vmem:[%s31204_s7 + $0x14c] ss:$16 sps:$4 sm:$0xff]  }
 0x913   :  { %v8461_v33 = vpack.c.b16 %v8460_v50, %v8460_v50  ;;  %v8627_v58 = vunpack.c.l.b16 %v8625_v57  ;;  %v9460_v28 = vrot.slane %v9439_v53, %v27845_v34  ;;  %v8229_v32 = vpop.f32.mrb[90].mxu1  ;;  %v31284_v61 = vrot.slane %v27867_v18, 1  ;;  %v19888_v3 = vld.sshfl [vmem:[#allocation4 + $0x30] sm:$0x20 pattern:$0x75316420]  ;;  %17907 = vmatprep.subr.bf16.mxu1 %v23700_v47 }
 0x914   :  { %v8965_v44 = vunpack.c.l.b16 %v8963_v26  ;;  %v9131_v9 = vrot.slane %v9124_v22, %v27845_v34  ;;  %v8257_v19 = vmax.f32 %v22607_v29, 0.0  ;;  %v22608_v2 = vadd.f32 %v28164_v10, %v8229_v32  ;;  %v22560_v12 = vpop.f32.mrb[91].mxu1  ;;  %v23695_v26 = vld [vmem:[%s31204_s7 + $0x140] ss:$16 sps:$4 sm:$0xff]   ;;  %v23697_v22 = vld [vmem:[%s31204_s7 + $0x144] ss:$16 sps:$4 sm:$0xff]  }
 0x915   :  { %v8468_v50 = vrot.slane %v8461_v33, %v27841_v15  ;;  %v8797_v4 = vsel %vm8377_vm0, %v8795_v43, %v31284_v61  ;;  %v8629_v57 = vsel %vm8377_vm0, %v8627_v58, %v27884_v39  ;;  %v31285_v58 = vrot.slane %v27874_v25, 1  ;;  %v19896_v25 = vld.sshfl [vmem:[#allocation4 + $0x34] sm:$0x10 pattern:$0x75316420]  ;;  %17374 = vmatprep.subr.bf16.mxu0 %v23697_v22 }
 0x916   :  { %v8798_v1 = vpack.c.b16 %v8797_v4, %v8797_v4  ;;  %v8630_v23 = vpack.c.b16 %v8629_v57, %v8629_v57  ;;  %v8967_v53 = vsel %vm8377_vm0, %v8965_v44, %v27888_v17  ;;  %v9133_v18 = vunpack.c.l.b16 %v9131_v9  ;;  %v19892_v4 = vld.sshfl [vmem:[#allocation4 + $0x34] sm:$0x1 pattern:$0x75316420]  ;;  %v23698_v44 = vld [vmem:[%s31204_s7 + $0x148] ss:$16 sps:$4 sm:$0xff]   ;;  %17375 = vmatpush1.bf16.msra.mxu0 %v23695_v26 }
 0x917   :  { %v8475_v56 = vrot.slane %v8468_v50, %v27841_v15  ;;  %v20845_v39 = vpack.c.bf16 %v8257_v19, %v8257_v19  ;;  %v8258_v33 = vmax.f32 %v22608_v2, 0.0  ;;  %v8968_v29 = vpack.c.b16 %v8967_v53, %v8967_v53  ;;  %v23701_v53 = vld [vmem:[%s31204_s7 + $0x160] ss:$16 sps:$4 sm:$0xff]   ;;  %17908 = vmatpush1.bf16.msra.mxu1 %v23698_v44 }
 0x918   :  { %v8805_v43 = vrot.slane %v8798_v1, %v27841_v15  ;;  %v8637_v17 = vrot.slane %v8630_v23, %v27841_v15  ;;  %v9135_v32 = vsel %vm8377_vm0, %v9133_v18, %v31285_v58  ;;  %v9296_v50 = vrot.slane %v9275_v36, %v27845_v34  ;;  %v23703_v36 = vld [vmem:[%s31204_s7 + $0x164] ss:$16 sps:$4 sm:$0xff]   ;;  %v19904_v44 = vld.sshfl [vmem:[#allocation4 + $0x38] sm:$0x10 pattern:$0x75316420] }
 0x919   :  { %8476 = vrot.lane.b32.xlu0 %v8475_v56, %s24876_s23  ;;  %v9467_v61 = vrot.slane %v9460_v28, %v27845_v34  ;;  %8308 = vst.msk [vmem:[#allocation4 + $0x40] sm:$0xf] %vm2602_vm7, %v20845_v39  ;;  %v20846_v9 = vpack.c.bf16 %v8258_v33, %v8258_v33  ;;  %v8975_v2 = vrot.slane %v8968_v29, %v27841_v15  ;;  %v8234_v28 = vpop.f32.mrb[92].mxu1  ;;  %v31286_v29 = vrot.slane %v27894_v62, 1 }
 0x91a   :  { %v8812_v19 = vrot.slane %v8805_v43, %v27841_v15  ;;  %v9136_v12 = vpack.c.b16 %v9135_v32, %v9135_v32  ;;  %v8644_v1 = vrot.slane %v8637_v17, %v27841_v15  ;;  %v9303_v57 = vrot.slane %v9296_v50, %v27845_v34  ;;  %v22563_v22 = vpop.f32.mrb[93].mxu1  ;;  %17376 = vmatprep.subr.bf16.mxu0 %v23703_v36 }
 0x91b   :  { %v9469_v56 = vunpack.c.l.b16 %v9467_v61  ;;  %v9603_v23 = vcombine.high %v19888_v3, %v19888_v3  ;;  %8309 = vst.msk [vmem:[#allocation4 + $0x44] sm:$0xf] %vm2602_vm7, %v20846_v9  ;;  %v22609_v18 = vadd.f32 %v28164_v10, %v8234_v28  ;;  %v8982_v39 = vrot.slane %v8975_v2, %v27841_v15  ;;  %v8237_v26 = vpop.f32.mrb[94].mxu1  ;;  %v8311_v2 = vld [vmem:[#allocation4 + $0x4c] sm:$0x1]  ;;  %17377 = vmatpush1.bf16.msra.mxu0 %v23701_v53 }
 0x91c   :  { %8813 = vrot.lane.b32.xlu1 %v8812_v19, %s24876_s23  ;;  %v9143_v33 = vrot.slane %v9136_v12, %v27841_v15  ;;  %v9775_v43 = vrot.slane %v19892_v4, %v27841_v15  ;;  %v9305_v47 = vunpack.c.l.b16 %v9303_v57  ;;  %v9936_v58 = vcombine.high %v19896_v25, %v19896_v25  ;;  %v22564_v61 = vpop.f32.mrb[95].mxu1  ;;  %v19900_v4 = vld.sshfl [vmem:[#allocation4 + $0x38] sm:$0x1 pattern:$0x75316420] }
 0x91d   :  { %8645 = vrot.lane.b32.xlu0 %v8644_v1, %s24876_s23  ;;  %v9471_v3 = vsel %vm8377_vm0, %v9469_v56, %v31286_v29  ;;  %v9610_v17 = vrot.slane %v9603_v23, %v27841_v15  ;;  %v8259_v32 = vmax.f32 %v22609_v18, 0.0  ;;  %v22610_v50 = vadd.f32 %v28164_v10, %v8237_v26  ;;  %v23704_v10 = vld [vmem:[%s31204_s7 + $0x168] ss:$16 sps:$4 sm:$0xff]   ;;  %v23706_v23 = vld [vmem:[%s31204_s7 + $0x16c] ss:$16 sps:$4 sm:$0xff]  }
 0x91e   :  { %v9150_v9 = vrot.slane %v9143_v33, %v27841_v15  ;;  %v9472_v19 = vpack.c.b16 %v9471_v3, %v9471_v3  ;;  %v31287_v12 = vrot.slane %v27892_v41, 1  ;;  %v9796_v1 = vrot.slane %v9775_v43, %v27845_v34  ;;  %v23707_v18 = vld [vmem:[%s31204_s7 + $0x180] ss:$16 sps:$4 sm:$0xff]   ;;  %v23709_v26 = vld [vmem:[%s31204_s7 + $0x184] ss:$16 sps:$4 sm:$0xff]   ;;  %17909 = vmatprep.subr.bf16.mxu1 %v23706_v23 }
 0x91f   :  { %v9611_v28 = vcombine.high %v9610_v17, %v9610_v17  ;;  %v9943_v25 = vrot.slane %v9936_v58, %v27841_v15  ;;  %v20847_v57 = vpack.c.bf16 %v8259_v32, %v8259_v32  ;;  %v8260_v56 = vmax.f32 %v22610_v50, 0.0  ;;  %v19908_v43 = vld.sshfl [vmem:[#allocation4 + $0x38] sm:$0x2 pattern:$0x75316420]  ;;  %17910 = vmatpush1.bf16.msra.mxu1 %v23704_v10  ;;  %17378 = vmatprep.subr.bf16.mxu0 %v23709_v26 }
 0x920   :  { %v9307_v62 = vsel %vm8377_vm0, %v9305_v47, %v31287_v12  ;;  %8983 = vrot.lane.b32.xlu1 %v8982_v39, %s24876_s23  ;;  %v9479_v41 = vrot.slane %v9472_v19, %v27841_v15  ;;  %v9803_v53 = vrot.slane %v9796_v1, %v27845_v34  ;;  %v10109_v39 = vrot.slane %v19900_v4, %v27841_v15  ;;  %v19912_v58 = vld.sshfl [vmem:[#allocation4 + $0x38] sm:$0x20 pattern:$0x75316420]  ;;  %v23710_v19 = vld [vmem:[%s31204_s7 + $0x188] ss:$16 sps:$4 sm:$0xff]  }
 0x921   :  { %v9308_v36 = vpack.c.b16 %v9307_v62, %v9307_v62  ;;  %9151 = vrot.lane.b32.xlu0 %v9150_v9, %s24876_s23  ;;  %v9632_v22 = vrot.slane %v9611_v28, %v27845_v34  ;;  %v9964_v33 = vrot.slane %v9943_v25, %v27845_v34  ;;  %8310 = vst.msk [vmem:[#allocation4 + $0x48] sm:$0xf] %vm2602_vm7, %v20847_v57  ;;  %v23712_v4 = vld [vmem:[%s31204_s7 + $0x18c] ss:$16 sps:$4 sm:$0xff]   ;;  %v31288_v57 = vrot.slane %v27913_v13, 1 }
 0x922   :  { %v20848_v47 = vpack.c.bf16 %v8260_v56, %v8260_v56  ;;  %v9486_v3 = vrot.slane %v9479_v41, %v27841_v15  ;;  %v10270_v17 = vcombine.high %v19904_v44, %v19904_v44  ;;  %v9805_v50 = vunpack.c.l.b16 %v9803_v53  ;;  %v19916_v25 = vld.sshfl [vmem:[#allocation4 + $0x3c] sm:$0x2 pattern:$0x75316420]  ;;  %17379 = vmatpush1.bf16.msra.mxu0 %v23707_v18  ;;  %v23713_v44 = vld [vmem:[%s31204_s7 + $0x1a0] ss:$16 sps:$4 sm:$0xff]   ;;  %17911 = vmatprep.subr.bf16.mxu1 %v23712_v4 }
 0x923   :  { %v9315_v29 = vrot.slane %v9308_v36, %v27841_v15  ;;  %v9639_v32 = vrot.slane %v9632_v22, %v27845_v34  ;;  %v9971_v61 = vrot.slane %v9964_v33, %v27845_v34  ;;  %v10130_v9 = vrot.slane %v10109_v39, %v27845_v34  ;;  %v23715_v36 = vld [vmem:[%s31204_s7 + $0x1a4] ss:$16 sps:$4 sm:$0xff]   ;;  %17912 = vmatpush1.bf16.msra.mxu1 %v23710_v19  ;;  %v23716_v26 = vld [vmem:[%s31204_s7 + $0x1a8] ss:$16 sps:$4 sm:$0xff]   ;;  %v23719_v19 = vld [vmem:[%s31204_s7 + $0x1c0] ss:$16 sps:$4 sm:$0xff]  }
 0x924   :  { %v8312_v12 = vsel %vm26304_vm13, %v20848_v47, %v8311_v2  ;;  %v10277_v28 = vrot.slane %v10270_v17, %v27841_v15  ;;  %v10444_v1 = vrot.slane %v19908_v43, %v27841_v15  ;;  %v9807_v38 = vsel %vm8377_vm0, %v9805_v50, %v31288_v57  ;;  %17380 = vmatprep.subr.bf16.mxu0 %v23715_v36  ;;  %v23718_v47 = vld [vmem:[%s31204_s7 + $0x1ac] ss:$16 sps:$4 sm:$0xff]   ;;  %v23721_v4 = vld [vmem:[%s31204_s7 + $0x1c4] ss:$16 sps:$4 sm:$0xff]  }
 0x925   :  { %v9322_v62 = vrot.slane %v9315_v29, %v27841_v15  ;;  %8313 = vst [vmem:[#allocation4 + $0x4c] sm:$0x1] %v8312_v12  ;;  %9487 = vrot.lane.b32.xlu0 %v9486_v3, %s24876_s23  ;;  %v9641_v10 = vunpack.c.l.b16 %v9639_v32  ;;  %v9973_v2 = vunpack.c.l.b16 %v9971_v61  ;;  %v10137_v56 = vrot.slane %v10130_v9, %v27845_v34  ;;  %17913 = vmatprep.subr.bf16.mxu1 %v23718_v47 }
 0x926   :  { %v9808_v41 = vpack.c.b16 %v9807_v38, %v9807_v38  ;;  %v10298_v23 = vrot.slane %v10277_v28, %v27845_v34  ;;  %v10445_v18 = vcombine.high %v10444_v1, %v10444_v1  ;;  %v10609_v22 = vcombine.high %v19912_v58, %v19912_v58  ;;  %17381 = vmatpush1.bf16.msra.mxu0 %v23713_v44  ;;  %v19924_v1 = vld.sshfl [vmem:[#allocation4 + $0x40] sm:$0x1 pattern:$0x75316420] }
 0x927   :  { %9323 = vrot.lane.b32.xlu1 %v9322_v62, %s24876_s23  ;;  %v31289_v53 = vrot.slane %v27927_v30, 1  ;;  %v9975_v33 = vsel %vm8377_vm0, %v9973_v2, %v27981_v35  ;;  %v10139_v39 = vunpack.c.l.b16 %v10137_v56  ;;  %v10784_v43 = vrot.slane %v19916_v25, %v27841_v15  ;;  %v19920_v35 = vld.sshfl [vmem:[#allocation4 + $0x3c] sm:$0x20 pattern:$0x75316420]  ;;  %17914 = vmatpush1.bf16.msra.mxu1 %v23716_v26 }
 0x928   :  { %v9815_v30 = vrot.slane %v9808_v41, %v27841_v15  ;;  %v9976_v3 = vpack.c.b16 %v9975_v33, %v9975_v33  ;;  %v10305_v17 = vrot.slane %v10298_v23, %v27845_v34  ;;  %v31290_v58 = vrot.slane %v27944_v11, 1  ;;  %17382 = vmatprep.subr.bf16.mxu0 %v23721_v4  ;;  %v23722_v38 = vld [vmem:[%s31204_s7 + $0x1c8] ss:$16 sps:$4 sm:$0xff]   ;;  %v23724_v2 = vld [vmem:[%s31204_s7 + $0x1cc] ss:$16 sps:$4 sm:$0xff]  }
 0x929   :  { %v9643_v13 = vsel %vm8377_vm0, %v9641_v10, %v31289_v53  ;;  %v10466_v50 = vrot.slane %v10445_v18, %v27845_v34  ;;  %v10616_v61 = vrot.slane %v10609_v22, %v27841_v15  ;;  %v10785_v9 = vcombine.high %v10784_v43, %v10784_v43  ;;  %17915 = vmatprep.subr.bf16.mxu1 %v23724_v2  ;;  %v23727_v43 = vld [vmem:[%s31204_s7 + $0x1e4] ss:$16 sps:$4 sm:$0xff]   ;;  %v19932_v2 = vld.sshfl [vmem:[#allocation4 + $0x44] sm:$0x1 pattern:$0x75316420] }
 0x92a   :  { %v9644_v29 = vpack.c.b16 %v9643_v13, %v9643_v13  ;;  %v10141_v32 = vsel %vm8377_vm0, %v10139_v39, %v31290_v58  ;;  %v9822_v11 = vrot.slane %v9815_v30, %v27841_v15  ;;  %v9983_v62 = vrot.slane %v9976_v3, %v27841_v15  ;;  %17383 = vmatpush1.bf16.msra.mxu0 %v23719_v19  ;;  %v23725_v39 = vld [vmem:[%s31204_s7 + $0x1e0] ss:$16 sps:$4 sm:$0xff]   ;;  %v19928_v30 = vld.sshfl [vmem:[#allocation4 + $0x40] sm:$0x20 pattern:$0x75316420] }
 0x92b   :  { %v10142_v28 = vpack.c.b16 %v10141_v32, %v10141_v32  ;;  %v10307_v25 = vunpack.c.l.b16 %v10305_v17  ;;  %v10473_v44 = vrot.slane %v10466_v50, %v27845_v34  ;;  %v10617_v10 = vcombine.high %v10616_v61, %v10616_v61  ;;  %17916 = vmatpush1.bf16.msra.mxu1 %v23722_v38  ;;  %v23728_v50 = vld [vmem:[%s31204_s7 + $0x1e8] ss:$16 sps:$4 sm:$0xff]   ;;  %v23730_v61 = vld [vmem:[%s31204_s7 + $0x1ec] ss:$16 sps:$4 sm:$0xff]   ;;  %17384 = vmatprep.subr.bf16.mxu0 %v23727_v43 }
 0x92c   :  { %v9651_v12 = vrot.slane %v9644_v29, %v27841_v15  ;;  %v10806_v57 = vrot.slane %v10785_v9, %v27845_v34  ;;  %v19954_v56 = vld.sshfl [vmem:[#allocation4 + $0x4c] sm:$0x1 pattern:$0x75316420]  ;;  %9823 = vrot.lane.b32.xlu0 %v9822_v11, %s24876_s23  ;;  %v9990_v41 = vrot.slane %v9983_v62, %v27841_v15  ;;  %v10949_v18 = vcombine.high %v19920_v35, %v19920_v35 }
 0x92d   :  { %v10149_v23 = vrot.slane %v10142_v28, %v27841_v15  ;;  %v12382_v22 = vrot.slane %v19954_v56, %v27841_v15  ;;  %v10309_v53 = vsel %vm8377_vm0, %v10307_v25, %v28004_v54  ;;  %v10475_v13 = vunpack.c.l.b16 %v10473_v44  ;;  %17917 = vmatprep.subr.bf16.mxu1 %v23730_v61 }
 0x92e   :  { %v9658_v36 = vrot.slane %v9651_v12, %v27841_v15  ;;  %v10638_v33 = vrot.slane %v10617_v10, %v27845_v34  ;;  %v10310_v47 = vpack.c.b16 %v10309_v53, %v10309_v53  ;;  %v10813_v54 = vrot.slane %v10806_v57, %v27845_v34  ;;  %17385 = vmatpush1.bf16.msra.mxu0 %v23725_v39 }
 0x92f   :  { %v10156_v26 = vrot.slane %v10149_v23, %v27841_v15  ;;  %v10956_v29 = vrot.slane %v10949_v18, %v27841_v15  ;;  %v12403_v3 = vrot.slane %v12382_v22, %v27845_v34  ;;  %v31291_v17 = vrot.slane %v27983_v45, 1  ;;  %17918 = vmatpush1.bf16.msra.mxu1 %v23728_v50 }
 0x930   :  { %9659 = vrot.lane.b32.xlu1 %v9658_v36, %s24876_s23  ;;  %v10645_v58 = vrot.slane %v10638_v33, %v27845_v34  ;;  %v11121_v32 = vrot.slane %v19924_v1, %v27841_v15  ;;  %v10317_v9 = vrot.slane %v10310_v47, %v27841_v15  ;;  %v10815_v19 = vunpack.c.l.b16 %v10813_v54  ;;  %v23733_v1 = vld [vmem:[%s31204_s7 + $0x204] ss:$16 sps:$4 sm:$0xff]  }
 0x931   :  { %v10477_v35 = vsel %vm8377_vm0, %v10475_v13, %v31291_v17  ;;  %10157 = vrot.lane.b32.xlu0 %v10156_v26, %s24876_s23  ;;  %v10957_v4 = vcombine.high %v10956_v29, %v10956_v29  ;;  %v12410_v12 = vrot.slane %v12403_v3, %v27845_v34  ;;  %v11283_v28 = vcombine.high %v19928_v30, %v19928_v30  ;;  %v19940_v17 = vld.sshfl [vmem:[#allocation4 + $0x44] sm:$0x2 pattern:$0x75316420] }
 0x932   :  { %v10478_v45 = vpack.c.b16 %v10477_v35, %v10477_v35  ;;  %v10647_v11 = vunpack.c.l.b16 %v10645_v58  ;;  %v11142_v62 = vrot.slane %v11121_v32, %v27845_v34  ;;  %v10324_v25 = vrot.slane %v10317_v9, %v27841_v15  ;;  %17395 = vmatprep.subr.bf16.mxu0 %v23733_v1  ;;  %v19944_v9 = vld.sshfl [vmem:[#allocation4 + $0x48] sm:$0x10 pattern:$0x75316420] }
 0x933   :  { %v31292_v10 = vrot.slane %v27987_v60, 1  ;;  %v10978_v38 = vrot.slane %v10957_v4, %v27845_v34  ;;  %v12412_v56 = vunpack.c.l.b16 %v12410_v12  ;;  %v31293_v36 = vrot.slane %v27985_v14, 1  ;;  %v23736_v60 = vld [vmem:[%s31204_s7 + $0x20c] ss:$16 sps:$4 sm:$0xff]  }
 0x934   :  { %9991 = vrot.lane.b32.xlu1 %v9990_v41, %s24876_s23  ;;  %v10485_v44 = vrot.slane %v10478_v45, %v27841_v15  ;;  %v11149_v22 = vrot.slane %v11142_v62, %v27845_v34  ;;  %v19936_v41 = vld.sshfl [vmem:[#allocation4 + $0x44] sm:$0x10 pattern:$0x75316420]  ;;  %v11290_v39 = vrot.slane %v11283_v28, %v27841_v15  ;;  %v11455_v47 = vrot.slane %v19932_v2, %v27841_v15 }
 0x935   :  { %v10817_v57 = vsel %vm8377_vm0, %v10815_v19, %v31292_v10  ;;  %v10649_v23 = vsel %vm8377_vm0, %v10647_v11, %v31293_v36  ;;  %v10985_v33 = vrot.slane %v10978_v38, %v27845_v34  ;;  %v12413_v14 = vrot.slane %v12412_v56, 7  ;;  %17928 = vmatprep.subr.bf16.mxu1 %v23736_v60  ;;  %v19948_v1 = vld.sshfl [vmem:[#allocation4 + $0x48] sm:$0x2 pattern:$0x75316420] }
 0x936   :  { %v10818_v18 = vpack.c.b16 %v10817_v57, %v10817_v57  ;;  %v10492_v53 = vrot.slane %v10485_v44, %v27841_v15  ;;  %v10650_v13 = vpack.c.b16 %v10649_v23, %v10649_v23  ;;  %v11151_v26 = vunpack.c.l.b16 %v11149_v22  ;;  %v19858_v23 = vld.sshfl [vmem:[#allocation4 + $0x28] sm:$0x1 pattern:$0x75316420] }
 0x937   :  { %v10987_v29 = vunpack.c.l.b16 %v10985_v33  ;;  %v11291_v30 = vcombine.high %v11290_v39, %v11290_v39  ;;  %v11616_v3 = vcombine.high %v19936_v41, %v19936_v41  ;;  %v28483_v35 = vsel %vm8377_vm0, %v12413_v14, %v28074_v55 }
 0x938   :  { %v10825_v43 = vrot.slane %v10818_v18, %v27841_v15  ;;  %10325 = vrot.lane.b32.xlu1 %v10324_v25, %s24876_s23  ;;  %10493 = vrot.lane.b32.xlu0 %v10492_v53, %s24876_s23  ;;  %v10657_v54 = vrot.slane %v10650_v13, %v27841_v15  ;;  %v31294_v32 = vrot.slane %v27994_v48, 1  ;;  %v11476_v61 = vrot.slane %v11455_v47, %v27845_v34  ;;  %v19952_v53 = vld.sshfl [vmem:[#allocation4 + $0x48] sm:$0x20 pattern:$0x75316420] }
 0x939   :  { %v12415_v45 = vpack.c.b16 %v28483_v35, %v28483_v35  ;;  %v31295_v4 = vrot.slane %v28022_v8, 1  ;;  %v11312_v62 = vrot.slane %v11291_v30, %v27845_v34  ;;  %v11623_v28 = vrot.slane %v11616_v3, %v27841_v15 }
 0x93a   :  { %v10832_v58 = vrot.slane %v10825_v43, %v27841_v15  ;;  %v11153_v50 = vsel %vm8377_vm0, %v11151_v26, %v31294_v32  ;;  %v10664_v19 = vrot.slane %v10657_v54, %v27841_v15  ;;  %v11483_v48 = vrot.slane %v11476_v61, %v27845_v34 }
 0x93b   :  { %v10989_v12 = vsel %vm8377_vm0, %v10987_v29, %v31295_v4  ;;  %v11154_v55 = vpack.c.b16 %v11153_v50, %v11153_v50  ;;  %v11790_v44 = vrot.slane %v19940_v17, %v27841_v15  ;;  %v11952_v8 = vcombine.high %v19944_v9, %v19944_v9 }
 0x93c   :  { %v10990_v11 = vpack.c.b16 %v10989_v12, %v10989_v12  ;;  %10665 = vrot.lane.b32.xlu1 %v10664_v19, %s24876_s23  ;;  %10833 = vrot.lane.b32.xlu0 %v10832_v58, %s24876_s23  ;;  %v31296_v10 = vrot.slane %v28218_v24, %v27845_v34  ;;  %v11319_v2 = vrot.slane %v11312_v62, %v27845_v34  ;;  %v11485_v56 = vunpack.c.l.b16 %v11483_v48  ;;  %v19866_v12 = vld.sshfl [vmem:[#allocation4 + $0x28] sm:$0x2 pattern:$0x75316420] }
 0x93d   :  { %v11161_v25 = vrot.slane %v11154_v55, %v27841_v15  ;;  %v11644_v36 = vrot.slane %v11623_v28, %v27845_v34  ;;  %v11791_v22 = vcombine.high %v11790_v44, %v11790_v44  ;;  %v11959_v41 = vrot.slane %v11952_v8, %v27841_v15 }
 0x93e   :  { %v28506_v57 = vunpack.c.l.b16 %v31296_v10  ;;  %v10997_v38 = vrot.slane %v10990_v11, %v27841_v15  ;;  %v12126_v60 = vrot.slane %v19948_v1, %v27841_v15  ;;  %v11321_v13 = vunpack.c.l.b16 %v11319_v2 }
 0x93f   :  { %v11168_v18 = vrot.slane %v11161_v25, %v27841_v15  ;;  %v31297_v33 = vrot.slane %v28032_v27, 1  ;;  %v11651_v14 = vrot.slane %v11644_v36, %v27845_v34  ;;  %v11812_v26 = vrot.slane %v11791_v22, %v27845_v34 }
 0x940   :  { %v11004_v24 = vrot.slane %v10997_v38, %v27841_v15  ;;  %v11980_v47 = vrot.slane %v11959_v41, %v27845_v34  ;;  %v12127_v54 = vcombine.high %v12126_v60, %v12126_v60  ;;  %v31298_v29 = vrot.slane %v28030_v37, 1 }
 0x941   :  { %v11487_v39 = vsel %vm8377_vm0, %v11485_v56, %v31297_v33  ;;  %11169 = vrot.lane.b32.xlu0 %v11168_v18, %s24876_s23  ;;  %v11653_v3 = vunpack.c.l.b16 %v11651_v14  ;;  %v12291_v27 = vcombine.high %v19952_v53, %v19952_v53  ;;  %v8345_v17 = vrot.slane %v19858_v23, %v27841_v15  ;;  %v19862_v56 = vld.sshfl [vmem:[#allocation4 + $0x28] sm:$0x10 pattern:$0x75316420] }
 0x942   :  { %v11488_v43 = vpack.c.b16 %v11487_v39, %v11487_v39  ;;  %11005 = vrot.lane.b32.xlu1 %v11004_v24, %s24876_s23  ;;  %v11323_v30 = vsel %vm8377_vm0, %v11321_v13, %v31298_v29  ;;  %v11819_v50 = vrot.slane %v11812_v26, %v27845_v34  ;;  %v11987_v61 = vrot.slane %v11980_v47, %v27845_v34 }
 0x943   :  { %v11324_v58 = vpack.c.b16 %v11323_v30, %v11323_v30  ;;  %v11655_v9 = vsel %vm8377_vm0, %v11653_v3, %v28083_v5  ;;  %v12148_v19 = vrot.slane %v12127_v54, %v27845_v34  ;;  %v12298_v37 = vrot.slane %v12291_v27, %v27841_v15 }
 0x944   :  { %v11495_v32 = vrot.slane %v11488_v43, %v27841_v15  ;;  %v8366_v4 = vrot.slane %v8345_v17, %v27845_v34  ;;  %v11656_v62 = vpack.c.b16 %v11655_v9, %v11655_v9  ;;  %v11821_v48 = vunpack.c.l.b16 %v11819_v50  ;;  %v19874_v17 = vld.sshfl [vmem:[#allocation4 + $0x2c] sm:$0x2 pattern:$0x75316420] }
 0x945   :  { %v11331_v55 = vrot.slane %v11324_v58, %v27841_v15  ;;  %v11989_v28 = vunpack.c.l.b16 %v11987_v61  ;;  %v12155_v1 = vrot.slane %v12148_v19, %v27845_v34  ;;  %v12299_v25 = vcombine.high %v12298_v37, %v12298_v37  ;;  %v19878_v61 = vld.sshfl [vmem:[#allocation4 + $0x2c] sm:$0x20 pattern:$0x75316420] }
 0x946   :  { %v11502_v11 = vrot.slane %v11495_v32, %v27841_v15  ;;  %v8373_v44 = vrot.slane %v8366_v4, %v27845_v34  ;;  %v11663_v8 = vrot.slane %v11656_v62, %v27841_v15  ;;  %v31299_v10 = vrot.slane %v28076_v59, 1  ;;  %v19870_v59 = vld.sshfl [vmem:[#allocation4 + $0x28] sm:$0x20 pattern:$0x75316420] }
 0x947   :  { %v11338_v5 = vrot.slane %v11331_v55, %v27841_v15  ;;  %v8681_v2 = vrot.slane %v19866_v12, %v27841_v15  ;;  %v11991_v23 = vsel %vm8377_vm0, %v11989_v28, %v28104_v46  ;;  %v12157_v18 = vunpack.c.l.b16 %v12155_v1  ;;  %v19882_v55 = vld.sshfl [vmem:[#allocation4 + $0x30] sm:$0x1 pattern:$0x75316420] }
 0x948   :  { %11503 = vrot.lane.b32.xlu0 %v11502_v11, %s24876_s23  ;;  %v11823_v38 = vsel %vm8377_vm0, %v11821_v48, %v31299_v10  ;;  %v12320_v22 = vrot.slane %v12299_v25, %v27845_v34  ;;  %v11670_v41 = vrot.slane %v11663_v8, %v27841_v15  ;;  %v11992_v60 = vpack.c.b16 %v11991_v23, %v11991_v23 }
 0x949   :  { %v11824_v36 = vpack.c.b16 %v11823_v38, %v11823_v38  ;;  %11339 = vrot.lane.b32.xlu1 %v11338_v5, %s24876_s23  ;;  %v8375_v53 = vunpack.c.l.b16 %v8373_v44  ;;  %v8682_v24 = vcombine.high %v8681_v2, %v8681_v2  ;;  %v31300_v33 = vrot.slane %v28106_v31, 1  ;;  %v19886_v38 = vld.sshfl [vmem:[#allocation4 + $0x30] sm:$0x20 pattern:$0x75316420] }
 0x94a   :  { %v12327_v14 = vrot.slane %v12320_v22, %v27845_v34  ;;  %v8507_v46 = vcombine.high %v19862_v56, %v19862_v56  ;;  %v11999_v43 = vrot.slane %v11992_v60, %v27841_v15  ;;  %v8844_v27 = vcombine.high %v19870_v59, %v19870_v59 }
 0x94b   :  { %v11831_v13 = vrot.slane %v11824_v36, %v27841_v15  ;;  %v12159_v39 = vsel %vm8377_vm0, %v12157_v18, %v31300_v33  ;;  %v8376_v47 = vrot.slane %v8375_v53, 7  ;;  %v8703_v54 = vrot.slane %v8682_v24, %v27845_v34  ;;  %v19890_v18 = vld.sshfl [vmem:[#allocation4 + $0x34] sm:$0x1 pattern:$0x75316420] }
 0x94c   :  { %v12160_v26 = vpack.c.b16 %v12159_v39, %v12159_v39  ;;  %v12329_v30 = vunpack.c.l.b16 %v12327_v14  ;;  %v8514_v3 = vrot.slane %v8507_v46, %v27841_v15  ;;  %v12006_v31 = vrot.slane %v11999_v43, %v27841_v15 }
 0x94d   :  { %v11838_v29 = vrot.slane %v11831_v13, %v27841_v15  ;;  %11671 = vrot.lane.b32.xlu1 %v11670_v41, %s24876_s23  ;;  %v8378_v32 = vsel %vm8377_vm0, %v8376_v47, %v28120_v63  ;;  %v8710_v50 = vrot.slane %v8703_v54, %v27845_v34  ;;  %v31301_v9 = vrot.slane %v28112_v52, 1 }
 0x94e   :  { %v12167_v58 = vrot.slane %v12160_v26, %v27841_v15  ;;  %v8379_v37 = vpack.c.b16 %v8378_v32, %v8378_v32  ;;  %v8535_v4 = vrot.slane %v8514_v3, %v27845_v34  ;;  %v8851_v12 = vrot.slane %v8844_v27, %v27841_v15 }
 0x94f   :  { %11839 = vrot.lane.b32.xlu0 %v11838_v29, %s24876_s23  ;;  %v12331_v19 = vsel %vm8377_vm0, %v12329_v30, %v31301_v9  ;;  %v8712_v48 = vunpack.c.l.b16 %v8710_v50  ;;  %v9019_v63 = vrot.slane %v19874_v17, %v27841_v15  ;;  %v9182_v52 = vcombine.high %v19878_v61, %v19878_v61 }
 0x950   :  { %v12174_v11 = vrot.slane %v12167_v58, %v27841_v15  ;;  %v12332_v62 = vpack.c.b16 %v12331_v19, %v12331_v19  ;;  %v8386_v28 = vrot.slane %v8379_v37, %v27841_v15  ;;  %v8542_v1 = vrot.slane %v8535_v4, %v27845_v34 }
 0x951   :  { %v8852_v25 = vcombine.high %v8851_v12, %v8851_v12  ;;  %12007 = vrot.lane.b32.xlu1 %v12006_v31, %s24876_s23  ;;  %v8713_v5 = vrot.slane %v8712_v48, 7  ;;  %v9020_v8 = vcombine.high %v9019_v63, %v9019_v63  ;;  %v9358_v10 = vrot.slane %v19882_v55, %v27841_v15  ;;  %v19894_v31 = vld.sshfl [vmem:[#allocation4 + $0x34] sm:$0x10 pattern:$0x75316420] }
 0x952   :  { %v12339_v44 = vrot.slane %v12332_v62, %v27841_v15  ;;  %v8393_v2 = vrot.slane %v8386_v28, %v27841_v15  ;;  %v8544_v56 = vunpack.c.l.b16 %v8542_v1  ;;  %v9189_v23 = vrot.slane %v9182_v52, %v27841_v15  ;;  %v19898_v62 = vld.sshfl [vmem:[#allocation4 + $0x34] sm:$0x2 pattern:$0x75316420] }
 0x953   :  { %12175 = vrot.lane.b32.xlu0 %v12174_v11, %s24876_s23  ;;  %v8873_v36 = vrot.slane %v8852_v25, %v27845_v34  ;;  %v8714_v41 = vsel %vm8377_vm0, %v8713_v5, %v28136_v51  ;;  %v9041_v60 = vrot.slane %v9020_v8, %v27845_v34  ;;  %v9379_v53 = vrot.slane %v9358_v10, %v27845_v34 }
 0x954   :  { %v12346_v22 = vrot.slane %v12339_v44, %v27841_v15  ;;  %8396 = vst.msk [vmem:[#allocation5] sm:$0x1] %vm2615_vm10, %v8393_v2  ;;  %v8715_v24 = vpack.c.b16 %v8714_v41, %v8714_v41  ;;  %v8545_v59 = vrot.slane %v8544_v56, 7  ;;  %v9190_v33 = vcombine.high %v9189_v23, %v9189_v23 }
 0x955   :  { %v8880_v13 = vrot.slane %v8873_v36, %v27845_v34  ;;  %v9048_v39 = vrot.slane %v9041_v60, %v27845_v34  ;;  %v9386_v14 = vrot.slane %v9379_v53, %v27845_v34  ;;  %v9518_v46 = vcombine.high %v19886_v38, %v19886_v38  ;;  %v19902_v36 = vld.sshfl [vmem:[#allocation4 + $0x38] sm:$0x10 pattern:$0x75316420] }
 0x956   :  { %12347 = vrot.lane.b32.xlu1 %v12346_v22, %s24876_s23  ;;  %v9694_v51 = vrot.slane %v19890_v18, %v27841_v15  ;;  %v8722_v43 = vrot.slane %v8715_v24, %v27841_v15  ;;  %v31302_v26 = vunpack.c.l.b16 %v28124_v16  ;;  %v9211_v29 = vrot.slane %v9190_v33, %v27845_v34  ;;  %v19906_v60 = vld.sshfl [vmem:[#allocation4 + $0x38] sm:$0x2 pattern:$0x75316420] }
 0x957   :  { %v8882_v54 = vunpack.c.l.b16 %v8880_v13  ;;  %v9050_v3 = vunpack.c.l.b16 %v9048_v39  ;;  %v9388_v27 = vunpack.c.l.b16 %v9386_v14  ;;  %v9525_v17 = vrot.slane %v9518_v46, %v27841_v15  ;;  %v19910_v33 = vld.sshfl [vmem:[#allocation4 + $0x38] sm:$0x20 pattern:$0x75316420]  ;;  %v31303_v39 = vld [vmem:[#allocation12_spill] sm:$0xff] }
 0x958   :  { %v8546_v47 = vsel %vm8377_vm0, %v8545_v59, %v31302_v26  ;;  %v8729_v58 = vrot.slane %v8722_v43, %v27841_v15  ;;  %v9218_v50 = vrot.slane %v9211_v29, %v27845_v34  ;;  %v9715_v61 = vrot.slane %v9694_v51, %v27845_v34 }
 0x959   :  { %v8547_v30 = vpack.c.b16 %v8546_v47, %v8546_v47  ;;  %v8883_v32 = vrot.slane %v8882_v54, 7  ;;  %v9051_v9 = vrot.slane %v9050_v3, 7  ;;  %v9389_v19 = vrot.slane %v9388_v27, 7 }
 0x95a   :  { %v9526_v37 = vcombine.high %v9525_v17, %v9525_v17  ;;  %8731 = vst.msk [vmem:[#allocation5 + $0x2] sm:$0x1] %vm2615_vm10, %v8729_v58  ;;  %v9220_v12 = vunpack.c.l.b16 %v9218_v50  ;;  %v9722_v55 = vrot.slane %v9715_v61, %v27845_v34  ;;  %v9853_v11 = vcombine.high %v19894_v31, %v19894_v31  ;;  %v19914_v17 = vld.sshfl [vmem:[#allocation4 + $0x3c] sm:$0x2 pattern:$0x75316420] }
 0x95b   :  { %v8554_v16 = vrot.slane %v8547_v30, %v27841_v15  ;;  %v8884_v4 = vsel %vm8377_vm0, %v8883_v32, %v28139_v40  ;;  %v9052_v28 = vsel %vm8377_vm0, %v9051_v9, %v28142_v6  ;;  %v9390_v1 = vsel %vm8377_vm0, %v9389_v19, %v28154_v20  ;;  %v31304_v31 = vld [vmem:[#allocation11_spill] sm:$0xff] }
 0x95c   :  { %v8885_v63 = vpack.c.b16 %v8884_v4, %v8884_v4  ;;  %v9053_v25 = vpack.c.b16 %v9052_v28, %v9052_v28  ;;  %v9221_v52 = vrot.slane %v9220_v12, 7  ;;  %v9391_v44 = vpack.c.b16 %v9390_v1, %v9390_v1 }
 0x95d   :  { %v8561_v48 = vrot.slane %v8554_v16, %v27841_v15  ;;  %v9547_v5 = vrot.slane %v9526_v37, %v27845_v34  ;;  %v9724_v8 = vunpack.c.l.b16 %v9722_v55  ;;  %v9860_v10 = vrot.slane %v9853_v11, %v27841_v15 }
 0x95e   :  { %v8892_v40 = vrot.slane %v8885_v63, %v27841_v15  ;;  %v10027_v38 = vrot.slane %v19898_v62, %v27841_v15  ;;  %v9060_v2 = vrot.slane %v9053_v25, %v27841_v15  ;;  %v9222_v6 = vsel %vm8377_vm0, %v9221_v52, %v28149_v49  ;;  %v19918_v62 = vld.sshfl [vmem:[#allocation4 + $0x3c] sm:$0x20 pattern:$0x75316420]  ;;  %v31305_v63 = vld [vmem:[#allocation10_spill] sm:$0xff] }
 0x95f   :  { %8563 = vst.msk [vmem:[#allocation5 + $0x1] sm:$0x1] %vm2615_vm10, %v8561_v48  ;;  %v9398_v20 = vrot.slane %v9391_v44, %v27841_v15  ;;  %v9554_v56 = vrot.slane %v9547_v5, %v27845_v34  ;;  %v9223_v18 = vpack.c.b16 %v9222_v6, %v9222_v6  ;;  %v9725_v22 = vrot.slane %v9724_v8, 7 }
 0x960   :  { %v8899_v23 = vrot.slane %v8892_v40, %v27841_v15  ;;  %v9881_v41 = vrot.slane %v9860_v10, %v27845_v34  ;;  %v9067_v53 = vrot.slane %v9060_v2, %v27841_v15  ;;  %v10028_v13 = vcombine.high %v10027_v38, %v10027_v38 }
 0x961   :  { %v9405_v24 = vrot.slane %v9398_v20, %v27841_v15  ;;  %v9556_v59 = vunpack.c.l.b16 %v9554_v56  ;;  %v9230_v49 = vrot.slane %v9223_v18, %v27841_v15  ;;  %v9726_v14 = vsel %vm8377_vm0, %v9725_v22, %v31303_v39  ;;  %v19922_v20 = vld.sshfl [vmem:[#allocation4 + $0x40] sm:$0x1 pattern:$0x75316420] }
 0x962   :  { %8901 = vst.msk [vmem:[#allocation5 + $0x3] sm:$0x1] %vm2615_vm10, %v8899_v23  ;;  %v9888_v46 = vrot.slane %v9881_v41, %v27845_v34  ;;  %v10187_v51 = vcombine.high %v19902_v36, %v19902_v36  ;;  %9069 = vst.msk [vmem:[#allocation5 + $0x4] sm:$0x1] %vm2615_vm10, %v9067_v53  ;;  %v9727_v26 = vpack.c.b16 %v9726_v14, %v9726_v14  ;;  %v31306_v28 = vunpack.c.l.b16 %v31305_v63 }
 0x963   :  { %9407 = vst.msk [vmem:[#allocation5 + $0x6] sm:$0x1] %vm2615_vm10, %v9405_v24  ;;  %v9557_v43 = vrot.slane %v9556_v59, 7  ;;  %v10049_v47 = vrot.slane %v10028_v13, %v27845_v34  ;;  %v10361_v54 = vrot.slane %v19906_v60, %v27841_v15  ;;  %v9237_v29 = vrot.slane %v9230_v49, %v27841_v15 }
 0x964   :  { %v9890_v30 = vunpack.c.l.b16 %v9888_v46  ;;  %v10194_v3 = vrot.slane %v10187_v51, %v27841_v15  ;;  %v10524_v27 = vcombine.high %v19910_v33, %v19910_v33  ;;  %v9734_v32 = vrot.slane %v9727_v26, %v27841_v15  ;;  %v19926_v51 = vld.sshfl [vmem:[#allocation4 + $0x40] sm:$0x10 pattern:$0x75316420] }
 0x965   :  { %v9558_v58 = vsel %vm8377_vm0, %v9557_v43, %v31304_v31  ;;  %v10056_v50 = vrot.slane %v10049_v47, %v27845_v34  ;;  %v10362_v61 = vcombine.high %v10361_v54, %v10361_v54  ;;  %9239 = vst.msk [vmem:[#allocation5 + $0x5] sm:$0x1] %vm2615_vm10, %v9237_v29  ;;  %v10701_v11 = vrot.slane %v19914_v17, %v27841_v15  ;;  %v19930_v29 = vld.sshfl [vmem:[#allocation4 + $0x44] sm:$0x1 pattern:$0x75316420] }
 0x966   :  { %v9559_v16 = vpack.c.b16 %v9558_v58, %v9558_v58  ;;  %v9891_v9 = vrot.slane %v9890_v30, 7  ;;  %v10215_v19 = vrot.slane %v10194_v3, %v27845_v34  ;;  %v10531_v37 = vrot.slane %v10524_v27, %v27841_v15 }
 0x967   :  { %v9741_v4 = vrot.slane %v9734_v32, %v27841_v15  ;;  %v10058_v12 = vunpack.c.l.b16 %v10056_v50  ;;  %v10383_v55 = vrot.slane %v10362_v61, %v27845_v34  ;;  %v10702_v8 = vcombine.high %v10701_v11, %v10701_v11  ;;  %v19938_v11 = vld.sshfl [vmem:[#allocation4 + $0x44] sm:$0x2 pattern:$0x75316420] }
 0x968   :  { %v9566_v48 = vrot.slane %v9559_v16, %v27841_v15  ;;  %v9892_v1 = vsel %vm8377_vm0, %v9891_v9, %v31306_v28  ;;  %v10222_v25 = vrot.slane %v10215_v19, %v27845_v34  ;;  %v10532_v52 = vcombine.high %v10531_v37, %v10531_v37  ;;  %v19934_v9 = vld.sshfl [vmem:[#allocation4 + $0x44] sm:$0x10 pattern:$0x75316420] }
 0x969   :  { %9743 = vst.msk [vmem:[#allocation5 + $0x8] sm:$0x1] %vm2615_vm10, %v9741_v4  ;;  %v9893_v44 = vpack.c.b16 %v9892_v1, %v9892_v1  ;;  %v10059_v5 = vrot.slane %v10058_v12, 7  ;;  %v10390_v40 = vrot.slane %v10383_v55, %v27845_v34  ;;  %v10864_v6 = vcombine.high %v19918_v62, %v19918_v62  ;;  %v31308_v4 = vld [vmem:[#allocation16_spill] sm:$0xff] }
 0x96a   :  { %v9573_v10 = vrot.slane %v9566_v48, %v27841_v15  ;;  %v10224_v38 = vunpack.c.l.b16 %v10222_v25  ;;  %v10553_v2 = vrot.slane %v10532_v52, %v27845_v34  ;;  %v10723_v18 = vrot.slane %v10702_v8, %v27845_v34 }
 0x96b   :  { %v9900_v56 = vrot.slane %v9893_v44, %v27841_v15  ;;  %v10060_v36 = vsel %vm8377_vm0, %v10059_v5, %v28185_v21  ;;  %v10392_v23 = vunpack.c.l.b16 %v10390_v40  ;;  %v10871_v53 = vrot.slane %v10864_v6, %v27841_v15 }
 0x96c   :  { %9575 = vst.msk [vmem:[#allocation5 + $0x7] sm:$0x1] %vm2615_vm10, %v9573_v10  ;;  %v10061_v22 = vpack.c.b16 %v10060_v36, %v10060_v36  ;;  %v10225_v41 = vrot.slane %v10224_v38, 7  ;;  %v10560_v60 = vrot.slane %v10553_v2, %v27845_v34  ;;  %v10730_v13 = vrot.slane %v10723_v18, %v27845_v34  ;;  %v31309_v2 = vld [vmem:[#allocation18_spill] sm:$0xff]  ;;  %v31310_v18 = vld [vmem:[#allocation17_spill] sm:$0xff] }
 0x96d   :  { %v9907_v24 = vrot.slane %v9900_v56, %v27841_v15  ;;  %v10393_v59 = vrot.slane %v10392_v23, 7  ;;  %v11040_v33 = vrot.slane %v19922_v20, %v27841_v15  ;;  %v31307_v49 = vunpack.c.l.b16 %v28170_v42  ;;  %v19942_v10 = vld.sshfl [vmem:[#allocation4 + $0x48] sm:$0x10 pattern:$0x75316420] }
 0x96e   :  { %v10068_v21 = vrot.slane %v10061_v22, %v27841_v15  ;;  %v10562_v14 = vunpack.c.l.b16 %v10560_v60  ;;  %v10872_v46 = vcombine.high %v10871_v53, %v10871_v53  ;;  %v10732_v47 = vunpack.c.l.b16 %v10730_v13  ;;  %v19946_v36 = vld.sshfl [vmem:[#allocation4 + $0x48] sm:$0x2 pattern:$0x75316420] }
 0x96f   :  { %v10226_v39 = vsel %vm8377_vm0, %v10225_v41, %v31307_v49  ;;  %9909 = vst.msk [vmem:[#allocation5 + $0x9] sm:$0x1] %vm2615_vm10, %v9907_v24  ;;  %v10394_v26 = vsel %vm8377_vm0, %v10393_v59, %v28206_v0  ;;  %v11061_v54 = vrot.slane %v11040_v33, %v27845_v34  ;;  %v11199_v32 = vcombine.high %v19926_v51, %v19926_v51 }
 0x970   :  { %v10227_v43 = vpack.c.b16 %v10226_v39, %v10226_v39  ;;  %v10075_v30 = vrot.slane %v10068_v21, %v27841_v15  ;;  %v10395_v3 = vpack.c.b16 %v10394_v26, %v10394_v26  ;;  %v10563_v27 = vrot.slane %v10562_v14, 7 }
 0x971   :  { %v10893_v42 = vrot.slane %v10872_v46, %v27845_v34  ;;  %v10733_v31 = vrot.slane %v10732_v47, 7  ;;  %v11068_v58 = vrot.slane %v11061_v54, %v27845_v34  ;;  %v11374_v16 = vrot.slane %v19930_v29, %v27841_v15 }
 0x972   :  { %v10234_v17 = vrot.slane %v10227_v43, %v27841_v15  ;;  %10077 = vst.msk [vmem:[#allocation5 + $0xa] sm:$0x1] %vm2615_vm10, %v10075_v30  ;;  %v10402_v0 = vrot.slane %v10395_v3, %v27841_v15  ;;  %v10564_v50 = vsel %vm8377_vm0, %v10563_v27, %v28215_v7  ;;  %v11206_v28 = vrot.slane %v11199_v32, %v27841_v15  ;;  %v19950_v30 = vld.sshfl [vmem:[#allocation4 + $0x48] sm:$0x20 pattern:$0x75316420] }
 0x973   :  { %v10900_v61 = vrot.slane %v10893_v42, %v27845_v34  ;;  %v10565_v37 = vpack.c.b16 %v10564_v50, %v10564_v50  ;;  %v10734_v12 = vsel %vm8377_vm0, %v10733_v31, %v31308_v4  ;;  %v11070_v55 = vunpack.c.l.b16 %v11068_v58  ;;  %v31311_v27 = vld [vmem:[#allocation19_spill] sm:$0xff]  ;;  %v31312_v58 = vld [vmem:[#allocation13_spill] sm:$0xff] }
 0x974   :  { %v10241_v19 = vrot.slane %v10234_v17, %v27841_v15  ;;  %v10409_v62 = vrot.slane %v10402_v0, %v27841_v15  ;;  %v10735_v48 = vpack.c.b16 %v10734_v12, %v10734_v12  ;;  %v11395_v25 = vrot.slane %v11374_v16, %v27845_v34 }
 0x975   :  { %v10902_v63 = vunpack.c.l.b16 %v10900_v61  ;;  %v10572_v7 = vrot.slane %v10565_v37, %v27841_v15  ;;  %v11071_v1 = vrot.slane %v11070_v55, 7  ;;  %v11533_v52 = vcombine.high %v19934_v9, %v19934_v9 }
 0x976   :  { %10243 = vst.msk [vmem:[#allocation5 + $0xb] sm:$0x1] %vm2615_vm10, %v10241_v19  ;;  %10411 = vst.msk [vmem:[#allocation5 + $0xc] sm:$0x1] %vm2615_vm10, %v10409_v62  ;;  %v10742_v44 = vrot.slane %v10735_v48, %v27841_v15  ;;  %v11227_v40 = vrot.slane %v11206_v28, %v27845_v34  ;;  %v11707_v8 = vrot.slane %v19938_v11, %v27841_v15  ;;  %v31313_v32 = vunpack.c.l.b16 %v31312_v58 }
 0x977   :  { %v10903_v5 = vrot.slane %v10902_v63, 7  ;;  %v10579_v38 = vrot.slane %v10572_v7, %v27841_v15  ;;  %v11072_v6 = vsel %vm8377_vm0, %v11071_v1, %v31309_v2  ;;  %v11402_v20 = vrot.slane %v11395_v25, %v27845_v34  ;;  %v31314_v63 = vld [vmem:[#allocation14_spill] sm:$0xff] }
 0x978   :  { %v11540_v56 = vrot.slane %v11533_v52, %v27841_v15  ;;  %v10749_v23 = vrot.slane %v10742_v44, %v27841_v15  ;;  %v11073_v41 = vpack.c.b16 %v11072_v6, %v11072_v6  ;;  %v11234_v60 = vrot.slane %v11227_v40, %v27845_v34 }
 0x979   :  { %v10904_v22 = vsel %vm8377_vm0, %v10903_v5, %v31310_v18  ;;  %10581 = vst.msk [vmem:[#allocation5 + $0xd] sm:$0x1] %vm2615_vm10, %v10579_v38  ;;  %v11404_v24 = vunpack.c.l.b16 %v11402_v20  ;;  %v11708_v13 = vcombine.high %v11707_v8, %v11707_v8  ;;  %v11869_v49 = vcombine.high %v19942_v10, %v19942_v10  ;;  %v31316_v10 = vld [vmem:[#allocation20_spill] sm:$0xff] }
 0x97a   :  { %v10905_v53 = vpack.c.b16 %v10904_v22, %v10904_v22  ;;  %v11561_v59 = vrot.slane %v11540_v56, %v27845_v34  ;;  %10751 = vst.msk [vmem:[#allocation5 + $0xe] sm:$0x1] %vm2615_vm10, %v10749_v23  ;;  %v11080_v33 = vrot.slane %v11073_v41, %v27841_v15  ;;  %v11236_v21 = vunpack.c.l.b16 %v11234_v60  ;;  %v31317_v22 = vld [vmem:[#allocation15_spill] sm:$0xff] }
 0x97b   :  { %v12043_v39 = vrot.slane %v19946_v36, %v27841_v15  ;;  %v11405_v46 = vrot.slane %v11404_v24, 7  ;;  %v11729_v43 = vrot.slane %v11708_v13, %v27845_v34  ;;  %v11876_v54 = vrot.slane %v11869_v49, %v27841_v15  ;;  %v31319_v13 = vld [vmem:[#allocation21_spill] sm:$0xff] }
 0x97c   :  { %v10912_v14 = vrot.slane %v10905_v53, %v27841_v15  ;;  %v11568_v51 = vrot.slane %v11561_v59, %v27845_v34  ;;  %v11087_v26 = vrot.slane %v11080_v33, %v27841_v15  ;;  %v11237_v47 = vrot.slane %v11236_v21, 7 }
 0x97d   :  { %v12044_v29 = vcombine.high %v12043_v39, %v12043_v39  ;;  %v11406_v42 = vsel %vm8377_vm0, %v11405_v46, %v31311_v27  ;;  %v11736_v31 = vrot.slane %v11729_v43, %v27845_v34  ;;  %v11897_v61 = vrot.slane %v11876_v54, %v27845_v34 }
 0x97e   :  { %v10919_v3 = vrot.slane %v10912_v14, %v27841_v15  ;;  %v11570_v17 = vunpack.c.l.b16 %v11568_v51  ;;  %11089 = vst.msk [vmem:[#allocation5 + $0x10] sm:$0x1] %vm2615_vm10, %v11087_v26  ;;  %v11238_v0 = vsel %vm8377_vm0, %v11237_v47, %v31313_v32  ;;  %v11407_v50 = vpack.c.b16 %v11406_v42, %v11406_v42 }
 0x97f   :  { %v12065_v16 = vrot.slane %v12044_v29, %v27845_v34  ;;  %v11239_v9 = vpack.c.b16 %v11238_v0, %v11238_v0  ;;  %v11738_v37 = vunpack.c.l.b16 %v11736_v31  ;;  %v12206_v4 = vcombine.high %v19950_v30, %v19950_v30 }
 0x980   :  { %10921 = vst.msk [vmem:[#allocation5 + $0xf] sm:$0x1] %vm2615_vm10, %v10919_v3  ;;  %v11571_v19 = vrot.slane %v11570_v17, 7  ;;  %v11414_v12 = vrot.slane %v11407_v50, %v27841_v15  ;;  %v11904_v55 = vrot.slane %v11897_v61, %v27845_v34  ;;  %v12422_v62 = vrot.slane %v12415_v45, %v27841_v15 }
 0x981   :  { %v12072_v11 = vrot.slane %v12065_v16, %v27845_v34  ;;  %v11246_v48 = vrot.slane %v11239_v9, %v27841_v15  ;;  %v31315_v28 = vunpack.c.l.b16 %v31314_v63  ;;  %v11739_v1 = vrot.slane %v11738_v37, 7 }
 0x982   :  { %v12213_v25 = vrot.slane %v12206_v4, %v27841_v15  ;;  %v11421_v52 = vrot.slane %v11414_v12, %v27841_v15  ;;  %v11906_v5 = vunpack.c.l.b16 %v11904_v55  ;;  %v12429_v38 = vrot.slane %v12422_v62, %v27841_v15  ;;  %v23731_v62 = vld [vmem:[%s31204_s7 + $0x200] ss:$16 sps:$4 sm:$0xff]  }
 0x983   :  { %v11572_v7 = vsel %vm8377_vm0, %v11571_v19, %v31315_v28  ;;  %v12074_v40 = vunpack.c.l.b16 %v12072_v11  ;;  %v11253_v8 = vrot.slane %v11246_v48, %v27841_v15  ;;  %v11740_v35 = vsel %vm8377_vm0, %v11739_v1, %v31316_v10  ;;  %v23734_v48 = vld [vmem:[%s31204_s7 + $0x208] ss:$16 sps:$4 sm:$0xff]   ;;  %v23742_v1 = vld [vmem:[%s31204_s7 + $0x22c] ss:$16 sps:$4 sm:$0xff]   ;;  %v23743_v10 = vld [vmem:[%s31204_s7 + $0x240] ss:$16 sps:$4 sm:$0xff]  }
 0x984   :  { %v11573_v44 = vpack.c.b16 %v11572_v7, %v11572_v7  ;;  %v12214_v45 = vcombine.high %v12213_v25, %v12213_v25  ;;  %11423 = vst.msk [vmem:[#allocation5 + $0x12] sm:$0x1] %vm2615_vm10, %v11421_v52  ;;  %v11741_v6 = vpack.c.b16 %v11740_v35, %v11740_v35  ;;  %v11907_v20 = vrot.slane %v11906_v5, 7  ;;  %12431 = vst.msk [vmem:[#allocation5 + $0x18] sm:$0x1] %vm2615_vm10, %v12429_v38 }
 0x985   :  { %v12075_v56 = vrot.slane %v12074_v40, 7  ;;  %11255 = vst.msk [vmem:[#allocation5 + $0x11] sm:$0x1] %vm2615_vm10, %v11253_v8  ;;  %v31318_v41 = vunpack.c.l.b16 %v31317_v22  ;;  %v12228_v33 = vrot.slane %v31319_v13, %v27845_v34  ;;  %v23739_v7 = vld [vmem:[%s31204_s7 + $0x224] ss:$16 sps:$4 sm:$0xff]  }
 0x986   :  { %v11580_v2 = vrot.slane %v11573_v44, %v27841_v15  ;;  %v12235_v36 = vrot.slane %v12214_v45, %v27845_v34  ;;  %v11748_v18 = vrot.slane %v11741_v6, %v27841_v15  ;;  %v23737_v44 = vld [vmem:[%s31204_s7 + $0x220] ss:$16 sps:$4 sm:$0xff]   ;;  %v23740_v5 = vld [vmem:[%s31204_s7 + $0x228] ss:$16 sps:$4 sm:$0xff]   ;;  %v23745_v40 = vld [vmem:[%s31204_s7 + $0x244] ss:$16 sps:$4 sm:$0xff]  }
 0x987   :  { %v11908_v60 = vsel %vm8377_vm0, %v11907_v20, %v31318_v41  ;;  %v12076_v53 = vsel %vm8377_vm0, %v12075_v56, %v28506_v57  ;;  %v12243_v43 = vunpack.c.l.b16 %v12228_v33  ;;  %v23748_v8 = vld [vmem:[%s31204_s7 + $0x24c] ss:$16 sps:$4 sm:$0xff]   ;;  %v23746_v35 = vld [vmem:[%s31204_s7 + $0x248] ss:$16 sps:$4 sm:$0xff]   ;;  %v23751_v38 = vld [vmem:[%s31204_s7 + $0x264] ss:$16 sps:$4 sm:$0xff]  }
 0x988   :  { %v11587_v23 = vrot.slane %v11580_v2, %v27841_v15  ;;  %v11909_v24 = vpack.c.b16 %v11908_v60, %v11908_v60  ;;  %v12077_v59 = vpack.c.b16 %v12076_v53, %v12076_v53  ;;  %v12242_v21 = vrot.slane %v12235_v36, %v27845_v34  ;;  %v23754_v2 = vld [vmem:[%s31204_s7 + $0x26c] ss:$16 sps:$4 sm:$0xff]   ;;  %v23749_v20 = vld [vmem:[%s31204_s7 + $0x260] ss:$16 sps:$4 sm:$0xff]   ;;  %v23752_v56 = vld [vmem:[%s31204_s7 + $0x268] ss:$16 sps:$4 sm:$0xff]  }
 0x989   :  { %v11755_v49 = vrot.slane %v11748_v18, %v27841_v15  ;;  %v23757_v36 = vld [vmem:[%s31204_s7 + $0x284] ss:$16 sps:$4 sm:$0xff]   ;;  %v23755_v41 = vld [vmem:[%s31204_s7 + $0x280] ss:$16 sps:$4 sm:$0xff]   ;;  %v23758_v60 = vld [vmem:[%s31204_s7 + $0x288] ss:$16 sps:$4 sm:$0xff]  }
 0x98a   :  { %11589 = vst.msk [vmem:[#allocation5 + $0x13] sm:$0x1] %vm2615_vm10, %v11587_v23  ;;  %v11916_v39 = vrot.slane %v11909_v24, %v27841_v15  ;;  %v12084_v14 = vrot.slane %v12077_v59, %v27841_v15  ;;  %v12244_v46 = vunpack.c.l.b16 %v12242_v21  ;;  %v23760_v23 = vld [vmem:[%s31204_s7 + $0x28c] ss:$16 sps:$4 sm:$0xff]   ;;  %v23763_v53 = vld [vmem:[%s31204_s7 + $0x2a4] ss:$16 sps:$4 sm:$0xff]  }
 0x98b   :  { %11757 = vst.msk [vmem:[#allocation5 + $0x14] sm:$0x1] %vm2615_vm10, %v11755_v49  ;;  %v8477_v54 = vpop.permute.xlu0 %8476  ;;  %v23766_v24 = vld [vmem:[%s31204_s7 + $0x2ac] ss:$16 sps:$4 sm:$0xff]   ;;  %v23761_v33 = vld [vmem:[%s31204_s7 + $0x2a0] ss:$16 sps:$4 sm:$0xff]  }
 0x98c   :  { %v11923_v57 = vrot.slane %v11916_v39, %v27841_v15  ;;  %v12091_v51 = vrot.slane %v12084_v14, %v27841_v15  ;;  %v12245_v26 = vrot.slane %v12244_v46, 7  ;;  %8480 = vst.msk [vmem:[#allocation5] sm:$0x1] %vm8479_vm1, %v8477_v54  ;;  %v23764_v21 = vld [vmem:[%s31204_s7 + $0x2a8] ss:$16 sps:$4 sm:$0xff]  }
 0x98d   :  { %v23769_v49 = vld [vmem:[%s31204_s7 + $0x2c4] ss:$16 sps:$4 sm:$0xff]   ;;  %v23772_v39 = vld [vmem:[%s31204_s7 + $0x2cc] ss:$16 sps:$4 sm:$0xff]   ;;  %v23767_v46 = vld [vmem:[%s31204_s7 + $0x2c0] ss:$16 sps:$4 sm:$0xff]  }
 0x98e   :  { %11925 = vst.msk [vmem:[#allocation5 + $0x15] sm:$0x1] %vm2615_vm10, %v11923_v57  ;;  %12093 = vst.msk [vmem:[#allocation5 + $0x16] sm:$0x1] %vm2615_vm10, %v12091_v51  ;;  %v12246_v34 = vsel %vm8377_vm0, %v12245_v26, %v12243_v43  ;;  %v8814_v30 = vpop.permute.xlu1 %8813  ;;  %v23770_v57 = vld [vmem:[%s31204_s7 + $0x2c8] ss:$16 sps:$4 sm:$0xff]  }
 0x98f   :  { %v12247_v47 = vpack.c.b16 %v12246_v34, %v12246_v34  ;;  %8816 = vst.msk [vmem:[#allocation5 + $0x2] sm:$0x1] %vm8479_vm1, %v8814_v30  ;;  %v8646_v27 = vpop.permute.xlu0 %8645  ;;  %v23775_v51 = vld [vmem:[%s31204_s7 + $0x2e4] ss:$16 sps:$4 sm:$0xff]   ;;  %v23778_v43 = vld [vmem:[%s31204_s7 + $0x2ec] ss:$16 sps:$4 sm:$0xff]  }
 0x990   :  { %8648 = vst.msk [vmem:[#allocation5 + $0x1] sm:$0x1] %vm8479_vm1, %v8646_v27  ;;  %v23773_v26 = vld [vmem:[%s31204_s7 + $0x2e0] ss:$16 sps:$4 sm:$0xff]   ;;  %v23776_v34 = vld [vmem:[%s31204_s7 + $0x2e8] ss:$16 sps:$4 sm:$0xff]  }
 0x991   :  { %v12254_v29 = vrot.slane %v12247_v47, %v27841_v15  ;;  %v23781_v47 = vld [vmem:[%s31204_s7 + $0x304] ss:$16 sps:$4 sm:$0xff]   ;;  %v23784_v54 = vld [vmem:[%s31204_s7 + $0x30c] ss:$16 sps:$4 sm:$0xff]   ;;  %v23782_v30 = vld [vmem:[%s31204_s7 + $0x308] ss:$16 sps:$4 sm:$0xff]  }
 0x992   :  { %v8984_v42 = vpop.permute.xlu1 %8983  ;;  %v23790_v27 = vld [vmem:[%s31204_s7 + $0x32c] ss:$16 sps:$4 sm:$0xff]  }
 0x993   :  { %v12261_v3 = vrot.slane %v12254_v29, %v27841_v15  ;;  %8986 = vst.msk [vmem:[#allocation5 + $0x3] sm:$0x1] %vm8479_vm1, %v8984_v42  ;;  %v9152_v17 = vpop.permute.xlu0 %9151  ;;  %v23779_v29 = vld [vmem:[%s31204_s7 + $0x300] ss:$16 sps:$4 sm:$0xff]  }
 0x994   :  { %9154 = vst.msk [vmem:[#allocation5 + $0x4] sm:$0x1] %vm8479_vm1, %v9152_v17  ;;  %v23785_v42 = vld [vmem:[%s31204_s7 + $0x320] ss:$16 sps:$4 sm:$0xff]   ;;  %v23788_v17 = vld [vmem:[%s31204_s7 + $0x328] ss:$16 sps:$4 sm:$0xff]  }
 0x995   :  { %12263 = vst.msk [vmem:[#allocation5 + $0x17] sm:$0x1] %vm2615_vm10, %v12261_v3  ;;  %v23787_v3 = vld [vmem:[%s31204_s7 + $0x324] ss:$16 sps:$4 sm:$0xff]  }
 0x997   :  { %v9488_v31 = vpop.permute.xlu0 %9487 }
 0x998   :  { %9490 = vst.msk [vmem:[#allocation5 + $0x6] sm:$0x1] %vm8479_vm1, %v9488_v31  ;;  %v23793_v31 = vld [vmem:[%s31204_s7 + $0x344] ss:$16 sps:$4 sm:$0xff]  }
 0x999   :  { %v9324_v58 = vpop.permute.xlu1 %9323 }
 0x99a   :  { %9326 = vst.msk [vmem:[#allocation5 + $0x5] sm:$0x1] %vm8479_vm1, %v9324_v58  ;;  %v23796_v58 = vld [vmem:[%s31204_s7 + $0x34c] ss:$16 sps:$4 sm:$0xff]  }
 0x99e   :  { %v9824_v32 = vpop.permute.xlu0 %9823 }
 0x99f   :  { %9826 = vst.msk [vmem:[#allocation5 + $0x8] sm:$0x1] %vm8479_vm1, %v9824_v32  ;;  %v23791_v32 = vld [vmem:[%s31204_s7 + $0x340] ss:$16 sps:$4 sm:$0xff]  }
 0x9a2   :  { %v9660_v0 = vpop.permute.xlu1 %9659 }
 0x9a3   :  { %9662 = vst.msk [vmem:[#allocation5 + $0x7] sm:$0x1] %vm8479_vm1, %v9660_v0  ;;  %v10158_v50 = vpop.permute.xlu0 %10157  ;;  %v23794_v0 = vld [vmem:[%s31204_s7 + $0x348] ss:$16 sps:$4 sm:$0xff]  }
 0x9a4   :  { %10160 = vst.msk [vmem:[#allocation5 + $0xa] sm:$0x1] %vm8479_vm1, %v10158_v50  ;;  %v23799_v50 = vld [vmem:[%s31204_s7 + $0x364] ss:$16 sps:$4 sm:$0xff]  }
 0x9a6   :  { %v9992_v61 = vpop.permute.xlu1 %9991 }
 0x9a7   :  { %9994 = vst.msk [vmem:[#allocation5 + $0x9] sm:$0x1] %vm8479_vm1, %v9992_v61  ;;  %v23802_v61 = vld [vmem:[%s31204_s7 + $0x36c] ss:$16 sps:$4 sm:$0xff]  }
 0x9aa   :  { %v10326_v16 = vpop.permute.xlu1 %10325  ;;  %v10494_v9 = vpop.permute.xlu0 %10493  ;;  %v28783_v19 = vld [vmem:[#allocation5] sm:$0xff] }
 0x9ab   :  { %10328 = vst.msk [vmem:[#allocation5 + $0xb] sm:$0x1] %vm8479_vm1, %v10326_v16  ;;  %10496 = vst.msk [vmem:[#allocation5 + $0xc] sm:$0x1] %vm8479_vm1, %v10494_v9  ;;  %v13253_v37 = vrot.slane %v28783_v19, %v27841_v15  ;;  %v23797_v16 = vld [vmem:[%s31204_s7 + $0x360] ss:$16 sps:$4 sm:$0xff]  }
 0x9ac   :  { %v23800_v9 = vld [vmem:[%s31204_s7 + $0x368] ss:$16 sps:$4 sm:$0xff]  }
 0x9ad   :  { %v13261_v4 = vcombine.high %v13253_v37, %v13253_v37  ;;  %v28799_v63 = vrot.slane %v13253_v37, %v27841_v15  ;;  %v23805_v37 = vld [vmem:[%s31204_s7 + $0x384] ss:$16 sps:$4 sm:$0xff]  }
 0x9ae   :  { %v10666_v12 = vpop.permute.xlu1 %10665  ;;  %v10834_v55 = vpop.permute.xlu0 %10833 }
 0x9af   :  { %10668 = vst.msk [vmem:[#allocation5 + $0xd] sm:$0x1] %vm8479_vm1, %v10666_v12  ;;  %10836 = vst.msk [vmem:[#allocation5 + $0xe] sm:$0x1] %vm8479_vm1, %v10834_v55  ;;  %v13283_v11 = vrot.slane %v13261_v4, %v27841_v15  ;;  %v23808_v4 = vld [vmem:[%s31204_s7 + $0x38c] ss:$16 sps:$4 sm:$0xff]  }
 0x9b0   :  { %v23803_v12 = vld [vmem:[%s31204_s7 + $0x380] ss:$16 sps:$4 sm:$0xff]   ;;  %v23806_v55 = vld [vmem:[%s31204_s7 + $0x388] ss:$16 sps:$4 sm:$0xff]  }
 0x9b1   :  { %17386 = vmatprep.mubr.bf16.mxu0 %v13283_v11  ;;  %17919 = vmatprep.mubr.bf16.mxu1 %v13283_v11  ;;  %v13293_v28 = vcombine.high %v13283_v11, %v13283_v11  ;;  %v23811_v11 = vld [vmem:[%s31204_s7 + $0x3a4] ss:$16 sps:$4 sm:$0xff]  }
 0x9b2   :  { %17387 = vmatmul.mubr.bf16.vlgmr.msra.gmra.mrb[224].mxu0 %v28799_v63  ;;  %17920 = vmatmul.mubr.bf16.vlgmr.msra.gmra.mrb[96].mxu1 %v28799_v63 }
 0x9b3   :  { %v11170_v25 = vpop.permute.xlu0 %11169  ;;  %17396 = vmatpush1.bf16.msra.mxu0 %v23731_v62  ;;  %17929 = vmatpush1.bf16.msra.mxu1 %v23734_v48  ;;  %v23814_v62 = vld [vmem:[%s31204_s7 + $0x3ac] ss:$16 sps:$4 sm:$0xff]   ;;  %v23809_v48 = vld [vmem:[%s31204_s7 + $0x3a0] ss:$16 sps:$4 sm:$0xff]  }
 0x9b4   :  { %v11006_v52 = vpop.permute.xlu1 %11005  ;;  %11172 = vst.msk [vmem:[#allocation5 + $0x10] sm:$0x1] %vm8479_vm1, %v11170_v25  ;;  %17427 = vmatprep.mubr.bf16.mxu0 %v13293_v28  ;;  %17960 = vmatprep.mubr.bf16.mxu1 %v13293_v28  ;;  %v23812_v28 = vld [vmem:[%s31204_s7 + $0x3a8] ss:$16 sps:$4 sm:$0xff]   ;;  %v13246_v25 = vcombine.high %v28783_v19, %v28783_v19  ;;  %v23826_v19 = vld [vmem:[%s31204_s7 + $0x3ec] ss:$16 sps:$4 sm:$0xff]  }
 0x9b5   :  { %11008 = vst.msk [vmem:[#allocation5 + $0xf] sm:$0x1] %vm8479_vm1, %v11006_v52  ;;  %17397 = vmatprep.subr.bf16.mxu0 %v23739_v7  ;;  %17930 = vmatprep.subr.bf16.mxu1 %v23742_v1  ;;  %v23817_v7 = vld [vmem:[%s31204_s7 + $0x3c4] ss:$16 sps:$4 sm:$0xff]   ;;  %v23820_v1 = vld [vmem:[%s31204_s7 + $0x3cc] ss:$16 sps:$4 sm:$0xff]  }
 0x9b6   :  { %v23815_v52 = vld [vmem:[%s31204_s7 + $0x3c0] ss:$16 sps:$4 sm:$0xff]  }
 0x9b7   :  { %17398 = vmatpush1.bf16.msra.mxu0 %v23737_v44  ;;  %17931 = vmatpush1.bf16.msra.mxu1 %v23740_v5  ;;  %v23818_v44 = vld [vmem:[%s31204_s7 + $0x3c8] ss:$16 sps:$4 sm:$0xff]   ;;  %v23823_v5 = vld [vmem:[%s31204_s7 + $0x3e4] ss:$16 sps:$4 sm:$0xff]  }
 0x9b8   :  { %17399 = vmatprep.subr.bf16.mxu0 %v23745_v40  ;;  %17932 = vmatprep.subr.bf16.mxu1 %v23748_v8  ;;  %v28989_v40 = vrot.slane %v13246_v25, %v27841_v15  ;;  %v23821_v8 = vld [vmem:[%s31204_s7 + $0x3e0] ss:$16 sps:$4 sm:$0xff]   ;;  %v23907_v25 = vld [vmem:[%s31204_s7 + $0x5a4] ss:$16 sps:$4 sm:$0xff]  }
 0x9ba   :  { %v11504_v45 = vpop.permute.xlu0 %11503 }
 0x9bb   :  { %11506 = vst.msk [vmem:[#allocation5 + $0x12] sm:$0x1] %vm8479_vm1, %v11504_v45  ;;  %v11340_v6 = vpop.permute.xlu1 %11339  ;;  %17400 = vmatpush1.bf16.msra.mxu0 %v23743_v10  ;;  %17933 = vmatpush1.bf16.msra.mxu1 %v23746_v35  ;;  %v23824_v10 = vld [vmem:[%s31204_s7 + $0x3e8] ss:$16 sps:$4 sm:$0xff]   ;;  %v23829_v35 = vld [vmem:[%s31204_s7 + $0x404] ss:$16 sps:$4 sm:$0xff]  }
 0x9bc   :  { %11342 = vst.msk [vmem:[#allocation5 + $0x11] sm:$0x1] %vm8479_vm1, %v11340_v6  ;;  %17401 = vmatprep.subr.bf16.mxu0 %v23751_v38  ;;  %17934 = vmatprep.subr.bf16.mxu1 %v23754_v2  ;;  %v23832_v45 = vld [vmem:[%s31204_s7 + $0x40c] ss:$16 sps:$4 sm:$0xff]   ;;  %v13262_v38 = vcombine.high %v28989_v40, %v28989_v40  ;;  %v23827_v2 = vld [vmem:[%s31204_s7 + $0x400] ss:$16 sps:$4 sm:$0xff]   ;;  %v13291_v6 = vcombine.high %v28799_v63, %v28799_v63 }
 0x9bd   :  { %v23833_v63 = vld [vmem:[%s31204_s7 + $0x420] ss:$16 sps:$4 sm:$0xff]  }
 0x9bf   :  { %v11672_v18 = vpop.permute.xlu1 %11671  ;;  %17402 = vmatpush1.bf16.msra.mxu0 %v23749_v20  ;;  %17935 = vmatpush1.bf16.msra.mxu1 %v23752_v56  ;;  %v23830_v20 = vld [vmem:[%s31204_s7 + $0x408] ss:$16 sps:$4 sm:$0xff]   ;;  %v29014_v56 = vrot.slane %v13262_v38, %v27841_v15  ;;  %v23922_v38 = vld [vmem:[%s31204_s7 + $0x5ec] ss:$16 sps:$4 sm:$0xff]  }
 0x9c0   :  { %11674 = vst.msk [vmem:[#allocation5 + $0x13] sm:$0x1] %vm8479_vm1, %v11672_v18  ;;  %17403 = vmatprep.subr.bf16.mxu0 %v23757_v36  ;;  %17936 = vmatprep.subr.bf16.mxu1 %v23760_v23  ;;  %v23835_v36 = vld [vmem:[%s31204_s7 + $0x424] ss:$16 sps:$4 sm:$0xff]   ;;  %v23838_v23 = vld [vmem:[%s31204_s7 + $0x42c] ss:$16 sps:$4 sm:$0xff]  }
 0x9c1   :  { %v11840_v22 = vpop.permute.xlu0 %11839  ;;  %v23836_v18 = vld [vmem:[%s31204_s7 + $0x428] ss:$16 sps:$4 sm:$0xff]  }
 0x9c2   :  { %11842 = vst.msk [vmem:[#allocation5 + $0x14] sm:$0x1] %vm8479_vm1, %v11840_v22  ;;  %v23841_v22 = vld [vmem:[%s31204_s7 + $0x444] ss:$16 sps:$4 sm:$0xff]  }
 0x9c3   :  { %v12008_v59 = vpop.permute.xlu1 %12007  ;;  %17404 = vmatpush1.bf16.msra.mxu0 %v23755_v41  ;;  %17937 = vmatpush1.bf16.msra.mxu1 %v23758_v60  ;;  %v23844_v41 = vld [vmem:[%s31204_s7 + $0x44c] ss:$16 sps:$4 sm:$0xff]   ;;  %v23839_v60 = vld [vmem:[%s31204_s7 + $0x440] ss:$16 sps:$4 sm:$0xff]  }
 0x9c4   :  { %12010 = vst.msk [vmem:[#allocation5 + $0x15] sm:$0x1] %vm8479_vm1, %v12008_v59  ;;  %17405 = vmatprep.subr.bf16.mxu0 %v23763_v53  ;;  %17938 = vmatprep.subr.bf16.mxu1 %v23766_v24  ;;  %v23842_v53 = vld [vmem:[%s31204_s7 + $0x448] ss:$16 sps:$4 sm:$0xff]   ;;  %v23847_v24 = vld [vmem:[%s31204_s7 + $0x464] ss:$16 sps:$4 sm:$0xff]  }
 0x9c5   :  { %v12176_v13 = vpop.permute.xlu0 %12175  ;;  %v23850_v59 = vld [vmem:[%s31204_s7 + $0x46c] ss:$16 sps:$4 sm:$0xff]  }
 0x9c6   :  { %12178 = vst.msk [vmem:[#allocation5 + $0x16] sm:$0x1] %vm8479_vm1, %v12176_v13  ;;  %v23845_v13 = vld [vmem:[%s31204_s7 + $0x460] ss:$16 sps:$4 sm:$0xff]  }
 0x9c7   :  { %17406 = vmatpush1.bf16.msra.mxu0 %v23761_v33  ;;  %17939 = vmatpush1.bf16.msra.mxu1 %v23764_v21  ;;  %v23848_v33 = vld [vmem:[%s31204_s7 + $0x468] ss:$16 sps:$4 sm:$0xff]   ;;  %v23853_v21 = vld [vmem:[%s31204_s7 + $0x484] ss:$16 sps:$4 sm:$0xff]  }
 0x9c8   :  { %v12348_v14 = vpop.permute.xlu1 %12347  ;;  %17407 = vmatprep.subr.bf16.mxu0 %v23769_v49  ;;  %17940 = vmatprep.subr.bf16.mxu1 %v23772_v39  ;;  %v23856_v49 = vld [vmem:[%s31204_s7 + $0x48c] ss:$16 sps:$4 sm:$0xff]   ;;  %v23851_v39 = vld [vmem:[%s31204_s7 + $0x480] ss:$16 sps:$4 sm:$0xff]  }
 0x9c9   :  { %12350 = vst.msk [vmem:[#allocation5 + $0x17] sm:$0x1] %vm8479_vm1, %v12348_v14  ;;  %v23854_v14 = vld [vmem:[%s31204_s7 + $0x488] ss:$16 sps:$4 sm:$0xff]  }
 0x9cb   :  { %17408 = vmatpush1.bf16.msra.mxu0 %v23767_v46  ;;  %17941 = vmatpush1.bf16.msra.mxu1 %v23770_v57  ;;  %v23859_v46 = vld [vmem:[%s31204_s7 + $0x4a4] ss:$16 sps:$4 sm:$0xff]   ;;  %v23862_v57 = vld [vmem:[%s31204_s7 + $0x4ac] ss:$16 sps:$4 sm:$0xff]  }
 0x9cc   :  { %17409 = vmatprep.subr.bf16.mxu0 %v23775_v51  ;;  %17942 = vmatprep.subr.bf16.mxu1 %v23778_v43  ;;  %v23857_v51 = vld [vmem:[%s31204_s7 + $0x4a0] ss:$16 sps:$4 sm:$0xff]   ;;  %v23860_v43 = vld [vmem:[%s31204_s7 + $0x4a8] ss:$16 sps:$4 sm:$0xff]  }
 0x9cf   :  { %17410 = vmatpush1.bf16.msra.mxu0 %v23773_v26  ;;  %17943 = vmatpush1.bf16.msra.mxu1 %v23776_v34  ;;  %v23865_v26 = vld [vmem:[%s31204_s7 + $0x4c4] ss:$16 sps:$4 sm:$0xff]   ;;  %v23868_v34 = vld [vmem:[%s31204_s7 + $0x4cc] ss:$16 sps:$4 sm:$0xff]  }
 0x9d0   :  { %17411 = vmatprep.subr.bf16.mxu0 %v23781_v47  ;;  %17944 = vmatprep.subr.bf16.mxu1 %v23784_v54  ;;  %v23863_v47 = vld [vmem:[%s31204_s7 + $0x4c0] ss:$16 sps:$4 sm:$0xff]   ;;  %v23866_v54 = vld [vmem:[%s31204_s7 + $0x4c8] ss:$16 sps:$4 sm:$0xff]  }
 0x9d3   :  { %17412 = vmatpush1.bf16.msra.mxu0 %v23779_v29  ;;  %17945 = vmatpush1.bf16.msra.mxu1 %v23782_v30  ;;  %v23871_v29 = vld [vmem:[%s31204_s7 + $0x4e4] ss:$16 sps:$4 sm:$0xff]   ;;  %v23874_v30 = vld [vmem:[%s31204_s7 + $0x4ec] ss:$16 sps:$4 sm:$0xff]  }
 0x9d4   :  { %17413 = vmatprep.subr.bf16.mxu0 %v23787_v3  ;;  %17946 = vmatprep.subr.bf16.mxu1 %v23790_v27  ;;  %v23869_v3 = vld [vmem:[%s31204_s7 + $0x4e0] ss:$16 sps:$4 sm:$0xff]   ;;  %v23872_v27 = vld [vmem:[%s31204_s7 + $0x4e8] ss:$16 sps:$4 sm:$0xff]  }
 0x9d7   :  { %17414 = vmatpush1.bf16.msra.mxu0 %v23785_v42  ;;  %17947 = vmatpush1.bf16.msra.mxu1 %v23788_v17  ;;  %v23877_v42 = vld [vmem:[%s31204_s7 + $0x504] ss:$16 sps:$4 sm:$0xff]   ;;  %v23880_v17 = vld [vmem:[%s31204_s7 + $0x50c] ss:$16 sps:$4 sm:$0xff]  }
 0x9d8   :  { %17415 = vmatprep.subr.bf16.mxu0 %v23793_v31  ;;  %17948 = vmatprep.subr.bf16.mxu1 %v23796_v58  ;;  %v23875_v31 = vld [vmem:[%s31204_s7 + $0x500] ss:$16 sps:$4 sm:$0xff]   ;;  %v23878_v58 = vld [vmem:[%s31204_s7 + $0x508] ss:$16 sps:$4 sm:$0xff]  }
 0x9db   :  { %17416 = vmatpush1.bf16.msra.mxu0 %v23791_v32  ;;  %17949 = vmatpush1.bf16.msra.mxu1 %v23794_v0  ;;  %v23883_v32 = vld [vmem:[%s31204_s7 + $0x524] ss:$16 sps:$4 sm:$0xff]   ;;  %v23886_v0 = vld [vmem:[%s31204_s7 + $0x52c] ss:$16 sps:$4 sm:$0xff]  }
 0x9dc   :  { %17417 = vmatprep.subr.bf16.mxu0 %v23799_v50  ;;  %17950 = vmatprep.subr.bf16.mxu1 %v23802_v61  ;;  %v23881_v50 = vld [vmem:[%s31204_s7 + $0x520] ss:$16 sps:$4 sm:$0xff]   ;;  %v23884_v61 = vld [vmem:[%s31204_s7 + $0x528] ss:$16 sps:$4 sm:$0xff]  }
 0x9df   :  { %17418 = vmatpush1.bf16.msra.mxu0 %v23797_v16  ;;  %17951 = vmatpush1.bf16.msra.mxu1 %v23800_v9  ;;  %v23889_v16 = vld [vmem:[%s31204_s7 + $0x544] ss:$16 sps:$4 sm:$0xff]   ;;  %v23892_v9 = vld [vmem:[%s31204_s7 + $0x54c] ss:$16 sps:$4 sm:$0xff]  }
 0x9e0   :  { %17419 = vmatprep.subr.bf16.mxu0 %v23805_v37  ;;  %17952 = vmatprep.subr.bf16.mxu1 %v23808_v4  ;;  %v23887_v37 = vld [vmem:[%s31204_s7 + $0x540] ss:$16 sps:$4 sm:$0xff]   ;;  %v23890_v4 = vld [vmem:[%s31204_s7 + $0x548] ss:$16 sps:$4 sm:$0xff]  }
 0x9e3   :  { %17420 = vmatpush1.bf16.msra.mxu0 %v23803_v12  ;;  %17953 = vmatpush1.bf16.msra.mxu1 %v23806_v55  ;;  %v23895_v12 = vld [vmem:[%s31204_s7 + $0x564] ss:$16 sps:$4 sm:$0xff]   ;;  %v23898_v55 = vld [vmem:[%s31204_s7 + $0x56c] ss:$16 sps:$4 sm:$0xff]  }
 0x9e4   :  { %17421 = vmatprep.subr.bf16.mxu0 %v23811_v11  ;;  %17954 = vmatprep.subr.bf16.mxu1 %v23814_v62  ;;  %v23893_v11 = vld [vmem:[%s31204_s7 + $0x560] ss:$16 sps:$4 sm:$0xff]   ;;  %v23896_v62 = vld [vmem:[%s31204_s7 + $0x568] ss:$16 sps:$4 sm:$0xff]  }
 0x9e7   :  { %17422 = vmatpush1.bf16.msra.mxu0 %v23809_v48  ;;  %17955 = vmatpush1.bf16.msra.mxu1 %v23812_v28  ;;  %v23901_v48 = vld [vmem:[%s31204_s7 + $0x584] ss:$16 sps:$4 sm:$0xff]   ;;  %v23904_v28 = vld [vmem:[%s31204_s7 + $0x58c] ss:$16 sps:$4 sm:$0xff]  }
 0x9e8   :  { %17423 = vmatprep.subr.bf16.mxu0 %v23817_v7  ;;  %17956 = vmatprep.subr.bf16.mxu1 %v23820_v1  ;;  %v23899_v7 = vld [vmem:[%s31204_s7 + $0x580] ss:$16 sps:$4 sm:$0xff]   ;;  %v23902_v1 = vld [vmem:[%s31204_s7 + $0x588] ss:$16 sps:$4 sm:$0xff]  }
 0x9eb   :  { %17424 = vmatpush1.bf16.msra.mxu0 %v23815_v52  ;;  %17957 = vmatpush1.bf16.msra.mxu1 %v23818_v44  ;;  %v23910_v52 = vld [vmem:[%s31204_s7 + $0x5ac] ss:$16 sps:$4 sm:$0xff]   ;;  %v23905_v44 = vld [vmem:[%s31204_s7 + $0x5a0] ss:$16 sps:$4 sm:$0xff]  }
 0x9ec   :  { %17425 = vmatprep.subr.bf16.mxu0 %v23823_v5  ;;  %17958 = vmatprep.subr.bf16.mxu1 %v23826_v19  ;;  %v23908_v5 = vld [vmem:[%s31204_s7 + $0x5a8] ss:$16 sps:$4 sm:$0xff]   ;;  %v23913_v19 = vld [vmem:[%s31204_s7 + $0x5c4] ss:$16 sps:$4 sm:$0xff]  }
 0x9ef   :  { %17426 = vmatpush1.bf16.msra.mxu0 %v23821_v8  ;;  %17959 = vmatpush1.bf16.msra.mxu1 %v23824_v10  ;;  %v23916_v8 = vld [vmem:[%s31204_s7 + $0x5cc] ss:$16 sps:$4 sm:$0xff]   ;;  %v23911_v10 = vld [vmem:[%s31204_s7 + $0x5c0] ss:$16 sps:$4 sm:$0xff]  }
 0x9f0   :  { %17436 = vmatprep.subr.bf16.mxu0 %v23829_v35  ;;  %17969 = vmatprep.subr.bf16.mxu1 %v23832_v45  ;;  %v23914_v35 = vld [vmem:[%s31204_s7 + $0x5c8] ss:$16 sps:$4 sm:$0xff]   ;;  %v23919_v45 = vld [vmem:[%s31204_s7 + $0x5e4] ss:$16 sps:$4 sm:$0xff]  }
 0x9f2   :  { %17428 = vmatmul.mubr.bf16.vlgmr.msra.gmra.mrb[224].mxu0 %v13291_v6  ;;  %17961 = vmatmul.mubr.bf16.vlgmr.msra.gmra.mrb[96].mxu1 %v13291_v6  ;;  %v23920_v6 = vld [vmem:[%s31204_s7 + $0x5e8] ss:$16 sps:$4 sm:$0xff]  }
 0x9f3   :  { %17437 = vmatpush1.bf16.msra.mxu0 %v23827_v2  ;;  %17468 = vmatprep.mubr.bf16.mxu0 %v29014_v56  ;;  %v23917_v2 = vld [vmem:[%s31204_s7 + $0x5e0] ss:$16 sps:$4 sm:$0xff]  }
 0x9f4   :  { %17970 = vmatpush1.bf16.msra.mxu1 %v23830_v20  ;;  %18001 = vmatprep.mubr.bf16.mxu1 %v29014_v56  ;;  %v23925_v20 = vld [vmem:[%s31204_s7 + $0x604] ss:$16 sps:$4 sm:$0xff]  }
 0x9f5   :  { %17438 = vmatprep.subr.bf16.mxu0 %v23835_v36  ;;  %17971 = vmatprep.subr.bf16.mxu1 %v23838_v23  ;;  %v23928_v36 = vld [vmem:[%s31204_s7 + $0x60c] ss:$16 sps:$4 sm:$0xff]   ;;  %v23923_v23 = vld [vmem:[%s31204_s7 + $0x600] ss:$16 sps:$4 sm:$0xff]  }
 0x9f7   :  { %17439 = vmatpush1.bf16.msra.mxu0 %v23833_v63  ;;  %v29209_v63 = vrot.slane %v28989_v40, %v27841_v15  ;;  %v23934_v40 = vld [vmem:[%s31204_s7 + $0x62c] ss:$16 sps:$4 sm:$0xff]  }
 0x9f8   :  { %17972 = vmatpush1.bf16.msra.mxu1 %v23836_v18  ;;  %17440 = vmatprep.subr.bf16.mxu0 %v23841_v22  ;;  %v23926_v18 = vld [vmem:[%s31204_s7 + $0x608] ss:$16 sps:$4 sm:$0xff]   ;;  %v23931_v22 = vld [vmem:[%s31204_s7 + $0x624] ss:$16 sps:$4 sm:$0xff]  }
 0x9f9   :  { %17973 = vmatprep.subr.bf16.mxu1 %v23844_v41  ;;  %v13294_v41 = vcombine.high %v29014_v56, %v29014_v56  ;;  %v23937_v56 = vld [vmem:[%s31204_s7 + $0x644] ss:$16 sps:$4 sm:$0xff]  }
 0x9fb   :  { %17441 = vmatpush1.bf16.msra.mxu0 %v23839_v60  ;;  %v23929_v60 = vld [vmem:[%s31204_s7 + $0x620] ss:$16 sps:$4 sm:$0xff]  }
 0x9fc   :  { %17974 = vmatpush1.bf16.msra.mxu1 %v23842_v53  ;;  %17442 = vmatprep.subr.bf16.mxu0 %v23847_v24  ;;  %v23932_v53 = vld [vmem:[%s31204_s7 + $0x628] ss:$16 sps:$4 sm:$0xff]   ;;  %v23940_v24 = vld [vmem:[%s31204_s7 + $0x64c] ss:$16 sps:$4 sm:$0xff]  }
 0x9fd   :  { %17975 = vmatprep.subr.bf16.mxu1 %v23850_v59  ;;  %v23935_v59 = vld [vmem:[%s31204_s7 + $0x640] ss:$16 sps:$4 sm:$0xff]  }
 0x9ff   :  { %17443 = vmatpush1.bf16.msra.mxu0 %v23845_v13  ;;  %v23938_v13 = vld [vmem:[%s31204_s7 + $0x648] ss:$16 sps:$4 sm:$0xff]  }
 0xa00   :  { %17976 = vmatpush1.bf16.msra.mxu1 %v23848_v33  ;;  %17444 = vmatprep.subr.bf16.mxu0 %v23853_v21  ;;  %v23943_v33 = vld [vmem:[%s31204_s7 + $0x664] ss:$16 sps:$4 sm:$0xff]   ;;  %v23946_v21 = vld [vmem:[%s31204_s7 + $0x66c] ss:$16 sps:$4 sm:$0xff]  }
 0xa01   :  { %17977 = vmatprep.subr.bf16.mxu1 %v23856_v49  ;;  %v23941_v49 = vld [vmem:[%s31204_s7 + $0x660] ss:$16 sps:$4 sm:$0xff]  }
 0xa03   :  { %17445 = vmatpush1.bf16.msra.mxu0 %v23851_v39  ;;  %v23944_v39 = vld [vmem:[%s31204_s7 + $0x668] ss:$16 sps:$4 sm:$0xff]  }
 0xa04   :  { %17978 = vmatpush1.bf16.msra.mxu1 %v23854_v14  ;;  %17446 = vmatprep.subr.bf16.mxu0 %v23859_v46  ;;  %v23949_v14 = vld [vmem:[%s31204_s7 + $0x684] ss:$16 sps:$4 sm:$0xff]   ;;  %v23952_v46 = vld [vmem:[%s31204_s7 + $0x68c] ss:$16 sps:$4 sm:$0xff]  }
 0xa05   :  { %17979 = vmatprep.subr.bf16.mxu1 %v23862_v57  ;;  %v23947_v57 = vld [vmem:[%s31204_s7 + $0x680] ss:$16 sps:$4 sm:$0xff]  }
 0xa07   :  { %17447 = vmatpush1.bf16.msra.mxu0 %v23857_v51  ;;  %v23950_v51 = vld [vmem:[%s31204_s7 + $0x688] ss:$16 sps:$4 sm:$0xff]  }
 0xa08   :  { %17980 = vmatpush1.bf16.msra.mxu1 %v23860_v43  ;;  %17448 = vmatprep.subr.bf16.mxu0 %v23865_v26  ;;  %v23955_v43 = vld [vmem:[%s31204_s7 + $0x6a4] ss:$16 sps:$4 sm:$0xff]   ;;  %v23958_v26 = vld [vmem:[%s31204_s7 + $0x6ac] ss:$16 sps:$4 sm:$0xff]  }
 0xa09   :  { %17981 = vmatprep.subr.bf16.mxu1 %v23868_v34  ;;  %v23953_v34 = vld [vmem:[%s31204_s7 + $0x6a0] ss:$16 sps:$4 sm:$0xff]  }
 0xa0b   :  { %17449 = vmatpush1.bf16.msra.mxu0 %v23863_v47  ;;  %v23956_v47 = vld [vmem:[%s31204_s7 + $0x6a8] ss:$16 sps:$4 sm:$0xff]  }
 0xa0c   :  { %17982 = vmatpush1.bf16.msra.mxu1 %v23866_v54  ;;  %17450 = vmatprep.subr.bf16.mxu0 %v23871_v29  ;;  %v23961_v54 = vld [vmem:[%s31204_s7 + $0x6c4] ss:$16 sps:$4 sm:$0xff]   ;;  %v23964_v29 = vld [vmem:[%s31204_s7 + $0x6cc] ss:$16 sps:$4 sm:$0xff]  }
 0xa0d   :  { %17983 = vmatprep.subr.bf16.mxu1 %v23874_v30  ;;  %v23959_v30 = vld [vmem:[%s31204_s7 + $0x6c0] ss:$16 sps:$4 sm:$0xff]  }
 0xa0f   :  { %17451 = vmatpush1.bf16.msra.mxu0 %v23869_v3  ;;  %v23962_v3 = vld [vmem:[%s31204_s7 + $0x6c8] ss:$16 sps:$4 sm:$0xff]  }
 0xa10   :  { %17984 = vmatpush1.bf16.msra.mxu1 %v23872_v27  ;;  %17452 = vmatprep.subr.bf16.mxu0 %v23877_v42  ;;  %v23967_v27 = vld [vmem:[%s31204_s7 + $0x6e4] ss:$16 sps:$4 sm:$0xff]   ;;  %v23970_v42 = vld [vmem:[%s31204_s7 + $0x6ec] ss:$16 sps:$4 sm:$0xff]  }
 0xa11   :  { %17985 = vmatprep.subr.bf16.mxu1 %v23880_v17  ;;  %v23965_v17 = vld [vmem:[%s31204_s7 + $0x6e0] ss:$16 sps:$4 sm:$0xff]  }
 0xa13   :  { %17453 = vmatpush1.bf16.msra.mxu0 %v23875_v31  ;;  %v23968_v31 = vld [vmem:[%s31204_s7 + $0x6e8] ss:$16 sps:$4 sm:$0xff]  }
 0xa14   :  { %17986 = vmatpush1.bf16.msra.mxu1 %v23878_v58  ;;  %17454 = vmatprep.subr.bf16.mxu0 %v23883_v32  ;;  %v23973_v58 = vld [vmem:[%s31204_s7 + $0x704] ss:$16 sps:$4 sm:$0xff]   ;;  %v23976_v32 = vld [vmem:[%s31204_s7 + $0x70c] ss:$16 sps:$4 sm:$0xff]  }
 0xa15   :  { %17987 = vmatprep.subr.bf16.mxu1 %v23886_v0  ;;  %v23971_v0 = vld [vmem:[%s31204_s7 + $0x700] ss:$16 sps:$4 sm:$0xff]  }
 0xa17   :  { %17455 = vmatpush1.bf16.msra.mxu0 %v23881_v50  ;;  %v23974_v50 = vld [vmem:[%s31204_s7 + $0x708] ss:$16 sps:$4 sm:$0xff]  }
 0xa18   :  { %17988 = vmatpush1.bf16.msra.mxu1 %v23884_v61  ;;  %17456 = vmatprep.subr.bf16.mxu0 %v23889_v16  ;;  %v23979_v61 = vld [vmem:[%s31204_s7 + $0x724] ss:$16 sps:$4 sm:$0xff]   ;;  %v23982_v16 = vld [vmem:[%s31204_s7 + $0x72c] ss:$16 sps:$4 sm:$0xff]  }
 0xa19   :  { %17989 = vmatprep.subr.bf16.mxu1 %v23892_v9  ;;  %v23977_v9 = vld [vmem:[%s31204_s7 + $0x720] ss:$16 sps:$4 sm:$0xff]  }
 0xa1b   :  { %17457 = vmatpush1.bf16.msra.mxu0 %v23887_v37  ;;  %v23980_v37 = vld [vmem:[%s31204_s7 + $0x728] ss:$16 sps:$4 sm:$0xff]  }
 0xa1c   :  { %17990 = vmatpush1.bf16.msra.mxu1 %v23890_v4  ;;  %17458 = vmatprep.subr.bf16.mxu0 %v23895_v12  ;;  %v23985_v4 = vld [vmem:[%s31204_s7 + $0x744] ss:$16 sps:$4 sm:$0xff]   ;;  %v23988_v12 = vld [vmem:[%s31204_s7 + $0x74c] ss:$16 sps:$4 sm:$0xff]  }
 0xa1d   :  { %17991 = vmatprep.subr.bf16.mxu1 %v23898_v55  ;;  %v23983_v55 = vld [vmem:[%s31204_s7 + $0x740] ss:$16 sps:$4 sm:$0xff]  }
 0xa1f   :  { %17459 = vmatpush1.bf16.msra.mxu0 %v23893_v11  ;;  %v23986_v11 = vld [vmem:[%s31204_s7 + $0x748] ss:$16 sps:$4 sm:$0xff]  }
 0xa20   :  { %17992 = vmatpush1.bf16.msra.mxu1 %v23896_v62  ;;  %17460 = vmatprep.subr.bf16.mxu0 %v23901_v48  ;;  %v23991_v62 = vld [vmem:[%s31204_s7 + $0x764] ss:$16 sps:$4 sm:$0xff]   ;;  %v23994_v48 = vld [vmem:[%s31204_s7 + $0x76c] ss:$16 sps:$4 sm:$0xff]  }
 0xa21   :  { %17993 = vmatprep.subr.bf16.mxu1 %v23904_v28  ;;  %v23989_v28 = vld [vmem:[%s31204_s7 + $0x760] ss:$16 sps:$4 sm:$0xff]  }
 0xa23   :  { %17461 = vmatpush1.bf16.msra.mxu0 %v23899_v7  ;;  %v23992_v7 = vld [vmem:[%s31204_s7 + $0x768] ss:$16 sps:$4 sm:$0xff]  }
 0xa24   :  { %17994 = vmatpush1.bf16.msra.mxu1 %v23902_v1  ;;  %17462 = vmatprep.subr.bf16.mxu0 %v23907_v25  ;;  %v23997_v1 = vld [vmem:[%s31204_s7 + $0x784] ss:$16 sps:$4 sm:$0xff]   ;;  %v24000_v25 = vld [vmem:[%s31204_s7 + $0x78c] ss:$16 sps:$4 sm:$0xff]  }
 0xa25   :  { %17995 = vmatprep.subr.bf16.mxu1 %v23910_v52  ;;  %v23995_v52 = vld [vmem:[%s31204_s7 + $0x780] ss:$16 sps:$4 sm:$0xff]  }
 0xa27   :  { %17463 = vmatpush1.bf16.msra.mxu0 %v23905_v44  ;;  %v23998_v44 = vld [vmem:[%s31204_s7 + $0x788] ss:$16 sps:$4 sm:$0xff]  }
 0xa28   :  { %17996 = vmatpush1.bf16.msra.mxu1 %v23908_v5  ;;  %17464 = vmatprep.subr.bf16.mxu0 %v23913_v19  ;;  %v24003_v5 = vld [vmem:[%s31204_s7 + $0x7a4] ss:$16 sps:$4 sm:$0xff]   ;;  %v24006_v19 = vld [vmem:[%s31204_s7 + $0x7ac] ss:$16 sps:$4 sm:$0xff]  }
 0xa29   :  { %17997 = vmatprep.subr.bf16.mxu1 %v23916_v8  ;;  %v24001_v8 = vld [vmem:[%s31204_s7 + $0x7a0] ss:$16 sps:$4 sm:$0xff]  }
 0xa2b   :  { %17465 = vmatpush1.bf16.msra.mxu0 %v23911_v10  ;;  %v24004_v10 = vld [vmem:[%s31204_s7 + $0x7a8] ss:$16 sps:$4 sm:$0xff]  }
 0xa2c   :  { %17998 = vmatpush1.bf16.msra.mxu1 %v23914_v35  ;;  %17466 = vmatprep.subr.bf16.mxu0 %v23919_v45  ;;  %v24009_v35 = vld [vmem:[%s31204_s7 + $0x7c4] ss:$16 sps:$4 sm:$0xff]   ;;  %v24012_v45 = vld [vmem:[%s31204_s7 + $0x7cc] ss:$16 sps:$4 sm:$0xff]  }
 0xa2d   :  { %17999 = vmatprep.subr.bf16.mxu1 %v23922_v38  ;;  %v24007_v38 = vld [vmem:[%s31204_s7 + $0x7c0] ss:$16 sps:$4 sm:$0xff]  }
 0xa2f   :  { %17467 = vmatpush1.bf16.msra.mxu0 %v23917_v2  ;;  %v29383_v2 = vld [vmem:[#allocation5 + $0x8] sm:$0xff] }
 0xa30   :  { %18000 = vmatpush1.bf16.msra.mxu1 %v23920_v6  ;;  %17477 = vmatprep.subr.bf16.mxu0 %v23925_v20  ;;  %v24010_v6 = vld [vmem:[%s31204_s7 + $0x7c8] ss:$16 sps:$4 sm:$0xff]   ;;  %v24015_v20 = vld [vmem:[%s31204_s7 + $0x7e4] ss:$16 sps:$4 sm:$0xff]  }
 0xa31   :  { %18010 = vmatprep.subr.bf16.mxu1 %v23928_v36  ;;  %v24018_v36 = vld [vmem:[%s31204_s7 + $0x7ec] ss:$16 sps:$4 sm:$0xff]  }
 0xa32   :  { %17469 = vmatmul.mubr.bf16.vlgmr.msra.gmra.mrb[224].mxu0 %v29209_v63 }
 0xa33   :  { %18002 = vmatmul.mubr.bf16.vlgmr.msra.gmra.mrb[96].mxu1 %v29209_v63  ;;  %17478 = vmatpush1.bf16.msra.mxu0 %v23923_v23  ;;  %v29396_v23 = vrot.slane %v29383_v2, %v27841_v15 }
 0xa34   :  { %17509 = vmatprep.mubr.bf16.mxu0 %v13294_v41  ;;  %18011 = vmatpush1.bf16.msra.mxu1 %v23926_v18  ;;  %v24013_v18 = vld [vmem:[%s31204_s7 + $0x7e0] ss:$16 sps:$4 sm:$0xff]  }
 0xa35   :  { %18042 = vmatprep.mubr.bf16.mxu1 %v13294_v41  ;;  %17479 = vmatprep.subr.bf16.mxu0 %v23931_v22  ;;  %v24016_v22 = vld [vmem:[%s31204_s7 + $0x7e8] ss:$16 sps:$4 sm:$0xff]   ;;  %v24021_v41 = vld [vmem:[%s31204_s7 + $0x804] ss:$16 sps:$4 sm:$0xff]  }
 0xa36   :  { %18012 = vmatprep.subr.bf16.mxu1 %v23934_v40  ;;  %v24024_v40 = vld [vmem:[%s31204_s7 + $0x80c] ss:$16 sps:$4 sm:$0xff]  }
 0xa37   :  { %17480 = vmatpush1.bf16.msra.mxu0 %v23929_v60  ;;  %v13310_v60 = vcombine.high %v29396_v23, %v29396_v23 }
 0xa38   :  { %18013 = vmatpush1.bf16.msra.mxu1 %v23932_v53  ;;  %17481 = vmatprep.subr.bf16.mxu0 %v23937_v56  ;;  %v24019_v53 = vld [vmem:[%s31204_s7 + $0x800] ss:$16 sps:$4 sm:$0xff]   ;;  %v13292_v56 = vcombine.high %v29209_v63, %v29209_v63 }
 0xa39   :  { %18014 = vmatprep.subr.bf16.mxu1 %v23940_v24  ;;  %v24022_v24 = vld [vmem:[%s31204_s7 + $0x808] ss:$16 sps:$4 sm:$0xff]   ;;  %v24025_v63 = vld [vmem:[%s31204_s7 + $0x820] ss:$16 sps:$4 sm:$0xff]  }
 0xa3b   :  { %17482 = vmatpush1.bf16.msra.mxu0 %v23935_v59  ;;  %v24027_v59 = vld [vmem:[%s31204_s7 + $0x824] ss:$16 sps:$4 sm:$0xff]  }
 0xa3c   :  { %18015 = vmatpush1.bf16.msra.mxu1 %v23938_v13  ;;  %17483 = vmatprep.subr.bf16.mxu0 %v23943_v33  ;;  %v29424_v13 = vrot.slane %v13310_v60, %v27841_v15  ;;  %v24030_v33 = vld [vmem:[%s31204_s7 + $0x82c] ss:$16 sps:$4 sm:$0xff]   ;;  %v24111_v60 = vld [vmem:[%s31204_s7 + $0x9e4] ss:$16 sps:$4 sm:$0xff]  }
 0xa3d   :  { %18016 = vmatprep.subr.bf16.mxu1 %v23946_v21  ;;  %v24028_v21 = vld [vmem:[%s31204_s7 + $0x828] ss:$16 sps:$4 sm:$0xff]  }
 0xa3f   :  { %17484 = vmatpush1.bf16.msra.mxu0 %v23941_v49  ;;  %v24033_v49 = vld [vmem:[%s31204_s7 + $0x844] ss:$16 sps:$4 sm:$0xff]  }
 0xa40   :  { %18017 = vmatpush1.bf16.msra.mxu1 %v23944_v39  ;;  %17485 = vmatprep.subr.bf16.mxu0 %v23949_v14  ;;  %v24036_v39 = vld [vmem:[%s31204_s7 + $0x84c] ss:$16 sps:$4 sm:$0xff]   ;;  %v24031_v14 = vld [vmem:[%s31204_s7 + $0x840] ss:$16 sps:$4 sm:$0xff]  }
 0xa41   :  { %18018 = vmatprep.subr.bf16.mxu1 %v23952_v46  ;;  %v24034_v46 = vld [vmem:[%s31204_s7 + $0x848] ss:$16 sps:$4 sm:$0xff]  }
 0xa43   :  { %17486 = vmatpush1.bf16.msra.mxu0 %v23947_v57  ;;  %v24039_v57 = vld [vmem:[%s31204_s7 + $0x864] ss:$16 sps:$4 sm:$0xff]  }
 0xa44   :  { %18019 = vmatpush1.bf16.msra.mxu1 %v23950_v51  ;;  %17487 = vmatprep.subr.bf16.mxu0 %v23955_v43  ;;  %v24042_v51 = vld [vmem:[%s31204_s7 + $0x86c] ss:$16 sps:$4 sm:$0xff]   ;;  %v24037_v43 = vld [vmem:[%s31204_s7 + $0x860] ss:$16 sps:$4 sm:$0xff]  }
 0xa45   :  { %18020 = vmatprep.subr.bf16.mxu1 %v23958_v26  ;;  %v24040_v26 = vld [vmem:[%s31204_s7 + $0x868] ss:$16 sps:$4 sm:$0xff]  }
 0xa47   :  { %17488 = vmatpush1.bf16.msra.mxu0 %v23953_v34  ;;  %v24045_v34 = vld [vmem:[%s31204_s7 + $0x884] ss:$16 sps:$4 sm:$0xff]  }
 0xa48   :  { %18021 = vmatpush1.bf16.msra.mxu1 %v23956_v47  ;;  %17489 = vmatprep.subr.bf16.mxu0 %v23961_v54  ;;  %v24048_v47 = vld [vmem:[%s31204_s7 + $0x88c] ss:$16 sps:$4 sm:$0xff]   ;;  %v24043_v54 = vld [vmem:[%s31204_s7 + $0x880] ss:$16 sps:$4 sm:$0xff]  }
 0xa49   :  { %18022 = vmatprep.subr.bf16.mxu1 %v23964_v29  ;;  %v24046_v29 = vld [vmem:[%s31204_s7 + $0x888] ss:$16 sps:$4 sm:$0xff]  }
 0xa4b   :  { %17490 = vmatpush1.bf16.msra.mxu0 %v23959_v30  ;;  %v24051_v30 = vld [vmem:[%s31204_s7 + $0x8a4] ss:$16 sps:$4 sm:$0xff]  }
 0xa4c   :  { %18023 = vmatpush1.bf16.msra.mxu1 %v23962_v3  ;;  %17491 = vmatprep.subr.bf16.mxu0 %v23967_v27  ;;  %v24054_v3 = vld [vmem:[%s31204_s7 + $0x8ac] ss:$16 sps:$4 sm:$0xff]   ;;  %v24049_v27 = vld [vmem:[%s31204_s7 + $0x8a0] ss:$16 sps:$4 sm:$0xff]  }
 0xa4d   :  { %18024 = vmatprep.subr.bf16.mxu1 %v23970_v42  ;;  %v24052_v42 = vld [vmem:[%s31204_s7 + $0x8a8] ss:$16 sps:$4 sm:$0xff]  }
 0xa4f   :  { %17492 = vmatpush1.bf16.msra.mxu0 %v23965_v17  ;;  %v24057_v17 = vld [vmem:[%s31204_s7 + $0x8c4] ss:$16 sps:$4 sm:$0xff]  }
 0xa50   :  { %18025 = vmatpush1.bf16.msra.mxu1 %v23968_v31  ;;  %17493 = vmatprep.subr.bf16.mxu0 %v23973_v58  ;;  %v24060_v31 = vld [vmem:[%s31204_s7 + $0x8cc] ss:$16 sps:$4 sm:$0xff]   ;;  %v24055_v58 = vld [vmem:[%s31204_s7 + $0x8c0] ss:$16 sps:$4 sm:$0xff]  }
 0xa51   :  { %18026 = vmatprep.subr.bf16.mxu1 %v23976_v32  ;;  %v24058_v32 = vld [vmem:[%s31204_s7 + $0x8c8] ss:$16 sps:$4 sm:$0xff]  }
 0xa53   :  { %17494 = vmatpush1.bf16.msra.mxu0 %v23971_v0  ;;  %v24063_v0 = vld [vmem:[%s31204_s7 + $0x8e4] ss:$16 sps:$4 sm:$0xff]  }
 0xa54   :  { %18027 = vmatpush1.bf16.msra.mxu1 %v23974_v50  ;;  %17495 = vmatprep.subr.bf16.mxu0 %v23979_v61  ;;  %v24066_v50 = vld [vmem:[%s31204_s7 + $0x8ec] ss:$16 sps:$4 sm:$0xff]   ;;  %v24061_v61 = vld [vmem:[%s31204_s7 + $0x8e0] ss:$16 sps:$4 sm:$0xff]  }
 0xa55   :  { %18028 = vmatprep.subr.bf16.mxu1 %v23982_v16  ;;  %v24064_v16 = vld [vmem:[%s31204_s7 + $0x8e8] ss:$16 sps:$4 sm:$0xff]  }
 0xa57   :  { %17496 = vmatpush1.bf16.msra.mxu0 %v23977_v9  ;;  %v24069_v9 = vld [vmem:[%s31204_s7 + $0x904] ss:$16 sps:$4 sm:$0xff]  }
 0xa58   :  { %18029 = vmatpush1.bf16.msra.mxu1 %v23980_v37  ;;  %17497 = vmatprep.subr.bf16.mxu0 %v23985_v4  ;;  %v24072_v37 = vld [vmem:[%s31204_s7 + $0x90c] ss:$16 sps:$4 sm:$0xff]   ;;  %v24067_v4 = vld [vmem:[%s31204_s7 + $0x900] ss:$16 sps:$4 sm:$0xff]  }
 0xa59   :  { %18030 = vmatprep.subr.bf16.mxu1 %v23988_v12  ;;  %v24070_v12 = vld [vmem:[%s31204_s7 + $0x908] ss:$16 sps:$4 sm:$0xff]  }
 0xa5b   :  { %17498 = vmatpush1.bf16.msra.mxu0 %v23983_v55  ;;  %v24075_v55 = vld [vmem:[%s31204_s7 + $0x924] ss:$16 sps:$4 sm:$0xff]  }
 0xa5c   :  { %18031 = vmatpush1.bf16.msra.mxu1 %v23986_v11  ;;  %17499 = vmatprep.subr.bf16.mxu0 %v23991_v62  ;;  %v24078_v11 = vld [vmem:[%s31204_s7 + $0x92c] ss:$16 sps:$4 sm:$0xff]   ;;  %v24073_v62 = vld [vmem:[%s31204_s7 + $0x920] ss:$16 sps:$4 sm:$0xff]  }
 0xa5d   :  { %18032 = vmatprep.subr.bf16.mxu1 %v23994_v48  ;;  %v24076_v48 = vld [vmem:[%s31204_s7 + $0x928] ss:$16 sps:$4 sm:$0xff]  }
 0xa5f   :  { %17500 = vmatpush1.bf16.msra.mxu0 %v23989_v28  ;;  %v24081_v28 = vld [vmem:[%s31204_s7 + $0x944] ss:$16 sps:$4 sm:$0xff]  }
 0xa60   :  { %18033 = vmatpush1.bf16.msra.mxu1 %v23992_v7  ;;  %17501 = vmatprep.subr.bf16.mxu0 %v23997_v1  ;;  %v24084_v7 = vld [vmem:[%s31204_s7 + $0x94c] ss:$16 sps:$4 sm:$0xff]   ;;  %v24079_v1 = vld [vmem:[%s31204_s7 + $0x940] ss:$16 sps:$4 sm:$0xff]  }
 0xa61   :  { %18034 = vmatprep.subr.bf16.mxu1 %v24000_v25  ;;  %v24082_v25 = vld [vmem:[%s31204_s7 + $0x948] ss:$16 sps:$4 sm:$0xff]  }
 0xa63   :  { %17502 = vmatpush1.bf16.msra.mxu0 %v23995_v52  ;;  %v24087_v52 = vld [vmem:[%s31204_s7 + $0x964] ss:$16 sps:$4 sm:$0xff]  }
 0xa64   :  { %18035 = vmatpush1.bf16.msra.mxu1 %v23998_v44  ;;  %17503 = vmatprep.subr.bf16.mxu0 %v24003_v5  ;;  %v24090_v44 = vld [vmem:[%s31204_s7 + $0x96c] ss:$16 sps:$4 sm:$0xff]   ;;  %v24085_v5 = vld [vmem:[%s31204_s7 + $0x960] ss:$16 sps:$4 sm:$0xff]  }
 0xa65   :  { %18036 = vmatprep.subr.bf16.mxu1 %v24006_v19  ;;  %v24088_v19 = vld [vmem:[%s31204_s7 + $0x968] ss:$16 sps:$4 sm:$0xff]  }
 0xa67   :  { %17504 = vmatpush1.bf16.msra.mxu0 %v24001_v8  ;;  %v24093_v8 = vld [vmem:[%s31204_s7 + $0x984] ss:$16 sps:$4 sm:$0xff]  }
 0xa68   :  { %18037 = vmatpush1.bf16.msra.mxu1 %v24004_v10  ;;  %17505 = vmatprep.subr.bf16.mxu0 %v24009_v35  ;;  %v24096_v10 = vld [vmem:[%s31204_s7 + $0x98c] ss:$16 sps:$4 sm:$0xff]   ;;  %v24091_v35 = vld [vmem:[%s31204_s7 + $0x980] ss:$16 sps:$4 sm:$0xff]  }
 0xa69   :  { %18038 = vmatprep.subr.bf16.mxu1 %v24012_v45  ;;  %v24094_v45 = vld [vmem:[%s31204_s7 + $0x988] ss:$16 sps:$4 sm:$0xff]  }
 0xa6b   :  { %17506 = vmatpush1.bf16.msra.mxu0 %v24007_v38  ;;  %v24099_v38 = vld [vmem:[%s31204_s7 + $0x9a4] ss:$16 sps:$4 sm:$0xff]  }
 0xa6c   :  { %18039 = vmatpush1.bf16.msra.mxu1 %v24010_v6  ;;  %17507 = vmatprep.subr.bf16.mxu0 %v24015_v20  ;;  %v24102_v6 = vld [vmem:[%s31204_s7 + $0x9ac] ss:$16 sps:$4 sm:$0xff]   ;;  %v24097_v20 = vld [vmem:[%s31204_s7 + $0x9a0] ss:$16 sps:$4 sm:$0xff]  }
 0xa6d   :  { %18040 = vmatprep.subr.bf16.mxu1 %v24018_v36  ;;  %v24100_v36 = vld [vmem:[%s31204_s7 + $0x9a8] ss:$16 sps:$4 sm:$0xff]  }
 0xa6f   :  { %17508 = vmatpush1.bf16.msra.mxu0 %v24013_v18  ;;  %v24105_v18 = vld [vmem:[%s31204_s7 + $0x9c4] ss:$16 sps:$4 sm:$0xff]  }
 0xa70   :  { %18041 = vmatpush1.bf16.msra.mxu1 %v24016_v22  ;;  %17518 = vmatprep.subr.bf16.mxu0 %v24021_v41  ;;  %v24108_v22 = vld [vmem:[%s31204_s7 + $0x9cc] ss:$16 sps:$4 sm:$0xff]   ;;  %v24103_v41 = vld [vmem:[%s31204_s7 + $0x9c0] ss:$16 sps:$4 sm:$0xff]  }
 0xa71   :  { %18051 = vmatprep.subr.bf16.mxu1 %v24024_v40  ;;  %v24106_v40 = vld [vmem:[%s31204_s7 + $0x9c8] ss:$16 sps:$4 sm:$0xff]  }
 0xa72   :  { %17510 = vmatmul.mubr.bf16.vlgmr.msra.gmra.mrb[224].mxu0 %v13292_v56 }
 0xa73   :  { %18043 = vmatmul.mubr.bf16.vlgmr.msra.gmra.mrb[96].mxu1 %v13292_v56  ;;  %17519 = vmatpush1.bf16.msra.mxu0 %v24019_v53  ;;  %v24114_v53 = vld [vmem:[%s31204_s7 + $0x9ec] ss:$16 sps:$4 sm:$0xff]   ;;  %v24109_v56 = vld [vmem:[%s31204_s7 + $0x9e0] ss:$16 sps:$4 sm:$0xff]  }
 0xa74   :  { %17550 = vmatprep.mubr.bf16.mxu0 %v29424_v13  ;;  %18052 = vmatpush1.bf16.msra.mxu1 %v24022_v24  ;;  %v24112_v24 = vld [vmem:[%s31204_s7 + $0x9e8] ss:$16 sps:$4 sm:$0xff]  }
 0xa75   :  { %18083 = vmatprep.mubr.bf16.mxu1 %v29424_v13  ;;  %17520 = vmatprep.subr.bf16.mxu0 %v24027_v59  ;;  %v24117_v59 = vld [vmem:[%s31204_s7 + $0xa04] ss:$16 sps:$4 sm:$0xff]  }
 0xa76   :  { %18053 = vmatprep.subr.bf16.mxu1 %v24030_v33  ;;  %v24120_v33 = vld [vmem:[%s31204_s7 + $0xa0c] ss:$16 sps:$4 sm:$0xff]  }
 0xa77   :  { %17521 = vmatpush1.bf16.msra.mxu0 %v24025_v63  ;;  %v24115_v63 = vld [vmem:[%s31204_s7 + $0xa00] ss:$16 sps:$4 sm:$0xff]  }
 0xa78   :  { %18054 = vmatpush1.bf16.msra.mxu1 %v24028_v21  ;;  %17522 = vmatprep.subr.bf16.mxu0 %v24033_v49  ;;  %v29616_v21 = vrot.slane %v29396_v23, %v27841_v15  ;;  %v24118_v49 = vld [vmem:[%s31204_s7 + $0xa08] ss:$16 sps:$4 sm:$0xff]   ;;  %v24126_v23 = vld [vmem:[%s31204_s7 + $0xa2c] ss:$16 sps:$4 sm:$0xff]  }
 0xa79   :  { %18055 = vmatprep.subr.bf16.mxu1 %v24036_v39  ;;  %v24123_v39 = vld [vmem:[%s31204_s7 + $0xa24] ss:$16 sps:$4 sm:$0xff]  }
 0xa7b   :  { %17523 = vmatpush1.bf16.msra.mxu0 %v24031_v14  ;;  %v13342_v14 = vcombine.high %v29424_v13, %v29424_v13  ;;  %v24129_v13 = vld [vmem:[%s31204_s7 + $0xa44] ss:$16 sps:$4 sm:$0xff]  }
 0xa7c   :  { %18056 = vmatpush1.bf16.msra.mxu1 %v24034_v46  ;;  %17524 = vmatprep.subr.bf16.mxu0 %v24039_v57  ;;  %v24121_v46 = vld [vmem:[%s31204_s7 + $0xa20] ss:$16 sps:$4 sm:$0xff]   ;;  %v24124_v57 = vld [vmem:[%s31204_s7 + $0xa28] ss:$16 sps:$4 sm:$0xff]  }
 0xa7d   :  { %18057 = vmatprep.subr.bf16.mxu1 %v24042_v51  ;;  %v24132_v51 = vld [vmem:[%s31204_s7 + $0xa4c] ss:$16 sps:$4 sm:$0xff]  }
 0xa7f   :  { %17525 = vmatpush1.bf16.msra.mxu0 %v24037_v43  ;;  %v24127_v43 = vld [vmem:[%s31204_s7 + $0xa40] ss:$16 sps:$4 sm:$0xff]  }
 0xa80   :  { %18058 = vmatpush1.bf16.msra.mxu1 %v24040_v26  ;;  %17526 = vmatprep.subr.bf16.mxu0 %v24045_v34  ;;  %v24130_v26 = vld [vmem:[%s31204_s7 + $0xa48] ss:$16 sps:$4 sm:$0xff]   ;;  %v24135_v34 = vld [vmem:[%s31204_s7 + $0xa64] ss:$16 sps:$4 sm:$0xff]  }
 0xa81   :  { %18059 = vmatprep.subr.bf16.mxu1 %v24048_v47  ;;  %v24138_v47 = vld [vmem:[%s31204_s7 + $0xa6c] ss:$16 sps:$4 sm:$0xff]  }
 0xa83   :  { %17527 = vmatpush1.bf16.msra.mxu0 %v24043_v54  ;;  %v24133_v54 = vld [vmem:[%s31204_s7 + $0xa60] ss:$16 sps:$4 sm:$0xff]  }
 0xa84   :  { %18060 = vmatpush1.bf16.msra.mxu1 %v24046_v29  ;;  %17528 = vmatprep.subr.bf16.mxu0 %v24051_v30  ;;  %v24136_v29 = vld [vmem:[%s31204_s7 + $0xa68] ss:$16 sps:$4 sm:$0xff]   ;;  %v24141_v30 = vld [vmem:[%s31204_s7 + $0xa84] ss:$16 sps:$4 sm:$0xff]  }
 0xa85   :  { %18061 = vmatprep.subr.bf16.mxu1 %v24054_v3  ;;  %v24144_v3 = vld [vmem:[%s31204_s7 + $0xa8c] ss:$16 sps:$4 sm:$0xff]  }
 0xa87   :  { %17529 = vmatpush1.bf16.msra.mxu0 %v24049_v27  ;;  %v24139_v27 = vld [vmem:[%s31204_s7 + $0xa80] ss:$16 sps:$4 sm:$0xff]  }
 0xa88   :  { %18062 = vmatpush1.bf16.msra.mxu1 %v24052_v42  ;;  %17530 = vmatprep.subr.bf16.mxu0 %v24057_v17  ;;  %v24142_v42 = vld [vmem:[%s31204_s7 + $0xa88] ss:$16 sps:$4 sm:$0xff]   ;;  %v24147_v17 = vld [vmem:[%s31204_s7 + $0xaa4] ss:$16 sps:$4 sm:$0xff]  }
 0xa89   :  { %18063 = vmatprep.subr.bf16.mxu1 %v24060_v31  ;;  %v24150_v31 = vld [vmem:[%s31204_s7 + $0xaac] ss:$16 sps:$4 sm:$0xff]  }
 0xa8b   :  { %17531 = vmatpush1.bf16.msra.mxu0 %v24055_v58  ;;  %v24145_v58 = vld [vmem:[%s31204_s7 + $0xaa0] ss:$16 sps:$4 sm:$0xff]  }
 0xa8c   :  { %18064 = vmatpush1.bf16.msra.mxu1 %v24058_v32  ;;  %17532 = vmatprep.subr.bf16.mxu0 %v24063_v0  ;;  %v24148_v32 = vld [vmem:[%s31204_s7 + $0xaa8] ss:$16 sps:$4 sm:$0xff]   ;;  %v24153_v0 = vld [vmem:[%s31204_s7 + $0xac4] ss:$16 sps:$4 sm:$0xff]  }
 0xa8d   :  { %18065 = vmatprep.subr.bf16.mxu1 %v24066_v50  ;;  %v24156_v50 = vld [vmem:[%s31204_s7 + $0xacc] ss:$16 sps:$4 sm:$0xff]  }
 0xa8f   :  { %17533 = vmatpush1.bf16.msra.mxu0 %v24061_v61  ;;  %v24151_v61 = vld [vmem:[%s31204_s7 + $0xac0] ss:$16 sps:$4 sm:$0xff]  }
 0xa90   :  { %18066 = vmatpush1.bf16.msra.mxu1 %v24064_v16  ;;  %17534 = vmatprep.subr.bf16.mxu0 %v24069_v9  ;;  %v24154_v16 = vld [vmem:[%s31204_s7 + $0xac8] ss:$16 sps:$4 sm:$0xff]   ;;  %v24159_v9 = vld [vmem:[%s31204_s7 + $0xae4] ss:$16 sps:$4 sm:$0xff]  }
 0xa91   :  { %18067 = vmatprep.subr.bf16.mxu1 %v24072_v37  ;;  %v24162_v37 = vld [vmem:[%s31204_s7 + $0xaec] ss:$16 sps:$4 sm:$0xff]  }
 0xa93   :  { %17535 = vmatpush1.bf16.msra.mxu0 %v24067_v4  ;;  %v24157_v4 = vld [vmem:[%s31204_s7 + $0xae0] ss:$16 sps:$4 sm:$0xff]  }
 0xa94   :  { %18068 = vmatpush1.bf16.msra.mxu1 %v24070_v12  ;;  %17536 = vmatprep.subr.bf16.mxu0 %v24075_v55  ;;  %v24160_v12 = vld [vmem:[%s31204_s7 + $0xae8] ss:$16 sps:$4 sm:$0xff]   ;;  %v24165_v55 = vld [vmem:[%s31204_s7 + $0xb04] ss:$16 sps:$4 sm:$0xff]  }
 0xa95   :  { %18069 = vmatprep.subr.bf16.mxu1 %v24078_v11  ;;  %v24168_v11 = vld [vmem:[%s31204_s7 + $0xb0c] ss:$16 sps:$4 sm:$0xff]  }
 0xa97   :  { %17537 = vmatpush1.bf16.msra.mxu0 %v24073_v62  ;;  %v24163_v62 = vld [vmem:[%s31204_s7 + $0xb00] ss:$16 sps:$4 sm:$0xff]  }
 0xa98   :  { %18070 = vmatpush1.bf16.msra.mxu1 %v24076_v48  ;;  %17538 = vmatprep.subr.bf16.mxu0 %v24081_v28  ;;  %v24166_v48 = vld [vmem:[%s31204_s7 + $0xb08] ss:$16 sps:$4 sm:$0xff]   ;;  %v24171_v28 = vld [vmem:[%s31204_s7 + $0xb24] ss:$16 sps:$4 sm:$0xff]  }
 0xa99   :  { %18071 = vmatprep.subr.bf16.mxu1 %v24084_v7  ;;  %v24174_v7 = vld [vmem:[%s31204_s7 + $0xb2c] ss:$16 sps:$4 sm:$0xff]  }
 0xa9b   :  { %17539 = vmatpush1.bf16.msra.mxu0 %v24079_v1  ;;  %v24169_v1 = vld [vmem:[%s31204_s7 + $0xb20] ss:$16 sps:$4 sm:$0xff]  }
 0xa9c   :  { %18072 = vmatpush1.bf16.msra.mxu1 %v24082_v25  ;;  %17540 = vmatprep.subr.bf16.mxu0 %v24087_v52  ;;  %v24172_v25 = vld [vmem:[%s31204_s7 + $0xb28] ss:$16 sps:$4 sm:$0xff]   ;;  %v24177_v52 = vld [vmem:[%s31204_s7 + $0xb44] ss:$16 sps:$4 sm:$0xff]  }
 0xa9d   :  { %18073 = vmatprep.subr.bf16.mxu1 %v24090_v44  ;;  %v24180_v44 = vld [vmem:[%s31204_s7 + $0xb4c] ss:$16 sps:$4 sm:$0xff]  }
 0xa9f   :  { %17541 = vmatpush1.bf16.msra.mxu0 %v24085_v5  ;;  %v24175_v5 = vld [vmem:[%s31204_s7 + $0xb40] ss:$16 sps:$4 sm:$0xff]  }
 0xaa0   :  { %18074 = vmatpush1.bf16.msra.mxu1 %v24088_v19  ;;  %17542 = vmatprep.subr.bf16.mxu0 %v24093_v8  ;;  %v24178_v19 = vld [vmem:[%s31204_s7 + $0xb48] ss:$16 sps:$4 sm:$0xff]   ;;  %v24183_v8 = vld [vmem:[%s31204_s7 + $0xb64] ss:$16 sps:$4 sm:$0xff]  }
 0xaa1   :  { %18075 = vmatprep.subr.bf16.mxu1 %v24096_v10  ;;  %v24186_v10 = vld [vmem:[%s31204_s7 + $0xb6c] ss:$16 sps:$4 sm:$0xff]  }
 0xaa3   :  { %17543 = vmatpush1.bf16.msra.mxu0 %v24091_v35  ;;  %v24181_v35 = vld [vmem:[%s31204_s7 + $0xb60] ss:$16 sps:$4 sm:$0xff]  }
 0xaa4   :  { %18076 = vmatpush1.bf16.msra.mxu1 %v24094_v45  ;;  %17544 = vmatprep.subr.bf16.mxu0 %v24099_v38  ;;  %v24184_v45 = vld [vmem:[%s31204_s7 + $0xb68] ss:$16 sps:$4 sm:$0xff]   ;;  %v24189_v38 = vld [vmem:[%s31204_s7 + $0xb84] ss:$16 sps:$4 sm:$0xff]  }
 0xaa5   :  { %18077 = vmatprep.subr.bf16.mxu1 %v24102_v6  ;;  %v24192_v6 = vld [vmem:[%s31204_s7 + $0xb8c] ss:$16 sps:$4 sm:$0xff]  }
 0xaa7   :  { %17545 = vmatpush1.bf16.msra.mxu0 %v24097_v20  ;;  %v24187_v20 = vld [vmem:[%s31204_s7 + $0xb80] ss:$16 sps:$4 sm:$0xff]  }
 0xaa8   :  { %18078 = vmatpush1.bf16.msra.mxu1 %v24100_v36  ;;  %17546 = vmatprep.subr.bf16.mxu0 %v24105_v18  ;;  %v24190_v36 = vld [vmem:[%s31204_s7 + $0xb88] ss:$16 sps:$4 sm:$0xff]   ;;  %v24195_v18 = vld [vmem:[%s31204_s7 + $0xba4] ss:$16 sps:$4 sm:$0xff]  }
 0xaa9   :  { %18079 = vmatprep.subr.bf16.mxu1 %v24108_v22  ;;  %v24198_v22 = vld [vmem:[%s31204_s7 + $0xbac] ss:$16 sps:$4 sm:$0xff]  }
 0xaab   :  { %17547 = vmatpush1.bf16.msra.mxu0 %v24103_v41  ;;  %v24193_v41 = vld [vmem:[%s31204_s7 + $0xba0] ss:$16 sps:$4 sm:$0xff]  }
 0xaac   :  { %18080 = vmatpush1.bf16.msra.mxu1 %v24106_v40  ;;  %17548 = vmatprep.subr.bf16.mxu0 %v24111_v60  ;;  %v24196_v40 = vld [vmem:[%s31204_s7 + $0xba8] ss:$16 sps:$4 sm:$0xff]   ;;  %v24201_v60 = vld [vmem:[%s31204_s7 + $0xbc4] ss:$16 sps:$4 sm:$0xff]  }
 0xaad   :  { %18081 = vmatprep.subr.bf16.mxu1 %v24114_v53  ;;  %v24204_v53 = vld [vmem:[%s31204_s7 + $0xbcc] ss:$16 sps:$4 sm:$0xff]  }
 0xaaf   :  { %17549 = vmatpush1.bf16.msra.mxu0 %v24109_v56  ;;  %v13295_v56 = vcombine.high %v29383_v2, %v29383_v2  ;;  %v24210_v2 = vld [vmem:[%s31204_s7 + $0xbec] ss:$16 sps:$4 sm:$0xff]  }
 0xab0   :  { %18082 = vmatpush1.bf16.msra.mxu1 %v24112_v24  ;;  %17559 = vmatprep.subr.bf16.mxu0 %v24117_v59  ;;  %v24199_v24 = vld [vmem:[%s31204_s7 + $0xbc0] ss:$16 sps:$4 sm:$0xff]   ;;  %v24202_v59 = vld [vmem:[%s31204_s7 + $0xbc8] ss:$16 sps:$4 sm:$0xff]  }
 0xab1   :  { %18092 = vmatprep.subr.bf16.mxu1 %v24120_v33  ;;  %v24207_v33 = vld [vmem:[%s31204_s7 + $0xbe4] ss:$16 sps:$4 sm:$0xff]  }
 0xab2   :  { %17551 = vmatmul.mubr.bf16.vlgmr.msra.gmra.mrb[224].mxu0 %v29616_v21 }
 0xab3   :  { %18084 = vmatmul.mubr.bf16.vlgmr.msra.gmra.mrb[96].mxu1 %v29616_v21  ;;  %17560 = vmatpush1.bf16.msra.mxu0 %v24115_v63  ;;  %v29802_v63 = vrot.slane %v13295_v56, %v27841_v15  ;;  %v24292_v56 = vld [vmem:[%s31204_s7 + $0xda4] ss:$16 sps:$4 sm:$0xff]  }
 0xab4   :  { %17591 = vmatprep.mubr.bf16.mxu0 %v13342_v14  ;;  %18093 = vmatpush1.bf16.msra.mxu1 %v24118_v49  ;;  %v24205_v49 = vld [vmem:[%s31204_s7 + $0xbe0] ss:$16 sps:$4 sm:$0xff]  }
 0xab5   :  { %18124 = vmatprep.mubr.bf16.mxu1 %v13342_v14  ;;  %17561 = vmatprep.subr.bf16.mxu0 %v24123_v39  ;;  %v24208_v39 = vld [vmem:[%s31204_s7 + $0xbe8] ss:$16 sps:$4 sm:$0xff]   ;;  %v24213_v14 = vld [vmem:[%s31204_s7 + $0xc04] ss:$16 sps:$4 sm:$0xff]  }
 0xab6   :  { %18094 = vmatprep.subr.bf16.mxu1 %v24126_v23  ;;  %v24216_v23 = vld [vmem:[%s31204_s7 + $0xc0c] ss:$16 sps:$4 sm:$0xff]  }
 0xab7   :  { %17562 = vmatpush1.bf16.msra.mxu0 %v24121_v46  ;;  %v13311_v46 = vcombine.high %v29802_v63, %v29802_v63 }
 0xab8   :  { %18095 = vmatpush1.bf16.msra.mxu1 %v24124_v57  ;;  %17563 = vmatprep.subr.bf16.mxu0 %v24129_v13  ;;  %v24211_v57 = vld [vmem:[%s31204_s7 + $0xc00] ss:$16 sps:$4 sm:$0xff]   ;;  %v13340_v13 = vcombine.high %v29616_v21, %v29616_v21 }
 0xab9   :  { %18096 = vmatprep.subr.bf16.mxu1 %v24132_v51  ;;  %v24214_v51 = vld [vmem:[%s31204_s7 + $0xc08] ss:$16 sps:$4 sm:$0xff]   ;;  %v24218_v21 = vld [vmem:[%s31204_s7 + $0xc20] ss:$16 sps:$4 sm:$0xff]  }
 0xabb   :  { %17564 = vmatpush1.bf16.msra.mxu0 %v24127_v43  ;;  %v24220_v43 = vld [vmem:[%s31204_s7 + $0xc24] ss:$16 sps:$4 sm:$0xff]  }
 0xabc   :  { %18097 = vmatpush1.bf16.msra.mxu1 %v24130_v26  ;;  %17565 = vmatprep.subr.bf16.mxu0 %v24135_v34  ;;  %v29830_v26 = vrot.slane %v13311_v46, %v27841_v15  ;;  %v24223_v34 = vld [vmem:[%s31204_s7 + $0xc2c] ss:$16 sps:$4 sm:$0xff]  }
 0xabd   :  { %18098 = vmatprep.subr.bf16.mxu1 %v24138_v47  ;;  %v24221_v47 = vld [vmem:[%s31204_s7 + $0xc28] ss:$16 sps:$4 sm:$0xff]   ;;  %v24307_v46 = vld [vmem:[%s31204_s7 + $0xdec] ss:$16 sps:$4 sm:$0xff]  }
 0xabf   :  { %17566 = vmatpush1.bf16.msra.mxu0 %v24133_v54  ;;  %v24226_v54 = vld [vmem:[%s31204_s7 + $0xc44] ss:$16 sps:$4 sm:$0xff]  }
 0xac0   :  { %18099 = vmatpush1.bf16.msra.mxu1 %v24136_v29  ;;  %17567 = vmatprep.subr.bf16.mxu0 %v24141_v30  ;;  %v24229_v29 = vld [vmem:[%s31204_s7 + $0xc4c] ss:$16 sps:$4 sm:$0xff]   ;;  %v24224_v30 = vld [vmem:[%s31204_s7 + $0xc40] ss:$16 sps:$4 sm:$0xff]  }
 0xac1   :  { %18100 = vmatprep.subr.bf16.mxu1 %v24144_v3  ;;  %v24227_v3 = vld [vmem:[%s31204_s7 + $0xc48] ss:$16 sps:$4 sm:$0xff]  }
 0xac3   :  { %17568 = vmatpush1.bf16.msra.mxu0 %v24139_v27  ;;  %v24232_v27 = vld [vmem:[%s31204_s7 + $0xc64] ss:$16 sps:$4 sm:$0xff]  }
 0xac4   :  { %18101 = vmatpush1.bf16.msra.mxu1 %v24142_v42  ;;  %17569 = vmatprep.subr.bf16.mxu0 %v24147_v17  ;;  %v24235_v42 = vld [vmem:[%s31204_s7 + $0xc6c] ss:$16 sps:$4 sm:$0xff]   ;;  %v24230_v17 = vld [vmem:[%s31204_s7 + $0xc60] ss:$16 sps:$4 sm:$0xff]  }
 0xac5   :  { %18102 = vmatprep.subr.bf16.mxu1 %v24150_v31  ;;  %v24233_v31 = vld [vmem:[%s31204_s7 + $0xc68] ss:$16 sps:$4 sm:$0xff]  }
 0xac7   :  { %17570 = vmatpush1.bf16.msra.mxu0 %v24145_v58  ;;  %v24238_v58 = vld [vmem:[%s31204_s7 + $0xc84] ss:$16 sps:$4 sm:$0xff]  }
 0xac8   :  { %18103 = vmatpush1.bf16.msra.mxu1 %v24148_v32  ;;  %17571 = vmatprep.subr.bf16.mxu0 %v24153_v0  ;;  %v24241_v32 = vld [vmem:[%s31204_s7 + $0xc8c] ss:$16 sps:$4 sm:$0xff]   ;;  %v24236_v0 = vld [vmem:[%s31204_s7 + $0xc80] ss:$16 sps:$4 sm:$0xff]  }
 0xac9   :  { %18104 = vmatprep.subr.bf16.mxu1 %v24156_v50  ;;  %v24239_v50 = vld [vmem:[%s31204_s7 + $0xc88] ss:$16 sps:$4 sm:$0xff]  }
 0xacb   :  { %17572 = vmatpush1.bf16.msra.mxu0 %v24151_v61  ;;  %v24244_v61 = vld [vmem:[%s31204_s7 + $0xca4] ss:$16 sps:$4 sm:$0xff]  }
 0xacc   :  { %18105 = vmatpush1.bf16.msra.mxu1 %v24154_v16  ;;  %17573 = vmatprep.subr.bf16.mxu0 %v24159_v9  ;;  %v24247_v16 = vld [vmem:[%s31204_s7 + $0xcac] ss:$16 sps:$4 sm:$0xff]   ;;  %v24242_v9 = vld [vmem:[%s31204_s7 + $0xca0] ss:$16 sps:$4 sm:$0xff]  }
 0xacd   :  { %18106 = vmatprep.subr.bf16.mxu1 %v24162_v37  ;;  %v24245_v37 = vld [vmem:[%s31204_s7 + $0xca8] ss:$16 sps:$4 sm:$0xff]  }
 0xacf   :  { %17574 = vmatpush1.bf16.msra.mxu0 %v24157_v4  ;;  %v24250_v4 = vld [vmem:[%s31204_s7 + $0xcc4] ss:$16 sps:$4 sm:$0xff]  }
 0xad0   :  { %18107 = vmatpush1.bf16.msra.mxu1 %v24160_v12  ;;  %17575 = vmatprep.subr.bf16.mxu0 %v24165_v55  ;;  %v24253_v12 = vld [vmem:[%s31204_s7 + $0xccc] ss:$16 sps:$4 sm:$0xff]   ;;  %v24248_v55 = vld [vmem:[%s31204_s7 + $0xcc0] ss:$16 sps:$4 sm:$0xff]  }
 0xad1   :  { %18108 = vmatprep.subr.bf16.mxu1 %v24168_v11  ;;  %v24251_v11 = vld [vmem:[%s31204_s7 + $0xcc8] ss:$16 sps:$4 sm:$0xff]  }
 0xad3   :  { %17576 = vmatpush1.bf16.msra.mxu0 %v24163_v62  ;;  %v24256_v62 = vld [vmem:[%s31204_s7 + $0xce4] ss:$16 sps:$4 sm:$0xff]  }
 0xad4   :  { %18109 = vmatpush1.bf16.msra.mxu1 %v24166_v48  ;;  %17577 = vmatprep.subr.bf16.mxu0 %v24171_v28  ;;  %v24259_v48 = vld [vmem:[%s31204_s7 + $0xcec] ss:$16 sps:$4 sm:$0xff]   ;;  %v24254_v28 = vld [vmem:[%s31204_s7 + $0xce0] ss:$16 sps:$4 sm:$0xff]  }
 0xad5   :  { %18110 = vmatprep.subr.bf16.mxu1 %v24174_v7  ;;  %v24257_v7 = vld [vmem:[%s31204_s7 + $0xce8] ss:$16 sps:$4 sm:$0xff]  }
 0xad7   :  { %17578 = vmatpush1.bf16.msra.mxu0 %v24169_v1  ;;  %v24262_v1 = vld [vmem:[%s31204_s7 + $0xd04] ss:$16 sps:$4 sm:$0xff]  }
 0xad8   :  { %18111 = vmatpush1.bf16.msra.mxu1 %v24172_v25  ;;  %17579 = vmatprep.subr.bf16.mxu0 %v24177_v52  ;;  %v24265_v25 = vld [vmem:[%s31204_s7 + $0xd0c] ss:$16 sps:$4 sm:$0xff]   ;;  %v24260_v52 = vld [vmem:[%s31204_s7 + $0xd00] ss:$16 sps:$4 sm:$0xff]  }
 0xad9   :  { %18112 = vmatprep.subr.bf16.mxu1 %v24180_v44  ;;  %v24263_v44 = vld [vmem:[%s31204_s7 + $0xd08] ss:$16 sps:$4 sm:$0xff]  }
 0xadb   :  { %17580 = vmatpush1.bf16.msra.mxu0 %v24175_v5  ;;  %v24268_v5 = vld [vmem:[%s31204_s7 + $0xd24] ss:$16 sps:$4 sm:$0xff]  }
 0xadc   :  { %18113 = vmatpush1.bf16.msra.mxu1 %v24178_v19  ;;  %17581 = vmatprep.subr.bf16.mxu0 %v24183_v8  ;;  %v24271_v19 = vld [vmem:[%s31204_s7 + $0xd2c] ss:$16 sps:$4 sm:$0xff]   ;;  %v24266_v8 = vld [vmem:[%s31204_s7 + $0xd20] ss:$16 sps:$4 sm:$0xff]  }
 0xadd   :  { %18114 = vmatprep.subr.bf16.mxu1 %v24186_v10  ;;  %v24269_v10 = vld [vmem:[%s31204_s7 + $0xd28] ss:$16 sps:$4 sm:$0xff]  }
 0xadf   :  { %17582 = vmatpush1.bf16.msra.mxu0 %v24181_v35  ;;  %v24274_v35 = vld [vmem:[%s31204_s7 + $0xd44] ss:$16 sps:$4 sm:$0xff]  }
 0xae0   :  { %18115 = vmatpush1.bf16.msra.mxu1 %v24184_v45  ;;  %17583 = vmatprep.subr.bf16.mxu0 %v24189_v38  ;;  %v24277_v45 = vld [vmem:[%s31204_s7 + $0xd4c] ss:$16 sps:$4 sm:$0xff]   ;;  %v24272_v38 = vld [vmem:[%s31204_s7 + $0xd40] ss:$16 sps:$4 sm:$0xff]  }
 0xae1   :  { %18116 = vmatprep.subr.bf16.mxu1 %v24192_v6  ;;  %v24275_v6 = vld [vmem:[%s31204_s7 + $0xd48] ss:$16 sps:$4 sm:$0xff]  }
 0xae3   :  { %17584 = vmatpush1.bf16.msra.mxu0 %v24187_v20  ;;  %v24280_v20 = vld [vmem:[%s31204_s7 + $0xd64] ss:$16 sps:$4 sm:$0xff]  }
 0xae4   :  { %18117 = vmatpush1.bf16.msra.mxu1 %v24190_v36  ;;  %17585 = vmatprep.subr.bf16.mxu0 %v24195_v18  ;;  %v24283_v36 = vld [vmem:[%s31204_s7 + $0xd6c] ss:$16 sps:$4 sm:$0xff]   ;;  %v24278_v18 = vld [vmem:[%s31204_s7 + $0xd60] ss:$16 sps:$4 sm:$0xff]  }
 0xae5   :  { %18118 = vmatprep.subr.bf16.mxu1 %v24198_v22  ;;  %v24281_v22 = vld [vmem:[%s31204_s7 + $0xd68] ss:$16 sps:$4 sm:$0xff]  }
 0xae7   :  { %17586 = vmatpush1.bf16.msra.mxu0 %v24193_v41  ;;  %v24286_v41 = vld [vmem:[%s31204_s7 + $0xd84] ss:$16 sps:$4 sm:$0xff]  }
 0xae8   :  { %18119 = vmatpush1.bf16.msra.mxu1 %v24196_v40  ;;  %17587 = vmatprep.subr.bf16.mxu0 %v24201_v60  ;;  %v24289_v40 = vld [vmem:[%s31204_s7 + $0xd8c] ss:$16 sps:$4 sm:$0xff]   ;;  %v24284_v60 = vld [vmem:[%s31204_s7 + $0xd80] ss:$16 sps:$4 sm:$0xff]  }
 0xae9   :  { %18120 = vmatprep.subr.bf16.mxu1 %v24204_v53  ;;  %v24287_v53 = vld [vmem:[%s31204_s7 + $0xd88] ss:$16 sps:$4 sm:$0xff]  }
 0xaeb   :  { %17588 = vmatpush1.bf16.msra.mxu0 %v24199_v24  ;;  %v24295_v24 = vld [vmem:[%s31204_s7 + $0xdac] ss:$16 sps:$4 sm:$0xff]  }
 0xaec   :  { %18121 = vmatpush1.bf16.msra.mxu1 %v24202_v59  ;;  %17589 = vmatprep.subr.bf16.mxu0 %v24207_v33  ;;  %v24290_v59 = vld [vmem:[%s31204_s7 + $0xda0] ss:$16 sps:$4 sm:$0xff]   ;;  %v24293_v33 = vld [vmem:[%s31204_s7 + $0xda8] ss:$16 sps:$4 sm:$0xff]  }
 0xaed   :  { %18122 = vmatprep.subr.bf16.mxu1 %v24210_v2  ;;  %v24298_v2 = vld [vmem:[%s31204_s7 + $0xdc4] ss:$16 sps:$4 sm:$0xff]  }
 0xaef   :  { %17590 = vmatpush1.bf16.msra.mxu0 %v24205_v49  ;;  %v24301_v49 = vld [vmem:[%s31204_s7 + $0xdcc] ss:$16 sps:$4 sm:$0xff]  }
 0xaf0   :  { %18123 = vmatpush1.bf16.msra.mxu1 %v24208_v39  ;;  %17600 = vmatprep.subr.bf16.mxu0 %v24213_v14  ;;  %v24296_v39 = vld [vmem:[%s31204_s7 + $0xdc0] ss:$16 sps:$4 sm:$0xff]   ;;  %v24299_v14 = vld [vmem:[%s31204_s7 + $0xdc8] ss:$16 sps:$4 sm:$0xff]  }
 0xaf1   :  { %18133 = vmatprep.subr.bf16.mxu1 %v24216_v23  ;;  %v24304_v23 = vld [vmem:[%s31204_s7 + $0xde4] ss:$16 sps:$4 sm:$0xff]  }
 0xaf2   :  { %17592 = vmatmul.mubr.bf16.vlgmr.msra.gmra.mrb[224].mxu0 %v13340_v13 }
 0xaf3   :  { %18125 = vmatmul.mubr.bf16.vlgmr.msra.gmra.mrb[96].mxu1 %v13340_v13  ;;  %17601 = vmatpush1.bf16.msra.mxu0 %v24211_v57  ;;  %v24302_v57 = vld [vmem:[%s31204_s7 + $0xde0] ss:$16 sps:$4 sm:$0xff]   ;;  %v24305_v13 = vld [vmem:[%s31204_s7 + $0xde8] ss:$16 sps:$4 sm:$0xff]  }
 0xaf4   :  { %17632 = vmatprep.mubr.bf16.mxu0 %v29830_v26  ;;  %18134 = vmatpush1.bf16.msra.mxu1 %v24214_v51  ;;  %v24310_v51 = vld [vmem:[%s31204_s7 + $0xe04] ss:$16 sps:$4 sm:$0xff]  }
 0xaf5   :  { %18165 = vmatprep.mubr.bf16.mxu1 %v29830_v26  ;;  %17602 = vmatprep.subr.bf16.mxu0 %v24220_v43  ;;  %v24313_v43 = vld [vmem:[%s31204_s7 + $0xe0c] ss:$16 sps:$4 sm:$0xff]  }
 0xaf6   :  { %18135 = vmatprep.subr.bf16.mxu1 %v24223_v34  ;;  %v24308_v34 = vld [vmem:[%s31204_s7 + $0xe00] ss:$16 sps:$4 sm:$0xff]  }
 0xaf7   :  { %17603 = vmatpush1.bf16.msra.mxu0 %v24218_v21  ;;  %v30022_v21 = vrot.slane %v29802_v63, %v27841_v15  ;;  %v24319_v63 = vld [vmem:[%s31204_s7 + $0xe2c] ss:$16 sps:$4 sm:$0xff]  }
 0xaf8   :  { %18136 = vmatpush1.bf16.msra.mxu1 %v24221_v47  ;;  %17604 = vmatprep.subr.bf16.mxu0 %v24226_v54  ;;  %v24311_v47 = vld [vmem:[%s31204_s7 + $0xe08] ss:$16 sps:$4 sm:$0xff]   ;;  %v24316_v54 = vld [vmem:[%s31204_s7 + $0xe24] ss:$16 sps:$4 sm:$0xff]  }
 0xaf9   :  { %18137 = vmatprep.subr.bf16.mxu1 %v24229_v29  ;;  %v13343_v29 = vcombine.high %v29830_v26, %v29830_v26  ;;  %v24322_v26 = vld [vmem:[%s31204_s7 + $0xe44] ss:$16 sps:$4 sm:$0xff]  }
 0xafb   :  { %17605 = vmatpush1.bf16.msra.mxu0 %v24224_v30  ;;  %v24314_v30 = vld [vmem:[%s31204_s7 + $0xe20] ss:$16 sps:$4 sm:$0xff]  }
 0xafc   :  { %18138 = vmatpush1.bf16.msra.mxu1 %v24227_v3  ;;  %17606 = vmatprep.subr.bf16.mxu0 %v24232_v27  ;;  %v24317_v3 = vld [vmem:[%s31204_s7 + $0xe28] ss:$16 sps:$4 sm:$0xff]   ;;  %v24325_v27 = vld [vmem:[%s31204_s7 + $0xe4c] ss:$16 sps:$4 sm:$0xff]  }
 0xafd   :  { %18139 = vmatprep.subr.bf16.mxu1 %v24235_v42  ;;  %v24320_v42 = vld [vmem:[%s31204_s7 + $0xe40] ss:$16 sps:$4 sm:$0xff]  }
 0xaff   :  { %17607 = vmatpush1.bf16.msra.mxu0 %v24230_v17  ;;  %v24323_v17 = vld [vmem:[%s31204_s7 + $0xe48] ss:$16 sps:$4 sm:$0xff]  }
 0xb00   :  { %18140 = vmatpush1.bf16.msra.mxu1 %v24233_v31  ;;  %17608 = vmatprep.subr.bf16.mxu0 %v24238_v58  ;;  %v24328_v31 = vld [vmem:[%s31204_s7 + $0xe64] ss:$16 sps:$4 sm:$0xff]   ;;  %v24331_v58 = vld [vmem:[%s31204_s7 + $0xe6c] ss:$16 sps:$4 sm:$0xff]  }
 0xb01   :  { %18141 = vmatprep.subr.bf16.mxu1 %v24241_v32  ;;  %v24326_v32 = vld [vmem:[%s31204_s7 + $0xe60] ss:$16 sps:$4 sm:$0xff]  }
 0xb03   :  { %17609 = vmatpush1.bf16.msra.mxu0 %v24236_v0  ;;  %v24329_v0 = vld [vmem:[%s31204_s7 + $0xe68] ss:$16 sps:$4 sm:$0xff]  }
 0xb04   :  { %18142 = vmatpush1.bf16.msra.mxu1 %v24239_v50  ;;  %17610 = vmatprep.subr.bf16.mxu0 %v24244_v61  ;;  %v24334_v50 = vld [vmem:[%s31204_s7 + $0xe84] ss:$16 sps:$4 sm:$0xff]   ;;  %v24337_v61 = vld [vmem:[%s31204_s7 + $0xe8c] ss:$16 sps:$4 sm:$0xff]  }
 0xb05   :  { %18143 = vmatprep.subr.bf16.mxu1 %v24247_v16  ;;  %v24332_v16 = vld [vmem:[%s31204_s7 + $0xe80] ss:$16 sps:$4 sm:$0xff]  }
 0xb07   :  { %17611 = vmatpush1.bf16.msra.mxu0 %v24242_v9  ;;  %v24335_v9 = vld [vmem:[%s31204_s7 + $0xe88] ss:$16 sps:$4 sm:$0xff]  }
 0xb08   :  { %18144 = vmatpush1.bf16.msra.mxu1 %v24245_v37  ;;  %17612 = vmatprep.subr.bf16.mxu0 %v24250_v4  ;;  %v24340_v37 = vld [vmem:[%s31204_s7 + $0xea4] ss:$16 sps:$4 sm:$0xff]   ;;  %v24343_v4 = vld [vmem:[%s31204_s7 + $0xeac] ss:$16 sps:$4 sm:$0xff]  }
 0xb09   :  { %18145 = vmatprep.subr.bf16.mxu1 %v24253_v12  ;;  %v24338_v12 = vld [vmem:[%s31204_s7 + $0xea0] ss:$16 sps:$4 sm:$0xff]  }
 0xb0b   :  { %17613 = vmatpush1.bf16.msra.mxu0 %v24248_v55  ;;  %v24341_v55 = vld [vmem:[%s31204_s7 + $0xea8] ss:$16 sps:$4 sm:$0xff]  }
 0xb0c   :  { %18146 = vmatpush1.bf16.msra.mxu1 %v24251_v11  ;;  %17614 = vmatprep.subr.bf16.mxu0 %v24256_v62  ;;  %v24346_v11 = vld [vmem:[%s31204_s7 + $0xec4] ss:$16 sps:$4 sm:$0xff]   ;;  %v24349_v62 = vld [vmem:[%s31204_s7 + $0xecc] ss:$16 sps:$4 sm:$0xff]  }
 0xb0d   :  { %18147 = vmatprep.subr.bf16.mxu1 %v24259_v48  ;;  %v24344_v48 = vld [vmem:[%s31204_s7 + $0xec0] ss:$16 sps:$4 sm:$0xff]  }
 0xb0f   :  { %17615 = vmatpush1.bf16.msra.mxu0 %v24254_v28  ;;  %v24347_v28 = vld [vmem:[%s31204_s7 + $0xec8] ss:$16 sps:$4 sm:$0xff]  }
 0xb10   :  { %18148 = vmatpush1.bf16.msra.mxu1 %v24257_v7  ;;  %17616 = vmatprep.subr.bf16.mxu0 %v24262_v1  ;;  %v24352_v7 = vld [vmem:[%s31204_s7 + $0xee4] ss:$16 sps:$4 sm:$0xff]   ;;  %v24355_v1 = vld [vmem:[%s31204_s7 + $0xeec] ss:$16 sps:$4 sm:$0xff]  }
 0xb11   :  { %18149 = vmatprep.subr.bf16.mxu1 %v24265_v25  ;;  %v24350_v25 = vld [vmem:[%s31204_s7 + $0xee0] ss:$16 sps:$4 sm:$0xff]  }
 0xb13   :  { %17617 = vmatpush1.bf16.msra.mxu0 %v24260_v52  ;;  %v24353_v52 = vld [vmem:[%s31204_s7 + $0xee8] ss:$16 sps:$4 sm:$0xff]  }
 0xb14   :  { %18150 = vmatpush1.bf16.msra.mxu1 %v24263_v44  ;;  %17618 = vmatprep.subr.bf16.mxu0 %v24268_v5  ;;  %v24358_v44 = vld [vmem:[%s31204_s7 + $0xf04] ss:$16 sps:$4 sm:$0xff]   ;;  %v24361_v5 = vld [vmem:[%s31204_s7 + $0xf0c] ss:$16 sps:$4 sm:$0xff]  }
 0xb15   :  { %18151 = vmatprep.subr.bf16.mxu1 %v24271_v19  ;;  %v24356_v19 = vld [vmem:[%s31204_s7 + $0xf00] ss:$16 sps:$4 sm:$0xff]  }
 0xb17   :  { %17619 = vmatpush1.bf16.msra.mxu0 %v24266_v8  ;;  %v24359_v8 = vld [vmem:[%s31204_s7 + $0xf08] ss:$16 sps:$4 sm:$0xff]  }
 0xb18   :  { %18152 = vmatpush1.bf16.msra.mxu1 %v24269_v10  ;;  %17620 = vmatprep.subr.bf16.mxu0 %v24274_v35  ;;  %v24364_v10 = vld [vmem:[%s31204_s7 + $0xf24] ss:$16 sps:$4 sm:$0xff]   ;;  %v24367_v35 = vld [vmem:[%s31204_s7 + $0xf2c] ss:$16 sps:$4 sm:$0xff]  }
 0xb19   :  { %18153 = vmatprep.subr.bf16.mxu1 %v24277_v45  ;;  %v24362_v45 = vld [vmem:[%s31204_s7 + $0xf20] ss:$16 sps:$4 sm:$0xff]  }
 0xb1b   :  { %17621 = vmatpush1.bf16.msra.mxu0 %v24272_v38  ;;  %v24365_v38 = vld [vmem:[%s31204_s7 + $0xf28] ss:$16 sps:$4 sm:$0xff]  }
 0xb1c   :  { %18154 = vmatpush1.bf16.msra.mxu1 %v24275_v6  ;;  %17622 = vmatprep.subr.bf16.mxu0 %v24280_v20  ;;  %v24370_v6 = vld [vmem:[%s31204_s7 + $0xf44] ss:$16 sps:$4 sm:$0xff]   ;;  %v24373_v20 = vld [vmem:[%s31204_s7 + $0xf4c] ss:$16 sps:$4 sm:$0xff]  }
 0xb1d   :  { %18155 = vmatprep.subr.bf16.mxu1 %v24283_v36  ;;  %v24368_v36 = vld [vmem:[%s31204_s7 + $0xf40] ss:$16 sps:$4 sm:$0xff]  }
 0xb1f   :  { %17623 = vmatpush1.bf16.msra.mxu0 %v24278_v18  ;;  %v24371_v18 = vld [vmem:[%s31204_s7 + $0xf48] ss:$16 sps:$4 sm:$0xff]  }
 0xb20   :  { %18156 = vmatpush1.bf16.msra.mxu1 %v24281_v22  ;;  %17624 = vmatprep.subr.bf16.mxu0 %v24286_v41  ;;  %v24376_v22 = vld [vmem:[%s31204_s7 + $0xf64] ss:$16 sps:$4 sm:$0xff]   ;;  %v24379_v41 = vld [vmem:[%s31204_s7 + $0xf6c] ss:$16 sps:$4 sm:$0xff]  }
 0xb21   :  { %18157 = vmatprep.subr.bf16.mxu1 %v24289_v40  ;;  %v24374_v40 = vld [vmem:[%s31204_s7 + $0xf60] ss:$16 sps:$4 sm:$0xff]  }
 0xb23   :  { %17625 = vmatpush1.bf16.msra.mxu0 %v24284_v60  ;;  %v24377_v60 = vld [vmem:[%s31204_s7 + $0xf68] ss:$16 sps:$4 sm:$0xff]  }
 0xb24   :  { %18158 = vmatpush1.bf16.msra.mxu1 %v24287_v53  ;;  %17626 = vmatprep.subr.bf16.mxu0 %v24292_v56  ;;  %v24382_v53 = vld [vmem:[%s31204_s7 + $0xf84] ss:$16 sps:$4 sm:$0xff]   ;;  %v24385_v56 = vld [vmem:[%s31204_s7 + $0xf8c] ss:$16 sps:$4 sm:$0xff]  }
 0xb25   :  { %18159 = vmatprep.subr.bf16.mxu1 %v24295_v24  ;;  %v24380_v24 = vld [vmem:[%s31204_s7 + $0xf80] ss:$16 sps:$4 sm:$0xff]  }
 0xb27   :  { %17627 = vmatpush1.bf16.msra.mxu0 %v24290_v59  ;;  %v24383_v59 = vld [vmem:[%s31204_s7 + $0xf88] ss:$16 sps:$4 sm:$0xff]  }
 0xb28   :  { %18160 = vmatpush1.bf16.msra.mxu1 %v24293_v33  ;;  %17628 = vmatprep.subr.bf16.mxu0 %v24298_v2  ;;  %v24388_v33 = vld [vmem:[%s31204_s7 + $0xfa4] ss:$16 sps:$4 sm:$0xff]   ;;  %v24391_v2 = vld [vmem:[%s31204_s7 + $0xfac] ss:$16 sps:$4 sm:$0xff]  }
 0xb29   :  { %18161 = vmatprep.subr.bf16.mxu1 %v24301_v49  ;;  %v24386_v49 = vld [vmem:[%s31204_s7 + $0xfa0] ss:$16 sps:$4 sm:$0xff]  }
 0xb2b   :  { %17629 = vmatpush1.bf16.msra.mxu0 %v24296_v39  ;;  %v24389_v39 = vld [vmem:[%s31204_s7 + $0xfa8] ss:$16 sps:$4 sm:$0xff]  }
 0xb2c   :  { %18162 = vmatpush1.bf16.msra.mxu1 %v24299_v14  ;;  %17630 = vmatprep.subr.bf16.mxu0 %v24304_v23  ;;  %v24394_v14 = vld [vmem:[%s31204_s7 + $0xfc4] ss:$16 sps:$4 sm:$0xff]   ;;  %v24397_v23 = vld [vmem:[%s31204_s7 + $0xfcc] ss:$16 sps:$4 sm:$0xff]  }
 0xb2d   :  { %18163 = vmatprep.subr.bf16.mxu1 %v24307_v46  ;;  %v24392_v46 = vld [vmem:[%s31204_s7 + $0xfc0] ss:$16 sps:$4 sm:$0xff]  }
 0xb2f   :  { %17631 = vmatpush1.bf16.msra.mxu0 %v24302_v57  ;;  %v30196_v57 = vld [vmem:[#allocation5 + $0x10] sm:$0xff] }
 0xb30   :  { %18164 = vmatpush1.bf16.msra.mxu1 %v24305_v13  ;;  %17641 = vmatprep.subr.bf16.mxu0 %v24310_v51  ;;  %v24395_v13 = vld [vmem:[%s31204_s7 + $0xfc8] ss:$16 sps:$4 sm:$0xff]   ;;  %v24400_v51 = vld [vmem:[%s31204_s7 + $0xfe4] ss:$16 sps:$4 sm:$0xff]  }
 0xb31   :  { %18174 = vmatprep.subr.bf16.mxu1 %v24313_v43  ;;  %v24403_v43 = vld [vmem:[%s31204_s7 + $0xfec] ss:$16 sps:$4 sm:$0xff]  }
 0xb32   :  { %17633 = vmatmul.mubr.bf16.vlgmr.msra.gmra.mrb[224].mxu0 %v30022_v21 }
 0xb33   :  { %18166 = vmatmul.mubr.bf16.vlgmr.msra.gmra.mrb[96].mxu1 %v30022_v21  ;;  %17642 = vmatpush1.bf16.msra.mxu0 %v24308_v34  ;;  %v30209_v34 = vrot.slane %v30196_v57, %v27841_v15 }
 0xb34   :  { %17673 = vmatprep.mubr.bf16.mxu0 %v13343_v29  ;;  %18175 = vmatpush1.bf16.msra.mxu1 %v24311_v47  ;;  %v24398_v47 = vld [vmem:[%s31204_s7 + $0xfe0] ss:$16 sps:$4 sm:$0xff]  }
 0xb35   :  { %18206 = vmatprep.mubr.bf16.mxu1 %v13343_v29  ;;  %17643 = vmatprep.subr.bf16.mxu0 %v24316_v54  ;;  %v24401_v54 = vld [vmem:[%s31204_s7 + $0xfe8] ss:$16 sps:$4 sm:$0xff]   ;;  %v24406_v29 = vld [vmem:[%s31204_s7 + $0x1004] ss:$16 sps:$4 sm:$0xff]  }
 0xb36   :  { %18176 = vmatprep.subr.bf16.mxu1 %v24319_v63  ;;  %v24409_v63 = vld [vmem:[%s31204_s7 + $0x100c] ss:$16 sps:$4 sm:$0xff]  }
 0xb37   :  { %17644 = vmatpush1.bf16.msra.mxu0 %v24314_v30  ;;  %v13359_v30 = vcombine.high %v30209_v34, %v30209_v34 }
 0xb38   :  { %18177 = vmatpush1.bf16.msra.mxu1 %v24317_v3  ;;  %17645 = vmatprep.subr.bf16.mxu0 %v24322_v26  ;;  %v24404_v3 = vld [vmem:[%s31204_s7 + $0x1000] ss:$16 sps:$4 sm:$0xff]   ;;  %v13341_v26 = vcombine.high %v30022_v21, %v30022_v21 }
 0xb39   :  { %18178 = vmatprep.subr.bf16.mxu1 %v24325_v27  ;;  %v24407_v27 = vld [vmem:[%s31204_s7 + $0x1008] ss:$16 sps:$4 sm:$0xff]   ;;  %v24410_v21 = vld [vmem:[%s31204_s7 + $0x1020] ss:$16 sps:$4 sm:$0xff]  }
 0xb3b   :  { %17646 = vmatpush1.bf16.msra.mxu0 %v24320_v42  ;;  %v24412_v42 = vld [vmem:[%s31204_s7 + $0x1024] ss:$16 sps:$4 sm:$0xff]  }
 0xb3c   :  { %18179 = vmatpush1.bf16.msra.mxu1 %v24323_v17  ;;  %17647 = vmatprep.subr.bf16.mxu0 %v24328_v31  ;;  %v30237_v17 = vrot.slane %v13359_v30, %v27841_v15  ;;  %v24415_v31 = vld [vmem:[%s31204_s7 + $0x102c] ss:$16 sps:$4 sm:$0xff]   ;;  %v24496_v30 = vld [vmem:[%s31204_s7 + $0x11e4] ss:$16 sps:$4 sm:$0xff]  }
 0xb3d   :  { %18180 = vmatprep.subr.bf16.mxu1 %v24331_v58  ;;  %v24413_v58 = vld [vmem:[%s31204_s7 + $0x1028] ss:$16 sps:$4 sm:$0xff]  }
 0xb3f   :  { %17648 = vmatpush1.bf16.msra.mxu0 %v24326_v32  ;;  %v24418_v32 = vld [vmem:[%s31204_s7 + $0x1044] ss:$16 sps:$4 sm:$0xff]  }
 0xb40   :  { %18181 = vmatpush1.bf16.msra.mxu1 %v24329_v0  ;;  %17649 = vmatprep.subr.bf16.mxu0 %v24334_v50  ;;  %v24421_v0 = vld [vmem:[%s31204_s7 + $0x104c] ss:$16 sps:$4 sm:$0xff]   ;;  %v24416_v50 = vld [vmem:[%s31204_s7 + $0x1040] ss:$16 sps:$4 sm:$0xff]  }
 0xb41   :  { %18182 = vmatprep.subr.bf16.mxu1 %v24337_v61  ;;  %v24419_v61 = vld [vmem:[%s31204_s7 + $0x1048] ss:$16 sps:$4 sm:$0xff]  }
 0xb43   :  { %17650 = vmatpush1.bf16.msra.mxu0 %v24332_v16  ;;  %v24424_v16 = vld [vmem:[%s31204_s7 + $0x1064] ss:$16 sps:$4 sm:$0xff]  }
 0xb44   :  { %18183 = vmatpush1.bf16.msra.mxu1 %v24335_v9  ;;  %17651 = vmatprep.subr.bf16.mxu0 %v24340_v37  ;;  %v24427_v9 = vld [vmem:[%s31204_s7 + $0x106c] ss:$16 sps:$4 sm:$0xff]   ;;  %v24422_v37 = vld [vmem:[%s31204_s7 + $0x1060] ss:$16 sps:$4 sm:$0xff]  }
 0xb45   :  { %18184 = vmatprep.subr.bf16.mxu1 %v24343_v4  ;;  %v24425_v4 = vld [vmem:[%s31204_s7 + $0x1068] ss:$16 sps:$4 sm:$0xff]  }
 0xb47   :  { %17652 = vmatpush1.bf16.msra.mxu0 %v24338_v12  ;;  %v24430_v12 = vld [vmem:[%s31204_s7 + $0x1084] ss:$16 sps:$4 sm:$0xff]  }
 0xb48   :  { %18185 = vmatpush1.bf16.msra.mxu1 %v24341_v55  ;;  %17653 = vmatprep.subr.bf16.mxu0 %v24346_v11  ;;  %v24433_v55 = vld [vmem:[%s31204_s7 + $0x108c] ss:$16 sps:$4 sm:$0xff]   ;;  %v24428_v11 = vld [vmem:[%s31204_s7 + $0x1080] ss:$16 sps:$4 sm:$0xff]  }
 0xb49   :  { %18186 = vmatprep.subr.bf16.mxu1 %v24349_v62  ;;  %v24431_v62 = vld [vmem:[%s31204_s7 + $0x1088] ss:$16 sps:$4 sm:$0xff]  }
 0xb4b   :  { %17654 = vmatpush1.bf16.msra.mxu0 %v24344_v48  ;;  %v24436_v48 = vld [vmem:[%s31204_s7 + $0x10a4] ss:$16 sps:$4 sm:$0xff]  }
 0xb4c   :  { %18187 = vmatpush1.bf16.msra.mxu1 %v24347_v28  ;;  %17655 = vmatprep.subr.bf16.mxu0 %v24352_v7  ;;  %v24439_v28 = vld [vmem:[%s31204_s7 + $0x10ac] ss:$16 sps:$4 sm:$0xff]   ;;  %v24434_v7 = vld [vmem:[%s31204_s7 + $0x10a0] ss:$16 sps:$4 sm:$0xff]  }
 0xb4d   :  { %18188 = vmatprep.subr.bf16.mxu1 %v24355_v1  ;;  %v24437_v1 = vld [vmem:[%s31204_s7 + $0x10a8] ss:$16 sps:$4 sm:$0xff]  }
 0xb4f   :  { %17656 = vmatpush1.bf16.msra.mxu0 %v24350_v25  ;;  %v24442_v25 = vld [vmem:[%s31204_s7 + $0x10c4] ss:$16 sps:$4 sm:$0xff]  }
 0xb50   :  { %18189 = vmatpush1.bf16.msra.mxu1 %v24353_v52  ;;  %17657 = vmatprep.subr.bf16.mxu0 %v24358_v44  ;;  %v24445_v52 = vld [vmem:[%s31204_s7 + $0x10cc] ss:$16 sps:$4 sm:$0xff]   ;;  %v24440_v44 = vld [vmem:[%s31204_s7 + $0x10c0] ss:$16 sps:$4 sm:$0xff]  }
 0xb51   :  { %18190 = vmatprep.subr.bf16.mxu1 %v24361_v5  ;;  %v24443_v5 = vld [vmem:[%s31204_s7 + $0x10c8] ss:$16 sps:$4 sm:$0xff]  }
 0xb53   :  { %17658 = vmatpush1.bf16.msra.mxu0 %v24356_v19  ;;  %v24448_v19 = vld [vmem:[%s31204_s7 + $0x10e4] ss:$16 sps:$4 sm:$0xff]  }
 0xb54   :  { %18191 = vmatpush1.bf16.msra.mxu1 %v24359_v8  ;;  %17659 = vmatprep.subr.bf16.mxu0 %v24364_v10  ;;  %v24451_v8 = vld [vmem:[%s31204_s7 + $0x10ec] ss:$16 sps:$4 sm:$0xff]   ;;  %v24446_v10 = vld [vmem:[%s31204_s7 + $0x10e0] ss:$16 sps:$4 sm:$0xff]  }
 0xb55   :  { %18192 = vmatprep.subr.bf16.mxu1 %v24367_v35  ;;  %v24449_v35 = vld [vmem:[%s31204_s7 + $0x10e8] ss:$16 sps:$4 sm:$0xff]  }
 0xb57   :  { %17660 = vmatpush1.bf16.msra.mxu0 %v24362_v45  ;;  %v24454_v45 = vld [vmem:[%s31204_s7 + $0x1104] ss:$16 sps:$4 sm:$0xff]  }
 0xb58   :  { %18193 = vmatpush1.bf16.msra.mxu1 %v24365_v38  ;;  %17661 = vmatprep.subr.bf16.mxu0 %v24370_v6  ;;  %v24457_v38 = vld [vmem:[%s31204_s7 + $0x110c] ss:$16 sps:$4 sm:$0xff]   ;;  %v24452_v6 = vld [vmem:[%s31204_s7 + $0x1100] ss:$16 sps:$4 sm:$0xff]  }
 0xb59   :  { %18194 = vmatprep.subr.bf16.mxu1 %v24373_v20  ;;  %v24455_v20 = vld [vmem:[%s31204_s7 + $0x1108] ss:$16 sps:$4 sm:$0xff]  }
 0xb5b   :  { %17662 = vmatpush1.bf16.msra.mxu0 %v24368_v36  ;;  %v24460_v36 = vld [vmem:[%s31204_s7 + $0x1124] ss:$16 sps:$4 sm:$0xff]  }
 0xb5c   :  { %18195 = vmatpush1.bf16.msra.mxu1 %v24371_v18  ;;  %17663 = vmatprep.subr.bf16.mxu0 %v24376_v22  ;;  %v24463_v18 = vld [vmem:[%s31204_s7 + $0x112c] ss:$16 sps:$4 sm:$0xff]   ;;  %v24458_v22 = vld [vmem:[%s31204_s7 + $0x1120] ss:$16 sps:$4 sm:$0xff]  }
 0xb5d   :  { %18196 = vmatprep.subr.bf16.mxu1 %v24379_v41  ;;  %v24461_v41 = vld [vmem:[%s31204_s7 + $0x1128] ss:$16 sps:$4 sm:$0xff]  }
 0xb5f   :  { %17664 = vmatpush1.bf16.msra.mxu0 %v24374_v40  ;;  %v24466_v40 = vld [vmem:[%s31204_s7 + $0x1144] ss:$16 sps:$4 sm:$0xff]  }
 0xb60   :  { %18197 = vmatpush1.bf16.msra.mxu1 %v24377_v60  ;;  %17665 = vmatprep.subr.bf16.mxu0 %v24382_v53  ;;  %v24469_v60 = vld [vmem:[%s31204_s7 + $0x114c] ss:$16 sps:$4 sm:$0xff]   ;;  %v24464_v53 = vld [vmem:[%s31204_s7 + $0x1140] ss:$16 sps:$4 sm:$0xff]  }
 0xb61   :  { %18198 = vmatprep.subr.bf16.mxu1 %v24385_v56  ;;  %v24467_v56 = vld [vmem:[%s31204_s7 + $0x1148] ss:$16 sps:$4 sm:$0xff]  }
 0xb63   :  { %17666 = vmatpush1.bf16.msra.mxu0 %v24380_v24  ;;  %v24472_v24 = vld [vmem:[%s31204_s7 + $0x1164] ss:$16 sps:$4 sm:$0xff]  }
 0xb64   :  { %18199 = vmatpush1.bf16.msra.mxu1 %v24383_v59  ;;  %17667 = vmatprep.subr.bf16.mxu0 %v24388_v33  ;;  %v24475_v59 = vld [vmem:[%s31204_s7 + $0x116c] ss:$16 sps:$4 sm:$0xff]   ;;  %v24470_v33 = vld [vmem:[%s31204_s7 + $0x1160] ss:$16 sps:$4 sm:$0xff]  }
 0xb65   :  { %18200 = vmatprep.subr.bf16.mxu1 %v24391_v2  ;;  %v24473_v2 = vld [vmem:[%s31204_s7 + $0x1168] ss:$16 sps:$4 sm:$0xff]  }
 0xb67   :  { %17668 = vmatpush1.bf16.msra.mxu0 %v24386_v49  ;;  %v24478_v49 = vld [vmem:[%s31204_s7 + $0x1184] ss:$16 sps:$4 sm:$0xff]  }
 0xb68   :  { %18201 = vmatpush1.bf16.msra.mxu1 %v24389_v39  ;;  %17669 = vmatprep.subr.bf16.mxu0 %v24394_v14  ;;  %v24481_v39 = vld [vmem:[%s31204_s7 + $0x118c] ss:$16 sps:$4 sm:$0xff]   ;;  %v24476_v14 = vld [vmem:[%s31204_s7 + $0x1180] ss:$16 sps:$4 sm:$0xff]  }
 0xb69   :  { %18202 = vmatprep.subr.bf16.mxu1 %v24397_v23  ;;  %v24479_v23 = vld [vmem:[%s31204_s7 + $0x1188] ss:$16 sps:$4 sm:$0xff]  }
 0xb6b   :  { %17670 = vmatpush1.bf16.msra.mxu0 %v24392_v46  ;;  %v24484_v46 = vld [vmem:[%s31204_s7 + $0x11a4] ss:$16 sps:$4 sm:$0xff]  }
 0xb6c   :  { %18203 = vmatpush1.bf16.msra.mxu1 %v24395_v13  ;;  %17671 = vmatprep.subr.bf16.mxu0 %v24400_v51  ;;  %v24487_v13 = vld [vmem:[%s31204_s7 + $0x11ac] ss:$16 sps:$4 sm:$0xff]   ;;  %v24482_v51 = vld [vmem:[%s31204_s7 + $0x11a0] ss:$16 sps:$4 sm:$0xff]  }
 0xb6d   :  { %18204 = vmatprep.subr.bf16.mxu1 %v24403_v43  ;;  %v24485_v43 = vld [vmem:[%s31204_s7 + $0x11a8] ss:$16 sps:$4 sm:$0xff]  }
 0xb6f   :  { %17672 = vmatpush1.bf16.msra.mxu0 %v24398_v47  ;;  %v24490_v47 = vld [vmem:[%s31204_s7 + $0x11c4] ss:$16 sps:$4 sm:$0xff]  }
 0xb70   :  { %18205 = vmatpush1.bf16.msra.mxu1 %v24401_v54  ;;  %17682 = vmatprep.subr.bf16.mxu0 %v24406_v29  ;;  %v24493_v54 = vld [vmem:[%s31204_s7 + $0x11cc] ss:$16 sps:$4 sm:$0xff]   ;;  %v24488_v29 = vld [vmem:[%s31204_s7 + $0x11c0] ss:$16 sps:$4 sm:$0xff]  }
 0xb71   :  { %18215 = vmatprep.subr.bf16.mxu1 %v24409_v63  ;;  %v24491_v63 = vld [vmem:[%s31204_s7 + $0x11c8] ss:$16 sps:$4 sm:$0xff]  }
 0xb72   :  { %17674 = vmatmul.mubr.bf16.vlgmr.msra.gmra.mrb[224].mxu0 %v13341_v26 }
 0xb73   :  { %18207 = vmatmul.mubr.bf16.vlgmr.msra.gmra.mrb[96].mxu1 %v13341_v26  ;;  %17683 = vmatpush1.bf16.msra.mxu0 %v24404_v3  ;;  %v24499_v3 = vld [vmem:[%s31204_s7 + $0x11ec] ss:$16 sps:$4 sm:$0xff]   ;;  %v24494_v26 = vld [vmem:[%s31204_s7 + $0x11e0] ss:$16 sps:$4 sm:$0xff]  }
 0xb74   :  { %17714 = vmatprep.mubr.bf16.mxu0 %v30237_v17  ;;  %18216 = vmatpush1.bf16.msra.mxu1 %v24407_v27  ;;  %v24497_v27 = vld [vmem:[%s31204_s7 + $0x11e8] ss:$16 sps:$4 sm:$0xff]  }
 0xb75   :  { %18247 = vmatprep.mubr.bf16.mxu1 %v30237_v17  ;;  %17684 = vmatprep.subr.bf16.mxu0 %v24412_v42  ;;  %v24502_v42 = vld [vmem:[%s31204_s7 + $0x1204] ss:$16 sps:$4 sm:$0xff]  }
 0xb76   :  { %18217 = vmatprep.subr.bf16.mxu1 %v24415_v31  ;;  %v24505_v31 = vld [vmem:[%s31204_s7 + $0x120c] ss:$16 sps:$4 sm:$0xff]  }
 0xb77   :  { %17685 = vmatpush1.bf16.msra.mxu0 %v24410_v21  ;;  %v24500_v21 = vld [vmem:[%s31204_s7 + $0x1200] ss:$16 sps:$4 sm:$0xff]  }
 0xb78   :  { %18218 = vmatpush1.bf16.msra.mxu1 %v24413_v58  ;;  %17686 = vmatprep.subr.bf16.mxu0 %v24418_v32  ;;  %v30429_v58 = vrot.slane %v30209_v34, %v27841_v15  ;;  %v24503_v32 = vld [vmem:[%s31204_s7 + $0x1208] ss:$16 sps:$4 sm:$0xff]   ;;  %v24511_v34 = vld [vmem:[%s31204_s7 + $0x122c] ss:$16 sps:$4 sm:$0xff]  }
 0xb79   :  { %18219 = vmatprep.subr.bf16.mxu1 %v24421_v0  ;;  %v24508_v0 = vld [vmem:[%s31204_s7 + $0x1224] ss:$16 sps:$4 sm:$0xff]  }
 0xb7b   :  { %17687 = vmatpush1.bf16.msra.mxu0 %v24416_v50  ;;  %v13391_v50 = vcombine.high %v30237_v17, %v30237_v17  ;;  %v24514_v17 = vld [vmem:[%s31204_s7 + $0x1244] ss:$16 sps:$4 sm:$0xff]  }
 0xb7c   :  { %18220 = vmatpush1.bf16.msra.mxu1 %v24419_v61  ;;  %17688 = vmatprep.subr.bf16.mxu0 %v24424_v16  ;;  %v24506_v61 = vld [vmem:[%s31204_s7 + $0x1220] ss:$16 sps:$4 sm:$0xff]   ;;  %v24509_v16 = vld [vmem:[%s31204_s7 + $0x1228] ss:$16 sps:$4 sm:$0xff]  }
 0xb7d   :  { %18221 = vmatprep.subr.bf16.mxu1 %v24427_v9  ;;  %v24517_v9 = vld [vmem:[%s31204_s7 + $0x124c] ss:$16 sps:$4 sm:$0xff]  }
 0xb7f   :  { %17689 = vmatpush1.bf16.msra.mxu0 %v24422_v37  ;;  %v24512_v37 = vld [vmem:[%s31204_s7 + $0x1240] ss:$16 sps:$4 sm:$0xff]  }
 0xb80   :  { %18222 = vmatpush1.bf16.msra.mxu1 %v24425_v4  ;;  %17690 = vmatprep.subr.bf16.mxu0 %v24430_v12  ;;  %v24515_v4 = vld [vmem:[%s31204_s7 + $0x1248] ss:$16 sps:$4 sm:$0xff]   ;;  %v24520_v12 = vld [vmem:[%s31204_s7 + $0x1264] ss:$16 sps:$4 sm:$0xff]  }
 0xb81   :  { %18223 = vmatprep.subr.bf16.mxu1 %v24433_v55  ;;  %v24523_v55 = vld [vmem:[%s31204_s7 + $0x126c] ss:$16 sps:$4 sm:$0xff]  }
 0xb83   :  { %17691 = vmatpush1.bf16.msra.mxu0 %v24428_v11  ;;  %v24518_v11 = vld [vmem:[%s31204_s7 + $0x1260] ss:$16 sps:$4 sm:$0xff]  }
 0xb84   :  { %18224 = vmatpush1.bf16.msra.mxu1 %v24431_v62  ;;  %17692 = vmatprep.subr.bf16.mxu0 %v24436_v48  ;;  %v24521_v62 = vld [vmem:[%s31204_s7 + $0x1268] ss:$16 sps:$4 sm:$0xff]   ;;  %v24526_v48 = vld [vmem:[%s31204_s7 + $0x1284] ss:$16 sps:$4 sm:$0xff]  }
 0xb85   :  { %18225 = vmatprep.subr.bf16.mxu1 %v24439_v28  ;;  %v24529_v28 = vld [vmem:[%s31204_s7 + $0x128c] ss:$16 sps:$4 sm:$0xff]  }
 0xb87   :  { %17693 = vmatpush1.bf16.msra.mxu0 %v24434_v7  ;;  %v24524_v7 = vld [vmem:[%s31204_s7 + $0x1280] ss:$16 sps:$4 sm:$0xff]  }
 0xb88   :  { %18226 = vmatpush1.bf16.msra.mxu1 %v24437_v1  ;;  %17694 = vmatprep.subr.bf16.mxu0 %v24442_v25  ;;  %v24527_v1 = vld [vmem:[%s31204_s7 + $0x1288] ss:$16 sps:$4 sm:$0xff]   ;;  %v24532_v25 = vld [vmem:[%s31204_s7 + $0x12a4] ss:$16 sps:$4 sm:$0xff]  }
 0xb89   :  { %18227 = vmatprep.subr.bf16.mxu1 %v24445_v52  ;;  %v24535_v52 = vld [vmem:[%s31204_s7 + $0x12ac] ss:$16 sps:$4 sm:$0xff]  }
 0xb8b   :  { %17695 = vmatpush1.bf16.msra.mxu0 %v24440_v44  ;;  %v24530_v44 = vld [vmem:[%s31204_s7 + $0x12a0] ss:$16 sps:$4 sm:$0xff]  }
 0xb8c   :  { %18228 = vmatpush1.bf16.msra.mxu1 %v24443_v5  ;;  %17696 = vmatprep.subr.bf16.mxu0 %v24448_v19  ;;  %v24533_v5 = vld [vmem:[%s31204_s7 + $0x12a8] ss:$16 sps:$4 sm:$0xff]   ;;  %v24538_v19 = vld [vmem:[%s31204_s7 + $0x12c4] ss:$16 sps:$4 sm:$0xff]  }
 0xb8d   :  { %18229 = vmatprep.subr.bf16.mxu1 %v24451_v8  ;;  %v24541_v8 = vld [vmem:[%s31204_s7 + $0x12cc] ss:$16 sps:$4 sm:$0xff]  }
 0xb8f   :  { %17697 = vmatpush1.bf16.msra.mxu0 %v24446_v10  ;;  %v24536_v10 = vld [vmem:[%s31204_s7 + $0x12c0] ss:$16 sps:$4 sm:$0xff]  }
 0xb90   :  { %18230 = vmatpush1.bf16.msra.mxu1 %v24449_v35  ;;  %17698 = vmatprep.subr.bf16.mxu0 %v24454_v45  ;;  %v24539_v35 = vld [vmem:[%s31204_s7 + $0x12c8] ss:$16 sps:$4 sm:$0xff]   ;;  %v24544_v45 = vld [vmem:[%s31204_s7 + $0x12e4] ss:$16 sps:$4 sm:$0xff]  }
 0xb91   :  { %18231 = vmatprep.subr.bf16.mxu1 %v24457_v38  ;;  %v24547_v38 = vld [vmem:[%s31204_s7 + $0x12ec] ss:$16 sps:$4 sm:$0xff]  }
 0xb93   :  { %17699 = vmatpush1.bf16.msra.mxu0 %v24452_v6  ;;  %v24542_v6 = vld [vmem:[%s31204_s7 + $0x12e0] ss:$16 sps:$4 sm:$0xff]  }
 0xb94   :  { %18232 = vmatpush1.bf16.msra.mxu1 %v24455_v20  ;;  %17700 = vmatprep.subr.bf16.mxu0 %v24460_v36  ;;  %v24545_v20 = vld [vmem:[%s31204_s7 + $0x12e8] ss:$16 sps:$4 sm:$0xff]   ;;  %v24550_v36 = vld [vmem:[%s31204_s7 + $0x1304] ss:$16 sps:$4 sm:$0xff]  }
 0xb95   :  { %18233 = vmatprep.subr.bf16.mxu1 %v24463_v18  ;;  %v24553_v18 = vld [vmem:[%s31204_s7 + $0x130c] ss:$16 sps:$4 sm:$0xff]  }
 0xb97   :  { %17701 = vmatpush1.bf16.msra.mxu0 %v24458_v22  ;;  %v24548_v22 = vld [vmem:[%s31204_s7 + $0x1300] ss:$16 sps:$4 sm:$0xff]  }
 0xb98   :  { %18234 = vmatpush1.bf16.msra.mxu1 %v24461_v41  ;;  %17702 = vmatprep.subr.bf16.mxu0 %v24466_v40  ;;  %v24551_v41 = vld [vmem:[%s31204_s7 + $0x1308] ss:$16 sps:$4 sm:$0xff]   ;;  %v24556_v40 = vld [vmem:[%s31204_s7 + $0x1324] ss:$16 sps:$4 sm:$0xff]  }
 0xb99   :  { %18235 = vmatprep.subr.bf16.mxu1 %v24469_v60  ;;  %v24559_v60 = vld [vmem:[%s31204_s7 + $0x132c] ss:$16 sps:$4 sm:$0xff]  }
 0xb9b   :  { %17703 = vmatpush1.bf16.msra.mxu0 %v24464_v53  ;;  %v24554_v53 = vld [vmem:[%s31204_s7 + $0x1320] ss:$16 sps:$4 sm:$0xff]  }
 0xb9c   :  { %18236 = vmatpush1.bf16.msra.mxu1 %v24467_v56  ;;  %17704 = vmatprep.subr.bf16.mxu0 %v24472_v24  ;;  %v24557_v56 = vld [vmem:[%s31204_s7 + $0x1328] ss:$16 sps:$4 sm:$0xff]   ;;  %v24562_v24 = vld [vmem:[%s31204_s7 + $0x1344] ss:$16 sps:$4 sm:$0xff]  }
 0xb9d   :  { %18237 = vmatprep.subr.bf16.mxu1 %v24475_v59  ;;  %v24565_v59 = vld [vmem:[%s31204_s7 + $0x134c] ss:$16 sps:$4 sm:$0xff]  }
 0xb9f   :  { %17705 = vmatpush1.bf16.msra.mxu0 %v24470_v33  ;;  %v24560_v33 = vld [vmem:[%s31204_s7 + $0x1340] ss:$16 sps:$4 sm:$0xff]  }
 0xba0   :  { %18238 = vmatpush1.bf16.msra.mxu1 %v24473_v2  ;;  %17706 = vmatprep.subr.bf16.mxu0 %v24478_v49  ;;  %v24563_v2 = vld [vmem:[%s31204_s7 + $0x1348] ss:$16 sps:$4 sm:$0xff]   ;;  %v24568_v49 = vld [vmem:[%s31204_s7 + $0x1364] ss:$16 sps:$4 sm:$0xff]  }
 0xba1   :  { %18239 = vmatprep.subr.bf16.mxu1 %v24481_v39  ;;  %v24571_v39 = vld [vmem:[%s31204_s7 + $0x136c] ss:$16 sps:$4 sm:$0xff]  }
 0xba3   :  { %17707 = vmatpush1.bf16.msra.mxu0 %v24476_v14  ;;  %v24566_v14 = vld [vmem:[%s31204_s7 + $0x1360] ss:$16 sps:$4 sm:$0xff]  }
 0xba4   :  { %18240 = vmatpush1.bf16.msra.mxu1 %v24479_v23  ;;  %17708 = vmatprep.subr.bf16.mxu0 %v24484_v46  ;;  %v24569_v23 = vld [vmem:[%s31204_s7 + $0x1368] ss:$16 sps:$4 sm:$0xff]   ;;  %v24574_v46 = vld [vmem:[%s31204_s7 + $0x1384] ss:$16 sps:$4 sm:$0xff]  }
 0xba5   :  { %18241 = vmatprep.subr.bf16.mxu1 %v24487_v13  ;;  %v24577_v13 = vld [vmem:[%s31204_s7 + $0x138c] ss:$16 sps:$4 sm:$0xff]  }
 0xba7   :  { %17709 = vmatpush1.bf16.msra.mxu0 %v24482_v51  ;;  %v24572_v51 = vld [vmem:[%s31204_s7 + $0x1380] ss:$16 sps:$4 sm:$0xff]  }
 0xba8   :  { %18242 = vmatpush1.bf16.msra.mxu1 %v24485_v43  ;;  %17710 = vmatprep.subr.bf16.mxu0 %v24490_v47  ;;  %v24575_v43 = vld [vmem:[%s31204_s7 + $0x1388] ss:$16 sps:$4 sm:$0xff]   ;;  %v24580_v47 = vld [vmem:[%s31204_s7 + $0x13a4] ss:$16 sps:$4 sm:$0xff]  }
 0xba9   :  { %18243 = vmatprep.subr.bf16.mxu1 %v24493_v54  ;;  %v24583_v54 = vld [vmem:[%s31204_s7 + $0x13ac] ss:$16 sps:$4 sm:$0xff]  }
 0xbab   :  { %17711 = vmatpush1.bf16.msra.mxu0 %v24488_v29  ;;  %v24578_v29 = vld [vmem:[%s31204_s7 + $0x13a0] ss:$16 sps:$4 sm:$0xff]  }
 0xbac   :  { %18244 = vmatpush1.bf16.msra.mxu1 %v24491_v63  ;;  %17712 = vmatprep.subr.bf16.mxu0 %v24496_v30  ;;  %v24581_v63 = vld [vmem:[%s31204_s7 + $0x13a8] ss:$16 sps:$4 sm:$0xff]   ;;  %v24586_v30 = vld [vmem:[%s31204_s7 + $0x13c4] ss:$16 sps:$4 sm:$0xff]  }
 0xbad   :  { %18245 = vmatprep.subr.bf16.mxu1 %v24499_v3  ;;  %v24589_v3 = vld [vmem:[%s31204_s7 + $0x13cc] ss:$16 sps:$4 sm:$0xff]  }
 0xbaf   :  { %17713 = vmatpush1.bf16.msra.mxu0 %v24494_v26  ;;  %v13344_v26 = vcombine.high %v30196_v57, %v30196_v57  ;;  %v24595_v57 = vld [vmem:[%s31204_s7 + $0x13ec] ss:$16 sps:$4 sm:$0xff]  }
 0xbb0   :  { %18246 = vmatpush1.bf16.msra.mxu1 %v24497_v27  ;;  %17723 = vmatprep.subr.bf16.mxu0 %v24502_v42  ;;  %v24584_v27 = vld [vmem:[%s31204_s7 + $0x13c0] ss:$16 sps:$4 sm:$0xff]   ;;  %v24587_v42 = vld [vmem:[%s31204_s7 + $0x13c8] ss:$16 sps:$4 sm:$0xff]  }
 0xbb1   :  { %18256 = vmatprep.subr.bf16.mxu1 %v24505_v31  ;;  %v24592_v31 = vld [vmem:[%s31204_s7 + $0x13e4] ss:$16 sps:$4 sm:$0xff]  }
 0xbb2   :  { %17715 = vmatmul.mubr.bf16.vlgmr.msra.gmra.mrb[224].mxu0 %v30429_v58 }
 0xbb3   :  { %18248 = vmatmul.mubr.bf16.vlgmr.msra.gmra.mrb[96].mxu1 %v30429_v58  ;;  %17724 = vmatpush1.bf16.msra.mxu0 %v24500_v21  ;;  %v30615_v21 = vrot.slane %v13344_v26, %v27841_v15  ;;  %v24677_v26 = vld [vmem:[%s31204_s7 + $0x15a4] ss:$16 sps:$4 sm:$0xff]  }
 0xbb4   :  { %17755 = vmatprep.mubr.bf16.mxu0 %v13391_v50  ;;  %18257 = vmatpush1.bf16.msra.mxu1 %v24503_v32  ;;  %v24590_v32 = vld [vmem:[%s31204_s7 + $0x13e0] ss:$16 sps:$4 sm:$0xff]  }
 0xbb5   :  { %18288 = vmatprep.mubr.bf16.mxu1 %v13391_v50  ;;  %17725 = vmatprep.subr.bf16.mxu0 %v24508_v0  ;;  %v24593_v0 = vld [vmem:[%s31204_s7 + $0x13e8] ss:$16 sps:$4 sm:$0xff]   ;;  %v24598_v50 = vld [vmem:[%s31204_s7 + $0x1404] ss:$16 sps:$4 sm:$0xff]  }
 0xbb6   :  { %18258 = vmatprep.subr.bf16.mxu1 %v24511_v34  ;;  %v24601_v34 = vld [vmem:[%s31204_s7 + $0x140c] ss:$16 sps:$4 sm:$0xff]  }
 0xbb7   :  { %17726 = vmatpush1.bf16.msra.mxu0 %v24506_v61  ;;  %v13360_v61 = vcombine.high %v30615_v21, %v30615_v21 }
 0xbb8   :  { %18259 = vmatpush1.bf16.msra.mxu1 %v24509_v16  ;;  %17727 = vmatprep.subr.bf16.mxu0 %v24514_v17  ;;  %v24596_v16 = vld [vmem:[%s31204_s7 + $0x1400] ss:$16 sps:$4 sm:$0xff]   ;;  %v13389_v17 = vcombine.high %v30429_v58, %v30429_v58 }
 0xbb9   :  { %18260 = vmatprep.subr.bf16.mxu1 %v24517_v9  ;;  %v24599_v9 = vld [vmem:[%s31204_s7 + $0x1408] ss:$16 sps:$4 sm:$0xff]   ;;  %v24603_v58 = vld [vmem:[%s31204_s7 + $0x1420] ss:$16 sps:$4 sm:$0xff]  }
 0xbbb   :  { %17728 = vmatpush1.bf16.msra.mxu0 %v24512_v37  ;;  %v24605_v37 = vld [vmem:[%s31204_s7 + $0x1424] ss:$16 sps:$4 sm:$0xff]  }
 0xbbc   :  { %18261 = vmatpush1.bf16.msra.mxu1 %v24515_v4  ;;  %17729 = vmatprep.subr.bf16.mxu0 %v24520_v12  ;;  %v30643_v4 = vrot.slane %v13360_v61, %v27841_v15  ;;  %v24608_v12 = vld [vmem:[%s31204_s7 + $0x142c] ss:$16 sps:$4 sm:$0xff]  }
 0xbbd   :  { %18262 = vmatprep.subr.bf16.mxu1 %v24523_v55  ;;  %v24606_v55 = vld [vmem:[%s31204_s7 + $0x1428] ss:$16 sps:$4 sm:$0xff]   ;;  %v24692_v61 = vld [vmem:[%s31204_s7 + $0x15ec] ss:$16 sps:$4 sm:$0xff]  }
 0xbbf   :  { %17730 = vmatpush1.bf16.msra.mxu0 %v24518_v11  ;;  %v24611_v11 = vld [vmem:[%s31204_s7 + $0x1444] ss:$16 sps:$4 sm:$0xff]  }
 0xbc0   :  { %18263 = vmatpush1.bf16.msra.mxu1 %v24521_v62  ;;  %17731 = vmatprep.subr.bf16.mxu0 %v24526_v48  ;;  %v24614_v62 = vld [vmem:[%s31204_s7 + $0x144c] ss:$16 sps:$4 sm:$0xff]   ;;  %v24609_v48 = vld [vmem:[%s31204_s7 + $0x1440] ss:$16 sps:$4 sm:$0xff]  }
 0xbc1   :  { %18264 = vmatprep.subr.bf16.mxu1 %v24529_v28  ;;  %v24612_v28 = vld [vmem:[%s31204_s7 + $0x1448] ss:$16 sps:$4 sm:$0xff]  }
 0xbc3   :  { %17732 = vmatpush1.bf16.msra.mxu0 %v24524_v7  ;;  %v24617_v7 = vld [vmem:[%s31204_s7 + $0x1464] ss:$16 sps:$4 sm:$0xff]  }
 0xbc4   :  { %18265 = vmatpush1.bf16.msra.mxu1 %v24527_v1  ;;  %17733 = vmatprep.subr.bf16.mxu0 %v24532_v25  ;;  %v24620_v1 = vld [vmem:[%s31204_s7 + $0x146c] ss:$16 sps:$4 sm:$0xff]   ;;  %v24615_v25 = vld [vmem:[%s31204_s7 + $0x1460] ss:$16 sps:$4 sm:$0xff]  }
 0xbc5   :  { %18266 = vmatprep.subr.bf16.mxu1 %v24535_v52  ;;  %v24618_v52 = vld [vmem:[%s31204_s7 + $0x1468] ss:$16 sps:$4 sm:$0xff]  }
 0xbc7   :  { %17734 = vmatpush1.bf16.msra.mxu0 %v24530_v44  ;;  %v24623_v44 = vld [vmem:[%s31204_s7 + $0x1484] ss:$16 sps:$4 sm:$0xff]  }
 0xbc8   :  { %18267 = vmatpush1.bf16.msra.mxu1 %v24533_v5  ;;  %17735 = vmatprep.subr.bf16.mxu0 %v24538_v19  ;;  %v24626_v5 = vld [vmem:[%s31204_s7 + $0x148c] ss:$16 sps:$4 sm:$0xff]   ;;  %v24621_v19 = vld [vmem:[%s31204_s7 + $0x1480] ss:$16 sps:$4 sm:$0xff]  }
 0xbc9   :  { %18268 = vmatprep.subr.bf16.mxu1 %v24541_v8  ;;  %v24624_v8 = vld [vmem:[%s31204_s7 + $0x1488] ss:$16 sps:$4 sm:$0xff]  }
 0xbcb   :  { %17736 = vmatpush1.bf16.msra.mxu0 %v24536_v10  ;;  %v24629_v10 = vld [vmem:[%s31204_s7 + $0x14a4] ss:$16 sps:$4 sm:$0xff]  }
 0xbcc   :  { %18269 = vmatpush1.bf16.msra.mxu1 %v24539_v35  ;;  %17737 = vmatprep.subr.bf16.mxu0 %v24544_v45  ;;  %v24632_v35 = vld [vmem:[%s31204_s7 + $0x14ac] ss:$16 sps:$4 sm:$0xff]   ;;  %v24627_v45 = vld [vmem:[%s31204_s7 + $0x14a0] ss:$16 sps:$4 sm:$0xff]  }
 0xbcd   :  { %18270 = vmatprep.subr.bf16.mxu1 %v24547_v38  ;;  %v24630_v38 = vld [vmem:[%s31204_s7 + $0x14a8] ss:$16 sps:$4 sm:$0xff]  }
 0xbcf   :  { %17738 = vmatpush1.bf16.msra.mxu0 %v24542_v6  ;;  %v24635_v6 = vld [vmem:[%s31204_s7 + $0x14c4] ss:$16 sps:$4 sm:$0xff]  }
 0xbd0   :  { %18271 = vmatpush1.bf16.msra.mxu1 %v24545_v20  ;;  %17739 = vmatprep.subr.bf16.mxu0 %v24550_v36  ;;  %v24638_v20 = vld [vmem:[%s31204_s7 + $0x14cc] ss:$16 sps:$4 sm:$0xff]   ;;  %v24633_v36 = vld [vmem:[%s31204_s7 + $0x14c0] ss:$16 sps:$4 sm:$0xff]  }
 0xbd1   :  { %18272 = vmatprep.subr.bf16.mxu1 %v24553_v18  ;;  %v24636_v18 = vld [vmem:[%s31204_s7 + $0x14c8] ss:$16 sps:$4 sm:$0xff]  }
 0xbd3   :  { %17740 = vmatpush1.bf16.msra.mxu0 %v24548_v22  ;;  %v24641_v22 = vld [vmem:[%s31204_s7 + $0x14e4] ss:$16 sps:$4 sm:$0xff]  }
 0xbd4   :  { %18273 = vmatpush1.bf16.msra.mxu1 %v24551_v41  ;;  %17741 = vmatprep.subr.bf16.mxu0 %v24556_v40  ;;  %v24644_v41 = vld [vmem:[%s31204_s7 + $0x14ec] ss:$16 sps:$4 sm:$0xff]   ;;  %v24639_v40 = vld [vmem:[%s31204_s7 + $0x14e0] ss:$16 sps:$4 sm:$0xff]  }
 0xbd5   :  { %18274 = vmatprep.subr.bf16.mxu1 %v24559_v60  ;;  %v24642_v60 = vld [vmem:[%s31204_s7 + $0x14e8] ss:$16 sps:$4 sm:$0xff]  }
 0xbd7   :  { %17742 = vmatpush1.bf16.msra.mxu0 %v24554_v53  ;;  %v24647_v53 = vld [vmem:[%s31204_s7 + $0x1504] ss:$16 sps:$4 sm:$0xff]  }
 0xbd8   :  { %18275 = vmatpush1.bf16.msra.mxu1 %v24557_v56  ;;  %17743 = vmatprep.subr.bf16.mxu0 %v24562_v24  ;;  %v24650_v56 = vld [vmem:[%s31204_s7 + $0x150c] ss:$16 sps:$4 sm:$0xff]   ;;  %v24645_v24 = vld [vmem:[%s31204_s7 + $0x1500] ss:$16 sps:$4 sm:$0xff]  }
 0xbd9   :  { %18276 = vmatprep.subr.bf16.mxu1 %v24565_v59  ;;  %v24648_v59 = vld [vmem:[%s31204_s7 + $0x1508] ss:$16 sps:$4 sm:$0xff]  }
 0xbdb   :  { %17744 = vmatpush1.bf16.msra.mxu0 %v24560_v33  ;;  %v24653_v33 = vld [vmem:[%s31204_s7 + $0x1524] ss:$16 sps:$4 sm:$0xff]  }
 0xbdc   :  { %18277 = vmatpush1.bf16.msra.mxu1 %v24563_v2  ;;  %17745 = vmatprep.subr.bf16.mxu0 %v24568_v49  ;;  %v24656_v2 = vld [vmem:[%s31204_s7 + $0x152c] ss:$16 sps:$4 sm:$0xff]   ;;  %v24651_v49 = vld [vmem:[%s31204_s7 + $0x1520] ss:$16 sps:$4 sm:$0xff]  }
 0xbdd   :  { %18278 = vmatprep.subr.bf16.mxu1 %v24571_v39  ;;  %v24654_v39 = vld [vmem:[%s31204_s7 + $0x1528] ss:$16 sps:$4 sm:$0xff]  }
 0xbdf   :  { %17746 = vmatpush1.bf16.msra.mxu0 %v24566_v14  ;;  %v24659_v14 = vld [vmem:[%s31204_s7 + $0x1544] ss:$16 sps:$4 sm:$0xff]  }
 0xbe0   :  { %18279 = vmatpush1.bf16.msra.mxu1 %v24569_v23  ;;  %17747 = vmatprep.subr.bf16.mxu0 %v24574_v46  ;;  %v24662_v23 = vld [vmem:[%s31204_s7 + $0x154c] ss:$16 sps:$4 sm:$0xff]   ;;  %v24657_v46 = vld [vmem:[%s31204_s7 + $0x1540] ss:$16 sps:$4 sm:$0xff]  }
 0xbe1   :  { %18280 = vmatprep.subr.bf16.mxu1 %v24577_v13  ;;  %v24660_v13 = vld [vmem:[%s31204_s7 + $0x1548] ss:$16 sps:$4 sm:$0xff]  }
 0xbe3   :  { %17748 = vmatpush1.bf16.msra.mxu0 %v24572_v51  ;;  %v24665_v51 = vld [vmem:[%s31204_s7 + $0x1564] ss:$16 sps:$4 sm:$0xff]  }
 0xbe4   :  { %18281 = vmatpush1.bf16.msra.mxu1 %v24575_v43  ;;  %17749 = vmatprep.subr.bf16.mxu0 %v24580_v47  ;;  %v24668_v43 = vld [vmem:[%s31204_s7 + $0x156c] ss:$16 sps:$4 sm:$0xff]   ;;  %v24663_v47 = vld [vmem:[%s31204_s7 + $0x1560] ss:$16 sps:$4 sm:$0xff]  }
 0xbe5   :  { %18282 = vmatprep.subr.bf16.mxu1 %v24583_v54  ;;  %v24666_v54 = vld [vmem:[%s31204_s7 + $0x1568] ss:$16 sps:$4 sm:$0xff]  }
 0xbe7   :  { %17750 = vmatpush1.bf16.msra.mxu0 %v24578_v29  ;;  %v24671_v29 = vld [vmem:[%s31204_s7 + $0x1584] ss:$16 sps:$4 sm:$0xff]  }
 0xbe8   :  { %18283 = vmatpush1.bf16.msra.mxu1 %v24581_v63  ;;  %17751 = vmatprep.subr.bf16.mxu0 %v24586_v30  ;;  %v24674_v63 = vld [vmem:[%s31204_s7 + $0x158c] ss:$16 sps:$4 sm:$0xff]   ;;  %v24669_v30 = vld [vmem:[%s31204_s7 + $0x1580] ss:$16 sps:$4 sm:$0xff]  }
 0xbe9   :  { %18284 = vmatprep.subr.bf16.mxu1 %v24589_v3  ;;  %v24672_v3 = vld [vmem:[%s31204_s7 + $0x1588] ss:$16 sps:$4 sm:$0xff]  }
 0xbeb   :  { %17752 = vmatpush1.bf16.msra.mxu0 %v24584_v27  ;;  %v24680_v27 = vld [vmem:[%s31204_s7 + $0x15ac] ss:$16 sps:$4 sm:$0xff]  }
 0xbec   :  { %18285 = vmatpush1.bf16.msra.mxu1 %v24587_v42  ;;  %17753 = vmatprep.subr.bf16.mxu0 %v24592_v31  ;;  %v24675_v42 = vld [vmem:[%s31204_s7 + $0x15a0] ss:$16 sps:$4 sm:$0xff]   ;;  %v24678_v31 = vld [vmem:[%s31204_s7 + $0x15a8] ss:$16 sps:$4 sm:$0xff]  }
 0xbed   :  { %18286 = vmatprep.subr.bf16.mxu1 %v24595_v57  ;;  %v24683_v57 = vld [vmem:[%s31204_s7 + $0x15c4] ss:$16 sps:$4 sm:$0xff]  }
 0xbef   :  { %17754 = vmatpush1.bf16.msra.mxu0 %v24590_v32  ;;  %v24686_v32 = vld [vmem:[%s31204_s7 + $0x15cc] ss:$16 sps:$4 sm:$0xff]  }
 0xbf0   :  { %18287 = vmatpush1.bf16.msra.mxu1 %v24593_v0  ;;  %17764 = vmatprep.subr.bf16.mxu0 %v24598_v50  ;;  %v24681_v0 = vld [vmem:[%s31204_s7 + $0x15c0] ss:$16 sps:$4 sm:$0xff]   ;;  %v24684_v50 = vld [vmem:[%s31204_s7 + $0x15c8] ss:$16 sps:$4 sm:$0xff]  }
 0xbf1   :  { %18297 = vmatprep.subr.bf16.mxu1 %v24601_v34  ;;  %v24689_v34 = vld [vmem:[%s31204_s7 + $0x15e4] ss:$16 sps:$4 sm:$0xff]  }
 0xbf2   :  { %17756 = vmatmul.mubr.bf16.vlgmr.msra.gmra.mrb[224].mxu0 %v13389_v17 }
 0xbf3   :  { %18289 = vmatmul.mubr.bf16.vlgmr.msra.gmra.mrb[96].mxu1 %v13389_v17  ;;  %17765 = vmatpush1.bf16.msra.mxu0 %v24596_v16  ;;  %v24687_v16 = vld [vmem:[%s31204_s7 + $0x15e0] ss:$16 sps:$4 sm:$0xff]   ;;  %v24690_v17 = vld [vmem:[%s31204_s7 + $0x15e8] ss:$16 sps:$4 sm:$0xff]  }
 0xbf4   :  { %17796 = vmatprep.mubr.bf16.mxu0 %v30643_v4  ;;  %18298 = vmatpush1.bf16.msra.mxu1 %v24599_v9  ;;  %v24695_v9 = vld [vmem:[%s31204_s7 + $0x1604] ss:$16 sps:$4 sm:$0xff]  }
 0xbf5   :  { %18329 = vmatprep.mubr.bf16.mxu1 %v30643_v4  ;;  %17766 = vmatprep.subr.bf16.mxu0 %v24605_v37  ;;  %v24698_v37 = vld [vmem:[%s31204_s7 + $0x160c] ss:$16 sps:$4 sm:$0xff]  }
 0xbf6   :  { %18299 = vmatprep.subr.bf16.mxu1 %v24608_v12  ;;  %v24693_v12 = vld [vmem:[%s31204_s7 + $0x1600] ss:$16 sps:$4 sm:$0xff]  }
 0xbf7   :  { %17767 = vmatpush1.bf16.msra.mxu0 %v24603_v58  ;;  %v30835_v58 = vrot.slane %v30615_v21, %v27841_v15  ;;  %v24704_v21 = vld [vmem:[%s31204_s7 + $0x162c] ss:$16 sps:$4 sm:$0xff]  }
 0xbf8   :  { %18300 = vmatpush1.bf16.msra.mxu1 %v24606_v55  ;;  %17768 = vmatprep.subr.bf16.mxu0 %v24611_v11  ;;  %v24696_v55 = vld [vmem:[%s31204_s7 + $0x1608] ss:$16 sps:$4 sm:$0xff]   ;;  %v24701_v11 = vld [vmem:[%s31204_s7 + $0x1624] ss:$16 sps:$4 sm:$0xff]  }
 0xbf9   :  { %18301 = vmatprep.subr.bf16.mxu1 %v24614_v62  ;;  %v13392_v62 = vcombine.high %v30643_v4, %v30643_v4  ;;  %v24707_v4 = vld [vmem:[%s31204_s7 + $0x1644] ss:$16 sps:$4 sm:$0xff]  }
 0xbfb   :  { %17769 = vmatpush1.bf16.msra.mxu0 %v24609_v48  ;;  %v24699_v48 = vld [vmem:[%s31204_s7 + $0x1620] ss:$16 sps:$4 sm:$0xff]  }
 0xbfc   :  { %18302 = vmatpush1.bf16.msra.mxu1 %v24612_v28  ;;  %17770 = vmatprep.subr.bf16.mxu0 %v24617_v7  ;;  %v24702_v28 = vld [vmem:[%s31204_s7 + $0x1628] ss:$16 sps:$4 sm:$0xff]   ;;  %v24710_v7 = vld [vmem:[%s31204_s7 + $0x164c] ss:$16 sps:$4 sm:$0xff]  }
 0xbfd   :  { %18303 = vmatprep.subr.bf16.mxu1 %v24620_v1  ;;  %v24705_v1 = vld [vmem:[%s31204_s7 + $0x1640] ss:$16 sps:$4 sm:$0xff]  }
 0xbff   :  { %17771 = vmatpush1.bf16.msra.mxu0 %v24615_v25  ;;  %v24708_v25 = vld [vmem:[%s31204_s7 + $0x1648] ss:$16 sps:$4 sm:$0xff]  }
 0xc00   :  { %18304 = vmatpush1.bf16.msra.mxu1 %v24618_v52  ;;  %17772 = vmatprep.subr.bf16.mxu0 %v24623_v44  ;;  %v24713_v52 = vld [vmem:[%s31204_s7 + $0x1664] ss:$16 sps:$4 sm:$0xff]   ;;  %v24716_v44 = vld [vmem:[%s31204_s7 + $0x166c] ss:$16 sps:$4 sm:$0xff]  }
 0xc01   :  { %18305 = vmatprep.subr.bf16.mxu1 %v24626_v5  ;;  %v24711_v5 = vld [vmem:[%s31204_s7 + $0x1660] ss:$16 sps:$4 sm:$0xff]  }
 0xc03   :  { %17773 = vmatpush1.bf16.msra.mxu0 %v24621_v19  ;;  %v24714_v19 = vld [vmem:[%s31204_s7 + $0x1668] ss:$16 sps:$4 sm:$0xff]  }
 0xc04   :  { %18306 = vmatpush1.bf16.msra.mxu1 %v24624_v8  ;;  %17774 = vmatprep.subr.bf16.mxu0 %v24629_v10  ;;  %v24719_v8 = vld [vmem:[%s31204_s7 + $0x1684] ss:$16 sps:$4 sm:$0xff]   ;;  %v24722_v10 = vld [vmem:[%s31204_s7 + $0x168c] ss:$16 sps:$4 sm:$0xff]  }
 0xc05   :  { %18307 = vmatprep.subr.bf16.mxu1 %v24632_v35  ;;  %v24717_v35 = vld [vmem:[%s31204_s7 + $0x1680] ss:$16 sps:$4 sm:$0xff]  }
 0xc07   :  { %17775 = vmatpush1.bf16.msra.mxu0 %v24627_v45  ;;  %v24720_v45 = vld [vmem:[%s31204_s7 + $0x1688] ss:$16 sps:$4 sm:$0xff]  }
 0xc08   :  { %18308 = vmatpush1.bf16.msra.mxu1 %v24630_v38  ;;  %17776 = vmatprep.subr.bf16.mxu0 %v24635_v6  ;;  %v24725_v38 = vld [vmem:[%s31204_s7 + $0x16a4] ss:$16 sps:$4 sm:$0xff]   ;;  %v24728_v6 = vld [vmem:[%s31204_s7 + $0x16ac] ss:$16 sps:$4 sm:$0xff]  }
 0xc09   :  { %18309 = vmatprep.subr.bf16.mxu1 %v24638_v20  ;;  %v24723_v20 = vld [vmem:[%s31204_s7 + $0x16a0] ss:$16 sps:$4 sm:$0xff]  }
 0xc0b   :  { %17777 = vmatpush1.bf16.msra.mxu0 %v24633_v36  ;;  %v24726_v36 = vld [vmem:[%s31204_s7 + $0x16a8] ss:$16 sps:$4 sm:$0xff]  }
 0xc0c   :  { %18310 = vmatpush1.bf16.msra.mxu1 %v24636_v18  ;;  %17778 = vmatprep.subr.bf16.mxu0 %v24641_v22  ;;  %v24731_v18 = vld [vmem:[%s31204_s7 + $0x16c4] ss:$16 sps:$4 sm:$0xff]   ;;  %v24734_v22 = vld [vmem:[%s31204_s7 + $0x16cc] ss:$16 sps:$4 sm:$0xff]  }
 0xc0d   :  { %18311 = vmatprep.subr.bf16.mxu1 %v24644_v41  ;;  %v24729_v41 = vld [vmem:[%s31204_s7 + $0x16c0] ss:$16 sps:$4 sm:$0xff]  }
 0xc0f   :  { %17779 = vmatpush1.bf16.msra.mxu0 %v24639_v40  ;;  %v24732_v40 = vld [vmem:[%s31204_s7 + $0x16c8] ss:$16 sps:$4 sm:$0xff]  }
 0xc10   :  { %18312 = vmatpush1.bf16.msra.mxu1 %v24642_v60  ;;  %17780 = vmatprep.subr.bf16.mxu0 %v24647_v53  ;;  %v24737_v60 = vld [vmem:[%s31204_s7 + $0x16e4] ss:$16 sps:$4 sm:$0xff]   ;;  %v24740_v53 = vld [vmem:[%s31204_s7 + $0x16ec] ss:$16 sps:$4 sm:$0xff]  }
 0xc11   :  { %18313 = vmatprep.subr.bf16.mxu1 %v24650_v56  ;;  %v24735_v56 = vld [vmem:[%s31204_s7 + $0x16e0] ss:$16 sps:$4 sm:$0xff]  }
 0xc13   :  { %17781 = vmatpush1.bf16.msra.mxu0 %v24645_v24  ;;  %v24738_v24 = vld [vmem:[%s31204_s7 + $0x16e8] ss:$16 sps:$4 sm:$0xff]  }
 0xc14   :  { %18314 = vmatpush1.bf16.msra.mxu1 %v24648_v59  ;;  %17782 = vmatprep.subr.bf16.mxu0 %v24653_v33  ;;  %v24743_v59 = vld [vmem:[%s31204_s7 + $0x1704] ss:$16 sps:$4 sm:$0xff]   ;;  %v24746_v33 = vld [vmem:[%s31204_s7 + $0x170c] ss:$16 sps:$4 sm:$0xff]  }
 0xc15   :  { %18315 = vmatprep.subr.bf16.mxu1 %v24656_v2  ;;  %v24741_v2 = vld [vmem:[%s31204_s7 + $0x1700] ss:$16 sps:$4 sm:$0xff]  }
 0xc17   :  { %17783 = vmatpush1.bf16.msra.mxu0 %v24651_v49  ;;  %v24744_v49 = vld [vmem:[%s31204_s7 + $0x1708] ss:$16 sps:$4 sm:$0xff]  }
 0xc18   :  { %18316 = vmatpush1.bf16.msra.mxu1 %v24654_v39  ;;  %17784 = vmatprep.subr.bf16.mxu0 %v24659_v14  ;;  %v24749_v39 = vld [vmem:[%s31204_s7 + $0x1724] ss:$16 sps:$4 sm:$0xff]   ;;  %v24752_v14 = vld [vmem:[%s31204_s7 + $0x172c] ss:$16 sps:$4 sm:$0xff]  }
 0xc19   :  { %18317 = vmatprep.subr.bf16.mxu1 %v24662_v23  ;;  %v24747_v23 = vld [vmem:[%s31204_s7 + $0x1720] ss:$16 sps:$4 sm:$0xff]  }
 0xc1b   :  { %17785 = vmatpush1.bf16.msra.mxu0 %v24657_v46  ;;  %v24750_v46 = vld [vmem:[%s31204_s7 + $0x1728] ss:$16 sps:$4 sm:$0xff]  }
 0xc1c   :  { %18318 = vmatpush1.bf16.msra.mxu1 %v24660_v13  ;;  %17786 = vmatprep.subr.bf16.mxu0 %v24665_v51  ;;  %v24755_v13 = vld [vmem:[%s31204_s7 + $0x1744] ss:$16 sps:$4 sm:$0xff]   ;;  %v24758_v51 = vld [vmem:[%s31204_s7 + $0x174c] ss:$16 sps:$4 sm:$0xff]  }
 0xc1d   :  { %18319 = vmatprep.subr.bf16.mxu1 %v24668_v43  ;;  %v24753_v43 = vld [vmem:[%s31204_s7 + $0x1740] ss:$16 sps:$4 sm:$0xff]  }
 0xc1f   :  { %17787 = vmatpush1.bf16.msra.mxu0 %v24663_v47  ;;  %v24756_v47 = vld [vmem:[%s31204_s7 + $0x1748] ss:$16 sps:$4 sm:$0xff]  }
 0xc20   :  { %18320 = vmatpush1.bf16.msra.mxu1 %v24666_v54  ;;  %17788 = vmatprep.subr.bf16.mxu0 %v24671_v29  ;;  %v24761_v54 = vld [vmem:[%s31204_s7 + $0x1764] ss:$16 sps:$4 sm:$0xff]   ;;  %v24764_v29 = vld [vmem:[%s31204_s7 + $0x176c] ss:$16 sps:$4 sm:$0xff]  }
 0xc21   :  { %18321 = vmatprep.subr.bf16.mxu1 %v24674_v63  ;;  %v24759_v63 = vld [vmem:[%s31204_s7 + $0x1760] ss:$16 sps:$4 sm:$0xff]  }
 0xc23   :  { %17789 = vmatpush1.bf16.msra.mxu0 %v24669_v30  ;;  %v24762_v30 = vld [vmem:[%s31204_s7 + $0x1768] ss:$16 sps:$4 sm:$0xff]  }
 0xc24   :  { %18322 = vmatpush1.bf16.msra.mxu1 %v24672_v3  ;;  %17790 = vmatprep.subr.bf16.mxu0 %v24677_v26  ;;  %v24767_v3 = vld [vmem:[%s31204_s7 + $0x1784] ss:$16 sps:$4 sm:$0xff]   ;;  %v24770_v26 = vld [vmem:[%s31204_s7 + $0x178c] ss:$16 sps:$4 sm:$0xff]  }
 0xc25   :  { %18323 = vmatprep.subr.bf16.mxu1 %v24680_v27  ;;  %v24765_v27 = vld [vmem:[%s31204_s7 + $0x1780] ss:$16 sps:$4 sm:$0xff]  }
 0xc27   :  { %17791 = vmatpush1.bf16.msra.mxu0 %v24675_v42  ;;  %v24768_v42 = vld [vmem:[%s31204_s7 + $0x1788] ss:$16 sps:$4 sm:$0xff]  }
 0xc28   :  { %18324 = vmatpush1.bf16.msra.mxu1 %v24678_v31  ;;  %17792 = vmatprep.subr.bf16.mxu0 %v24683_v57  ;;  %v24773_v31 = vld [vmem:[%s31204_s7 + $0x17a4] ss:$16 sps:$4 sm:$0xff]   ;;  %v24776_v57 = vld [vmem:[%s31204_s7 + $0x17ac] ss:$16 sps:$4 sm:$0xff]  }
 0xc29   :  { %18325 = vmatprep.subr.bf16.mxu1 %v24686_v32  ;;  %v24771_v32 = vld [vmem:[%s31204_s7 + $0x17a0] ss:$16 sps:$4 sm:$0xff]  }
 0xc2b   :  { %17793 = vmatpush1.bf16.msra.mxu0 %v24681_v0  ;;  %v24774_v0 = vld [vmem:[%s31204_s7 + $0x17a8] ss:$16 sps:$4 sm:$0xff]  }
 0xc2c   :  { %18326 = vmatpush1.bf16.msra.mxu1 %v24684_v50  ;;  %17794 = vmatprep.subr.bf16.mxu0 %v24689_v34  ;;  %v24779_v50 = vld [vmem:[%s31204_s7 + $0x17c4] ss:$16 sps:$4 sm:$0xff]   ;;  %v24782_v34 = vld [vmem:[%s31204_s7 + $0x17cc] ss:$16 sps:$4 sm:$0xff]  }
 0xc2d   :  { %18327 = vmatprep.subr.bf16.mxu1 %v24692_v61  ;;  %v24777_v61 = vld [vmem:[%s31204_s7 + $0x17c0] ss:$16 sps:$4 sm:$0xff]  }
 0xc2f   :  { %17795 = vmatpush1.bf16.msra.mxu0 %v24687_v16  ;;  %v24780_v16 = vld [vmem:[%s31204_s7 + $0x17c8] ss:$16 sps:$4 sm:$0xff]  }
 0xc30   :  { %18328 = vmatpush1.bf16.msra.mxu1 %v24690_v17  ;;  %17805 = vmatprep.subr.bf16.mxu0 %v24695_v9  ;;  %v24785_v17 = vld [vmem:[%s31204_s7 + $0x17e4] ss:$16 sps:$4 sm:$0xff]   ;;  %v24788_v9 = vld [vmem:[%s31204_s7 + $0x17ec] ss:$16 sps:$4 sm:$0xff]  }
 0xc31   :  { %18338 = vmatprep.subr.bf16.mxu1 %v24698_v37  ;;  %v24783_v37 = vld [vmem:[%s31204_s7 + $0x17e0] ss:$16 sps:$4 sm:$0xff]  }
 0xc32   :  { %17797 = vmatmul.mubr.bf16.vlgmr.msra.gmra.mrb[224].mxu0 %v30835_v58 }
 0xc33   :  { %18330 = vmatmul.mubr.bf16.vlgmr.msra.gmra.mrb[96].mxu1 %v30835_v58  ;;  %17806 = vmatpush1.bf16.msra.mxu0 %v24693_v12  ;;  %v24786_v12 = vld [vmem:[%s31204_s7 + $0x17e8] ss:$16 sps:$4 sm:$0xff]  }
 0xc34   :  { %17837 = vmatprep.mubr.bf16.mxu0 %v13392_v62  ;;  %18339 = vmatpush1.bf16.msra.mxu1 %v24696_v55  ;;  %v24791_v55 = vld [vmem:[%s31204_s7 + $0x1804] ss:$16 sps:$4 sm:$0xff]  }
 0xc35   :  { %18370 = vmatprep.mubr.bf16.mxu1 %v13392_v62  ;;  %17807 = vmatprep.subr.bf16.mxu0 %v24701_v11  ;;  %v24794_v11 = vld [vmem:[%s31204_s7 + $0x180c] ss:$16 sps:$4 sm:$0xff]   ;;  %v24789_v62 = vld [vmem:[%s31204_s7 + $0x1800] ss:$16 sps:$4 sm:$0xff]  }
 0xc36   :  { %18340 = vmatprep.subr.bf16.mxu1 %v24704_v21  ;;  %v13390_v21 = vcombine.high %v30835_v58, %v30835_v58  ;;  %v24795_v58 = vld [vmem:[%s31204_s7 + $0x1820] ss:$16 sps:$4 sm:$0xff]  }
 0xc37   :  { %17808 = vmatpush1.bf16.msra.mxu0 %v24699_v48  ;;  %v24792_v48 = vld [vmem:[%s31204_s7 + $0x1808] ss:$16 sps:$4 sm:$0xff]  }
 0xc38   :  { %18341 = vmatpush1.bf16.msra.mxu1 %v24702_v28  ;;  %17809 = vmatprep.subr.bf16.mxu0 %v24707_v4  ;;  %v24797_v28 = vld [vmem:[%s31204_s7 + $0x1824] ss:$16 sps:$4 sm:$0xff]   ;;  %v24800_v4 = vld [vmem:[%s31204_s7 + $0x182c] ss:$16 sps:$4 sm:$0xff]  }
 0xc39   :  { %18342 = vmatprep.subr.bf16.mxu1 %v24710_v7  ;;  %v24798_v7 = vld [vmem:[%s31204_s7 + $0x1828] ss:$16 sps:$4 sm:$0xff]  }
 0xc3b   :  { %17810 = vmatpush1.bf16.msra.mxu0 %v24705_v1  ;;  %v24803_v1 = vld [vmem:[%s31204_s7 + $0x1844] ss:$16 sps:$4 sm:$0xff]  }
 0xc3c   :  { %18343 = vmatpush1.bf16.msra.mxu1 %v24708_v25  ;;  %17811 = vmatprep.subr.bf16.mxu0 %v24713_v52  ;;  %v24806_v25 = vld [vmem:[%s31204_s7 + $0x184c] ss:$16 sps:$4 sm:$0xff]   ;;  %v24877_v52 = vmov 0  }
 0xc3d   :  { %18344 = vmatprep.subr.bf16.mxu1 %v24716_v44  ;;  %v24801_v44 = vld [vmem:[%s31204_s7 + $0x1840] ss:$16 sps:$4 sm:$0xff]  }
 0xc3f   :  { %17812 = vmatpush1.bf16.msra.mxu0 %v24711_v5  ;;  %v24804_v5 = vld [vmem:[%s31204_s7 + $0x1848] ss:$16 sps:$4 sm:$0xff]  }
 0xc40   :  { %18345 = vmatpush1.bf16.msra.mxu1 %v24714_v19  ;;  %17813 = vmatprep.subr.bf16.mxu0 %v24719_v8  ;;  %v24809_v19 = vld [vmem:[%s31204_s7 + $0x1864] ss:$16 sps:$4 sm:$0xff]   ;;  %v24812_v8 = vld [vmem:[%s31204_s7 + $0x186c] ss:$16 sps:$4 sm:$0xff]  }
 0xc41   :  { %18346 = vmatprep.subr.bf16.mxu1 %v24722_v10  ;;  %v24807_v10 = vld [vmem:[%s31204_s7 + $0x1860] ss:$16 sps:$4 sm:$0xff]  }
 0xc43   :  { %17814 = vmatpush1.bf16.msra.mxu0 %v24717_v35  ;;  %v24810_v35 = vld [vmem:[%s31204_s7 + $0x1868] ss:$16 sps:$4 sm:$0xff]  }
 0xc44   :  { %18347 = vmatpush1.bf16.msra.mxu1 %v24720_v45  ;;  %17815 = vmatprep.subr.bf16.mxu0 %v24725_v38  ;;  %v24813_v45 = vld [vmem:[%s31206_s9 + $0x40] sm:$0xff]  }
 0xc45   :  { %18348 = vmatprep.subr.bf16.mxu1 %v24728_v6  ;;  %v19955_v38 = vld.sshfl [vmem:[#allocation5 + $0x18] sm:$0x1 pattern:$0x75316420] }
 0xc46   :  { %v24814_v6 = vld [vmem:[%s31206_s9] sm:$0xff]  }
 0xc47   :  { %17816 = vmatpush1.bf16.msra.mxu0 %v24723_v20  ;;  %v13406_v20 = vrot.slane %v19955_v38, %v27841_v15  ;;  %v24818_v15 = vld [vmem:[%s31206_s9 + $0x10] sm:$0xff]  }
 0xc48   :  { %18349 = vmatpush1.bf16.msra.mxu1 %v24726_v36  ;;  %17817 = vmatprep.subr.bf16.mxu0 %v24731_v18  ;;  %v24815_v36 = vld [vmem:[%s31206_s9 + $0x48] sm:$0xff]  }
 0xc49   :  { %18350 = vmatprep.subr.bf16.mxu1 %v24734_v22  ;;  %v24816_v18 = vld [vmem:[%s31206_s9 + $0x8] sm:$0xff]   ;;  %v24817_v22 = vld [vmem:[%s31206_s9 + $0x50] sm:$0xff]  }
 0xc4b   :  { %17818 = vmatpush1.bf16.msra.mxu0 %v24729_v41  ;;  %v24819_v41 = vld [vmem:[%s31206_s9 + $0x58] sm:$0xff]  }
 0xc4c   :  { %18351 = vmatpush1.bf16.msra.mxu1 %v24732_v40  ;;  %17819 = vmatprep.subr.bf16.mxu0 %v24737_v60  ;;  %v24820_v40 = vld [vmem:[%s31206_s9 + $0x18] sm:$0xff]   ;;  %v24821_v60 = vld [vmem:[%s31206_s9 + $0x60] sm:$0xff]  }
 0xc4d   :  { %18352 = vmatprep.subr.bf16.mxu1 %v24740_v53  ;;  %v24822_v53 = vld [vmem:[%s31206_s9 + $0x20] sm:$0xff]  }
 0xc4f   :  { %17820 = vmatpush1.bf16.msra.mxu0 %v24735_v56  ;;  %v24823_v56 = vld [vmem:[%s31206_s9 + $0x68] sm:$0xff]  }
 0xc50   :  { %18353 = vmatpush1.bf16.msra.mxu1 %v24738_v24  ;;  %17821 = vmatprep.subr.bf16.mxu0 %v24743_v59  ;;  %v24824_v24 = vld [vmem:[%s31206_s9 + $0x28] sm:$0xff]   ;;  %v24825_v59 = vld [vmem:[%s31206_s9 + $0x70] sm:$0xff]  }
 0xc51   :  { %18354 = vmatprep.subr.bf16.mxu1 %v24746_v33  ;;  %v24826_v33 = vld [vmem:[%s31206_s9 + $0x30] sm:$0xff]  }
 0xc53   :  { %17822 = vmatpush1.bf16.msra.mxu0 %v24741_v2  ;;  %v24827_v2 = vld [vmem:[%s31206_s9 + $0x78] sm:$0xff]  }
 0xc54   :  { %18355 = vmatpush1.bf16.msra.mxu1 %v24744_v49  ;;  %17823 = vmatprep.subr.bf16.mxu0 %v24749_v39  ;;  %v24828_v49 = vld [vmem:[%s31206_s9 + $0x38] sm:$0xff]   ;;  %v24829_v39 = vld [vmem:[%s31206_s9 + $0xc0] sm:$0xff]  }
 0xc55   :  { %18356 = vmatprep.subr.bf16.mxu1 %v24752_v14  ;;  %v31320_v14 = vld [vmem:[#allocation9_spill] sm:$0xff] }
 0xc57   :  { %17824 = vmatpush1.bf16.msra.mxu0 %v24747_v23  ;;  %v13224_v23 = vsub.s32 0, %v31320_v14 }
 0xc58   :  { %18357 = vmatpush1.bf16.msra.mxu1 %v24750_v46  ;;  %17825 = vmatprep.subr.bf16.mxu0 %v24755_v13  ;;  %v13220_v46 = vld [vmem:[%s31205_s8] sm:$0xf]  ;;  %v13228_v13 = vsub.s32 1, %v31320_v14 }
 0xc59   :  { %18358 = vmatprep.subr.bf16.mxu1 %v24758_v51  ;;  %v13236_v51 = vsub.s32 3, %v31320_v14 }
 0xc5b   :  { %17826 = vmatpush1.bf16.msra.mxu0 %v24753_v43  ;;  %v13225_v43 = vrot.slane %v13220_v46, %v13224_v23 }
 0xc5c   :  { %18359 = vmatpush1.bf16.msra.mxu1 %v24756_v47  ;;  %17827 = vmatprep.subr.bf16.mxu0 %v24761_v54  ;;  %v13229_v47 = vrot.slane %v13220_v46, %v13228_v13  ;;  %v13237_v54 = vrot.slane %v13220_v46, %v13236_v51 }
 0xc5d   :  { %18360 = vmatprep.subr.bf16.mxu1 %v24764_v29 }
 0xc5f   :  { %17828 = vmatpush1.bf16.msra.mxu0 %v24759_v63 }
 0xc60   :  { %18361 = vmatpush1.bf16.msra.mxu1 %v24762_v30  ;;  %17829 = vmatprep.subr.bf16.mxu0 %v24767_v3 }
 0xc61   :  { %18362 = vmatprep.subr.bf16.mxu1 %v24770_v26 }
 0xc63   :  { %17830 = vmatpush1.bf16.msra.mxu0 %v24765_v27 }
 0xc64   :  { %18363 = vmatpush1.bf16.msra.mxu1 %v24768_v42  ;;  %17831 = vmatprep.subr.bf16.mxu0 %v24773_v31 }
 0xc65   :  { %18364 = vmatprep.subr.bf16.mxu1 %v24776_v57 }
 0xc67   :  { %17832 = vmatpush1.bf16.msra.mxu0 %v24771_v32 }
 0xc68   :  { %18365 = vmatpush1.bf16.msra.mxu1 %v24774_v0  ;;  %17833 = vmatprep.subr.bf16.mxu0 %v24779_v50 }
 0xc69   :  { %18366 = vmatprep.subr.bf16.mxu1 %v24782_v34 }
 0xc6b   :  { %17834 = vmatpush1.bf16.msra.mxu0 %v24777_v61 }
 0xc6c   :  { %18367 = vmatpush1.bf16.msra.mxu1 %v24780_v16  ;;  %17835 = vmatprep.subr.bf16.mxu0 %v24785_v17  ;;  %v24830_v17 = vld [vmem:[%s31206_s9 + $0x80] sm:$0xff]  }
 0xc6d   :  { %18368 = vmatprep.subr.bf16.mxu1 %v24788_v9 }
 0xc6f   :  { %17836 = vmatpush1.bf16.msra.mxu0 %v24783_v37  ;;  %v24831_v37 = vld [vmem:[%s31206_s9 + $0xc8] sm:$0xff]  }
 0xc70   :  { %18369 = vmatpush1.bf16.msra.mxu1 %v24786_v12  ;;  %17846 = vmatprep.subr.bf16.mxu0 %v24791_v55  ;;  %v24832_v55 = vld [vmem:[%s31206_s9 + $0x88] sm:$0xff]  }
 0xc71   :  { %18379 = vmatprep.subr.bf16.mxu1 %v24794_v11  ;;  %v24833_v11 = vld [vmem:[%s31206_s9 + $0xd0] sm:$0xff]  }
 0xc72   :  { %17838 = vmatmul.mubr.bf16.vlgmr.msra.gmra.mrb[224].mxu0 %v13390_v21 }
 0xc73   :  { %18371 = vmatmul.mubr.bf16.vlgmr.msra.gmra.mrb[96].mxu1 %v13390_v21  ;;  %17847 = vmatpush1.bf16.msra.mxu0 %v24789_v62  ;;  %v24834_v62 = vld [vmem:[%s31206_s9 + $0x90] sm:$0xff]   ;;  %v24835_v21 = vld [vmem:[%s31206_s9 + $0xd8] sm:$0xff]  }
 0xc74   :  { %18380 = vmatpush1.bf16.msra.mxu1 %v24792_v48  ;;  %17848 = vmatprep.subr.bf16.mxu0 %v24797_v28  ;;  %v24836_v48 = vld [vmem:[%s31206_s9 + $0x98] sm:$0xff]   ;;  %v24837_v28 = vld [vmem:[%s31206_s9 + $0xe0] sm:$0xff]  }
 0xc75   :  { %18381 = vmatprep.subr.bf16.mxu1 %v24800_v4  ;;  %17878 = vmatprep.mubr.bf16.mxu0 %v24877_v52  ;;  %v24838_v4 = vld [vmem:[%s31206_s9 + $0xa0] sm:$0xff]  }
 0xc76   :  { %18411 = vmatprep.mubr.bf16.mxu1 %v24877_v52  ;;  %v24841_v52 = vld [vmem:[%s31206_s9 + $0xf0] sm:$0xff]  }
 0xc77   :  { %17849 = vmatpush1.bf16.msra.mxu0 %v24795_v58  ;;  %v13232_v58 = vsub.s32 2, %v31320_v14 }
 0xc78   :  { %18382 = vmatpush1.bf16.msra.mxu1 %v24798_v7  ;;  %17850 = vmatprep.subr.bf16.mxu0 %v24803_v1  ;;  %v24839_v7 = vld [vmem:[%s31206_s9 + $0xe8] sm:$0xff]  }
 0xc79   :  { %18383 = vmatprep.subr.bf16.mxu1 %v24806_v25  ;;  %v24840_v1 = vld [vmem:[%s31206_s9 + $0xa8] sm:$0xff]   ;;  %v13233_v25 = vrot.slane %v13220_v46, %v13232_v58 }
 0xc7b   :  { %17851 = vmatpush1.bf16.msra.mxu0 %v24801_v44  ;;  %v24842_v44 = vld [vmem:[%s31206_s9 + $0xb0] sm:$0xff]  }
 0xc7c   :  { %18384 = vmatpush1.bf16.msra.mxu1 %v24804_v5  ;;  %17852 = vmatprep.subr.bf16.mxu0 %v24809_v19  ;;  %v24843_v19 = vld [vmem:[%s31206_s9 + $0xf8] sm:$0xff]  }
 0xc7d   :  { %18385 = vmatprep.subr.bf16.mxu1 %v24812_v8  ;;  %v24844_v8 = vld [vmem:[%s31206_s9 + $0xb8] sm:$0xff]   ;;  %s24879_s9 = smov [#allocation6]  }
 0xc7f   :  { %17853 = vmatpush1.bf16.msra.mxu0 %v24807_v10 }
 0xc80   :  { %18386 = vmatpush1.bf16.msra.mxu1 %v24810_v35  ;;  %21665 = vmatprep.subr.bf16.mxu0 %v24813_v45 }
 0xc82   :  { %20740 = vmatmul.mubr.msk.bf16.vlgmr.msra.gmra.mrb[224].mxu0 %vm2688_vm8, %v13406_v20 }
 0xc83   :  { %20741 = vmatmul.mubr.msk.bf16.vlgmr.msra.gmra.mrb[96].mxu1 %vm2688_vm8, %v13406_v20  ;;  %21666 = vmatpush3.bf16.msra.mxu0 %v24814_v6 }
 0xc84   :  { %21667 = vmatprep.subr.bf16.mxu0 %v24815_v36 }
 0xc87   :  { %21668 = vmatpush3.bf16.msra.mxu0 %v24816_v18  ;;  %v20742_v18 = vld [vmem:[%s31207_s10] ss:$0 sm:$0xff]  ;;  %s18791_s10 = sshll.u32 %s24879_s9, 4  ;;  %s18792_s10 = int_to_ptr.vmem [resolvable:$true] %s18791_s10 }
 0xc88   :  { %21669 = vmatprep.subr.bf16.mxu0 %v24817_v22  ;;  %s24848_s15 = scalar_lea.vmem %s18792_s10, 32  ;;  %p24853_p1 = scmp.lt.s32.totalorder %s18792_s10, %s18792_s10 }
 0xc89   :  { %p24849_p0 = scmp.ne.s32.totalorder %s18792_s10, %s24848_s15  ;;  %p24854_p2 = scmp.lt.s32.totalorder %s24848_s15, %s24848_s15 }
 0xc8b   :  { %21670 = vmatpush3.bf16.msra.mxu0 %v24818_v15  ;;  %p24855_p3 = por %p24854_p2, %p24853_p1 }
 0xc8c   :  { %21671 = vmatprep.subr.bf16.mxu0 %v24819_v41 }
 0xc8d   :  { %p24856_p4 = pnand %p24855_p3, %p24849_p0 }
 0xc8f   :  { %21672 = vmatpush3.bf16.msra.mxu0 %v24820_v40 }
 0xc90   :  { %21673 = vmatprep.subr.bf16.mxu0 %v24821_v60 }
 0xc93   :  { %21674 = vmatpush3.bf16.msra.mxu0 %v24822_v53 }
 0xc94   :  { %21675 = vmatprep.subr.bf16.mxu0 %v24823_v56 }
 0xc97   :  { %21676 = vmatpush3.bf16.msra.mxu0 %v24824_v24 }
 0xc98   :  { %21677 = vmatprep.subr.bf16.mxu0 %v24825_v59  ;;  %v24878_v59 = vmov 6  }
 0xc99   :  { %23207 = vset.pattern.permute.xlu1 %v24878_v59  ;;  %23208 = vset.pattern.permute.xlu0 %v24878_v59 }
 0xc9b   :  { %21678 = vmatpush3.bf16.msra.mxu0 %v24826_v33 }
 0xc9c   :  { %21679 = vmatprep.subr.bf16.mxu0 %v24827_v2 }
 0xc9f   :  { %21680 = vmatpush3.bf16.msra.mxu0 %v24828_v49 }
 0xca0   :  { %21687 = vmatprep.subr.bf16.mxu0 %v24829_v39 }
 0xd55   :  { %v17880_v29 = vpop.f32.mrb[224].mxu0 }
 0xd56   :  { %v22611_v63 = vadd.f32 %v17880_v29, %v13225_v43  ;;  %v18413_v30 = vpop.f32.mrb[96].mxu1  ;;  %v17882_v3 = vpop.f32.mrb[225].mxu0 }
 0xd57   :  { %v22612_v26 = vadd.f32 %v17882_v3, %v13229_v47  ;;  %v18415_v27 = vpop.f32.mrb[97].mxu1  ;;  %v17884_v42 = vpop.f32.mrb[226].mxu0  ;;  %v22613_v5 = vadd.f32 %v18413_v30, %v13233_v25 }
 0xd58   :  { %v18420_v31 = vmax.f32 %v22611_v63, 0.0  ;;  %v22614_v57 = vadd.f32 %v18415_v27, %v13237_v54  ;;  %v18417_v32 = vpop.f32.mrb[98].mxu1  ;;  %v17885_v0 = vpop.f32.mrb[227].mxu0 }
 0xd59   :  { %v18421_v50 = vmax.f32 %v22612_v26, 0.0  ;;  %v18418_v34 = vpop.f32.mrb[99].mxu1  ;;  %v18422_v10 = vmax.f32 %v22613_v5, 0.0 }
 0xd5a   :  { %v18423_v61 = vmax.f32 %v22614_v57, 0.0  ;;  %v18424_v9 = vpack.c.bf16 %v18420_v31, %v18420_v31 }
 0xd5b   :  { %v18425_v16 = vpack.c.bf16 %v18421_v50, %v18421_v50  ;;  %v18426_v35 = vpack.c.bf16 %v18422_v10, %v18422_v10 }
 0xd5c   :  { %v18427_v12 = vpack.c.bf16 %v18423_v61, %v18423_v61 }
 0xd5d   :  { %18723 = vmatprep.mubr.bf16.mxu0 %v18425_v16 }
 0xd5e   :  { %18724 = vmatmul.mubr.bf16.vlgmr.msra.gmra.mrb[228].mxu0 %v18424_v9 }
 0xd5f   :  { %21688 = vmatpush3.bf16.msra.mxu0 %v24830_v17  ;;  %18763 = vmatprep.mubr.bf16.mxu0 %v18427_v12 }
 0xd60   :  { %21689 = vmatprep.subr.bf16.mxu0 %v24831_v37 }
 0xd63   :  { %21690 = vmatpush3.bf16.msra.mxu0 %v24832_v55 }
 0xd64   :  { %21691 = vmatprep.subr.bf16.mxu0 %v24833_v11 }
 0xd67   :  { %21692 = vmatpush3.bf16.msra.mxu0 %v24834_v62 }
 0xd68   :  { %21693 = vmatprep.subr.bf16.mxu0 %v24835_v21 }
 0xd6b   :  { %21694 = vmatpush3.bf16.msra.mxu0 %v24836_v48 }
 0xd6c   :  { %21695 = vmatprep.subr.bf16.mxu0 %v24837_v28 }
 0xd6f   :  { %21696 = vmatpush3.bf16.msra.mxu0 %v24838_v4 }
 0xd70   :  { %21697 = vmatprep.subr.bf16.mxu0 %v24839_v7 }
 0xd73   :  { %21698 = vmatpush3.bf16.msra.mxu0 %v24840_v1 }
 0xd74   :  { %21699 = vmatprep.subr.bf16.mxu0 %v24841_v52 }
 0xd77   :  { %21700 = vmatpush3.bf16.msra.mxu0 %v24842_v44 }
 0xd78   :  { %21701 = vmatprep.subr.bf16.mxu0 %v24843_v19 }
 0xd7b   :  { %21702 = vmatpush3.bf16.msra.mxu0 %v24844_v8 }
 0xd7e   :  { %18764 = vmatmul.mubr.bf16.vlgmr.msra.gmra.mrb[232].mxu0 %v18426_v35 }
 0xe31   :  { %v21681_v45 = vpop.f32.mrb[228].mxu0 }
 0xe32   :  { %v21682_v38 = vpop.f32.mrb[229].mxu0 }
 0xe33   :  { %v21683_v6 = vadd.f32 %v21682_v38, %v21681_v45  ;;  %v21684_v20 = vpop.f32.mrb[230].mxu0 }
 0xe34   :  { %v21685_v36 = vpop.f32.mrb[231].mxu0 }
 0xe35   :  { %v18726_v41 = vadd.f32 %v21683_v6, %v20742_v18 }
 0xe51   :  { %v21703_v22 = vpop.f32.mrb[232].mxu0 }
 0xe52   :  { %v21704_v15 = vpop.f32.mrb[233].mxu0 }
 0xe53   :  { %v21705_v40 = vadd.f32 %v21704_v15, %v21703_v22  ;;  %v21706_v60 = vpop.f32.mrb[234].mxu0 }
 0xe54   :  { %v21707_v53 = vpop.f32.mrb[235].mxu0 }
 0xe55   :  { %v18766_v56 = vadd.f32 %v21705_v40, %v18726_v41 }
 0xe57   :  { %v18772_v24 = vsel %vm18771_vm2, %v18766_v56, 0.0 }
 0xe58   :  { %18773 = vadd.xlane.f32.xlu0 %v18772_v24 }
 0xee5   :  { %v18774_v33 = vpop.xlane.xlu0 %18773 }
 0xee6   :  { %v18776_v2 = vmul.f32 0.16666667, %v18774_v33 }
 0xee8   :  { %v18777_v49 = vsub.f32 %v18766_v56, %v18776_v2 }
 0xeea   :  { %18780 = vperm.xlu1 %23207, %v18777_v49  }
 0xf69   :  { %v18781_v39 = vpop.permute.xlu1 %18780 }
 0xf6a   :  { %v18783_v14 = vadd.f32 %v18781_v39, %v18766_v56 }
 0xf6c   :  { %18784 = vst.msk [vmem:[#allocation6] sm:$0x3] %vm18771_vm2, %v18783_v14 }
 0xf6d   :  { %24859 = shalt.err (!%p24856_p4)
}
 0xf6e   :  { %s24860_s17 = scalar_lea.hbm %s31208_s11, 32 }
 0xf6f   :  { %p24861_p5 = scmp.ne.s32.totalorder %s31208_s11, %s24860_s17  ;;  %p24864_p6 = scmp.lt.u32.totalorder %s24860_s17, %s31208_s11 }
 0xf71   :  { %p24866_p7 = pnand %p24864_p6, %p24861_p5 }
 0xf73   :  { %24869 = shalt.err (!%p24866_p7)
}
 0xf74   :  { %18794 = dma.vmem_to_hbm [thread:$0]  %s18792_s10, 32, %s31208_s11, [#allocation7]  }
 0xf75   :  { %24870 = dma.done.wait [#allocation7], 32  }
 0xf76   :  { %24871 = vsyncadd [#allocation7], 4294967264 }
 0xf77   :  { %18798 = vsyncpa [#allocation7], 1 }

</bundles_post_ra>
